<compile_context>
chip_gen: v7x
topology: tpu7x:2x2x1
jax: 0.10.0
libtpu: 0.0.40
codegen_flags: <defaults>
</compile_context>

<pallas_src>
import functools

import jax
import jax.numpy as jnp
from jax.experimental import pallas as pl
from jax.experimental.pallas import tpu as pltpu


def _halo_pad(W):
    # Zero-border rows needed so every 3x3 tap (|row offset| <= W+1 on the
    # flattened HW axis) stays inside the scratch, rounded to a sublane
    # multiple so the middle-window store/load is 8-aligned.
    return ((W + 1 + 7) // 8) * 8


def _pixel_masks(H, W, dx, dy):
    """Host-side per-pixel masks (exact integer math), shape (H*W, 8) f32.

    col 0: w >= 1        (3x3 tap dw = -1 valid)
    col 1: w <= W-2      (3x3 tap dw = +1 valid)
    col 2..5: deconv quadrant masks, q = ki*2 + kj with ki=(h-dx)%2, kj=(w-dy)%2
    col 6: valid (non zero-padding) region of the upsampled map
    col 7: zero padding
    """
    hh, ww = jnp.meshgrid(jnp.arange(H), jnp.arange(W), indexing="ij")
    hh = hh.reshape(-1)
    ww = ww.reshape(-1)
    hs = hh - dx
    ws = ww - dy
    valid = (hs >= 0) & (ws >= 0)
    cols = [ww >= 1, ww <= W - 2]
    for ki in range(2):
        for kj in range(2):
            cols.append(valid & (hs % 2 == ki) & (ws % 2 == kj))
    cols.append(valid)
    cols.append(jnp.zeros_like(valid))
    return jnp.stack(cols, axis=-1).astype(jnp.float32)


# ----------------------------------------------------------------------------
# Fused Pallas kernel (one grid step per batch sample)
# ----------------------------------------------------------------------------
def _ru_up_kernel(
    x2_ref,      # (1, HW, C2)    f32   skip features (NHWC, flattened)
    x1u_ref,     # (1, HW, C1)    f32   NN-upsampled + zero-padded x1
    msk_ref,     # (HW, 8)        f32   precomputed per-pixel masks
    wup_ref,     # (C1, 4*C1)     mmdt  ConvTranspose2d weights (quadrant lane blocks)
    bup_ref,     # (1, C1)        f32   ConvTranspose2d bias
    w1_ref,      # (9*Cin, Cmid)  mmdt  conv1 weights, tap-major
    sb1_ref,     # (2, Cmid)      f32   folded BN1 [scale ; bias]
    w2_ref,      # (9*Cmid, Cout) mmdt  conv2 weights, tap-major
    sb2_ref,     # (4, Cout)      f32   [BN2 scale ; BN2 bias ; GN gamma ; GN beta]
    wr_ref,      # (Cin, Cout)    mmdt  1x1 residual conv (no bias)
    gmat_ref,    # (Cout, Cout)   f32   GroupNorm averaging matrix (inv_n on same group)
    o_ref,       # (1, HW, Cout)  f32
    halo1_ref,   # (HW + 2*PAD, Cin)  mmdt scratch
    halo2_ref,   # (HW + 2*PAD, Cmid) mmdt scratch
    *,
    H,
    W,
):
    HW = H * W
    PAD = _halo_pad(W)
    C1 = wup_ref.shape[0]
    Cin = wr_ref.shape[0]
    C2 = Cin - C1
    Cmid = sb1_ref.shape[1]
    Cout = sb2_ref.shape[1]
    mmdt = w1_ref.dtype

    # ---- hoisted per-pixel masks (built on host with exact integer math) ----
    msk = msk_ref[...]                         # (HW, 8) f32
    valid = msk[:, 6:7]
    m_left_mm = msk[:, 0:1].astype(mmdt)       # dw = -1 taps
    m_right_mm = msk[:, 1:2].astype(mmdt)      # dw = +1 taps

    # ---- ConvTranspose2d(k=2, s=2): ONE fused matmul + quadrant lane select --
    q_all = jnp.dot(x1u_ref[0].astype(mmdt), wup_ref[...],
                    preferred_element_type=jnp.float32)        # (HW, 4*C1)
    up = valid * jnp.broadcast_to(bup_ref[...], (HW, C1))
    for q in range(4):
        up = up + msk[:, 2 + q:3 + q] * q_all[:, q * C1:(q + 1) * C1]

    # ---- halo1: zero borders + in-place channel concat [x2_skip | up] -------
    # Borders are re-zeroed every step: scratch is not zero-initialised and a
    # once-per-core guard would need a per-core flag; 2*PAD*C stores is cheap.
    halo1_ref[pl.ds(0, PAD), :] = jnp.zeros((PAD, Cin), halo1_ref.dtype)
    halo1_ref[pl.ds(PAD + HW, PAD), :] = jnp.zeros((PAD, Cin), halo1_ref.dtype)
    halo1_ref[pl.ds(PAD, HW), 0:C2] = x2_ref[0].astype(mmdt)
    halo1_ref[pl.ds(PAD, HW), C2:Cin] = up.astype(mmdt)

    # ---- 3x3 "same" conv: nine K=C dots on static halo row windows ----------
    # Vertical OOB taps land in the zero borders; only the two hoisted column
    # masks are applied.  No im2col scratch, no masked lane-offset stores.
    def conv3x3(halo_ref, w_ref_, C, Co):
        acc = None
        for k in range(9):
            kh, kw = divmod(k, 3)
            dh, dw = kh - 1, kw - 1
            tap = halo_ref[pl.ds(PAD + dh * W + dw, HW), :]
            if dw == -1:
                tap = m_left_mm * tap
            elif dw == 1:
                tap = m_right_mm * tap
            d = jnp.dot(tap, w_ref_[k * C:(k + 1) * C, :],
                        preferred_element_type=jnp.float32)
            acc = d if acc is None else acc + d
        return acc                                              # (HW, Co) f32

    # double conv: conv3x3 -> BN -> ReLU -> conv3x3 -> BN (BN folded, inference)
    c1 = conv3x3(halo1_ref, w1_ref, Cin, Cmid)
    h1 = jnp.maximum(c1 * sb1_ref[0:1, :] + sb1_ref[1:2, :], 0.0)
    halo2_ref[pl.ds(0, PAD), :] = jnp.zeros((PAD, Cmid), halo2_ref.dtype)
    halo2_ref[pl.ds(PAD + HW, PAD), :] = jnp.zeros((PAD, Cmid), halo2_ref.dtype)
    halo2_ref[pl.ds(PAD, HW), :] = h1.astype(mmdt)
    c2 = conv3x3(halo2_ref, w2_ref, Cmid, Cout)
    ft1 = c2 * sb2_ref[0:1, :] + sb2_ref[1:2, :]

    # ---- residual path: ONE 1x1 matmul over the concat window + GroupNorm ---
    xcat = halo1_ref[pl.ds(PAD, HW), :]                         # (HW, Cin)
    r = jnp.dot(xcat, wr_ref[...], preferred_element_type=jnp.float32)

    # two-pass stats; per-group combine via the tiny host-built gmat matmul
    ch_sum = jnp.sum(r, axis=0, keepdims=True)                  # (1, Cout)
    mean_c = jnp.dot(ch_sum, gmat_ref[...], preferred_element_type=jnp.float32)
    centered = r - mean_c
    sq_sum = jnp.sum(centered * centered, axis=0, keepdims=True)
    var_c = jnp.dot(sq_sum, gmat_ref[...], preferred_element_type=jnp.float32)
    r_gn = (centered * jax.lax.rsqrt(var_c + 1e-5) * sb2_ref[2:3, :]
            + sb2_ref[3:4, :])

    # ---- final: relu(residual + double-conv) ---------------------------------
    # TODO(synk): with Cout < 128 this store is lane-masked; present a
    # lane-dense output layout if the consumer tolerates it.
    o_ref[0] = jnp.maximum(r_gn + ft1, 0.0)


# ----------------------------------------------------------------------------
# Wrapper: layout/parameter folding + one fused pallas_call
# ----------------------------------------------------------------------------
def ru_up_forward(x1_nchw, x2_nchw, p, *, matmul_dtype=jnp.float32):
    x1 = x1_nchw.astype(jnp.float32)
    x2 = x2_nchw.astype(jnp.float32)
    N, C1, H1, W1 = x1.shape
    _, C2, H2, W2 = x2.shape
    Cin = C1 + C2
    HW = H2 * W2
    dx = H2 - 2 * H1          # top zero-padding of the upsampled map
    dy = W2 - 2 * W1          # left zero-padding
    PAD = _halo_pad(W2)
    mmdt = matmul_dtype

    # NHWC; nearest-neighbour 2x placement of x1 (the deconv matmul, channel
    # concat and everything downstream happen inside the kernel; the wrapper
    # no longer materializes the concatenated tensor in HBM).
    x1n = jnp.transpose(x1, (0, 2, 3, 1))
    x1u = jnp.repeat(jnp.repeat(x1n, 2, axis=1), 2, axis=2)
    x1u = jnp.pad(x1u, ((0, 0), (dx, 0), (dy, 0), (0, 0))).reshape(N, HW, C1)
    x2n = jnp.transpose(x2, (0, 2, 3, 1)).reshape(N, HW, C2)
    masks = _pixel_masks(H2, W2, dx, dy)                        # (HW, 8)

    # ---------------- parameter folding ---------------------------------------
    Cmid = p["w1"].shape[0]
    Cout = p["w2"].shape[0]
    G = p["groups"]
    cg = Cout // G
    eps_bn = 1e-5

    # ConvTranspose2d weight (ci, co, kh, kw) -> (ci, (kh*2+kw)*C1 + co)
    wup = jnp.transpose(p["w_up"], (0, 2, 3, 1)).reshape(C1, 4 * C1).astype(mmdt)
    bup = p["b_up"].reshape(1, C1)
    # Conv2d weight (co, ci, kh, kw) -> tap-major ((kh*3+kw)*Cin + ci, co)
    w1 = jnp.transpose(p["w1"], (2, 3, 1, 0)).reshape(9 * Cin, Cmid).astype(mmdt)
    w2 = jnp.transpose(p["w2"], (2, 3, 1, 0)).reshape(9 * Cmid, Cout).astype(mmdt)
    wr = p["wr"][:, :, 0, 0].T.astype(mmdt)                     # (Cin, Cout)
    s1 = p["bn1_g"] / jnp.sqrt(p["bn1_rv"] + eps_bn)
    b1 = (p["b1"] - p["bn1_rm"]) * s1 + p["bn1_b"]
    s2 = p["bn2_g"] / jnp.sqrt(p["bn2_rv"] + eps_bn)
    b2 = (p["b2"] - p["bn2_rm"]) * s2 + p["bn2_b"]
    sb1 = jnp.stack([s1, b1])                                   # (2, Cmid)
    sb2 = jnp.stack([s2, b2, p["gn_g"], p["gn_b"]])             # (4, Cout)
    # GroupNorm combine matrix: 1/(HW*cg) on same-group channel pairs.
    gidx = jnp.arange(Cout) // cg
    gmat = ((gidx[:, None] == gidx[None, :]).astype(jnp.float32)
            / float(HW * cg))                                   # (Cout, Cout)

    kernel = functools.partial(_ru_up_kernel, H=H2, W=W2)

    out_flat = pl.pallas_call(
        kernel,
        out_shape=jax.ShapeDtypeStruct((N, HW, Cout), jnp.float32),
        grid=(N,),
        in_specs=[
            pl.BlockSpec((1, HW, C2), lambda n: (n, 0, 0)),
            pl.BlockSpec((1, HW, C1), lambda n: (n, 0, 0)),
            pl.BlockSpec((HW, 8), lambda n: (0, 0)),
            pl.BlockSpec((C1, 4 * C1), lambda n: (0, 0)),
            pl.BlockSpec((1, C1), lambda n: (0, 0)),
            pl.BlockSpec((9 * Cin, Cmid), lambda n: (0, 0)),
            pl.BlockSpec((2, Cmid), lambda n: (0, 0)),
            pl.BlockSpec((9 * Cmid, Cout), lambda n: (0, 0)),
            pl.BlockSpec((4, Cout), lambda n: (0, 0)),
            pl.BlockSpec((Cin, Cout), lambda n: (0, 0)),
            pl.BlockSpec((Cout, Cout), lambda n: (0, 0)),
        ],
        out_specs=pl.BlockSpec((1, HW, Cout), lambda n: (n, 0, 0)),
        scratch_shapes=[
            pltpu.VMEM((HW + 2 * PAD, Cin), mmdt),
            pltpu.VMEM((HW + 2 * PAD, Cmid), mmdt),
        ],
        compiler_params=pltpu.CompilerParams(
            dimension_semantics=("parallel",)),
    )(x2n, x1u, masks, wup, bup, w1, sb1, w2, sb2, wr, gmat)

    return out_flat.reshape(N, H2, W2, Cout).transpose(0, 3, 1, 2)  # NCHW


# ----------------------------------------------------------------------------
# Pure-JAX reference (mirrors the PyTorch forward, BN in inference mode)
# ----------------------------------------------------------------------------
def reference_forward(x1, x2, p):
    x1 = x1.astype(jnp.float32)
    x2 = x2.astype(jnp.float32)
    N, C1, H1, W1 = x1.shape
    _, _, H2, W2 = x2.shape
    x1n = jnp.transpose(x1, (0, 2, 3, 1))
    t = jnp.einsum("nijc,cdkl->nikjld", x1n, p["w_up"])
    up = t.reshape(N, 2 * H1, 2 * W1, C1) + p["b_up"]
    diff_x = H2 - up.shape[1]
    diff_y = W2 - up.shape[2]
    up = jnp.pad(up, ((0, 0), (diff_x, 0), (diff_y, 0), (0, 0)))
    x2n = jnp.transpose(x2, (0, 2, 3, 1))
    x = jnp.concatenate([x2n, up], axis=-1)

    dn = ("NHWC", "HWIO", "NHWC")
    eps = 1e-5
    k1 = jnp.transpose(p["w1"], (2, 3, 1, 0))
    c1 = jax.lax.conv_general_dilated(x, k1, (1, 1), "SAME", dimension_numbers=dn) + p["b1"]
    c1 = (c1 - p["bn1_rm"]) / jnp.sqrt(p["bn1_rv"] + eps) * p["bn1_g"] + p["bn1_b"]
    h1 = jax.nn.relu(c1)
    k2 = jnp.transpose(p["w2"], (2, 3, 1, 0))
    c2 = jax.lax.conv_general_dilated(h1, k2, (1, 1), "SAME", dimension_numbers=dn) + p["b2"]
    ft1 = (c2 - p["bn2_rm"]) / jnp.sqrt(p["bn2_rv"] + eps) * p["bn2_g"] + p["bn2_b"]

    r = jnp.einsum("nhwc,oc->nhwo", x, p["wr"][:, :, 0, 0])
    G = p["groups"]
    Cout = r.shape[-1]
    cg = Cout // G
    rg = r.reshape(N, H2, W2, G, cg)
    mean = rg.mean(axis=(1, 2, 4), keepdims=True)
    var = rg.var(axis=(1, 2, 4), keepdims=True)
    rg = (rg - mean) / jnp.sqrt(var + 1e-5)
    r = rg.reshape(N, H2, W2, Cout) * p["gn_g"] + p["gn_b"]
    out = jax.nn.relu(r + ft1)
    return jnp.transpose(out, (0, 3, 1, 2))


# ----------------------------------------------------------------------------
# Deterministic parameter init (shapes per RU_up.__init__)
# ----------------------------------------------------------------------------
def init_params(key, in_ch, out_ch, in_ch_skip=0):
    C1 = in_ch // 2
    Cin = in_ch + in_ch_skip

    group_num = 32
    if out_ch % 32 == 0 and out_ch >= 32:
        if out_ch % 24 == 0:
            group_num = 24
    elif out_ch % 16 == 0 and out_ch >= 16:
        group_num = 16

    ks = jax.random.split(key, 18)

    def n(k, shape, scale=0.1):
        return scale * jax.random.normal(k, shape, jnp.float32)

    return {
        "w_up": n(ks[0], (C1, C1, 2, 2)),      # ConvTranspose2d weight (in, out, kh, kw)
        "b_up": n(ks[1], (C1,)),
        "w1": n(ks[2], (out_ch, Cin, 3, 3)),    # Conv2d weight (out, in, kh, kw)
        "b1": n(ks[3], (out_ch,)),
        "bn1_g": 1.0 + n(ks[4], (out_ch,)),
        "bn1_b": n(ks[5], (out_ch,)),
        "bn1_rm": n(ks[6], (out_ch,)),
        "bn1_rv": 0.5 + jax.random.uniform(ks[7], (out_ch,), jnp.float32),
        "w2": n(ks[8], (out_ch, out_ch, 3, 3)),
        "b2": n(ks[9], (out_ch,)),
        "bn2_g": 1.0 + n(ks[10], (out_ch,)),
        "bn2_b": n(ks[11], (out_ch,)),
        "bn2_rm": n(ks[12], (out_ch,)),
        "bn2_rv": 0.5 + jax.random.uniform(ks[13], (out_ch,), jnp.float32),
        "wr": n(ks[14], (out_ch, Cin, 1, 1)),   # 1x1 conv, bias=False
        "gn_g": 1.0 + n(ks[15], (out_ch,)),
        "gn_b": n(ks[16], (out_ch,)),
        "groups": group_num,
    }


if __name__ == "__main__":
    # RU_up(out_ch=16, in_ch=8, in_ch_skip=0, bilinear=False, with_skip=True)
    in_ch, out_ch = 8, 16
    key = jax.random.PRNGKey(0)
    kx1, kx2, kp = jax.random.split(key, 3)
    x1 = jax.random.normal(kx1, (2, in_ch // 2, 8, 8), jnp.float32)    # low-res input
    x2 = jax.random.normal(kx2, (2, in_ch // 2, 16, 16), jnp.float32)  # skip features
    params = init_params(kp, in_ch=in_ch, out_ch=out_ch)

    ref = jax.block_until_ready(reference_forward(x1, x2, params))

    # f32 MXU path (exact check).
    out = jax.block_until_ready(ru_up_forward(x1, x2, params))
    assert out.shape == ref.shape == (2, out_ch, 16, 16), (out.shape, ref.shape)
    max_err = float(jnp.max(jnp.abs(out - ref)))
    assert bool(jnp.allclose(out, ref, atol=2e-4, rtol=2e-4)), f"f32 max_err={max_err}"

    # bf16 MXU + bf16 halo path (recommended on v6e/v7x: ~2x MXU throughput,
    # half the weight DMA and half the halo/tap bytes; statistics and
    # normalization math stay f32).  Keep the f32 default on v5e.
    out_bf16 = jax.block_until_ready(
        ru_up_forward(x1, x2, params, matmul_dtype=jnp.bfloat16))
    max_err_bf16 = float(jnp.max(jnp.abs(out_bf16 - ref)))
    assert bool(jnp.allclose(out_bf16, ref, atol=1.5e-1, rtol=1e-1)), (
        f"bf16 max_err={max_err_bf16}")

    print("KERNEL_OK")
</pallas_src>

<mosaic_0001>
module attributes {stable_mosaic.version = 11 : i64} {
  func.func @_ru_up_kernel(%arg0: i32, %arg1: memref<1x256x4xf32, #tpu.memory_space<vmem>>, %arg2: memref<1x256x4xf32, #tpu.memory_space<vmem>>, %arg3: memref<256x8xf32, #tpu.memory_space<vmem>>, %arg4: memref<4x16xf32, #tpu.memory_space<vmem>>, %arg5: memref<1x4xf32, #tpu.memory_space<vmem>>, %arg6: memref<72x16xf32, #tpu.memory_space<vmem>>, %arg7: memref<2x16xf32, #tpu.memory_space<vmem>>, %arg8: memref<144x16xf32, #tpu.memory_space<vmem>>, %arg9: memref<4x16xf32, #tpu.memory_space<vmem>>, %arg10: memref<8x16xf32, #tpu.memory_space<vmem>>, %arg11: memref<16x16xf32, #tpu.memory_space<vmem>>, %arg12: memref<1x256x16xf32, #tpu.memory_space<vmem>>, %arg13: memref<304x8xf32, #tpu.memory_space<vmem>>, %arg14: memref<304x16xf32, #tpu.memory_space<vmem>>) attributes {dimension_semantics = [#tpu.dimension_semantics<parallel>], iteration_bounds = array<i64: 2>, scalar_prefetch = 0 : i64, scratch_operands = 2 : i64, tpu.core_type = #tpu.core_type<tc>, window_params = [{transform_indices = @transform_0, window_bounds = array<i64: 1, 256, 4>}, {transform_indices = @transform_1, window_bounds = array<i64: 1, 256, 4>}, {pipeline_mode = #tpu.pipeline_mode<synchronous>, transform_indices = @transform_2, window_bounds = array<i64: 256, 8>}, {pipeline_mode = #tpu.pipeline_mode<synchronous>, transform_indices = @transform_3, window_bounds = array<i64: 4, 16>}, {pipeline_mode = #tpu.pipeline_mode<synchronous>, transform_indices = @transform_4, window_bounds = array<i64: 1, 4>}, {pipeline_mode = #tpu.pipeline_mode<synchronous>, transform_indices = @transform_5, window_bounds = array<i64: 72, 16>}, {pipeline_mode = #tpu.pipeline_mode<synchronous>, transform_indices = @transform_6, window_bounds = array<i64: 2, 16>}, {pipeline_mode = #tpu.pipeline_mode<synchronous>, transform_indices = @transform_7, window_bounds = array<i64: 144, 16>}, {pipeline_mode = #tpu.pipeline_mode<synchronous>, transform_indices = @transform_8, window_bounds = array<i64: 4, 16>}, {pipeline_mode = #tpu.pipeline_mode<synchronous>, transform_indices = @transform_9, window_bounds = array<i64: 8, 16>}, {pipeline_mode = #tpu.pipeline_mode<synchronous>, transform_indices = @transform_10, window_bounds = array<i64: 16, 16>}, {transform_indices = @transform_11, window_bounds = array<i64: 1, 256, 16>}]} {
    %c0 = arith.constant 0 : index
    %c0_0 = arith.constant 0 : index
    %0 = vector.load %arg3[%c0, %c0_0] : memref<256x8xf32, #tpu.memory_space<vmem>>, vector<256x8xf32>
    %1 = vector.extract_strided_slice %0 {offsets = [0, 6], sizes = [256, 1], strides = [1, 1]} : vector<256x8xf32> to vector<256x1xf32>
    %2 = vector.extract_strided_slice %0 {offsets = [0, 0], sizes = [256, 1], strides = [1, 1]} : vector<256x8xf32> to vector<256x1xf32>
    %3 = vector.extract_strided_slice %0 {offsets = [0, 1], sizes = [256, 1], strides = [1, 1]} : vector<256x8xf32> to vector<256x1xf32>
    %c0_1 = arith.constant 0 : index
    %c0_2 = arith.constant 0 : index
    %c0_3 = arith.constant 0 : index
    %4 = vector.load %arg2[%c0_1, %c0_2, %c0_3] : memref<1x256x4xf32, #tpu.memory_space<vmem>>, vector<1x256x4xf32>
    %5 = vector.shape_cast %4 : vector<1x256x4xf32> to vector<256x4xf32>
    %c0_4 = arith.constant 0 : index
    %c0_5 = arith.constant 0 : index
    %6 = vector.load %arg4[%c0_4, %c0_5] : memref<4x16xf32, #tpu.memory_space<vmem>>, vector<4x16xf32>
    %cst = arith.constant dense<0.000000e+00> : vector<256x16xf32>
    %7 = tpu.matmul %5, %6, %cst {dimension_numbers = #tpu.dot_dimension_numbers<[1], [0], [0], [1], [0, 0, 1, 1], [], []>} : vector<256x4xf32>, vector<4x16xf32>, vector<256x16xf32> -> vector<256x16xf32>
    %c0_6 = arith.constant 0 : index
    %c0_7 = arith.constant 0 : index
    %8 = vector.load %arg5[%c0_6, %c0_7] : memref<1x4xf32, #tpu.memory_space<vmem>>, vector<1x4xf32>
    %9 = vector.shape_cast %8 : vector<1x4xf32> to vector<1x4xf32>
    %10 = vector.broadcast %9 : vector<1x4xf32> to vector<256x4xf32>
    %11 = vector.broadcast %1 : vector<256x1xf32> to vector<256x4xf32>
    %12 = arith.mulf %11, %10 : vector<256x4xf32>
    %13 = vector.extract_strided_slice %0 {offsets = [0, 2], sizes = [256, 1], strides = [1, 1]} : vector<256x8xf32> to vector<256x1xf32>
    %14 = vector.extract_strided_slice %7 {offsets = [0, 0], sizes = [256, 4], strides = [1, 1]} : vector<256x16xf32> to vector<256x4xf32>
    %15 = vector.broadcast %13 : vector<256x1xf32> to vector<256x4xf32>
    %16 = arith.mulf %15, %14 : vector<256x4xf32>
    %17 = arith.addf %12, %16 : vector<256x4xf32>
    %18 = vector.extract_strided_slice %0 {offsets = [0, 3], sizes = [256, 1], strides = [1, 1]} : vector<256x8xf32> to vector<256x1xf32>
    %19 = vector.extract_strided_slice %7 {offsets = [0, 4], sizes = [256, 4], strides = [1, 1]} : vector<256x16xf32> to vector<256x4xf32>
    %20 = vector.broadcast %18 : vector<256x1xf32> to vector<256x4xf32>
    %21 = arith.mulf %20, %19 : vector<256x4xf32>
    %22 = arith.addf %17, %21 : vector<256x4xf32>
    %23 = vector.extract_strided_slice %0 {offsets = [0, 4], sizes = [256, 1], strides = [1, 1]} : vector<256x8xf32> to vector<256x1xf32>
    %24 = vector.extract_strided_slice %7 {offsets = [0, 8], sizes = [256, 4], strides = [1, 1]} : vector<256x16xf32> to vector<256x4xf32>
    %25 = vector.broadcast %23 : vector<256x1xf32> to vector<256x4xf32>
    %26 = arith.mulf %25, %24 : vector<256x4xf32>
    %27 = arith.addf %22, %26 : vector<256x4xf32>
    %28 = vector.extract_strided_slice %0 {offsets = [0, 5], sizes = [256, 1], strides = [1, 1]} : vector<256x8xf32> to vector<256x1xf32>
    %29 = vector.extract_strided_slice %7 {offsets = [0, 12], sizes = [256, 4], strides = [1, 1]} : vector<256x16xf32> to vector<256x4xf32>
    %30 = vector.broadcast %28 : vector<256x1xf32> to vector<256x4xf32>
    %31 = arith.mulf %30, %29 : vector<256x4xf32>
    %32 = arith.addf %27, %31 : vector<256x4xf32>
    %cst_8 = arith.constant 0.000000e+00 : f32
    %33 = vector.broadcast %cst_8 : f32 to vector<24x8xf32>
    %c0_9 = arith.constant 0 : index
    %c0_10 = arith.constant 0 : index
    %34 = vector.load %arg13[%c0_9, %c0_10] : memref<304x8xf32, #tpu.memory_space<vmem>>, vector<24x8xf32>
    tpu.vector_store %arg13[%c0_9, %c0_10], %33 {strides = array<i32>} : memref<304x8xf32, #tpu.memory_space<vmem>>, vector<24x8xf32>,
    %cst_11 = arith.constant 0.000000e+00 : f32
    %35 = vector.broadcast %cst_11 : f32 to vector<24x8xf32>
    %c280 = arith.constant 280 : index
    %c0_12 = arith.constant 0 : index
    %36 = vector.load %arg13[%c280, %c0_12] : memref<304x8xf32, #tpu.memory_space<vmem>>, vector<24x8xf32>
    tpu.vector_store %arg13[%c280, %c0_12], %35 {strides = array<i32>} : memref<304x8xf32, #tpu.memory_space<vmem>>, vector<24x8xf32>,
    %c0_13 = arith.constant 0 : index
    %c0_14 = arith.constant 0 : index
    %c0_15 = arith.constant 0 : index
    %37 = vector.load %arg1[%c0_13, %c0_14, %c0_15] : memref<1x256x4xf32, #tpu.memory_space<vmem>>, vector<1x256x4xf32>
    %38 = vector.shape_cast %37 : vector<1x256x4xf32> to vector<256x4xf32>
    %c24 = arith.constant 24 : index
    %c0_16 = arith.constant 0 : index
    %39 = vector.load %arg13[%c24, %c0_16] : memref<304x8xf32, #tpu.memory_space<vmem>>, vector<256x4xf32>
    tpu.vector_store %arg13[%c24, %c0_16], %38 {strides = array<i32>} : memref<304x8xf32, #tpu.memory_space<vmem>>, vector<256x4xf32>,
    %c24_17 = arith.constant 24 : index
    %c4 = arith.constant 4 : index
    %40 = vector.load %arg13[%c24_17, %c4] : memref<304x8xf32, #tpu.memory_space<vmem>>, vector<256x4xf32>
    tpu.vector_store %arg13[%c24_17, %c4], %32 {strides = array<i32>} : memref<304x8xf32, #tpu.memory_space<vmem>>, vector<256x4xf32>,
    %c7 = arith.constant 7 : index
    %c0_18 = arith.constant 0 : index
    %41 = vector.load %arg13[%c7, %c0_18] : memref<304x8xf32, #tpu.memory_space<vmem>>, vector<256x8xf32>
    %42 = vector.broadcast %2 : vector<256x1xf32> to vector<256x8xf32>
    %43 = arith.mulf %42, %41 : vector<256x8xf32>
    %c0_19 = arith.constant 0 : index
    %c0_20 = arith.constant 0 : index
    %44 = vector.load %arg6[%c0_19, %c0_20] : memref<72x16xf32, #tpu.memory_space<vmem>>, vector<8x16xf32>
    %cst_21 = arith.constant dense<0.000000e+00> : vector<256x16xf32>
    %45 = tpu.matmul %43, %44, %cst_21 {dimension_numbers = #tpu.dot_dimension_numbers<[1], [0], [0], [1], [0, 0, 1, 1], [], []>} : vector<256x8xf32>, vector<8x16xf32>, vector<256x16xf32> -> vector<256x16xf32>
    %c8 = arith.constant 8 : index
    %c0_22 = arith.constant 0 : index
    %46 = vector.load %arg13[%c8, %c0_22] : memref<304x8xf32, #tpu.memory_space<vmem>>, vector<256x8xf32>
    %c8_23 = arith.constant 8 : index
    %c0_24 = arith.constant 0 : index
    %47 = vector.load %arg6[%c8_23, %c0_24] : memref<72x16xf32, #tpu.memory_space<vmem>>, vector<8x16xf32>
    %cst_25 = arith.constant dense<0.000000e+00> : vector<256x16xf32>
    %48 = tpu.matmul %46, %47, %cst_25 {dimension_numbers = #tpu.dot_dimension_numbers<[1], [0], [0], [1], [0, 0, 1, 1], [], []>} : vector<256x8xf32>, vector<8x16xf32>, vector<256x16xf32> -> vector<256x16xf32>
    %49 = arith.addf %45, %48 : vector<256x16xf32>
    %c9 = arith.constant 9 : index
    %c0_26 = arith.constant 0 : index
    %50 = vector.load %arg13[%c9, %c0_26] : memref<304x8xf32, #tpu.memory_space<vmem>>, vector<256x8xf32>
    %51 = vector.broadcast %3 : vector<256x1xf32> to vector<256x8xf32>
    %52 = arith.mulf %51, %50 : vector<256x8xf32>
    %c16 = arith.constant 16 : index
    %c0_27 = arith.constant 0 : index
    %53 = vector.load %arg6[%c16, %c0_27] : memref<72x16xf32, #tpu.memory_space<vmem>>, vector<8x16xf32>
    %cst_28 = arith.constant dense<0.000000e+00> : vector<256x16xf32>
    %54 = tpu.matmul %52, %53, %cst_28 {dimension_numbers = #tpu.dot_dimension_numbers<[1], [0], [0], [1], [0, 0, 1, 1], [], []>} : vector<256x8xf32>, vector<8x16xf32>, vector<256x16xf32> -> vector<256x16xf32>
    %55 = arith.addf %49, %54 : vector<256x16xf32>
    %c23 = arith.constant 23 : index
    %c0_29 = arith.constant 0 : index
    %56 = vector.load %arg13[%c23, %c0_29] : memref<304x8xf32, #tpu.memory_space<vmem>>, vector<256x8xf32>
    %57 = vector.broadcast %2 : vector<256x1xf32> to vector<256x8xf32>
    %58 = arith.mulf %57, %56 : vector<256x8xf32>
    %c24_30 = arith.constant 24 : index
    %c0_31 = arith.constant 0 : index
    %59 = vector.load %arg6[%c24_30, %c0_31] : memref<72x16xf32, #tpu.memory_space<vmem>>, vector<8x16xf32>
    %cst_32 = arith.constant dense<0.000000e+00> : vector<256x16xf32>
    %60 = tpu.matmul %58, %59, %cst_32 {dimension_numbers = #tpu.dot_dimension_numbers<[1], [0], [0], [1], [0, 0, 1, 1], [], []>} : vector<256x8xf32>, vector<8x16xf32>, vector<256x16xf32> -> vector<256x16xf32>
    %61 = arith.addf %55, %60 : vector<256x16xf32>
    %c24_33 = arith.constant 24 : index
    %c0_34 = arith.constant 0 : index
    %62 = vector.load %arg13[%c24_33, %c0_34] : memref<304x8xf32, #tpu.memory_space<vmem>>, vector<256x8xf32>
    %c32 = arith.constant 32 : index
    %c0_35 = arith.constant 0 : index
    %63 = vector.load %arg6[%c32, %c0_35] : memref<72x16xf32, #tpu.memory_space<vmem>>, vector<8x16xf32>
    %cst_36 = arith.constant dense<0.000000e+00> : vector<256x16xf32>
    %64 = tpu.matmul %62, %63, %cst_36 {dimension_numbers = #tpu.dot_dimension_numbers<[1], [0], [0], [1], [0, 0, 1, 1], [], []>} : vector<256x8xf32>, vector<8x16xf32>, vector<256x16xf32> -> vector<256x16xf32>
    %65 = arith.addf %61, %64 : vector<256x16xf32>
    %c25 = arith.constant 25 : index
    %c0_37 = arith.constant 0 : index
    %66 = vector.load %arg13[%c25, %c0_37] : memref<304x8xf32, #tpu.memory_space<vmem>>, vector<256x8xf32>
    %67 = vector.broadcast %3 : vector<256x1xf32> to vector<256x8xf32>
    %68 = arith.mulf %67, %66 : vector<256x8xf32>
    %c40 = arith.constant 40 : index
    %c0_38 = arith.constant 0 : index
    %69 = vector.load %arg6[%c40, %c0_38] : memref<72x16xf32, #tpu.memory_space<vmem>>, vector<8x16xf32>
    %cst_39 = arith.constant dense<0.000000e+00> : vector<256x16xf32>
    %70 = tpu.matmul %68, %69, %cst_39 {dimension_numbers = #tpu.dot_dimension_numbers<[1], [0], [0], [1], [0, 0, 1, 1], [], []>} : vector<256x8xf32>, vector<8x16xf32>, vector<256x16xf32> -> vector<256x16xf32>
    %71 = arith.addf %65, %70 : vector<256x16xf32>
    %c39 = arith.constant 39 : index
    %c0_40 = arith.constant 0 : index
    %72 = vector.load %arg13[%c39, %c0_40] : memref<304x8xf32, #tpu.memory_space<vmem>>, vector<256x8xf32>
    %73 = vector.broadcast %2 : vector<256x1xf32> to vector<256x8xf32>
    %74 = arith.mulf %73, %72 : vector<256x8xf32>
    %c48 = arith.constant 48 : index
    %c0_41 = arith.constant 0 : index
    %75 = vector.load %arg6[%c48, %c0_41] : memref<72x16xf32, #tpu.memory_space<vmem>>, vector<8x16xf32>
    %cst_42 = arith.constant dense<0.000000e+00> : vector<256x16xf32>
    %76 = tpu.matmul %74, %75, %cst_42 {dimension_numbers = #tpu.dot_dimension_numbers<[1], [0], [0], [1], [0, 0, 1, 1], [], []>} : vector<256x8xf32>, vector<8x16xf32>, vector<256x16xf32> -> vector<256x16xf32>
    %77 = arith.addf %71, %76 : vector<256x16xf32>
    %c40_43 = arith.constant 40 : index
    %c0_44 = arith.constant 0 : index
    %78 = vector.load %arg13[%c40_43, %c0_44] : memref<304x8xf32, #tpu.memory_space<vmem>>, vector<256x8xf32>
    %c56 = arith.constant 56 : index
    %c0_45 = arith.constant 0 : index
    %79 = vector.load %arg6[%c56, %c0_45] : memref<72x16xf32, #tpu.memory_space<vmem>>, vector<8x16xf32>
    %cst_46 = arith.constant dense<0.000000e+00> : vector<256x16xf32>
    %80 = tpu.matmul %78, %79, %cst_46 {dimension_numbers = #tpu.dot_dimension_numbers<[1], [0], [0], [1], [0, 0, 1, 1], [], []>} : vector<256x8xf32>, vector<8x16xf32>, vector<256x16xf32> -> vector<256x16xf32>
    %81 = arith.addf %77, %80 : vector<256x16xf32>
    %c41 = arith.constant 41 : index
    %c0_47 = arith.constant 0 : index
    %82 = vector.load %arg13[%c41, %c0_47] : memref<304x8xf32, #tpu.memory_space<vmem>>, vector<256x8xf32>
    %83 = vector.broadcast %3 : vector<256x1xf32> to vector<256x8xf32>
    %84 = arith.mulf %83, %82 : vector<256x8xf32>
    %c64 = arith.constant 64 : index
    %c0_48 = arith.constant 0 : index
    %85 = vector.load %arg6[%c64, %c0_48] : memref<72x16xf32, #tpu.memory_space<vmem>>, vector<8x16xf32>
    %cst_49 = arith.constant dense<0.000000e+00> : vector<256x16xf32>
    %86 = tpu.matmul %84, %85, %cst_49 {dimension_numbers = #tpu.dot_dimension_numbers<[1], [0], [0], [1], [0, 0, 1, 1], [], []>} : vector<256x8xf32>, vector<8x16xf32>, vector<256x16xf32> -> vector<256x16xf32>
    %87 = arith.addf %81, %86 : vector<256x16xf32>
    %c0_50 = arith.constant 0 : index
    %c0_51 = arith.constant 0 : index
    %88 = vector.load %arg7[%c0_50, %c0_51] : memref<2x16xf32, #tpu.memory_space<vmem>>, vector<1x16xf32>
    %89 = vector.broadcast %88 : vector<1x16xf32> to vector<256x16xf32>
    %90 = arith.mulf %87, %89 : vector<256x16xf32>
    %c1 = arith.constant 1 : index
    %c0_52 = arith.constant 0 : index
    %91 = vector.load %arg7[%c1, %c0_52] : memref<2x16xf32, #tpu.memory_space<vmem>>, vector<1x16xf32>
    %92 = vector.broadcast %91 : vector<1x16xf32> to vector<256x16xf32>
    %93 = arith.addf %90, %92 : vector<256x16xf32>
    %cst_53 = arith.constant 0.000000e+00 : f32
    %94 = vector.broadcast %cst_53 : f32 to vector<256x16xf32>
    %95 = arith.maximumf %93, %94 : vector<256x16xf32>
    %cst_54 = arith.constant 0.000000e+00 : f32
    %96 = vector.broadcast %cst_54 : f32 to vector<24x16xf32>
    %c0_55 = arith.constant 0 : index
    %c0_56 = arith.constant 0 : index
    %97 = vector.load %arg14[%c0_55, %c0_56] : memref<304x16xf32, #tpu.memory_space<vmem>>, vector<24x16xf32>
    tpu.vector_store %arg14[%c0_55, %c0_56], %96 {strides = array<i32>} : memref<304x16xf32, #tpu.memory_space<vmem>>, vector<24x16xf32>,
    %cst_57 = arith.constant 0.000000e+00 : f32
    %98 = vector.broadcast %cst_57 : f32 to vector<24x16xf32>
    %c280_58 = arith.constant 280 : index
    %c0_59 = arith.constant 0 : index
    %99 = vector.load %arg14[%c280_58, %c0_59] : memref<304x16xf32, #tpu.memory_space<vmem>>, vector<24x16xf32>
    tpu.vector_store %arg14[%c280_58, %c0_59], %98 {strides = array<i32>} : memref<304x16xf32, #tpu.memory_space<vmem>>, vector<24x16xf32>,
    %c24_60 = arith.constant 24 : index
    %c0_61 = arith.constant 0 : index
    %100 = vector.load %arg14[%c24_60, %c0_61] : memref<304x16xf32, #tpu.memory_space<vmem>>, vector<256x16xf32>
    tpu.vector_store %arg14[%c24_60, %c0_61], %95 {strides = array<i32>} : memref<304x16xf32, #tpu.memory_space<vmem>>, vector<256x16xf32>,
    %c7_62 = arith.constant 7 : index
    %c0_63 = arith.constant 0 : index
    %101 = vector.load %arg14[%c7_62, %c0_63] : memref<304x16xf32, #tpu.memory_space<vmem>>, vector<256x16xf32>
    %102 = vector.broadcast %2 : vector<256x1xf32> to vector<256x16xf32>
    %103 = arith.mulf %102, %101 : vector<256x16xf32>
    %c0_64 = arith.constant 0 : index
    %c0_65 = arith.constant 0 : index
    %104 = vector.load %arg8[%c0_64, %c0_65] : memref<144x16xf32, #tpu.memory_space<vmem>>, vector<16x16xf32>
    %cst_66 = arith.constant dense<0.000000e+00> : vector<256x16xf32>
    %105 = tpu.matmul %103, %104, %cst_66 {dimension_numbers = #tpu.dot_dimension_numbers<[1], [0], [0], [1], [0, 0, 1, 1], [], []>} : vector<256x16xf32>, vector<16x16xf32>, vector<256x16xf32> -> vector<256x16xf32>
    %c8_67 = arith.constant 8 : index
    %c0_68 = arith.constant 0 : index
    %106 = vector.load %arg14[%c8_67, %c0_68] : memref<304x16xf32, #tpu.memory_space<vmem>>, vector<256x16xf32>
    %c16_69 = arith.constant 16 : index
    %c0_70 = arith.constant 0 : index
    %107 = vector.load %arg8[%c16_69, %c0_70] : memref<144x16xf32, #tpu.memory_space<vmem>>, vector<16x16xf32>
    %cst_71 = arith.constant dense<0.000000e+00> : vector<256x16xf32>
    %108 = tpu.matmul %106, %107, %cst_71 {dimension_numbers = #tpu.dot_dimension_numbers<[1], [0], [0], [1], [0, 0, 1, 1], [], []>} : vector<256x16xf32>, vector<16x16xf32>, vector<256x16xf32> -> vector<256x16xf32>
    %109 = arith.addf %105, %108 : vector<256x16xf32>
    %c9_72 = arith.constant 9 : index
    %c0_73 = arith.constant 0 : index
    %110 = vector.load %arg14[%c9_72, %c0_73] : memref<304x16xf32, #tpu.memory_space<vmem>>, vector<256x16xf32>
    %111 = vector.broadcast %3 : vector<256x1xf32> to vector<256x16xf32>
    %112 = arith.mulf %111, %110 : vector<256x16xf32>
    %c32_74 = arith.constant 32 : index
    %c0_75 = arith.constant 0 : index
    %113 = vector.load %arg8[%c32_74, %c0_75] : memref<144x16xf32, #tpu.memory_space<vmem>>, vector<16x16xf32>
    %cst_76 = arith.constant dense<0.000000e+00> : vector<256x16xf32>
    %114 = tpu.matmul %112, %113, %cst_76 {dimension_numbers = #tpu.dot_dimension_numbers<[1], [0], [0], [1], [0, 0, 1, 1], [], []>} : vector<256x16xf32>, vector<16x16xf32>, vector<256x16xf32> -> vector<256x16xf32>
    %115 = arith.addf %109, %114 : vector<256x16xf32>
    %c23_77 = arith.constant 23 : index
    %c0_78 = arith.constant 0 : index
    %116 = vector.load %arg14[%c23_77, %c0_78] : memref<304x16xf32, #tpu.memory_space<vmem>>, vector<256x16xf32>
    %117 = vector.broadcast %2 : vector<256x1xf32> to vector<256x16xf32>
    %118 = arith.mulf %117, %116 : vector<256x16xf32>
    %c48_79 = arith.constant 48 : index
    %c0_80 = arith.constant 0 : index
    %119 = vector.load %arg8[%c48_79, %c0_80] : memref<144x16xf32, #tpu.memory_space<vmem>>, vector<16x16xf32>
    %cst_81 = arith.constant dense<0.000000e+00> : vector<256x16xf32>
    %120 = tpu.matmul %118, %119, %cst_81 {dimension_numbers = #tpu.dot_dimension_numbers<[1], [0], [0], [1], [0, 0, 1, 1], [], []>} : vector<256x16xf32>, vector<16x16xf32>, vector<256x16xf32> -> vector<256x16xf32>
    %121 = arith.addf %115, %120 : vector<256x16xf32>
    %c24_82 = arith.constant 24 : index
    %c0_83 = arith.constant 0 : index
    %122 = vector.load %arg14[%c24_82, %c0_83] : memref<304x16xf32, #tpu.memory_space<vmem>>, vector<256x16xf32>
    %c64_84 = arith.constant 64 : index
    %c0_85 = arith.constant 0 : index
    %123 = vector.load %arg8[%c64_84, %c0_85] : memref<144x16xf32, #tpu.memory_space<vmem>>, vector<16x16xf32>
    %cst_86 = arith.constant dense<0.000000e+00> : vector<256x16xf32>
    %124 = tpu.matmul %122, %123, %cst_86 {dimension_numbers = #tpu.dot_dimension_numbers<[1], [0], [0], [1], [0, 0, 1, 1], [], []>} : vector<256x16xf32>, vector<16x16xf32>, vector<256x16xf32> -> vector<256x16xf32>
    %125 = arith.addf %121, %124 : vector<256x16xf32>
    %c25_87 = arith.constant 25 : index
    %c0_88 = arith.constant 0 : index
    %126 = vector.load %arg14[%c25_87, %c0_88] : memref<304x16xf32, #tpu.memory_space<vmem>>, vector<256x16xf32>
    %127 = vector.broadcast %3 : vector<256x1xf32> to vector<256x16xf32>
    %128 = arith.mulf %127, %126 : vector<256x16xf32>
    %c80 = arith.constant 80 : index
    %c0_89 = arith.constant 0 : index
    %129 = vector.load %arg8[%c80, %c0_89] : memref<144x16xf32, #tpu.memory_space<vmem>>, vector<16x16xf32>
    %cst_90 = arith.constant dense<0.000000e+00> : vector<256x16xf32>
    %130 = tpu.matmul %128, %129, %cst_90 {dimension_numbers = #tpu.dot_dimension_numbers<[1], [0], [0], [1], [0, 0, 1, 1], [], []>} : vector<256x16xf32>, vector<16x16xf32>, vector<256x16xf32> -> vector<256x16xf32>
    %131 = arith.addf %125, %130 : vector<256x16xf32>
    %c39_91 = arith.constant 39 : index
    %c0_92 = arith.constant 0 : index
    %132 = vector.load %arg14[%c39_91, %c0_92] : memref<304x16xf32, #tpu.memory_space<vmem>>, vector<256x16xf32>
    %133 = vector.broadcast %2 : vector<256x1xf32> to vector<256x16xf32>
    %134 = arith.mulf %133, %132 : vector<256x16xf32>
    %c96 = arith.constant 96 : index
    %c0_93 = arith.constant 0 : index
    %135 = vector.load %arg8[%c96, %c0_93] : memref<144x16xf32, #tpu.memory_space<vmem>>, vector<16x16xf32>
    %cst_94 = arith.constant dense<0.000000e+00> : vector<256x16xf32>
    %136 = tpu.matmul %134, %135, %cst_94 {dimension_numbers = #tpu.dot_dimension_numbers<[1], [0], [0], [1], [0, 0, 1, 1], [], []>} : vector<256x16xf32>, vector<16x16xf32>, vector<256x16xf32> -> vector<256x16xf32>
    %137 = arith.addf %131, %136 : vector<256x16xf32>
    %c40_95 = arith.constant 40 : index
    %c0_96 = arith.constant 0 : index
    %138 = vector.load %arg14[%c40_95, %c0_96] : memref<304x16xf32, #tpu.memory_space<vmem>>, vector<256x16xf32>
    %c112 = arith.constant 112 : index
    %c0_97 = arith.constant 0 : index
    %139 = vector.load %arg8[%c112, %c0_97] : memref<144x16xf32, #tpu.memory_space<vmem>>, vector<16x16xf32>
    %cst_98 = arith.constant dense<0.000000e+00> : vector<256x16xf32>
    %140 = tpu.matmul %138, %139, %cst_98 {dimension_numbers = #tpu.dot_dimension_numbers<[1], [0], [0], [1], [0, 0, 1, 1], [], []>} : vector<256x16xf32>, vector<16x16xf32>, vector<256x16xf32> -> vector<256x16xf32>
    %141 = arith.addf %137, %140 : vector<256x16xf32>
    %c41_99 = arith.constant 41 : index
    %c0_100 = arith.constant 0 : index
    %142 = vector.load %arg14[%c41_99, %c0_100] : memref<304x16xf32, #tpu.memory_space<vmem>>, vector<256x16xf32>
    %143 = vector.broadcast %3 : vector<256x1xf32> to vector<256x16xf32>
    %144 = arith.mulf %143, %142 : vector<256x16xf32>
    %c128 = arith.constant 128 : index
    %c0_101 = arith.constant 0 : index
    %145 = vector.load %arg8[%c128, %c0_101] : memref<144x16xf32, #tpu.memory_space<vmem>>, vector<16x16xf32>
    %cst_102 = arith.constant dense<0.000000e+00> : vector<256x16xf32>
    %146 = tpu.matmul %144, %145, %cst_102 {dimension_numbers = #tpu.dot_dimension_numbers<[1], [0], [0], [1], [0, 0, 1, 1], [], []>} : vector<256x16xf32>, vector<16x16xf32>, vector<256x16xf32> -> vector<256x16xf32>
    %147 = arith.addf %141, %146 : vector<256x16xf32>
    %c0_103 = arith.constant 0 : index
    %c0_104 = arith.constant 0 : index
    %148 = vector.load %arg9[%c0_103, %c0_104] : memref<4x16xf32, #tpu.memory_space<vmem>>, vector<1x16xf32>
    %149 = vector.broadcast %148 : vector<1x16xf32> to vector<256x16xf32>
    %150 = arith.mulf %147, %149 : vector<256x16xf32>
    %c1_105 = arith.constant 1 : index
    %c0_106 = arith.constant 0 : index
    %151 = vector.load %arg9[%c1_105, %c0_106] : memref<4x16xf32, #tpu.memory_space<vmem>>, vector<1x16xf32>
    %152 = vector.broadcast %151 : vector<1x16xf32> to vector<256x16xf32>
    %153 = arith.addf %150, %152 : vector<256x16xf32>
    %c24_107 = arith.constant 24 : index
    %c0_108 = arith.constant 0 : index
    %154 = vector.load %arg13[%c24_107, %c0_108] : memref<304x8xf32, #tpu.memory_space<vmem>>, vector<256x8xf32>
    %c0_109 = arith.constant 0 : index
    %c0_110 = arith.constant 0 : index
    %155 = vector.load %arg10[%c0_109, %c0_110] : memref<8x16xf32, #tpu.memory_space<vmem>>, vector<8x16xf32>
    %cst_111 = arith.constant dense<0.000000e+00> : vector<256x16xf32>
    %156 = tpu.matmul %154, %155, %cst_111 {dimension_numbers = #tpu.dot_dimension_numbers<[1], [0], [0], [1], [0, 0, 1, 1], [], []>} : vector<256x8xf32>, vector<8x16xf32>, vector<256x16xf32> -> vector<256x16xf32>
    %cst_112 = arith.constant dense<0.000000e+00> : vector<16xf32>
    %157 = vector.multi_reduction <add>, %156, %cst_112 [0] : vector<256x16xf32> to vector<16xf32>
    %158 = vector.shape_cast %157 : vector<16xf32> to vector<1x16xf32>
    %c0_113 = arith.constant 0 : index
    %c0_114 = arith.constant 0 : index
    %159 = vector.load %arg11[%c0_113, %c0_114] : memref<16x16xf32, #tpu.memory_space<vmem>>, vector<16x16xf32>
    %cst_115 = arith.constant dense<0.000000e+00> : vector<1x16xf32>
    %160 = tpu.matmul %158, %159, %cst_115 {dimension_numbers = #tpu.dot_dimension_numbers<[1], [0], [0], [1], [0, 0, 1, 1], [], []>} : vector<1x16xf32>, vector<16x16xf32>, vector<1x16xf32> -> vector<1x16xf32>
    %161 = vector.broadcast %160 : vector<1x16xf32> to vector<256x16xf32>
    %162 = arith.subf %156, %161 : vector<256x16xf32>
    %163 = arith.mulf %162, %162 : vector<256x16xf32>
    %cst_116 = arith.constant dense<0.000000e+00> : vector<16xf32>
    %164 = vector.multi_reduction <add>, %163, %cst_116 [0] : vector<256x16xf32> to vector<16xf32>
    %165 = vector.shape_cast %164 : vector<16xf32> to vector<1x16xf32>
    %c0_117 = arith.constant 0 : index
    %c0_118 = arith.constant 0 : index
    %166 = vector.load %arg11[%c0_117, %c0_118] : memref<16x16xf32, #tpu.memory_space<vmem>>, vector<16x16xf32>
    %cst_119 = arith.constant dense<0.000000e+00> : vector<1x16xf32>
    %167 = tpu.matmul %165, %166, %cst_119 {dimension_numbers = #tpu.dot_dimension_numbers<[1], [0], [0], [1], [0, 0, 1, 1], [], []>} : vector<1x16xf32>, vector<16x16xf32>, vector<1x16xf32> -> vector<1x16xf32>
    %cst_120 = arith.constant 9.99999974E-6 : f32
    %168 = vector.broadcast %cst_120 : f32 to vector<1x16xf32>
    %169 = arith.addf %167, %168 : vector<1x16xf32>
    %170 = math.rsqrt %169 : vector<1x16xf32>
    %171 = vector.broadcast %170 : vector<1x16xf32> to vector<256x16xf32>
    %172 = arith.mulf %162, %171 : vector<256x16xf32>
    %c2 = arith.constant 2 : index
    %c0_121 = arith.constant 0 : index
    %173 = vector.load %arg9[%c2, %c0_121] : memref<4x16xf32, #tpu.memory_space<vmem>>, vector<1x16xf32>
    %174 = vector.broadcast %173 : vector<1x16xf32> to vector<256x16xf32>
    %175 = arith.mulf %172, %174 : vector<256x16xf32>
    %c3 = arith.constant 3 : index
    %c0_122 = arith.constant 0 : index
    %176 = vector.load %arg9[%c3, %c0_122] : memref<4x16xf32, #tpu.memory_space<vmem>>, vector<1x16xf32>
    %177 = vector.broadcast %176 : vector<1x16xf32> to vector<256x16xf32>
    %178 = arith.addf %175, %177 : vector<256x16xf32>
    %179 = arith.addf %178, %153 : vector<256x16xf32>
    %cst_123 = arith.constant 0.000000e+00 : f32
    %180 = vector.broadcast %cst_123 : f32 to vector<256x16xf32>
    %181 = arith.maximumf %179, %180 : vector<256x16xf32>
    %c0_124 = arith.constant 0 : index
    %c0_125 = arith.constant 0 : index
    %c0_126 = arith.constant 0 : index
    %182 = vector.load %arg12[%c0_124, %c0_125, %c0_126] : memref<1x256x16xf32, #tpu.memory_space<vmem>>, vector<1x256x16xf32>
    %183 = vector.shape_cast %182 : vector<1x256x16xf32> to vector<256x16xf32>
    %184 = vector.shape_cast %181 : vector<256x16xf32> to vector<1x256x16xf32>
    tpu.vector_store %arg12[%c0_124, %c0_125, %c0_126], %184 {strides = array<i32>} : memref<1x256x16xf32, #tpu.memory_space<vmem>>, vector<1x256x16xf32>,
    return
  }
  func.func @transform_0(%arg0: i32) -> (i32, i32, i32) {
    %c0_i32 = arith.constant 0 : i32
    %c0_i32_0 = arith.constant 0 : i32
    %c0_i32_1 = arith.constant 0 : i32
    return %arg0, %c0_i32, %c0_i32_0 : i32, i32, i32
  }
  func.func @transform_1(%arg0: i32) -> (i32, i32, i32) {
    %c0_i32 = arith.constant 0 : i32
    %c0_i32_0 = arith.constant 0 : i32
    %c0_i32_1 = arith.constant 0 : i32
    return %arg0, %c0_i32, %c0_i32_0 : i32, i32, i32
  }
  func.func @transform_2(%arg0: i32) -> (i32, i32) {
    %c0_i32 = arith.constant 0 : i32
    %c0_i32_0 = arith.constant 0 : i32
    %c0_i32_1 = arith.constant 0 : i32
    return %c0_i32, %c0_i32_0 : i32, i32
  }
  func.func @transform_3(%arg0: i32) -> (i32, i32) {
    %c0_i32 = arith.constant 0 : i32
    %c0_i32_0 = arith.constant 0 : i32
    %c0_i32_1 = arith.constant 0 : i32
    return %c0_i32, %c0_i32_0 : i32, i32
  }
  func.func @transform_4(%arg0: i32) -> (i32, i32) {
    %c0_i32 = arith.constant 0 : i32
    %c0_i32_0 = arith.constant 0 : i32
    %c0_i32_1 = arith.constant 0 : i32
    return %c0_i32, %c0_i32_0 : i32, i32
  }
  func.func @transform_5(%arg0: i32) -> (i32, i32) {
    %c0_i32 = arith.constant 0 : i32
    %c0_i32_0 = arith.constant 0 : i32
    %c0_i32_1 = arith.constant 0 : i32
    return %c0_i32, %c0_i32_0 : i32, i32
  }
  func.func @transform_6(%arg0: i32) -> (i32, i32) {
    %c0_i32 = arith.constant 0 : i32
    %c0_i32_0 = arith.constant 0 : i32
    %c0_i32_1 = arith.constant 0 : i32
    return %c0_i32, %c0_i32_0 : i32, i32
  }
  func.func @transform_7(%arg0: i32) -> (i32, i32) {
    %c0_i32 = arith.constant 0 : i32
    %c0_i32_0 = arith.constant 0 : i32
    %c0_i32_1 = arith.constant 0 : i32
    return %c0_i32, %c0_i32_0 : i32, i32
  }
  func.func @transform_8(%arg0: i32) -> (i32, i32) {
    %c0_i32 = arith.constant 0 : i32
    %c0_i32_0 = arith.constant 0 : i32
    %c0_i32_1 = arith.constant 0 : i32
    return %c0_i32, %c0_i32_0 : i32, i32
  }
  func.func @transform_9(%arg0: i32) -> (i32, i32) {
    %c0_i32 = arith.constant 0 : i32
    %c0_i32_0 = arith.constant 0 : i32
    %c0_i32_1 = arith.constant 0 : i32
    return %c0_i32, %c0_i32_0 : i32, i32
  }
  func.func @transform_10(%arg0: i32) -> (i32, i32) {
    %c0_i32 = arith.constant 0 : i32
    %c0_i32_0 = arith.constant 0 : i32
    %c0_i32_1 = arith.constant 0 : i32
    return %c0_i32, %c0_i32_0 : i32, i32
  }
  func.func @transform_11(%arg0: i32) -> (i32, i32, i32) {
    %c0_i32 = arith.constant 0 : i32
    %c0_i32_0 = arith.constant 0 : i32
    %c0_i32_1 = arith.constant 0 : i32
    return %arg0, %c0_i32, %c0_i32_0 : i32, i32, i32
  }
}

</mosaic_0001>

<bundles_post_ra>
// kernel: tpu_custom_call.1
= control target key start
LH: loop header
LB: loop body
LE: loop exit
PB: predicated region body
PF: predicated region fallthrough
CT: control target
= control target key end

     0   :  { %s14215_s17 = smov 0   ;;  %s18895_s0 = inlined_call_operand.vmem [shape: f32[2,256,4], index: 0, kind: input, shape index: {}]   ;;  %s18896_s1 = inlined_call_operand.vmem [shape: f32[2,256,4], index: 1, kind: input, shape index: {}]   ;;  %s18897_s2 = inlined_call_operand.vmem [shape: f32[256,8], index: 2, kind: input, shape index: {}]   ;;  %s18898_s3 = inlined_call_operand.vmem [shape: f32[4,16], index: 3, kind: input, shape index: {}]   ;;  %s18899_s4 = inlined_call_operand.vmem [shape: f32[1,4], index: 4, kind: input, shape index: {}]   ;;  %s18900_s5 = inlined_call_operand.vmem [shape: f32[72,16], index: 5, kind: input, shape index: {}]   ;;  %s18901_s6 = inlined_call_operand.vmem [shape: f32[2,16], index: 6, kind: input, shape index: {}]   ;;  %s18902_s7 = inlined_call_operand.vmem [shape: f32[144,16], index: 7, kind: input, shape index: {}]   ;;  %s18903_s8 = inlined_call_operand.vmem [shape: f32[4,16], index: 8, kind: input, shape index: {}]   ;;  %s18904_s9 = inlined_call_operand.vmem [shape: f32[8,16], index: 9, kind: input, shape index: {}]   ;;  %s18905_s10 = inlined_call_operand.vmem [shape: f32[16,16], index: 10, kind: input, shape index: {}]   ;;  %s18906_s11 = inlined_call_operand.vmem [shape: f32[2,256,16], index: 11, kind: output, shape index: {}]  }
   0x1 LB: > { %s11051_s18 = sadd.s32 4294967295, %s14139_s17   ;;  %p11055_p0 = scmp.ge.s32.totalorder %s14139_s17, 1  ;;  %s14139_s17 = sphi %s14215_s17, %s21_s17  }
   0x2   : > { %p347_p1 = scmp.lt.s32.totalorder %s14139_s17, 3 }
   0x4   : > { %p348_p2 = pnand %p11055_p0, %p347_p1 }
   0x6   : > { %351 = sbr.rel (%p348_p2) target bundleno = 2934 (0xb76), region = 64 }
   0xd   : > { %v14226_v0 = vld [vmem:[%s18897_s2] sm:$0xff]  ;;  %vm569_vm0 = vcmask 1043456   ;;  %v18911_v2 = vmov 4   ;;  %p392_p3 = scmp.lt.s32.totalorder %s11051_s18, 1  ;;  %v14236_v3 = vld [vmem:[%s18897_s2 + $0x8] sm:$0xff]  ;;  %v18913_v4 = vmov 3  }
   0xe   : > { %v471_v1 = vld [vmem:[%s18898_s3] sm:$0xf]  ;;  %14001 = vset.pattern.permute.xlu1 %v18911_v2  ;;  %14000 = vset.pattern.permute.xlu0 %v18913_v4  ;;  %vm472_vm1 = vcmask 31744   ;;  %v14258_v8 = vld [vmem:[%s18897_s2 + $0x10] sm:$0xff]  ;;  %v18909_v9 = vmov 5   ;;  %v14274_v14 = vld [vmem:[%s18897_s2 + $0x18] sm:$0xff] }
   0xf   : > { %12392 = vmatprep.subr.msk.mxu0 %vm569_vm0, %v471_v1  ;;  %1510 = vperm.xlu1 %14001, %v14226_v0   ;;  %s20200_s18 = smov (!%p392_p3, %s11051_s18), 1  ;;  %v14291_v18 = vld [vmem:[%s18897_s2 + $0x20] sm:$0xff]  ;;  %v14302_v21 = vld [vmem:[%s18897_s2 + $0x28] sm:$0xff]  ;;  %v14311_v23 = vld [vmem:[%s18897_s2 + $0x30] sm:$0xff]  ;;  %v18907_v60 = vmov 6   ;;  %s14145_s16 = smov 124  }
  0x10   : > { %12393 = vmatpush3.msk.msra.mxu0 %vm569_vm0, %v471_v1  ;;  %1190 = vperm.xlu0 %14000, %v14226_v0   ;;  %s14240_s25 = sshll.u32 %s20200_s18, 8  ;;  %v14325_v27 = vld [vmem:[%s18897_s2 + $0x40] sm:$0xff]  ;;  %v14336_v30 = vld [vmem:[%s18897_s2 + $0x50] sm:$0xff]  ;;  %v14361_v36 = vld [vmem:[%s18897_s2 + $0x38] sm:$0xff]  ;;  %s14146_s18 = smov 116   ;;  %vm2149_vm2 = vcmask 64512  }
  0x11   : > { %s14247_s28 = scalar_lea.vmem %s18896_s1, %s14240_s25  ;;  %19304 = vst [vmem:[#allocation4_spill] sm:$0xff] %v14336_v30  ;;  %v14347_v33 = vld [vmem:[%s18897_s2 + $0x60] sm:$0xff]  ;;  %v14356_v35 = vld [vmem:[%s18897_s2 + $0x70] sm:$0xff]  ;;  %v14417_v50 = vld [vmem:[%s18897_s2 + $0x48] sm:$0xff]  ;;  %s14148_s21 = smov 120   ;;  %vm2348_vm3 = vcmask 64544  }
  0x12   : > { %v439_v5 = vld [vmem:[%s14247_s28] sm:$0xff]  ;;  %v440_v6 = vld [vmem:[%s14247_s28 + $0x8] sm:$0xff]  ;;  %v441_v7 = vld [vmem:[%s14247_s28 + $0x10] sm:$0xff]  ;;  %19305 = vst [vmem:[#allocation5_spill] sm:$0xff] %v14347_v33  ;;  %s15156_s24 = scalar_lea.vmem %s18895_s0, %s14240_s25  ;;  %s14150_s14 = smov 4   ;;  %vm6345_vm4 = vcmask 130048  }
  0x13   : > { %1514 = vperm.xlu1 %14001, %v14236_v3   ;;  %12394 = vmatprep.mubr.msk.f32.mxu0 %vm472_vm1, %v439_v5  ;;  %v442_v10 = vld [vmem:[%s14247_s28 + $0x18] sm:$0xff]  ;;  %v443_v11 = vld [vmem:[%s14247_s28 + $0x20] sm:$0xff]  ;;  %v444_v12 = vld [vmem:[%s14247_s28 + $0x28] sm:$0xff]  ;;  %vm14154_vm5 = vmmov 0   ;;  %s18802_s26 = scalar_lea.vmem %s18906_s11, %s14240_s25 }
  0x14   : > { %1194 = vperm.xlu0 %14000, %v14236_v3   ;;  %12395 = vmatmul.mubr.msk.f32.vlgmr.msra.gmra.mrb[0].mxu0 %vm472_vm1, %v440_v6  ;;  %v445_v13 = vld [vmem:[%s14247_s28 + $0x30] sm:$0xff]  ;;  %v446_v15 = vld [vmem:[%s14247_s28 + $0x38] sm:$0xff]  ;;  %v447_v16 = vld [vmem:[%s14247_s28 + $0x40] sm:$0xff] }
  0x15   : > { %12397 = vmatprep.mubr.msk.f32.mxu0 %vm472_vm1, %v441_v7  ;;  %v448_v17 = vld [vmem:[%s14247_s28 + $0x48] sm:$0xff]  ;;  %v449_v19 = vld [vmem:[%s14247_s28 + $0x50] sm:$0xff]  ;;  %v450_v20 = vld [vmem:[%s14247_s28 + $0x58] sm:$0xff] }
  0x16   : > { %v451_v22 = vld [vmem:[%s14247_s28 + $0x60] sm:$0xff]  ;;  %v452_v24 = vld [vmem:[%s14247_s28 + $0x68] sm:$0xff]  ;;  %v453_v25 = vld [vmem:[%s14247_s28 + $0x70] sm:$0xff] }
  0x17   : > { %14002 = vset.pattern.permute.xlu1 %v18909_v9  ;;  %v454_v26 = vld [vmem:[%s14247_s28 + $0x78] sm:$0xff]  ;;  %v455_v28 = vld [vmem:[%s14247_s28 + $0x80] sm:$0xff]  ;;  %v456_v29 = vld [vmem:[%s14247_s28 + $0x88] sm:$0xff] }
  0x18   : > { %1830 = vperm.xlu1 %14002, %v14226_v0   ;;  %1198 = vperm.xlu0 %14000, %v14258_v8   ;;  %v457_v31 = vld [vmem:[%s14247_s28 + $0x90] sm:$0xff]  ;;  %v458_v32 = vld [vmem:[%s14247_s28 + $0x98] sm:$0xff]  ;;  %v459_v34 = vld [vmem:[%s14247_s28 + $0xa0] sm:$0xff] }
  0x19   : > { %12398 = vmatmul.mubr.msk.f32.gmra.mrb[2].mxu0 %vm472_vm1, %v442_v10  ;;  %v460_v37 = vld [vmem:[%s14247_s28 + $0xa8] sm:$0xff]  ;;  %v461_v38 = vld [vmem:[%s14247_s28 + $0xb0] sm:$0xff]  ;;  %v14372_v39 = vld [vmem:[%s18897_s2 + $0x80] sm:$0xff] }
  0x1a   : > { %12400 = vmatprep.mubr.msk.f32.mxu0 %vm472_vm1, %v443_v11  ;;  %v462_v40 = vld [vmem:[%s14247_s28 + $0xb8] sm:$0xff]  ;;  %v463_v41 = vld [vmem:[%s14247_s28 + $0xc0] sm:$0xff]  ;;  %v14383_v42 = vld [vmem:[%s18897_s2 + $0x90] sm:$0xff] }
  0x1b   : > { %v464_v43 = vld [vmem:[%s14247_s28 + $0xc8] sm:$0xff]  ;;  %v465_v44 = vld [vmem:[%s14247_s28 + $0xd0] sm:$0xff]  ;;  %v14394_v45 = vld [vmem:[%s18897_s2 + $0xa0] sm:$0xff] }
  0x1c   : > { %1834 = vperm.xlu1 %14002, %v14236_v3   ;;  %1202 = vperm.xlu0 %14000, %v14274_v14   ;;  %v466_v46 = vld [vmem:[%s14247_s28 + $0xd8] sm:$0xff]  ;;  %v467_v47 = vld [vmem:[%s14247_s28 + $0xe0] sm:$0xff]  ;;  %v14406_v48 = vld [vmem:[%s18897_s2 + $0xb0] sm:$0xff] }
  0x1d   : > { %12401 = vmatmul.mubr.msk.f32.gmra.mrb[4].mxu0 %vm472_vm1, %v444_v12  ;;  %v468_v49 = vld [vmem:[%s14247_s28 + $0xe8] sm:$0xff]  ;;  %v14422_v51 = vld [vmem:[%s18897_s2 + $0xc0] sm:$0xff]  ;;  %v14430_v52 = vld [vmem:[%s18897_s2 + $0xd0] sm:$0xff] }
  0x1e   : > { %12403 = vmatprep.mubr.msk.f32.mxu0 %vm472_vm1, %v445_v13  ;;  %v14445_v53 = vld [vmem:[%s18897_s2 + $0x58] sm:$0xff]  ;;  %v14462_v54 = vld [vmem:[%s18897_s2 + $0x68] sm:$0xff] }
  0x1f   : > { %19306 = vst [vmem:[#allocation6_spill] sm:$0xff] %v14445_v53  ;;  %19307 = vst [vmem:[#allocation7_spill] sm:$0xff] %v14462_v54  ;;  %v14479_v55 = vld [vmem:[%s18897_s2 + $0x78] sm:$0xff]  ;;  %v14491_v57 = vld [vmem:[%s18897_s2 + $0xe8] sm:$0xff] }
  0x20   : > { %14004 = vset.pattern.permute.xlu1 %v18911_v2  ;;  %14003 = vset.pattern.permute.xlu0 %v18911_v2  ;;  %19308 = vst [vmem:[#allocation8_spill] sm:$0xff] %v14479_v55  ;;  %v14484_v56 = vld [vmem:[%s18897_s2 + $0xd8] sm:$0xff]  ;;  %v14516_v1 = vld [vmem:[%s18897_s2 + $0x88] sm:$0xff] }
  0x21   : > { %1522 = vperm.xlu1 %14004, %v14274_v14   ;;  %12404 = vmatmul.mubr.msk.f32.gmra.mrb[6].mxu0 %vm472_vm1, %v446_v15  ;;  %19309 = vst [vmem:[#allocation9_spill] sm:$0xff] %v14484_v56  ;;  %19310 = vst [vmem:[#allocation10_spill] sm:$0xff] %v14516_v1  ;;  %v14545_v15 = vld [vmem:[%s18897_s2 + $0x98] sm:$0xff] }
  0x22   : > { %1518 = vperm.xlu0 %14003, %v14258_v8   ;;  %12406 = vmatprep.mubr.msk.f32.mxu0 %vm472_vm1, %v447_v16  ;;  %19312 = vst [vmem:[#allocation12_spill] sm:$0xff] %v14545_v15 }
  0x25   : > { %14005 = vset.pattern.permute.xlu1 %v18913_v4  ;;  %12407 = vmatmul.mubr.msk.f32.gmra.mrb[8].mxu0 %vm472_vm1, %v448_v17 }
  0x26   : > { %1206 = vperm.xlu1 %14005, %v14291_v18   ;;  %12409 = vmatprep.mubr.msk.f32.mxu0 %vm472_vm1, %v449_v19 }
  0x27   : > { %1526 = vperm.xlu0 %14003, %v14291_v18  }
  0x29   : > { %12410 = vmatmul.mubr.msk.f32.gmra.mrb[10].mxu0 %vm472_vm1, %v450_v20 }
  0x2a   : > { %1210 = vperm.xlu1 %14005, %v14302_v21   ;;  %12412 = vmatprep.mubr.msk.f32.mxu0 %vm472_vm1, %v451_v22 }
  0x2b   : > { %1534 = vperm.xlu0 %14003, %v14311_v23  }
  0x2d   : > { %12413 = vmatmul.mubr.msk.f32.gmra.mrb[12].mxu0 %vm472_vm1, %v452_v24 }
  0x2e   : > { %14006 = vset.pattern.permute.xlu1 %v18909_v9  ;;  %12415 = vmatprep.mubr.msk.f32.mxu0 %vm472_vm1, %v453_v25 }
  0x2f   : > { %1842 = vperm.xlu1 %14006, %v14274_v14   ;;  %1542 = vperm.xlu0 %14003, %v14325_v27  }
  0x31   : > { %12416 = vmatmul.mubr.msk.f32.gmra.mrb[14].mxu0 %vm472_vm1, %v454_v26  ;;  %v14571_v26 = vld [vmem:[%s18897_s2 + $0xa8] sm:$0xff] }
  0x32   : > { %12418 = vmatprep.mubr.msk.f32.mxu0 %vm472_vm1, %v455_v28  ;;  %19318 = vst [vmem:[#allocation18_spill] sm:$0xff] %v14571_v26 }
  0x33   : > { %14007 = vset.pattern.permute.xlu1 %v18911_v2  ;;  %1550 = vperm.xlu0 %14003, %v14336_v30  }
  0x34   : > { %1530 = vperm.xlu1 %14007, %v14302_v21  }
  0x35   : > { %12419 = vmatmul.mubr.msk.f32.gmra.mrb[16].mxu0 %vm472_vm1, %v456_v29 }
  0x36   : > { %12421 = vmatprep.mubr.msk.f32.mxu0 %vm472_vm1, %v457_v31 }
  0x37   : > { %1558 = vperm.xlu0 %14003, %v14347_v33  }
  0x38   : > { %14008 = vset.pattern.permute.xlu1 %v18913_v4 }
  0x39   : > { %1214 = vperm.xlu1 %14008, %v14311_v23   ;;  %12422 = vmatmul.mubr.msk.f32.gmra.mrb[18].mxu0 %vm472_vm1, %v458_v32 }
  0x3a   : > { %12424 = vmatprep.mubr.msk.f32.mxu0 %vm472_vm1, %v459_v34 }
  0x3b   : > { %1566 = vperm.xlu0 %14003, %v14356_v35  }
  0x3d   : > { %1218 = vperm.xlu1 %14008, %v14361_v36   ;;  %12425 = vmatmul.mubr.msk.f32.gmra.mrb[20].mxu0 %vm472_vm1, %v460_v37 }
  0x3e   : > { %12427 = vmatprep.mubr.msk.f32.mxu0 %vm472_vm1, %v461_v38 }
  0x3f   : > { %1574 = vperm.xlu0 %14003, %v14372_v39  }
  0x41   : > { %14009 = vset.pattern.permute.xlu1 %v18909_v9  ;;  %12428 = vmatmul.mubr.msk.f32.gmra.mrb[22].mxu0 %vm472_vm1, %v462_v40  ;;  %v14597_v40 = vld [vmem:[%s18897_s2 + $0xb8] sm:$0xff] }
  0x42   : > { %1850 = vperm.xlu1 %14009, %v14302_v21   ;;  %12430 = vmatprep.mubr.msk.f32.mxu0 %vm472_vm1, %v463_v41  ;;  %19324 = vst [vmem:[#allocation24_spill] sm:$0xff] %v14597_v40 }
  0x43   : > { %1582 = vperm.xlu0 %14003, %v14383_v42  }
  0x45   : > { %12431 = vmatmul.mubr.msk.f32.gmra.mrb[24].mxu0 %vm472_vm1, %v464_v43 }
  0x46   : > { %14010 = vset.pattern.permute.xlu1 %v18911_v2  ;;  %12433 = vmatprep.mubr.msk.f32.mxu0 %vm472_vm1, %v465_v44 }
  0x47   : > { %1538 = vperm.xlu1 %14010, %v14361_v36   ;;  %1590 = vperm.xlu0 %14003, %v14394_v45  }
  0x49   : > { %12434 = vmatmul.mubr.msk.f32.gmra.mrb[26].mxu0 %vm472_vm1, %v466_v46 }
  0x4a   : > { %12436 = vmatprep.mubr.msk.f32.mxu0 %vm472_vm1, %v467_v47 }
  0x4b   : > { %14011 = vset.pattern.permute.xlu1 %v18913_v4  ;;  %1598 = vperm.xlu0 %14003, %v14406_v48  }
  0x4c   : > { %1222 = vperm.xlu1 %14011, %v14325_v27  }
  0x4d   : > { %12437 = vmatmul.mubr.msk.f32.gmra.mrb[28].mxu0 %vm472_vm1, %v468_v49 }
  0x4f   : > { %1606 = vperm.xlu0 %14003, %v14422_v51  }
  0x50   : > { %1226 = vperm.xlu1 %14011, %v14417_v50  }
  0x53   : > { %1614 = vperm.xlu0 %14003, %v14430_v52  }
  0x54   : > { %14012 = vset.pattern.permute.xlu1 %v18909_v9 }
  0x55   : > { %1858 = vperm.xlu1 %14012, %v14361_v36  }
  0x57   : > { %14040 = vset.pattern.permute.xlu0 %v18909_v9 }
  0x58   : > { %1838 = vperm.xlu0 %14040, %v14258_v8  }
  0x59   : > { %14013 = vset.pattern.permute.xlu1 %v18911_v2 }
  0x5a   : > { %1546 = vperm.xlu1 %14013, %v14417_v50  }
  0x5c   : > { %1846 = vperm.xlu0 %14040, %v14291_v18  }
  0x5e   : > { %14014 = vset.pattern.permute.xlu1 %v18913_v4 }
  0x5f   : > { %1230 = vperm.xlu1 %14014, %v14336_v30  }
  0x60   : > { %1854 = vperm.xlu0 %14040, %v14311_v23  }
  0x63   : > { %1234 = vperm.xlu1 %14014, %v14445_v53  }
  0x64   : > { %1862 = vperm.xlu0 %14040, %v14325_v27  }
  0x67   : > { %14015 = vset.pattern.permute.xlu1 %v18909_v9 }
  0x68   : > { %1866 = vperm.xlu1 %14015, %v14417_v50   ;;  %1870 = vperm.xlu0 %14040, %v14336_v30  }
  0x6c   : > { %14016 = vset.pattern.permute.xlu1 %v18911_v2  ;;  %1878 = vperm.xlu0 %14040, %v14347_v33  }
  0x6d   : > { %1554 = vperm.xlu1 %14016, %v14445_v53  }
  0x70   : > { %1886 = vperm.xlu0 %14040, %v14356_v35  }
  0x71   : > { %14017 = vset.pattern.permute.xlu1 %v18913_v4 }
  0x72   : > { %1238 = vperm.xlu1 %14017, %v14347_v33  }
  0x74   : > { %1894 = vperm.xlu0 %14040, %v14372_v39  }
  0x76   : > { %1242 = vperm.xlu1 %14017, %v14462_v54  }
  0x78   : > { %1902 = vperm.xlu0 %14040, %v14383_v42  }
  0x7a   : > { %14018 = vset.pattern.permute.xlu1 %v18909_v9 }
  0x7b   : > { %1874 = vperm.xlu1 %14018, %v14445_v53  }
  0x7c   : > { %1910 = vperm.xlu0 %14040, %v14394_v45  }
  0x7f   : > { %14019 = vset.pattern.permute.xlu1 %v18911_v2 }
  0x80   : > { %1562 = vperm.xlu1 %14019, %v14462_v54   ;;  %1918 = vperm.xlu0 %14040, %v14406_v48  }
  0x84   : > { %14020 = vset.pattern.permute.xlu1 %v18913_v4  ;;  %1926 = vperm.xlu0 %14040, %v14422_v51  }
  0x85   : > { %1246 = vperm.xlu1 %14020, %v14356_v35  }
  0x88   : > { %1938 = vperm.xlu0 %14040, %v14484_v56  }
  0x89   : > { %1250 = vperm.xlu1 %14020, %v14479_v55  }
  0x8c   : > { %1946 = vperm.xlu0 %14040, %v14491_v57  }
  0x8d   : > { %14021 = vset.pattern.permute.xlu1 %v18909_v9 }
  0x8e   : > { %1882 = vperm.xlu1 %14021, %v14462_v54   ;;  %v14496_v58 = vpop.permute.xlu1 %1510 }
  0x8f   : > { %v14498_v59 = vpop.permute.xlu0 %1190 }
  0x90   : > { %14051 = vset.pattern.permute.xlu0 %v18907_v60 }
  0x91   : > { %812 = vperm.xlu0 %14051, %v14236_v3  }
  0x92   : > { %14022 = vset.pattern.permute.xlu1 %v18911_v2  ;;  %v14502_v61 = vpop.permute.xlu1 %1514 }
  0x93   : > { %1570 = vperm.xlu1 %14022, %v14479_v55   ;;  %v14507_v62 = vpop.permute.xlu0 %1194 }
  0x95   : > { %817 = vperm.xlu0 %14051, %v14258_v8  }
  0x97   : > { %14023 = vset.pattern.permute.xlu1 %v18913_v4  ;;  %v14510_v63 = vpop.permute.xlu1 %1830  ;;  %v14522_v6 = vpop.permute.xlu0 %1198 }
  0x98   : > { %1254 = vperm.xlu1 %14023, %v14372_v39  }
  0x99   : > { %822 = vperm.xlu0 %14051, %v14274_v14  }
  0x9b   : > { %v14519_v5 = vpop.permute.xlu1 %1834  ;;  %v14529_v10 = vpop.permute.xlu0 %1202 }
  0x9c   : > { %1258 = vperm.xlu1 %14023, %v14516_v1  }
  0x9d   : > { %832 = vperm.xlu0 %14051, %v14302_v21  }
  0xa0   : > { %14024 = vset.pattern.permute.xlu1 %v18909_v9  ;;  %v14526_v7 = vpop.permute.xlu1 %1522 }
  0xa1   : > { %1890 = vperm.xlu1 %14024, %v14479_v55   ;;  %837 = vperm.xlu0 %14051, %v14311_v23   ;;  %v14536_v12 = vpop.permute.xlu0 %1518 }
  0xa5   : > { %14025 = vset.pattern.permute.xlu1 %v18911_v2  ;;  %v14533_v11 = vpop.permute.xlu1 %1206 }
  0xa6   : > { %1578 = vperm.xlu1 %14025, %v14516_v1   ;;  %v14549_v17 = vpop.permute.xlu0 %1526 }
  0xa7   : > { %19313 = vst [vmem:[#allocation13_spill] sm:$0xff] %v14549_v17 }
  0xa9   : > { %v14538_v13 = vpop.permute.xlu1 %1210 }
  0xaa   : > { %19311 = vst [vmem:[#allocation11_spill] sm:$0xff] %v14538_v13  ;;  %14026 = vset.pattern.permute.xlu1 %v18913_v4  ;;  %v14556_v20 = vpop.permute.xlu0 %1534 }
  0xab   : > { %1262 = vperm.xlu1 %14026, %v14383_v42   ;;  %19315 = vst [vmem:[#allocation15_spill] sm:$0xff] %v14556_v20 }
  0xae   : > { %v14547_v16 = vpop.permute.xlu1 %1842  ;;  %v14562_v24 = vpop.permute.xlu0 %1542 }
  0xaf   : > { %1266 = vperm.xlu1 %14026, %v14545_v15   ;;  %19316 = vst [vmem:[#allocation16_spill] sm:$0xff] %v14562_v24 }
  0xb2   : > { %v14573_v28 = vpop.permute.xlu0 %1550 }
  0xb3   : > { %14027 = vset.pattern.permute.xlu1 %v18909_v9  ;;  %v14553_v19 = vpop.permute.xlu1 %1530  ;;  %19319 = vst [vmem:[#allocation19_spill] sm:$0xff] %v14573_v28 }
  0xb4   : > { %19314 = vst [vmem:[#allocation14_spill] sm:$0xff] %v14553_v19  ;;  %1898 = vperm.xlu1 %14027, %v14516_v1  }
  0xb6   : > { %v14581_v32 = vpop.permute.xlu0 %1558 }
  0xb7   : > { %19321 = vst [vmem:[#allocation21_spill] sm:$0xff] %v14581_v32  ;;  %v19334_v32 = vmov 5  }
  0xb8   : > { %14028 = vset.pattern.permute.xlu1 %v18911_v2  ;;  %v14559_v22 = vpop.permute.xlu1 %1214 }
  0xb9   : > { %1586 = vperm.xlu1 %14028, %v14545_v15  }
  0xba   : > { %v14588_v37 = vpop.permute.xlu0 %1566 }
  0xbb   : > { %19322 = vst [vmem:[#allocation22_spill] sm:$0xff] %v14588_v37 }
  0xbc   : > { %v14564_v25 = vpop.permute.xlu1 %1218 }
  0xbd   : > { %19317 = vst [vmem:[#allocation17_spill] sm:$0xff] %v14564_v25  ;;  %14029 = vset.pattern.permute.xlu1 %v18913_v4 }
  0xbe   : > { %1270 = vperm.xlu1 %14029, %v14394_v45   ;;  %v14599_v41 = vpop.permute.xlu0 %1574 }
  0xbf   : > { %19325 = vst [vmem:[#allocation25_spill] sm:$0xff] %v14599_v41 }
  0xc1   : > { %v14575_v29 = vpop.permute.xlu1 %1850 }
  0xc2   : > { %1274 = vperm.xlu1 %14029, %v14571_v26   ;;  %v14604_v44 = vpop.permute.xlu0 %1582 }
  0xc3   : > { %19326 = vst [vmem:[#allocation26_spill] sm:$0xff] %v14604_v44 }
  0xc6   : > { %14030 = vset.pattern.permute.xlu1 %v18909_v9  ;;  %v14579_v31 = vpop.permute.xlu1 %1538  ;;  %v14613_v49 = vpop.permute.xlu0 %1590 }
  0xc7   : > { %19320 = vst [vmem:[#allocation20_spill] sm:$0xff] %v14579_v31  ;;  %1906 = vperm.xlu1 %14030, %v14545_v15   ;;  %19328 = vst [vmem:[#allocation28_spill] sm:$0xff] %v14613_v49 }
  0xca   : > { %v14620_v44 = vpop.permute.xlu0 %1598 }
  0xcb   : > { %14031 = vset.pattern.permute.xlu1 %v18911_v2  ;;  %v14585_v34 = vpop.permute.xlu1 %1222  ;;  %19330 = vst [vmem:[#allocation30_spill] sm:$0xff] %v14620_v44 }
  0xcc   : > { %1594 = vperm.xlu1 %14031, %v14571_v26  }
  0xce   : > { %v14636_v37 = vpop.permute.xlu0 %1606 }
  0xcf   : > { %v14590_v38 = vpop.permute.xlu1 %1226  ;;  %19333 = vst [vmem:[#allocation33_spill] sm:$0xff] %v14636_v37  ;;  %v19339_v37 = vmov 4  }
  0xd0   : > { %19323 = vst [vmem:[#allocation23_spill] sm:$0xff] %v14590_v38  ;;  %14032 = vset.pattern.permute.xlu1 %v18913_v4 }
  0xd1   : > { %1278 = vperm.xlu1 %14032, %v14406_v48  }
  0xd2   : > { %v14649_v24 = vpop.permute.xlu0 %1614 }
  0xd3   : > { %19337 = vst [vmem:[#allocation36_spill] sm:$0xff] %v14649_v24  ;;  %v19344_v24 = vmov 3  }
  0xd4   : > { %v14601_v43 = vpop.permute.xlu1 %1858 }
  0xd5   : > { %1282 = vperm.xlu1 %14032, %v14597_v40  }
  0xd9   : > { %14033 = vset.pattern.permute.xlu1 %v18909_v9  ;;  %v14607_v46 = vpop.permute.xlu1 %1546  ;;  %v14625_v9 = vld [vmem:[%s18897_s2 + $0xc8] sm:$0xff] }
  0xda   : > { %19327 = vst [vmem:[#allocation27_spill] sm:$0xff] %v14607_v46  ;;  %1914 = vperm.xlu1 %14033, %v14571_v26   ;;  %19331 = vst [vmem:[#allocation31_spill] sm:$0xff] %v14625_v9 }
  0xde   : > { %14034 = vset.pattern.permute.xlu1 %v18911_v2  ;;  %v14611_v47 = vpop.permute.xlu1 %1230 }
  0xdf   : > { %1602 = vperm.xlu1 %14034, %v14597_v40  }
  0xe2   : > { %v14616_v60 = vpop.permute.xlu1 %1234 }
  0xe3   : > { %19329 = vst [vmem:[#allocation29_spill] sm:$0xff] %v14616_v60  ;;  %14035 = vset.pattern.permute.xlu1 %v18913_v4 }
  0xe4   : > { %1286 = vperm.xlu1 %14035, %v14422_v51  }
  0xe7   : > { %v14627_v2 = vpop.permute.xlu1 %1866  ;;  %v14630_v49 = vpop.f32.mrb[0].mxu0 }
  0xe8   : > { %1290 = vperm.xlu1 %14035, %v14625_v9   ;;  %19332 = vst [vmem:[#allocation32_spill] sm:$0xff] %v14630_v49  ;;  %v14632_v41 = vpop.f32.mrb[1].mxu0  ;;  %v1318_v4 = vmul.f32 %v14630_v49, %v14507_v62  ;;  %v1958_v20 = vmul.f32 %v14630_v49, %v14519_v5 }
  0xea   : > { %1383 = vrot.lane.b32.xlu0 %v1318_v4, %s14145_s16 }
  0xec   : > { %14036 = vset.pattern.permute.xlu1 %v19334_v32  ;;  %v14639_v44 = vpop.permute.xlu1 %1554  ;;  %v14642_v28 = vpop.f32.mrb[2].mxu0 }
  0xed   : > { %19335 = vst [vmem:[#allocation34_spill] sm:$0xff] %v14639_v44  ;;  %19336 = vst [vmem:[#allocation35_spill] sm:$0xff] %v14642_v28  ;;  %1922 = vperm.xlu1 %14036, %v14597_v40   ;;  %v14645_v60 = vpop.f32.mrb[3].mxu0 }
  0xee   : > { %v1319_v46 = vmul.f32 %v14522_v6, %v14645_v60 }
  0xf0   : > { %1385 = vrot.lane.b32.xlu0 %v1319_v46, %s14145_s16  ;;  %v14652_v62 = vpop.f32.mrb[4].mxu0  ;;  %v14668_v46 = vpop.permute.xlu0 %1838 }
  0xf1   : > { %19338 = vst [vmem:[#allocation37_spill] sm:$0xff] %v14652_v62  ;;  %14037 = vset.pattern.permute.xlu1 %v19339_v37  ;;  %v14655_v44 = vpop.permute.xlu1 %1238  ;;  %v14657_v4 = vpop.f32.mrb[5].mxu0 }
  0xf2   : > { %19340 = vst [vmem:[#allocation38_spill] sm:$0xff] %v14657_v4  ;;  %1610 = vperm.xlu1 %14037, %v14625_v9  }
  0xf4   : > { %847 = vperm.xlu0 %14051, %v14325_v27   ;;  %v14661_v38 = vpop.f32.mrb[6].mxu0  ;;  %v14683_v15 = vpop.permute.xlu0 %1846 }
  0xf5   : > { %19341 = vst [vmem:[#allocation39_spill] sm:$0xff] %v14661_v38  ;;  %v14663_v31 = vpop.permute.xlu1 %1242  ;;  %v14665_v6 = vpop.f32.mrb[7].mxu0  ;;  %19347 = vst [vmem:[#allocation44_spill] sm:$0xff] %v14683_v15 }
  0xf6   : > { %19342 = vst [vmem:[#allocation40_spill] sm:$0xff] %v14663_v31  ;;  %19343 = vst [vmem:[#allocation41_spill] sm:$0xff] %v14665_v6  ;;  %14038 = vset.pattern.permute.xlu1 %v19344_v24  ;;  %v1321_v31 = vmul.f32 %v14533_v11, %v14657_v4  ;;  %v1323_v17 = vmul.f32 %v14559_v22, %v14665_v6  ;;  %v1962_v6 = vmul.f32 %v14652_v62, %v14575_v29  ;;  %v18943_v62 = vmov 2  }
  0xf7   : > { %1294 = vperm.xlu1 %14038, %v14430_v52  }
  0xf8   : > { %2023 = vrot.lane.b32.xlu0 %v1958_v20, %s14146_s18  ;;  %v14674_v40 = vpop.f32.mrb[8].mxu0  ;;  %v14699_v11 = vpop.permute.xlu0 %1854 }
  0xf9   : > { %19345 = vst [vmem:[#allocation42_spill] sm:$0xff] %v14674_v40  ;;  %v14676_v25 = vpop.f32.mrb[9].mxu0  ;;  %19352 = vst [vmem:[#allocation49_spill] sm:$0xff] %v14699_v11 }
  0xfa   : > { %19346 = vst [vmem:[#allocation43_spill] sm:$0xff] %v14676_v25  ;;  %v14678_v26 = vpop.permute.xlu1 %1874 }
  0xfb   : > { %1298 = vperm.xlu1 %14038, %v14484_v56  }
  0xfc   : > { %1389 = vrot.lane.b32.xlu0 %v1321_v31, %s14145_s16  ;;  %v14686_v1 = vpop.f32.mrb[10].mxu0  ;;  %v1960_v31 = vmul.f32 %v14642_v28, %v14547_v16  ;;  %v14716_v11 = vpop.permute.xlu0 %1862  ;;  %v19355_v16 = vmov 6  }
  0xfd   : > { %19348 = vst [vmem:[#allocation45_spill] sm:$0xff] %v14686_v1  ;;  %v14688_v5 = vpop.f32.mrb[11].mxu0  ;;  %19354 = vst [vmem:[#allocation51_spill] sm:$0xff] %v14716_v11 }
  0xfe   : > { %19349 = vst [vmem:[#allocation46_spill] sm:$0xff] %v14688_v5 }
  0xff   : > { %14039 = vset.pattern.permute.xlu1 %v19334_v32  ;;  %v14691_v20 = vpop.permute.xlu1 %1562 }
 0x100   : > { %19350 = vst [vmem:[#allocation47_spill] sm:$0xff] %v14691_v20  ;;  %1930 = vperm.xlu1 %14039, %v14625_v9   ;;  %857 = vperm.xlu0 %14051, %v14336_v30   ;;  %v14695_v19 = vpop.f32.mrb[12].mxu0  ;;  %v14738_v11 = vpop.permute.xlu0 %1870  ;;  %v1325_v30 = vmul.f32 %v14585_v34, %v14676_v25 }
 0x101   : > { %19351 = vst [vmem:[#allocation48_spill] sm:$0xff] %v14695_v19  ;;  %v14697_v55 = vpop.f32.mrb[13].mxu0  ;;  %19357 = vst [vmem:[#allocation53_spill] sm:$0xff] %v14738_v11 }
 0x104   : > { %14041 = vset.pattern.permute.xlu1 %v19339_v37  ;;  %v14704_v15 = vpop.permute.xlu1 %1246  ;;  %2027 = vrot.lane.b32.xlu0 %v1960_v31, %s14146_s18  ;;  %v14707_v20 = vpop.f32.mrb[14].mxu0 }
 0x105   : > { %1618 = vperm.xlu1 %14041, %v14484_v56   ;;  %v14710_v9 = vpop.f32.mrb[15].mxu0  ;;  %v14728_v56 = vld [vmem:[%s18897_s2 + $0xe0] sm:$0xff]  ;;  %v14754_v11 = vpop.permute.xlu0 %1878 }
 0x106   : > { %19356 = vst [vmem:[#allocation52_spill] sm:$0xff] %v14728_v56  ;;  %19360 = vst [vmem:[#allocation56_spill] sm:$0xff] %v14754_v11 }
 0x108   : > { %v14714_v4 = vpop.permute.xlu1 %1250  ;;  %1393 = vrot.lane.b32.xlu0 %v1323_v17, %s14145_s16  ;;  %v14720_v54 = vpop.f32.mrb[16].mxu0 }
 0x109   : > { %19353 = vst [vmem:[#allocation50_spill] sm:$0xff] %v14714_v4  ;;  %14042 = vset.pattern.permute.xlu1 %v19355_v16  ;;  %v14723_v31 = vpop.f32.mrb[17].mxu0  ;;  %v14766_v34 = vpop.permute.xlu0 %1886 }
 0x10a   : > { %807 = vperm.xlu1 %14042, %v14226_v0   ;;  %19364 = vst [vmem:[#allocation60_spill] sm:$0xff] %v14766_v34 }
 0x10c   : > { %867 = vperm.xlu0 %14051, %v14347_v33   ;;  %v14733_v4 = vpop.f32.mrb[18].mxu0 }
 0x10d   : > { %v14731_v22 = vpop.permute.xlu1 %1882  ;;  %v14736_v17 = vpop.f32.mrb[19].mxu0 }
 0x10e   : > { %14043 = vset.pattern.permute.xlu1 %v19344_v24 }
 0x10f   : > { %1302 = vperm.xlu1 %14043, %v14728_v56  }
 0x110   : > { %2031 = vrot.lane.b32.xlu0 %v1962_v6, %s14146_s18  ;;  %v14744_v53 = vpop.f32.mrb[20].mxu0 }
 0x111   : > { %19358 = vst [vmem:[#allocation54_spill] sm:$0xff] %v14744_v53  ;;  %v14748_v13 = vpop.f32.mrb[21].mxu0 }
 0x112   : > { %v14746_v33 = vpop.permute.xlu1 %1570 }
 0x113   : > { %19359 = vst [vmem:[#allocation55_spill] sm:$0xff] %v14746_v33  ;;  %14044 = vset.pattern.permute.xlu1 %v19334_v32 }
 0x114   : > { %1934 = vperm.xlu1 %14044, %v14430_v52   ;;  %1397 = vrot.lane.b32.xlu0 %v1325_v30, %s14145_s16  ;;  %v14757_v29 = vpop.f32.mrb[22].mxu0  ;;  %v1964_v30 = vmul.f32 %v14661_v38, %v14601_v43 }
 0x115   : > { %19361 = vst [vmem:[#allocation57_spill] sm:$0xff] %v14757_v29  ;;  %v14759_v6 = vpop.f32.mrb[23].mxu0  ;;  %v1327_v29 = vmul.f32 %v14611_v47, %v14688_v5  ;;  %v1966_v47 = vmul.f32 %v14674_v40, %v14627_v2 }
 0x116   : > { %19362 = vst [vmem:[#allocation58_spill] sm:$0xff] %v14759_v6 }
 0x117   : > { %v1255_v53 = vpop.permute.xlu1 %1254 }
 0x118   : > { %14045 = vset.pattern.permute.xlu1 %v18943_v62  ;;  %877 = vperm.xlu0 %14051, %v14356_v35   ;;  %v14764_v33 = vpop.f32.mrb[24].mxu0 }
 0x119   : > { %1002 = vperm.xlu1 %14045, %v14236_v3   ;;  %19363 = vst [vmem:[#allocation59_spill] sm:$0xff] %v14764_v33  ;;  %v14768_v25 = vpop.f32.mrb[25].mxu0  ;;  %v14783_v33 = vpop.permute.xlu0 %1894 }
 0x11a   : > { %19365 = vst [vmem:[#allocation61_spill] sm:$0xff] %v14768_v25  ;;  %19369 = vst [vmem:[#allocation65_spill] sm:$0xff] %v14783_v33  ;;  %v19372_v33 = vmov 2  }
 0x11b   : > { %v14770_v11 = vpop.permute.xlu1 %1258 }
 0x11c   : > { %19366 = vst [vmem:[#allocation62_spill] sm:$0xff] %v14770_v11  ;;  %2035 = vrot.lane.b32.xlu0 %v1964_v30, %s14146_s18  ;;  %v14776_v62 = vpop.f32.mrb[26].mxu0 }
 0x11d   : > { %14046 = vset.pattern.permute.xlu1 %v19344_v24  ;;  %19367 = vst [vmem:[#allocation63_spill] sm:$0xff] %v14776_v62  ;;  %v14779_v3 = vpop.f32.mrb[27].mxu0  ;;  %v14795_v62 = vpop.permute.xlu0 %1902 }
 0x11e   : > { %1306 = vperm.xlu1 %14046, %v14491_v57   ;;  %19368 = vst [vmem:[#allocation64_spill] sm:$0xff] %v14779_v3  ;;  %19371 = vst [vmem:[#allocation67_spill] sm:$0xff] %v14795_v62 }
 0x120   : > { %v1891_v34 = vpop.permute.xlu1 %1890  ;;  %1401 = vrot.lane.b32.xlu0 %v1327_v29, %s14145_s16  ;;  %v14786_v11 = vpop.f32.mrb[28].mxu0 }
 0x121   : > { %v14789_v43 = vpop.f32.mrb[29].mxu0  ;;  %v14805_v5 = vpop.permute.xlu0 %1910 }
 0x122   : > { %14047 = vset.pattern.permute.xlu1 %v19339_v37  ;;  %19370 = vst [vmem:[#allocation66_spill] sm:$0xff] %v14789_v43  ;;  %v1329_v37 = vmul.f32 %v14655_v44, %v14697_v55  ;;  %19373 = vst [vmem:[#allocation68_spill] sm:$0xff] %v14805_v5  ;;  %v1968_v44 = vmul.f32 %v14686_v1, %v14678_v26 }
 0x123   : > { %1622 = vperm.xlu1 %14047, %v14728_v56  }
 0x124   : > { %887 = vperm.xlu0 %14051, %v14372_v39  }
 0x125   : > { %v14793_v30 = vpop.permute.xlu1 %1578  ;;  %v14813_v2 = vpop.permute.xlu0 %1918 }
 0x126   : > { %19374 = vst [vmem:[#allocation69_spill] sm:$0xff] %v14813_v2 }
 0x127   : > { %1626 = vperm.xlu1 %14047, %v14491_v57  }
 0x128   : > { %2039 = vrot.lane.b32.xlu0 %v1966_v47, %s14146_s18 }
 0x12a   : > { %v1263_v29 = vpop.permute.xlu1 %1262 }
 0x12b   : > { %14048 = vset.pattern.permute.xlu1 %v19372_v33 }
 0x12c   : > { %1006 = vperm.xlu1 %14048, %v14258_v8   ;;  %1405 = vrot.lane.b32.xlu0 %v1329_v37, %s14145_s16  ;;  %v1331_v8 = vmul.f32 %v14704_v15, %v14710_v9 }
 0x12e   : > { %v14808_v62 = vpop.permute.xlu1 %1266 }
 0x130   : > { %14049 = vset.pattern.permute.xlu1 %v19334_v32  ;;  %897 = vperm.xlu0 %14051, %v14383_v42   ;;  %v14824_v32 = vpop.permute.xlu0 %1926 }
 0x131   : > { %1942 = vperm.xlu1 %14049, %v14728_v56   ;;  %19375 = vst [vmem:[#allocation70_spill] sm:$0xff] %v14824_v32 }
 0x133   : > { %v1899_v47 = vpop.permute.xlu1 %1898 }
 0x134   : > { %2043 = vrot.lane.b32.xlu0 %v1968_v44, %s14146_s18  ;;  %v14830_v44 = vpop.permute.xlu0 %1938 }
 0x135   : > { %14050 = vset.pattern.permute.xlu1 %v19372_v33  ;;  %19376 = vst [vmem:[#allocation71_spill] sm:$0xff] %v14830_v44 }
 0x136   : > { %1010 = vperm.xlu1 %14050, %v14274_v14   ;;  %v1970_v14 = vmul.f32 %v14695_v19, %v14731_v22 }
 0x138   : > { %v14822_v37 = vpop.permute.xlu1 %1586  ;;  %1409 = vrot.lane.b32.xlu0 %v1331_v8, %s14145_s16  ;;  %v1333_v8 = vmul.f32 %v1255_v53, %v14723_v31  ;;  %v14841_v32 = vpop.permute.xlu0 %1946 }
 0x139   : > { %19377 = vst [vmem:[#allocation72_spill] sm:$0xff] %v14841_v32 }
 0x13a   : > { %14052 = vset.pattern.permute.xlu1 %v19355_v16 }
 0x13b   : > { %827 = vperm.xlu1 %14052, %v14291_v18  }
 0x13c   : > { %907 = vperm.xlu0 %14051, %v14394_v45   ;;  %v1317_v45 = vmul.f32 %v14498_v59, %v14632_v41 }
 0x13d   : > { %v1271_v26 = vpop.permute.xlu1 %1270 }
 0x13f   : > { %14053 = vset.pattern.permute.xlu1 %v19372_v33 }
 0x140   : > { %1014 = vperm.xlu1 %14053, %v14291_v18   ;;  %2047 = vrot.lane.b32.xlu0 %v1970_v14, %s14146_s18  ;;  %v14848_v18 = vpop.permute.xlu0 %812  ;;  %v1972_v14 = vmul.f32 %v14707_v20, %v1891_v34 }
 0x141   : > { %v14837_v15 = vpop.permute.xlu1 %1274  ;;  %19378 = vst [vmem:[#allocation73_spill] sm:$0xff] %v14848_v18 }
 0x144   : > { %1018 = vperm.xlu1 %14053, %v14302_v21   ;;  %1413 = vrot.lane.b32.xlu0 %v1333_v8, %s14145_s16  ;;  %v1335_v21 = vmul.f32 %v1263_v29, %v14736_v17  ;;  %v14857_v59 = vpop.permute.xlu0 %817  ;;  %v1638_v29 = vmul.f32 %v14630_v49, %v14502_v61  ;;  %v1974_v8 = vmul.f32 %v14720_v54, %v1899_v47 }
 0x146   : > { %v1907_v22 = vpop.permute.xlu1 %1906 }
 0x148   : > { %1381 = vrot.lane.b32.xlu1 %v1317_v45, %s14145_s16  ;;  %917 = vperm.xlu0 %14051, %v14406_v48   ;;  %v1637_v48 = vmul.f32 %v14496_v58, %v14632_v41  ;;  %v1337_v58 = vmul.f32 %v1271_v26, %v14748_v13 }
 0x14b   : > { %v14851_v44 = vpop.permute.xlu1 %1594 }
 0x14c   : > { %1022 = vperm.xlu1 %14053, %v14311_v23   ;;  %2051 = vrot.lane.b32.xlu0 %v1972_v14, %s14146_s18  ;;  %v14867_v23 = vpop.permute.xlu0 %822 }
 0x14d   : > { %19380 = vst [vmem:[#allocation75_spill] sm:$0xff] %v14867_v23 }
 0x150   : > { %v1279_v53 = vpop.permute.xlu1 %1278  ;;  %14054 = vset.pattern.permute.xlu1 %v19355_v16  ;;  %1417 = vrot.lane.b32.xlu0 %v1335_v21, %s14145_s16  ;;  %v14880_v14 = vpop.permute.xlu0 %832  ;;  %v1320_v21 = vmul.f32 %v14642_v28, %v14529_v10  ;;  %v1639_v10 = vmul.f32 %v14536_v12, %v14645_v60  ;;  %v1959_v12 = vmul.f32 %v14668_v46, %v14645_v60 }
 0x151   : > { %842 = vperm.xlu1 %14054, %v14361_v36   ;;  %19381 = vst [vmem:[#allocation76_spill] sm:$0xff] %v14880_v14 }
 0x154   : > { %v14863_v34 = vpop.permute.xlu1 %1282  ;;  %927 = vperm.xlu0 %14051, %v14422_v51   ;;  %v1957_v51 = vmul.f32 %v14510_v63, %v14632_v41  ;;  %v14888_v47 = vpop.permute.xlu0 %837  ;;  %v1976_v63 = vmul.f32 %v14733_v4, %v1907_v22 }
 0x155   : > { %19379 = vst [vmem:[#allocation74_spill] sm:$0xff] %v14863_v34  ;;  %1701 = vrot.lane.b32.xlu1 %v1637_v48, %s14148_s21  ;;  %v1339_v48 = vmul.f32 %v1279_v53, %v14759_v6  ;;  %v1640_v53 = vmul.f32 %v14642_v28, %v14526_v7  ;;  %v19416_v34 = vld [vmem:[#allocation20_spill] sm:$0xff] }
 0x156   : > { %14055 = vset.pattern.permute.xlu1 %v19372_v33 }
 0x158   : > { %2055 = vrot.lane.b32.xlu0 %v1974_v8, %s14146_s18 }
 0x159   : > { %v14874_v45 = vpop.permute.xlu1 %1914  ;;  %1703 = vrot.lane.b32.xlu1 %v1638_v29, %s14148_s21 }
 0x15c   : > { %1421 = vrot.lane.b32.xlu0 %v1337_v58, %s14145_s16 }
 0x15d   : > { %2021 = vrot.lane.b32.xlu1 %v1957_v51, %s14146_s18 }
 0x15e   : > { %v14884_v61 = vpop.permute.xlu1 %1602 }
 0x15f   : > { %19382 = vst [vmem:[#allocation77_spill] sm:$0xff] %v14884_v61 }
 0x160   : > { %937 = vperm.xlu0 %14051, %v14430_v52  }
 0x161   : > { %1030 = vperm.xlu1 %14055, %v14325_v27   ;;  %v14901_v27 = vpop.permute.xlu0 %1383 }
 0x162   : > { %19383 = vst [vmem:[#allocation78_spill] sm:$0xff] %v14901_v27  ;;  %v19398_v27 = vld [vmem:[#allocation14_spill] sm:$0xff] }
 0x163   : > { %v14893_v26 = vpop.permute.xlu1 %1286 }
 0x164   : > { %2059 = vrot.lane.b32.xlu0 %v1976_v63, %s14146_s18 }
 0x165   : > { %1387 = vrot.lane.b32.xlu1 %v1320_v21, %s14145_s16  ;;  %v14911_v29 = vpop.permute.xlu0 %1385  ;;  %v19387_v21 = vld [vmem:[#allocation4_spill] sm:$0xff] }
 0x166   : > { %14056 = vset.pattern.permute.xlu1 %v19355_v16 }
 0x167   : > { %v14899_v52 = vpop.permute.xlu1 %1290 }
 0x168   : > { %1425 = vrot.lane.b32.xlu0 %v1339_v48, %s14145_s16  ;;  %v19389_v48 = vld [vmem:[#allocation37_spill] sm:$0xff] }
 0x169   : > { %852 = vperm.xlu1 %14056, %v14417_v50   ;;  %v1642_v28 = vmul.f32 %v19389_v48, %v19398_v27 }
 0x16c   : > { %v14907_v22 = vpop.permute.xlu1 %1922  ;;  %947 = vperm.xlu0 %14051, %v14728_v56  }
 0x16d   : > { %19384 = vst [vmem:[#allocation79_spill] sm:$0xff] %v14907_v22  ;;  %1705 = vrot.lane.b32.xlu1 %v1639_v10, %s14148_s21 }
 0x16e   : > { %14057 = vset.pattern.permute.xlu1 %v19372_v33 }
 0x170   : > { %14075 = vset.pattern.permute.xlu0 %v19372_v33 }
 0x171   : > { %v14917_v8 = vpop.permute.xlu1 %1610  ;;  %1707 = vrot.lane.b32.xlu1 %v1640_v53, %s14148_s21  ;;  %998 = vperm.xlu0 %14075, %v14226_v0   ;;  %v19388_v0 = vld [vmem:[#allocation11_spill] sm:$0xff]  ;;  %v19390_v53 = vld [vmem:[#allocation6_spill] sm:$0xff] }
 0x172   : > { %19385 = vst [vmem:[#allocation80_spill] sm:$0xff] %v14917_v8  ;;  %v1322_v10 = vmul.f32 %v19389_v48, %v19388_v0  ;;  %v19404_v48 = vld [vmem:[#allocation5_spill] sm:$0xff] }
 0x173   : > { %v14923_v51 = vpop.permute.xlu0 %847 }
 0x175   : > { %2025 = vrot.lane.b32.xlu1 %v1959_v12, %s14146_s18  ;;  %1026 = vperm.xlu0 %14075, %v14361_v36  }
 0x176   : > { %v14927_v58 = vpop.permute.xlu1 %1294 }
 0x177   : > { %v14929_v7 = vpop.permute.xlu0 %2023 }
 0x178   : > { %19386 = vst [vmem:[#allocation81_spill] sm:$0xff] %v14929_v7  ;;  %v19394_v7 = vld [vmem:[#allocation13_spill] sm:$0xff] }
 0x179   : > { %1038 = vperm.xlu1 %14057, %v19387_v21   ;;  %1034 = vperm.xlu0 %14075, %v14417_v50   ;;  %v19392_v50 = vld [vmem:[#allocation7_spill] sm:$0xff]  ;;  %v19393_v21 = vld [vmem:[#allocation38_spill] sm:$0xff] }
 0x17a   : > { %v14933_v63 = vpop.permute.xlu1 %1298  ;;  %v1641_v32 = vmul.f32 %v19394_v7, %v19393_v21  ;;  %v19399_v7 = vld [vmem:[#allocation10_spill] sm:$0xff] }
 0x17b   : > { %v14937_v46 = vpop.permute.xlu0 %1389 }
 0x17d   : > { %1391 = vrot.lane.b32.xlu1 %v1322_v10, %s14145_s16  ;;  %1042 = vperm.xlu0 %14075, %v19390_v53   ;;  %v19397_v10 = vld [vmem:[#allocation8_spill] sm:$0xff] }
 0x17e   : > { %14058 = vset.pattern.permute.xlu1 %v19355_v16 }
 0x17f   : > { %v14942_v36 = vpop.permute.xlu1 %1930  ;;  %v14944_v12 = vpop.permute.xlu0 %857 }
 0x180   : > { %19391 = vst [vmem:[#allocation4_spill] sm:$0xff] %v14942_v36  ;;  %v19405_v36 = vld [vmem:[#allocation18_spill] sm:$0xff] }
 0x181   : > { %862 = vperm.xlu1 %14058, %v19390_v53   ;;  %1050 = vperm.xlu0 %14075, %v19392_v50  }
 0x183   : > { %v14950_v0 = vpop.permute.xlu0 %2027 }
 0x184   : > { %19395 = vst [vmem:[#allocation11_spill] sm:$0xff] %v14950_v0  ;;  %v14952_v14 = vpop.permute.xlu1 %1618  ;;  %v19400_v0 = vld [vmem:[#allocation44_spill] sm:$0xff] }
 0x185   : > { %19396 = vst [vmem:[#allocation6_spill] sm:$0xff] %v14952_v14  ;;  %1709 = vrot.lane.b32.xlu1 %v1641_v32, %s14148_s21  ;;  %1058 = vperm.xlu0 %14075, %v19397_v10   ;;  %v1961_v49 = vmul.f32 %v19400_v0, %v19393_v21  ;;  %v19402_v32 = vld [vmem:[#allocation12_spill] sm:$0xff] }
 0x186   : > { %14059 = vset.pattern.permute.xlu1 %v19372_v33 }
 0x187   : > { %v14959_v23 = vpop.permute.xlu0 %1393 }
 0x189   : > { %v14961_v53 = vpop.permute.xlu1 %807  ;;  %1711 = vrot.lane.b32.xlu1 %v1642_v28, %s14148_s21  ;;  %1066 = vperm.xlu0 %14075, %v19399_v7   ;;  %v19406_v28 = vld [vmem:[#allocation17_spill] sm:$0xff] }
 0x18a   : > { %v1324_v8 = vmul.f32 %v14661_v38, %v19406_v28  ;;  %v19413_v28 = vld [vmem:[#allocation15_spill] sm:$0xff] }
 0x18b   : > { %v14967_v18 = vpop.permute.xlu0 %867 }
 0x18c   : > { %19401 = vst [vmem:[#allocation7_spill] sm:$0xff] %v14967_v18  ;;  %v19412_v18 = vld [vmem:[#allocation41_spill] sm:$0xff] }
 0x18d   : > { %2029 = vrot.lane.b32.xlu1 %v1961_v49, %s14146_s18  ;;  %1074 = vperm.xlu0 %14075, %v19402_v32   ;;  %v19408_v49 = vld [vmem:[#allocation24_spill] sm:$0xff]  ;;  %v1643_v61 = vmul.f32 %v19413_v28, %v19412_v18 }
 0x18e   : > { %v14971_v14 = vpop.permute.xlu1 %1302 }
 0x18f   : > { %v14973_v27 = vpop.permute.xlu0 %2031 }
 0x190   : > { %19403 = vst [vmem:[#allocation38_spill] sm:$0xff] %v14973_v27 }
 0x191   : > { %1046 = vperm.xlu1 %14059, %v19404_v48   ;;  %1082 = vperm.xlu0 %14075, %v19405_v36   ;;  %v19411_v48 = vld [vmem:[#allocation31_spill] sm:$0xff] }
 0x193   : > { %v14979_v22 = vpop.permute.xlu1 %1934  ;;  %v14981_v0 = vpop.permute.xlu0 %1397 }
 0x194   : > { %19407 = vst [vmem:[#allocation13_spill] sm:$0xff] %v14979_v22 }
 0x195   : > { %1395 = vrot.lane.b32.xlu1 %v1324_v8, %s14145_s16  ;;  %1090 = vperm.xlu0 %14075, %v19408_v49   ;;  %v19415_v8 = vld [vmem:[#allocation9_spill] sm:$0xff] }
 0x196   : > { %14060 = vset.pattern.permute.xlu1 %v19355_v16 }
 0x197   : > { %v14986_v2 = vpop.permute.xlu0 %877 }
 0x198   : > { %19409 = vst [vmem:[#allocation8_spill] sm:$0xff] %v14986_v2  ;;  %v14988_v27 = vpop.permute.xlu1 %1002  ;;  %v1644_v2 = vmul.f32 %v14661_v38, %v19416_v34 }
 0x199   : > { %19410 = vst [vmem:[#allocation14_spill] sm:$0xff] %v14988_v27  ;;  %872 = vperm.xlu1 %14060, %v19392_v50   ;;  %1098 = vperm.xlu0 %14075, %v19411_v48   ;;  %v19417_v27 = vld [vmem:[#allocation54_spill] sm:$0xff] }
 0x19a   : > { %v1978_v50 = vmul.f32 %v19417_v27, %v14874_v45  ;;  %v1341_v45 = vmul.f32 %v14893_v26, %v14768_v25 }
 0x19b   : > { %v14994_v22 = vpop.permute.xlu0 %2035 }
 0x19c   : > { %19414 = vst [vmem:[#allocation10_spill] sm:$0xff] %v14994_v22  ;;  %v19418_v22 = vld [vmem:[#allocation49_spill] sm:$0xff] }
 0x19d   : > { %v1307_v6 = vpop.permute.xlu1 %1306  ;;  %1713 = vrot.lane.b32.xlu1 %v1643_v61, %s14148_s21  ;;  %1106 = vperm.xlu0 %14075, %v19415_v8   ;;  %v1963_v61 = vmul.f32 %v19418_v22, %v19412_v18 }
 0x19e   : > { %14061 = vset.pattern.permute.xlu1 %v19372_v33 }
 0x19f   : > { %v15003_v56 = vpop.permute.xlu0 %1401 }
 0x1a1   : > { %1715 = vrot.lane.b32.xlu1 %v1644_v2, %s14148_s21  ;;  %2063 = vrot.lane.b32.xlu0 %v1978_v50, %s14146_s18  ;;  %v19422_v2 = vld [vmem:[#allocation23_spill] sm:$0xff] }
 0x1a2   : > { %v1623_v28 = vpop.permute.xlu1 %1622  ;;  %v1326_v22 = vmul.f32 %v14674_v40, %v19422_v2 }
 0x1a3   : > { %v15009_v5 = vpop.permute.xlu0 %887 }
 0x1a4   : > { %19419 = vst [vmem:[#allocation44_spill] sm:$0xff] %v15009_v5 }
 0x1a5   : > { %2033 = vrot.lane.b32.xlu1 %v1963_v61, %s14146_s18  ;;  %1114 = vperm.xlu0 %14075, %v14491_v57   ;;  %v19423_v57 = vld [vmem:[#allocation59_spill] sm:$0xff] }
 0x1a6   : > { %v15013_v34 = vpop.permute.xlu1 %1626  ;;  %v1342_v61 = vmul.f32 %v19423_v57, %v14899_v52  ;;  %v19427_v52 = vld [vmem:[#allocation16_spill] sm:$0xff] }
 0x1a7   : > { %19420 = vst [vmem:[#allocation12_spill] sm:$0xff] %v15013_v34  ;;  %v15017_v8 = vpop.permute.xlu0 %2039 }
 0x1a8   : > { %19421 = vst [vmem:[#allocation5_spill] sm:$0xff] %v15017_v8 }
 0x1a9   : > { %1054 = vperm.xlu1 %14061, %v14356_v35   ;;  %1429 = vrot.lane.b32.xlu0 %v1341_v45, %s14145_s16  ;;  %v19424_v35 = vld [vmem:[#allocation33_spill] sm:$0xff] }
 0x1aa   : > { %14078 = vset.pattern.permute.xlu0 %v19344_v24  ;;  %v1661_v26 = vmul.f32 %v19424_v35, %v14768_v25  ;;  %v19426_v24 = vld [vmem:[#allocation43_spill] sm:$0xff] }
 0x1ab   : > { %v15023_v50 = vpop.permute.xlu1 %1006  ;;  %v15028_v5 = vpop.permute.xlu0 %1405  ;;  %v1645_v8 = vmul.f32 %v19427_v52, %v19426_v24  ;;  %v19430_v35 = vld [vmem:[#allocation27_spill] sm:$0xff] }
 0x1ad   : > { %1399 = vrot.lane.b32.xlu1 %v1326_v22, %s14145_s16  ;;  %1431 = vrot.lane.b32.xlu0 %v1342_v61, %s14145_s16  ;;  %v1343_v22 = vmul.f32 %v14927_v58, %v14779_v3 }
 0x1ae   : > { %14062 = vset.pattern.permute.xlu1 %v19355_v16 }
 0x1af   : > { %v15035_v45 = vpop.permute.xlu0 %897 }
 0x1b0   : > { %19425 = vst [vmem:[#allocation18_spill] sm:$0xff] %v15035_v45  ;;  %v1943_v2 = vpop.permute.xlu1 %1942 }
 0x1b1   : > { %882 = vperm.xlu1 %14062, %v19397_v10   ;;  %1749 = vrot.lane.b32.xlu0 %v1661_v26, %s14148_s21  ;;  %v1646_v10 = vmul.f32 %v14674_v40, %v19430_v35  ;;  %v19431_v26 = vld [vmem:[#allocation63_spill] sm:$0xff]  ;;  %v1345_v35 = vmul.f32 %v14971_v14, %v14789_v43 }
 0x1b2   : > { %v1344_v45 = vmul.f32 %v19431_v26, %v14933_v63 }
 0x1b3   : > { %v15043_v38 = vpop.permute.xlu0 %2043 }
 0x1b4   : > { %19428 = vst [vmem:[#allocation17_spill] sm:$0xff] %v15043_v38 }
 0x1b5   : > { %v15045_v61 = vpop.permute.xlu1 %1010  ;;  %1717 = vrot.lane.b32.xlu1 %v1645_v8, %s14148_s21  ;;  %1433 = vrot.lane.b32.xlu0 %v1343_v22, %s14145_s16  ;;  %v19432_v8 = vld [vmem:[#allocation51_spill] sm:$0xff]  ;;  %v19433_v22 = vld [vmem:[#allocation36_spill] sm:$0xff] }
 0x1b6   : > { %19429 = vst [vmem:[#allocation24_spill] sm:$0xff] %v15045_v61  ;;  %14063 = vset.pattern.permute.xlu1 %v19372_v33  ;;  %v1965_v38 = vmul.f32 %v19432_v8, %v19426_v24  ;;  %v1663_v61 = vmul.f32 %v19433_v22, %v14779_v3 }
 0x1b7   : > { %v15054_v52 = vpop.permute.xlu0 %1409 }
 0x1b9   : > { %1719 = vrot.lane.b32.xlu1 %v1646_v10, %s14148_s21  ;;  %1435 = vrot.lane.b32.xlu0 %v1344_v45, %s14145_s16  ;;  %v19436_v10 = vld [vmem:[#allocation29_spill] sm:$0xff] }
 0x1ba   : > { %v15058_v58 = vpop.permute.xlu1 %827  ;;  %v1328_v8 = vmul.f32 %v14686_v1, %v19436_v10 }
 0x1bb   : > { %v15064_v34 = vpop.permute.xlu0 %907 }
 0x1bc   : > { %19434 = vst [vmem:[#allocation31_spill] sm:$0xff] %v15064_v34 }
 0x1bd   : > { %2037 = vrot.lane.b32.xlu1 %v1965_v38, %s14146_s18  ;;  %1753 = vrot.lane.b32.xlu0 %v1663_v61, %s14148_s21  ;;  %v1346_v38 = vmul.f32 %v14786_v11, %v1307_v6  ;;  %v19441_v6 = vld [vmem:[#allocation19_spill] sm:$0xff] }
 0x1bf   : > { %v15068_v63 = vpop.permute.xlu1 %1014  ;;  %v15072_v45 = vpop.permute.xlu0 %2047 }
 0x1c0   : > { %19435 = vst [vmem:[#allocation41_spill] sm:$0xff] %v15072_v45 }
 0x1c1   : > { %1062 = vperm.xlu1 %14063, %v14372_v39   ;;  %1437 = vrot.lane.b32.xlu0 %v1345_v35, %s14145_s16  ;;  %v1665_v39 = vmul.f32 %v1623_v28, %v14789_v43  ;;  %v19440_v35 = vld [vmem:[#allocation46_spill] sm:$0xff] }
 0x1c2   : > { %v1647_v10 = vmul.f32 %v19441_v6, %v19440_v35  ;;  %v19443_v28 = vld [vmem:[#allocation34_spill] sm:$0xff]  ;;  %v19446_v6 = vld [vmem:[#allocation53_spill] sm:$0xff] }
 0x1c3   : > { %v15078_v22 = vpop.permute.xlu1 %1018  ;;  %v15081_v34 = vpop.permute.xlu0 %1413 }
 0x1c4   : > { %19437 = vst [vmem:[#allocation15_spill] sm:$0xff] %v15078_v22  ;;  %19438 = vst [vmem:[#allocation9_spill] sm:$0xff] %v15081_v34 }
 0x1c5   : > { %1403 = vrot.lane.b32.xlu1 %v1328_v8, %s14145_s16  ;;  %1439 = vrot.lane.b32.xlu0 %v1346_v38, %s14145_s16  ;;  %v1985_v8 = vmul.f32 %v1943_v2, %v14789_v43  ;;  %v1967_v2 = vmul.f32 %v19446_v6, %v19440_v35 }
 0x1c6   : > { %14064 = vset.pattern.permute.xlu1 %v19355_v16 }
 0x1c7   : > { %v15086_v14 = vpop.permute.xlu1 %1381  ;;  %v15089_v61 = vpop.permute.xlu0 %917 }
 0x1c8   : > { %19439 = vst [vmem:[#allocation20_spill] sm:$0xff] %v15089_v61 }
 0x1c9   : > { %892 = vperm.xlu1 %14064, %v19399_v7   ;;  %1757 = vrot.lane.b32.xlu0 %v1665_v39, %s14148_s21  ;;  %v1648_v7 = vmul.f32 %v14686_v1, %v19443_v28  ;;  %v19450_v28 = vld [vmem:[#allocation40_spill] sm:$0xff] }
 0x1cb   : > { %v15095_v45 = vpop.permute.xlu1 %1022  ;;  %v15098_v38 = vpop.permute.xlu0 %2051 }
 0x1cc   : > { %19442 = vst [vmem:[#allocation54_spill] sm:$0xff] %v15098_v38 }
 0x1cd   : > { %1721 = vrot.lane.b32.xlu1 %v1647_v10, %s14148_s21  ;;  %2077 = vrot.lane.b32.xlu0 %v1985_v8, %s14146_s18 }
 0x1ce   : > { %14065 = vset.pattern.permute.xlu1 %v19372_v33 }
 0x1cf   : > { %v15105_v61 = vpop.permute.xlu0 %1417 }
 0x1d0   : > { %19444 = vst [vmem:[#allocation49_spill] sm:$0xff] %v15105_v61  ;;  %v15107_v39 = vpop.permute.xlu1 %842  ;;  %v1330_v61 = vmul.f32 %v14695_v19, %v19450_v28 }
 0x1d1   : > { %19445 = vst [vmem:[#allocation23_spill] sm:$0xff] %v15107_v39  ;;  %1723 = vrot.lane.b32.xlu1 %v1648_v7, %s14148_s21  ;;  %v19462_v39 = vld [vmem:[#allocation50_spill] sm:$0xff] }
 0x1d3   : > { %v15112_v43 = vpop.permute.xlu0 %927 }
 0x1d4   : > { %19447 = vst [vmem:[#allocation33_spill] sm:$0xff] %v15112_v43  ;;  %v15114_v38 = vpop.permute.xlu1 %1701  ;;  %v19453_v43 = vld [vmem:[#allocation21_spill] sm:$0xff] }
 0x1d5   : > { %2041 = vrot.lane.b32.xlu1 %v1967_v2, %s14146_s18 }
 0x1d7   : > { %v15117_v10 = vpop.permute.xlu0 %2055 }
 0x1d8   : > { %19448 = vst [vmem:[#allocation43_spill] sm:$0xff] %v15117_v10  ;;  %v15119_v8 = vpop.permute.xlu1 %1703 }
 0x1d9   : > { %19449 = vst [vmem:[#allocation16_spill] sm:$0xff] %v15119_v8  ;;  %1070 = vperm.xlu1 %14065, %v14383_v42   ;;  %v1649_v42 = vmul.f32 %v19453_v43, %v14697_v55 }
 0x1db   : > { %v15124_v34 = vpop.permute.xlu0 %1421 }
 0x1dc   : > { %19451 = vst [vmem:[#allocation27_spill] sm:$0xff] %v15124_v34  ;;  %v2022_v7 = vpop.permute.xlu1 %2021 }
 0x1dd   : > { %1407 = vrot.lane.b32.xlu1 %v1330_v61, %s14145_s16  ;;  %v19456_v61 = vld [vmem:[#allocation47_spill] sm:$0xff] }
 0x1de   : > { %14066 = vset.pattern.permute.xlu1 %v19355_v16  ;;  %v1650_v34 = vmul.f32 %v14695_v19, %v19456_v61  ;;  %v18964_v61 = vmov 0.0  }
 0x1df   : > { %v15128_v6 = vpop.permute.xlu0 %937  ;;  %2151 = vst.msk [vmem:[#allocation2 + $0x8] sm:$0xff] %vm2149_vm2, %v18964_v61  ;;  %2150 = vst.msk [vmem:[#allocation2] sm:$0xff] %vm2149_vm2, %v18964_v61 }
 0x1e0   : > { %19452 = vst [vmem:[#allocation51_spill] sm:$0xff] %v15128_v6  ;;  %v15130_v2 = vpop.permute.xlu1 %1030  ;;  %2152 = vst.msk [vmem:[#allocation2 + $0x10] sm:$0xff] %vm2149_vm2, %v18964_v61 }
 0x1e1   : > { %902 = vperm.xlu1 %14066, %v19402_v32   ;;  %v19459_v32 = vld [vmem:[#allocation56_spill] sm:$0xff]  ;;  %2153 = vst.msk [vmem:[#allocation2 + $0x118] sm:$0xff] %vm2149_vm2, %v18964_v61  ;;  %2154 = vst.msk [vmem:[#allocation2 + $0x120] sm:$0xff] %vm2149_vm2, %v18964_v61 }
 0x1e2   : > { %v1969_v43 = vmul.f32 %v19459_v32, %v14697_v55  ;;  %2155 = vst.msk [vmem:[#allocation2 + $0x128] sm:$0xff] %vm2149_vm2, %v18964_v61  ;;  %v1127_v61 = vmul.f32 %v15023_v50, %v14645_v60 }
 0x1e3   : > { %v15135_v10 = vpop.permute.xlu0 %2059 }
 0x1e4   : > { %19454 = vst [vmem:[#allocation36_spill] sm:$0xff] %v15135_v10  ;;  %v15137_v28 = vpop.permute.xlu1 %1387 }
 0x1e5   : > { %19455 = vst [vmem:[#allocation29_spill] sm:$0xff] %v15137_v28  ;;  %1725 = vrot.lane.b32.xlu1 %v1649_v42, %s14148_s21  ;;  %v2156_v42 = vld [vmem:[%s15156_s24] sm:$0xff] }
 0x1e6   : > { %14067 = vset.pattern.permute.xlu1 %v19372_v33  ;;  %2188 = vst.msk [vmem:[#allocation2 + $0x18] sm:$0xff] %vm472_vm1, %v2156_v42 }
 0x1e7   : > { %v15143_v1 = vpop.permute.xlu0 %1425  ;;  %v2575_v60 = vld [vmem:[#allocation2 + $0x10] sm:$0xff] }
 0x1e8   : > { %19457 = vst [vmem:[#allocation46_spill] sm:$0xff] %v15143_v1  ;;  %v15145_v6 = vpop.permute.xlu1 %852  ;;  %v2158_v1 = vld [vmem:[%s15156_s24 + $0x10] sm:$0xff] }
 0x1e9   : > { %19458 = vst [vmem:[#allocation19_spill] sm:$0xff] %v15145_v6  ;;  %1727 = vrot.lane.b32.xlu1 %v1650_v34, %s14148_s21  ;;  %v15176_v34 = vld [vmem:[%s18899_s4] ss:$0 sm:$0xff]  ;;  %2190 = vst.msk [vmem:[#allocation2 + $0x28] sm:$0xff] %vm472_vm1, %v2158_v1 }
 0x1ea   : > { %v967_v19 = vmul.f32 %v15176_v34, %v14857_v59  ;;  %v965_v42 = vmul.f32 %v15176_v34, %v14961_v53  ;;  %v2574_v59 = vld [vmem:[#allocation2 + $0x8] sm:$0xff] }
 0x1eb   : > { %v15150_v10 = vpop.permute.xlu0 %947  ;;  %12444 = vmatprep.mubr.msk.f32.mxu1 %vm2149_vm2, %v2574_v59 }
 0x1ec   : > { %v1706_v40 = vpop.permute.xlu1 %1705  ;;  %19460 = vst [vmem:[#allocation34_spill] sm:$0xff] %v15150_v10  ;;  %v14096_v10 = vld [vmem:[%s18897_s2 + $0xa0] sm:$0xff] }
 0x1ed   : > { %2045 = vrot.lane.b32.xlu1 %v1969_v43, %s14146_s18 }
 0x1f0   : > { %v15178_v32 = vpop.permute.xlu1 %1707  ;;  %v999_v43 = vpop.permute.xlu0 %998 }
 0x1f1   : > { %19461 = vst [vmem:[#allocation53_spill] sm:$0xff] %v15178_v32  ;;  %1078 = vperm.xlu1 %14067, %v14096_v10   ;;  %v1125_v6 = vmul.f32 %v999_v43, %v14632_v41  ;;  %v1332_v32 = vmul.f32 %v14707_v20, %v19462_v39  ;;  %v2606_v10 = vld [vmem:[%s18900_s5 + $0x8] sm:$0xff]  ;;  %v1159_v41 = vadd.f32 %v1127_v61, %v967_v19  ;;  %v19463_v19 = vld [vmem:[#allocation22_spill] sm:$0xff] }
 0x1f2   : > { %12442 = vmatprep.subr.mxu1 %v2606_v10 }
 0x1f3   : > { %v1157_v28 = vadd.f32 %v1125_v6, %v965_v42  ;;  %12443 = vmatpush3.msra.mxu1 %v2606_v10  ;;  %v1479_v6 = vadd.f32 %v14911_v29, %v1159_v41  ;;  %v2160_v10 = vld [vmem:[%s15156_s24 + $0x20] sm:$0xff] }
 0x1f4   : > { %v2026_v8 = vpop.permute.xlu1 %2025  ;;  %v15197_v22 = vpop.permute.xlu0 %1026  ;;  %12445 = vmatmul.mubr.msk.f32.vlgmr.msra.gmra.mrb[0].mxu1 %vm2149_vm2, %v2575_v60  ;;  %2192 = vst.msk [vmem:[#allocation2 + $0x38] sm:$0xff] %vm472_vm1, %v2160_v10  ;;  %v969_v60 = vmul.f32 %v15176_v34, %v15058_v58 }
 0x1f5   : > { %1411 = vrot.lane.b32.xlu1 %v1332_v32, %s14145_s16  ;;  %v1477_v1 = vadd.f32 %v15086_v14, %v1157_v28  ;;  %v1651_v14 = vmul.f32 %v19463_v19, %v14710_v9  ;;  %v1799_v28 = vadd.f32 %v1706_v40, %v1479_v6  ;;  %v1129_v40 = vmul.f32 %v15068_v63, %v19393_v21  ;;  %v19466_v19 = vld [vmem:[#allocation62_spill] sm:$0xff] }
 0x1f6   : > { %14068 = vset.pattern.permute.xlu1 %v19355_v16  ;;  %v1334_v58 = vmul.f32 %v14720_v54, %v19466_v19 }
 0x1f7   : > { %v1797_v53 = vadd.f32 %v15114_v38, %v1477_v1  ;;  %v2119_v43 = vadd.f32 %v2026_v8, %v1799_v28  ;;  %v19465_v8 = vld [vmem:[#allocation60_spill] sm:$0xff]  ;;  %v1161_v1 = vadd.f32 %v1129_v40, %v969_v60  ;;  %v19467_v40 = vld [vmem:[#allocation25_spill] sm:$0xff]  ;;  %v1654_v60 = vmul.f32 %v14720_v54, %v14793_v30 }
 0x1f8   : > { %v15205_v50 = vpop.permute.xlu1 %1038  ;;  %v15207_v39 = vpop.permute.xlu0 %1034  ;;  %v1971_v59 = vmul.f32 %v19465_v8, %v14710_v9  ;;  %v1653_v10 = vmul.f32 %v19467_v40, %v14723_v31 }
 0x1f9   : > { %912 = vperm.xlu1 %14068, %v19405_v36   ;;  %v2117_v32 = vadd.f32 %v2022_v7, %v1797_v53  ;;  %v19464_v36 = vld [vmem:[#allocation55_spill] sm:$0xff]  ;;  %v1481_v63 = vadd.f32 %v14937_v46, %v1161_v1  ;;  %v1131_v1 = vmul.f32 %v15095_v45, %v19412_v18  ;;  %v15291_v45 = vld [vmem:[%s18897_s2 + $0xc0] sm:$0xff] }
 0x1fa   : > { %v1652_v29 = vmul.f32 %v14707_v20, %v19464_v36  ;;  %19470 = vst [vmem:[#allocation21_spill] sm:$0xff] %v15291_v45 }
 0x1fb   : > { %2252 = vrot.lane.b32.xlu0 %v2117_v32, %s14150_s14  ;;  %v14097_v32 = vld [vmem:[%s18897_s2 + $0xb0] sm:$0xff] }
 0x1fc   : > { %v15214_v61 = vpop.permute.xlu1 %1391  ;;  %v15216_v38 = vpop.permute.xlu0 %1042 }
 0x1fd   : > { %1729 = vrot.lane.b32.xlu1 %v1651_v14, %s14148_s21 }
 0x1fe   : > { %14069 = vset.pattern.permute.xlu1 %v19372_v33 }
 0x1ff   : > { %2256 = vrot.lane.b32.xlu0 %v2119_v43, %s14150_s14 }
 0x200   : > { %v15223_v7 = vpop.permute.xlu1 %862  ;;  %v15227_v42 = vpop.permute.xlu0 %1050 }
 0x201   : > { %1731 = vrot.lane.b32.xlu1 %v1652_v29, %s14148_s21 }
 0x204   : > { %v1710_v41 = vpop.permute.xlu1 %1709  ;;  %v15236_v53 = vpop.permute.xlu0 %1058 }
 0x205   : > { %2049 = vrot.lane.b32.xlu1 %v1971_v59, %s14146_s18  ;;  %v1801_v14 = vadd.f32 %v1710_v41, %v1481_v63  ;;  %v2162_v63 = vld [vmem:[%s15156_s24 + $0x30] sm:$0xff] }
 0x206   : > { %2194 = vst.msk [vmem:[#allocation2 + $0x48] sm:$0xff] %vm472_vm1, %v2162_v63 }
 0x208   : > { %v15239_v21 = vpop.permute.xlu1 %1711  ;;  %v15242_v6 = vpop.permute.xlu0 %1066 }
 0x209   : > { %1086 = vperm.xlu1 %14069, %v14097_v32   ;;  %v19468_v32 = vld [vmem:[#allocation65_spill] sm:$0xff] }
 0x20a   : > { %v1973_v19 = vmul.f32 %v19468_v32, %v14723_v31  ;;  %v19472_v32 = vld [vmem:[#allocation26_spill] sm:$0xff] }
 0x20c   : > { %v2030_v28 = vpop.permute.xlu1 %2029  ;;  %v15249_v36 = vpop.permute.xlu0 %1074 }
 0x20d   : > { %v2121_v43 = vadd.f32 %v2030_v28, %v1801_v14  ;;  %1415 = vrot.lane.b32.xlu1 %v1334_v58, %s14145_s16  ;;  %v469_v28 = vld [vmem:[%s14247_s28 + $0xf0] sm:$0xff] }
 0x20e   : > { %14070 = vset.pattern.permute.xlu1 %v19355_v16  ;;  %12439 = vmatprep.mubr.msk.f32.mxu0 %vm472_vm1, %v469_v28 }
 0x20f   : > { %2260 = vrot.lane.b32.xlu0 %v2121_v43, %s14150_s14  ;;  %v470_v43 = vld [vmem:[%s14247_s28 + $0xf8] sm:$0xff] }
 0x210   : > { %v15254_v46 = vpop.permute.xlu1 %1046  ;;  %v15256_v29 = vpop.permute.xlu0 %1082  ;;  %12440 = vmatmul.mubr.msk.f32.gmra.mrb[30].mxu0 %vm472_vm1, %v470_v43  ;;  %v2164_v43 = vld [vmem:[%s15156_s24 + $0x40] sm:$0xff] }
 0x211   : > { %922 = vperm.xlu1 %14070, %v19408_v49   ;;  %v971_v49 = vmul.f32 %v15176_v34, %v14888_v47  ;;  %2196 = vst.msk [vmem:[#allocation2 + $0x58] sm:$0xff] %vm472_vm1, %v2164_v43 }
 0x213   : > { %v1163_v14 = vadd.f32 %v1131_v1, %v971_v49 }
 0x214   : > { %v15261_v8 = vpop.permute.xlu1 %1395  ;;  %v15264_v59 = vpop.permute.xlu0 %1090 }
 0x215   : > { %1733 = vrot.lane.b32.xlu1 %v1653_v10, %s14148_s21  ;;  %v1483_v18 = vadd.f32 %v14959_v23, %v1163_v14  ;;  %v1336_v10 = vmul.f32 %v14733_v4, %v14808_v62  ;;  %v1656_v14 = vmul.f32 %v14733_v4, %v14822_v37 }
 0x216   : > { %14071 = vset.pattern.permute.xlu1 %v19372_v33 }
 0x218   : > { %v15269_v41 = vpop.permute.xlu1 %872  ;;  %v15280_v58 = vpop.permute.xlu0 %1098 }
 0x219   : > { %1735 = vrot.lane.b32.xlu1 %v1654_v60, %s14148_s21  ;;  %19469 = vst [vmem:[#allocation40_spill] sm:$0xff] %v15280_v58  ;;  %v19519_v58 = vld [vmem:[#allocation16_spill] sm:$0xff] }
 0x21c   : > { %v1714_v30 = vpop.permute.xlu1 %1713  ;;  %v15295_v40 = vpop.permute.xlu0 %1106 }
 0x21d   : > { %2053 = vrot.lane.b32.xlu1 %v1973_v19, %s14146_s18  ;;  %19471 = vst [vmem:[#allocation47_spill] sm:$0xff] %v15295_v40  ;;  %v1803_v60 = vadd.f32 %v1714_v30, %v1483_v18  ;;  %v1655_v19 = vmul.f32 %v19472_v32, %v14736_v17  ;;  %v973_v18 = vmul.f32 %v15176_v34, %v14923_v51  ;;  %v19508_v40 = vld [vmem:[#allocation32_spill] sm:$0xff] }
 0x220   : > { %v15284_v47 = vpop.permute.xlu1 %1715  ;;  %v15303_v23 = vpop.permute.xlu0 %2063 }
 0x221   : > { %1094 = vperm.xlu1 %14071, %v15291_v45   ;;  %v19484_v45 = vld [vmem:[#allocation52_spill] sm:$0xff] }
 0x224   : > { %v2034_v49 = vpop.permute.xlu1 %2033  ;;  %v15313_v30 = vpop.permute.xlu0 %1114 }
 0x225   : > { %v2123_v1 = vadd.f32 %v2034_v49, %v1803_v60  ;;  %1419 = vrot.lane.b32.xlu1 %v1336_v10, %s14145_s16  ;;  %19473 = vst [vmem:[#allocation56_spill] sm:$0xff] %v15313_v30  ;;  %v19474_v10 = vld [vmem:[#allocation67_spill] sm:$0xff] }
 0x226   : > { %14072 = vset.pattern.permute.xlu1 %v19355_v16  ;;  %v1975_v60 = vmul.f32 %v19474_v10, %v14736_v17  ;;  %v15355_v10 = vld [vmem:[%s18897_s2 + $0xd8] sm:$0xff] }
 0x227   : > { %2264 = vrot.lane.b32.xlu0 %v2123_v1, %s14150_s14  ;;  %19479 = vst [vmem:[#allocation62_spill] sm:$0xff] %v15355_v10 }
 0x228   : > { %v15305_v63 = vpop.permute.xlu1 %1054  ;;  %v15329_v49 = vpop.permute.xlu0 %1429 }
 0x229   : > { %932 = vperm.xlu1 %14072, %v19411_v48   ;;  %v1133_v48 = vmul.f32 %v15130_v2, %v19426_v24  ;;  %19475 = vst [vmem:[#allocation50_spill] sm:$0xff] %v15329_v49  ;;  %v15338_v24 = vld [vmem:[%s18897_s2 + $0xd0] sm:$0xff] }
 0x22a   : > { %19476 = vst [vmem:[#allocation22_spill] sm:$0xff] %v15338_v24  ;;  %v19514_v49 = vld [vmem:[#allocation78_spill] sm:$0xff] }
 0x22b   : > { %v1165_v37 = vadd.f32 %v1133_v48, %v973_v18 }
 0x22c   : > { %v15310_v62 = vpop.permute.xlu1 %1399  ;;  %v15341_v2 = vpop.permute.xlu0 %1431 }
 0x22d   : > { %1737 = vrot.lane.b32.xlu1 %v1655_v19, %s14148_s21  ;;  %v1485_v51 = vadd.f32 %v14981_v0, %v1165_v37  ;;  %19477 = vst [vmem:[#allocation55_spill] sm:$0xff] %v15341_v2  ;;  %v1338_v19 = vmul.f32 %v19417_v27, %v14837_v15  ;;  %v19480_v15 = vld [vmem:[#allocation28_spill] sm:$0xff] }
 0x22e   : > { %14073 = vset.pattern.permute.xlu1 %v19372_v33 }
 0x230   : > { %v15318_v28 = vpop.permute.xlu1 %882  ;;  %v15348_v0 = vpop.permute.xlu0 %1749 }
 0x231   : > { %1739 = vrot.lane.b32.xlu1 %v1656_v14, %s14148_s21  ;;  %19478 = vst [vmem:[#allocation60_spill] sm:$0xff] %v15348_v0 }
 0x234   : > { %v1718_v1 = vpop.permute.xlu1 %1717  ;;  %v15363_v37 = vpop.permute.xlu0 %1433 }
 0x235   : > { %2057 = vrot.lane.b32.xlu1 %v1975_v60, %s14146_s18  ;;  %v1805_v14 = vadd.f32 %v1718_v1, %v1485_v51  ;;  %v1657_v60 = vmul.f32 %v19480_v15, %v14748_v13  ;;  %19481 = vst [vmem:[#allocation25_spill] sm:$0xff] %v15363_v37  ;;  %v1658_v51 = vmul.f32 %v19417_v27, %v14851_v44  ;;  %v19482_v15 = vld [vmem:[#allocation68_spill] sm:$0xff] }
 0x238   : > { %v15332_v32 = vpop.permute.xlu1 %1719 }
 0x239   : > { %1102 = vperm.xlu1 %14073, %v15338_v24  }
 0x23c   : > { %v2038_v18 = vpop.permute.xlu1 %2037 }
 0x23d   : > { %v2125_v48 = vadd.f32 %v2038_v18, %v1805_v14  ;;  %1423 = vrot.lane.b32.xlu1 %v1338_v19, %s14145_s16  ;;  %v975_v14 = vmul.f32 %v15176_v34, %v14944_v12  ;;  %v1135_v18 = vmul.f32 %v15205_v50, %v19440_v35  ;;  %v19486_v50 = vld [vmem:[#allocation74_spill] sm:$0xff] }
 0x23e   : > { %14074 = vset.pattern.permute.xlu1 %v19355_v16 }
 0x23f   : > { %2268 = vrot.lane.b32.xlu0 %v2125_v48, %s14150_s14  ;;  %v2166_v48 = vld [vmem:[%s15156_s24 + $0x50] sm:$0xff]  ;;  %v1167_v44 = vadd.f32 %v1135_v18, %v975_v14 }
 0x240   : > { %v15350_v43 = vpop.permute.xlu1 %1062  ;;  %2198 = vst.msk [vmem:[#allocation2 + $0x68] sm:$0xff] %vm472_vm1, %v2166_v48 }
 0x241   : > { %942 = vperm.xlu1 %14074, %v15355_v10   ;;  %v1487_v12 = vadd.f32 %v15003_v56, %v1167_v44  ;;  %v19493_v44 = vmov 5  }
 0x244   : > { %v15360_v1 = vpop.permute.xlu1 %1403 }
 0x245   : > { %1741 = vrot.lane.b32.xlu1 %v1657_v60, %s14148_s21  ;;  %v1977_v60 = vmul.f32 %v19482_v15, %v14748_v13 }
 0x246   : > { %14076 = vset.pattern.permute.xlu1 %v19372_v33  ;;  %v15379_v33 = vpop.permute.xlu0 %1435 }
 0x247   : > { %19483 = vst [vmem:[#allocation65_spill] sm:$0xff] %v15379_v33  ;;  %v19498_v33 = vld [vmem:[#allocation79_spill] sm:$0xff] }
 0x248   : > { %v15368_v19 = vpop.permute.xlu1 %892 }
 0x249   : > { %1743 = vrot.lane.b32.xlu1 %v1658_v51, %s14148_s21  ;;  %v19487_v51 = vld [vmem:[#allocation57_spill] sm:$0xff] }
 0x24a   : > { %v15386_v35 = vpop.permute.xlu0 %1753  ;;  %v1340_v48 = vmul.f32 %v19487_v51, %v19486_v50 }
 0x24b   : > { %19485 = vst [vmem:[#allocation26_spill] sm:$0xff] %v15386_v35 }
 0x24c   : > { %v1722_v24 = vpop.permute.xlu1 %1721 }
 0x24d   : > { %2061 = vrot.lane.b32.xlu1 %v1977_v60, %s14146_s18  ;;  %v1807_v30 = vadd.f32 %v1722_v24, %v1487_v12  ;;  %v19490_v24 = vld [vmem:[#allocation58_spill] sm:$0xff]  ;;  %v19494_v12 = vld [vmem:[#allocation77_spill] sm:$0xff] }
 0x24e   : > { %v15393_v14 = vpop.permute.xlu0 %1437  ;;  %v1660_v50 = vmul.f32 %v19487_v51, %v19494_v12 }
 0x24f   : > { %19488 = vst [vmem:[#allocation67_spill] sm:$0xff] %v15393_v14 }
 0x250   : > { %v15382_v10 = vpop.permute.xlu1 %1723 }
 0x251   : > { %1110 = vperm.xlu1 %14076, %v19484_v45   ;;  %v15400_v45 = vld [vmem:[%s18897_s2 + $0xe8] sm:$0xff] }
 0x252   : > { %19489 = vst [vmem:[#allocation28_spill] sm:$0xff] %v15400_v45  ;;  %v15408_v60 = vpop.permute.xlu0 %1439 }
 0x253   : > { %19492 = vst [vmem:[#allocation68_spill] sm:$0xff] %v15408_v60 }
 0x254   : > { %v2042_v37 = vpop.permute.xlu1 %2041 }
 0x255   : > { %v2127_v15 = vadd.f32 %v2042_v37, %v1807_v30  ;;  %1427 = vrot.lane.b32.xlu1 %v1340_v48, %s14145_s16  ;;  %v19491_v30 = vld [vmem:[#allocation30_spill] sm:$0xff] }
 0x256   : > { %14077 = vset.pattern.permute.xlu1 %v19355_v16  ;;  %v1659_v37 = vmul.f32 %v19491_v30, %v19490_v24  ;;  %v2168_v30 = vld [vmem:[%s15156_s24 + $0x60] sm:$0xff] }
 0x257   : > { %2272 = vrot.lane.b32.xlu0 %v2127_v15, %s14150_s14  ;;  %v19495_v15 = vld [vmem:[#allocation7_spill] sm:$0xff]  ;;  %2200 = vst.msk [vmem:[#allocation2 + $0x78] sm:$0xff] %vm472_vm1, %v2168_v30 }
 0x258   : > { %v15395_v56 = vpop.permute.xlu1 %1070  ;;  %v977_v16 = vmul.f32 %v15176_v34, %v19495_v15  ;;  %v1980_v15 = vmul.f32 %v19487_v51, %v19498_v33  ;;  %v19501_v33 = vld [vmem:[#allocation70_spill] sm:$0xff] }
 0x259   : > { %952 = vperm.xlu1 %14077, %v15400_v45   ;;  %v1137_v45 = vmul.f32 %v15254_v46, %v14697_v55 }
 0x25b   : > { %v1169_v12 = vadd.f32 %v1137_v45, %v977_v16 }
 0x25c   : > { %v15405_v18 = vpop.permute.xlu1 %1407 }
 0x25d   : > { %1745 = vrot.lane.b32.xlu1 %v1659_v37, %s14148_s21  ;;  %v19496_v37 = vld [vmem:[#allocation69_spill] sm:$0xff]  ;;  %v1489_v55 = vadd.f32 %v15028_v5, %v1169_v12 }
 0x25e   : > { %14080 = vset.pattern.permute.xlu1 %v19493_v44  ;;  %v1979_v60 = vmul.f32 %v19496_v37, %v19490_v24  ;;  %v15424_v44 = vpop.permute.xlu0 %1757 }
 0x25f   : > { %19497 = vst [vmem:[#allocation52_spill] sm:$0xff] %v15424_v44 }
 0x260   : > { %v15413_v48 = vpop.permute.xlu1 %902 }
 0x261   : > { %1747 = vrot.lane.b32.xlu1 %v1660_v50, %s14148_s21  ;;  %v19500_v50 = vld [vmem:[#allocation80_spill] sm:$0xff] }
 0x262   : > { %v15433_v46 = vpop.permute.xlu0 %2077  ;;  %v1662_v30 = vmul.f32 %v19423_v57, %v19500_v50  ;;  %v19503_v50 = vld [vmem:[#allocation6_spill] sm:$0xff] }
 0x263   : > { %19499 = vst [vmem:[#allocation74_spill] sm:$0xff] %v15433_v46  ;;  %v19507_v46 = vld [vmem:[#allocation14_spill] sm:$0xff] }
 0x264   : > { %v1726_v14 = vpop.permute.xlu1 %1725  ;;  %v1126_v2 = vmul.f32 %v19508_v40, %v19507_v46  ;;  %v19511_v40 = vld [vmem:[#allocation12_spill] sm:$0xff] }
 0x265   : > { %2065 = vrot.lane.b32.xlu1 %v1979_v60, %s14146_s18  ;;  %v1809_v37 = vadd.f32 %v1726_v14, %v1489_v55  ;;  %v1981_v60 = vmul.f32 %v19501_v33, %v14768_v25  ;;  %v19502_v14 = vld [vmem:[#allocation4_spill] sm:$0xff]  ;;  %v19504_v33 = vld [vmem:[#allocation13_spill] sm:$0xff]  ;;  %v1666_v46 = vmul.f32 %v14786_v11, %v19511_v40 }
 0x268   : > { %v15429_v35 = vpop.permute.xlu1 %1727 }
 0x269   : > { %2067 = vrot.lane.b32.xlu1 %v1980_v15, %s14146_s18  ;;  %v1982_v15 = vmul.f32 %v19423_v57, %v19502_v14  ;;  %v19518_v57 = vld [vmem:[#allocation37_spill] sm:$0xff] }
 0x26c   : > { %v2046_v44 = vpop.permute.xlu1 %2045 }
 0x26d   : > { %v2129_v16 = vadd.f32 %v2046_v44, %v1809_v37  ;;  %1751 = vrot.lane.b32.xlu1 %v1662_v30, %s14148_s21  ;;  %v2253_v45 = vpop.permute.xlu0 %2252  ;;  %v1664_v30 = vmul.f32 %v19431_v26, %v19503_v50  ;;  %v19506_v50 = vld [vmem:[#allocation73_spill] sm:$0xff] }
 0x26e   : > { %2349 = vst.msk [vmem:[#allocation2 + $0x18] sm:$0xff] %vm2348_vm3, %v2253_v45  ;;  %v2170_v45 = vld [vmem:[%s15156_s24 + $0x70] sm:$0xff] }
 0x26f   : > { %2276 = vrot.lane.b32.xlu0 %v2129_v16, %s14150_s14  ;;  %v1139_v16 = vmul.f32 %v15305_v63, %v14710_v9  ;;  %2202 = vst.msk [vmem:[#allocation2 + $0x88] sm:$0xff] %vm472_vm1, %v2170_v45  ;;  %v19509_v9 = vld [vmem:[#allocation71_spill] sm:$0xff] }
 0x270   : > { %v15442_v5 = vpop.permute.xlu1 %1078  ;;  %v1984_v63 = vmul.f32 %v19431_v26, %v19509_v9 }
 0x271   : > { %2069 = vrot.lane.b32.xlu1 %v1981_v60, %s14146_s18  ;;  %v2257_v12 = vpop.permute.xlu0 %2256  ;;  %v1983_v60 = vmul.f32 %v19504_v33, %v14779_v3 }
 0x272   : > { %2351 = vst.msk [vmem:[#allocation2 + $0x28] sm:$0xff] %vm2348_vm3, %v2257_v12  ;;  %v19505_v12 = vld [vmem:[#allocation8_spill] sm:$0xff] }
 0x273   : > { %v979_v14 = vmul.f32 %v15176_v34, %v19505_v12 }
 0x274   : > { %v15448_v44 = vpop.permute.xlu1 %1411 }
 0x275   : > { %2071 = vrot.lane.b32.xlu1 %v1982_v15, %s14146_s18  ;;  %v2576_v55 = vld [vmem:[#allocation2 + $0x18] sm:$0xff]  ;;  %v1171_v0 = vadd.f32 %v1139_v16, %v979_v14  ;;  %v19512_v16 = vld [vmem:[#allocation24_spill] sm:$0xff] }
 0x276   : > { %12447 = vmatprep.mubr.msk.f32.mxu1 %vm2149_vm2, %v2576_v55  ;;  %v966_v55 = vmul.f32 %v15176_v34, %v19506_v50  ;;  %v19510_v50 = vld [vmem:[#allocation75_spill] sm:$0xff] }
 0x277   : > { %v1491_v33 = vadd.f32 %v15054_v52, %v1171_v0  ;;  %v968_v3 = vmul.f32 %v15176_v34, %v19510_v50  ;;  %v19515_v52 = vld [vmem:[#allocation76_spill] sm:$0xff]  ;;  %v19517_v50 = vld [vmem:[#allocation15_spill] sm:$0xff] }
 0x278   : > { %v15454_v37 = vpop.permute.xlu1 %912  ;;  %v1158_v45 = vadd.f32 %v1126_v2, %v966_v55  ;;  %v970_v0 = vmul.f32 %v15176_v34, %v19515_v52  ;;  %v1130_v40 = vmul.f32 %v19518_v57, %v19517_v50 }
 0x279   : > { %1755 = vrot.lane.b32.xlu1 %v1664_v30, %s14148_s21 }
 0x27a   : > { %v1478_v2 = vadd.f32 %v19514_v49, %v1158_v45  ;;  %v19521_v45 = vld [vmem:[#allocation81_spill] sm:$0xff]  ;;  %v1162_v57 = vadd.f32 %v1130_v40, %v970_v0 }
 0x27c   : > { %v1730_v15 = vpop.permute.xlu1 %1729  ;;  %v1798_v25 = vadd.f32 %v19519_v58, %v1478_v2  ;;  %v19524_v58 = vld [vmem:[#allocation23_spill] sm:$0xff]  ;;  %v1482_v2 = vadd.f32 %v15214_v61, %v1162_v57  ;;  %v19530_v57 = vld [vmem:[#allocation45_spill] sm:$0xff] }
 0x27d   : > { %2073 = vrot.lane.b32.xlu1 %v1983_v60, %s14146_s18  ;;  %v19513_v60 = vld [vmem:[#allocation35_spill] sm:$0xff]  ;;  %v1811_v9 = vadd.f32 %v1730_v15, %v1491_v33 }
 0x27e   : > { %v1128_v14 = vmul.f32 %v19513_v60, %v19512_v16  ;;  %v2118_v33 = vadd.f32 %v19521_v45, %v1798_v25  ;;  %v19525_v25 = vld [vmem:[#allocation11_spill] sm:$0xff]  ;;  %v1141_v45 = vmul.f32 %v15350_v43, %v14723_v31  ;;  %v2161_v43 = vld [vmem:[%s15156_s24 + $0x28] sm:$0xff] }
 0x27f   : > { %2193 = vst.msk [vmem:[#allocation2 + $0x40] sm:$0xff] %vm472_vm1, %v2161_v43 }
 0x280   : > { %v15472_v30 = vpop.permute.xlu1 %1731  ;;  %v1160_v16 = vadd.f32 %v1128_v14, %v968_v3  ;;  %v2157_v3 = vld [vmem:[%s15156_s24 + $0x8] sm:$0xff]  ;;  %v972_v14 = vmul.f32 %v15176_v34, %v19524_v58 }
 0x281   : > { %2075 = vrot.lane.b32.xlu1 %v1984_v63, %s14146_s18  ;;  %v2261_v12 = vpop.permute.xlu0 %2260  ;;  %v19516_v63 = vld [vmem:[#allocation72_spill] sm:$0xff]  ;;  %2189 = vst.msk [vmem:[#allocation2 + $0x20] sm:$0xff] %vm472_vm1, %v2157_v3  ;;  %v1136_v3 = vmul.f32 %v19530_v57, %v15216_v38 }
 0x282   : > { %2353 = vst.msk [vmem:[#allocation2 + $0x38] sm:$0xff] %vm2348_vm3, %v2261_v12  ;;  %v1986_v12 = vmul.f32 %v14786_v11, %v19516_v63 }
 0x284   : > { %v2050_v26 = vpop.permute.xlu1 %2049 }
 0x285   : > { %v2131_v55 = vadd.f32 %v2050_v26, %v1811_v9  ;;  %1759 = vrot.lane.b32.xlu1 %v1666_v46, %s14148_s21  ;;  %v19520_v26 = vld [vmem:[#allocation29_spill] sm:$0xff]  ;;  %v19523_v9 = vld [vmem:[#allocation39_spill] sm:$0xff] }
 0x286   : > { %v1480_v49 = vadd.f32 %v19520_v26, %v1160_v16  ;;  %v19522_v46 = vld [vmem:[#allocation53_spill] sm:$0xff]  ;;  %v1132_v52 = vmul.f32 %v19523_v9, %v15197_v22  ;;  %v1802_v22 = vadd.f32 %v15239_v21, %v1482_v2  ;;  %v2159_v16 = vld [vmem:[%s15156_s24 + $0x18] sm:$0xff]  ;;  %v19531_v2 = vld [vmem:[#allocation10_spill] sm:$0xff] }
 0x287   : > { %2280 = vrot.lane.b32.xlu0 %v2131_v55, %s14150_s14  ;;  %v19527_v26 = vld [vmem:[#allocation19_spill] sm:$0xff]  ;;  %2191 = vst.msk [vmem:[#allocation2 + $0x30] sm:$0xff] %vm472_vm1, %v2159_v16 }
 0x288   : > { %v15493_v15 = vpop.permute.xlu1 %1086  ;;  %v1800_v60 = vadd.f32 %v19522_v46, %v1480_v49  ;;  %v1164_v0 = vadd.f32 %v1132_v52, %v972_v14  ;;  %v974_v49 = vmul.f32 %v15176_v34, %v19527_v26  ;;  %v976_v46 = vmul.f32 %v15176_v34, %v15223_v7 }
 0x289   : > { %2079 = vrot.lane.b32.xlu1 %v1986_v12, %s14146_s18  ;;  %v19526_v12 = vld [vmem:[#allocation42_spill] sm:$0xff]  ;;  %v978_v7 = vmul.f32 %v15176_v34, %v15269_v41 }
 0x28a   : > { %v2120_v55 = vadd.f32 %v19525_v25, %v1800_v60  ;;  %v1134_v50 = vmul.f32 %v19526_v12, %v15207_v39  ;;  %v1484_v61 = vadd.f32 %v15261_v8, %v1164_v0  ;;  %v2172_v39 = vld [vmem:[%s15156_s24 + $0x80] sm:$0xff]  ;;  %v19529_v60 = vld [vmem:[#allocation38_spill] sm:$0xff]  ;;  %v19533_v0 = vld [vmem:[#allocation9_spill] sm:$0xff] }
 0x28b   : > { %2204 = vst.msk [vmem:[#allocation2 + $0x98] sm:$0xff] %vm472_vm1, %v2172_v39  ;;  %v2122_v9 = vadd.f32 %v19529_v60, %v1802_v22  ;;  %v19532_v12 = vld [vmem:[#allocation48_spill] sm:$0xff]  ;;  %v2163_v22 = vld [vmem:[%s15156_s24 + $0x38] sm:$0xff]  ;;  %v2165_v39 = vld [vmem:[%s15156_s24 + $0x48] sm:$0xff] }
 0x28c   : > { %v15501_v63 = vpop.permute.xlu1 %1415  ;;  %v1804_v8 = vadd.f32 %v15284_v47, %v1484_v61  ;;  %v1166_v52 = vadd.f32 %v1134_v50, %v974_v49  ;;  %v1138_v50 = vmul.f32 %v19532_v12, %v15227_v42  ;;  %2195 = vst.msk [vmem:[#allocation2 + $0x50] sm:$0xff] %vm472_vm1, %v2163_v22  ;;  %v19534_v49 = vld [vmem:[#allocation5_spill] sm:$0xff]  ;;  %2197 = vst.msk [vmem:[#allocation2 + $0x60] sm:$0xff] %vm472_vm1, %v2165_v39  ;;  %v19539_v12 = vld [vmem:[#allocation43_spill] sm:$0xff] }
 0x28d   : > { %2254 = vrot.lane.b32.xlu1 %v2118_v33, %s14150_s14  ;;  %v19528_v33 = vld [vmem:[#allocation44_spill] sm:$0xff]  ;;  %v19535_v60 = vld [vmem:[#allocation17_spill] sm:$0xff] }
 0x28e   : > { %v981_v21 = vmul.f32 %v15176_v34, %v19528_v33  ;;  %v1486_v58 = vadd.f32 %v15310_v62, %v1166_v52  ;;  %v2124_v25 = vadd.f32 %v19531_v2, %v1804_v8  ;;  %v1170_v41 = vadd.f32 %v1138_v50, %v978_v7  ;;  %v2171_v7 = vld [vmem:[%s15156_s24 + $0x78] sm:$0xff]  ;;  %v2177_v39 = vld [vmem:[%s15156_s24 + $0xa8] sm:$0xff] }
 0x28f   : > { %v1140_v33 = vmul.f32 %v14707_v20, %v15236_v53  ;;  %v2167_v20 = vld [vmem:[%s15156_s24 + $0x58] sm:$0xff]  ;;  %v1142_v53 = vmul.f32 %v14720_v54, %v15242_v6  ;;  %v19537_v54 = vld [vmem:[#allocation54_spill] sm:$0xff]  ;;  %v1143_v2 = vmul.f32 %v15395_v56, %v14736_v17  ;;  %2203 = vst.msk [vmem:[#allocation2 + $0x90] sm:$0xff] %vm472_vm1, %v2171_v7  ;;  %v2173_v56 = vld [vmem:[%s15156_s24 + $0x88] sm:$0xff] }
 0x290   : > { %v15513_v40 = vpop.permute.xlu1 %922  ;;  %v1173_v14 = vadd.f32 %v1141_v45, %v981_v21  ;;  %v1806_v47 = vadd.f32 %v15332_v32, %v1486_v58  ;;  %v980_v32 = vmul.f32 %v15176_v34, %v15318_v28  ;;  %v1490_v21 = vadd.f32 %v15405_v18, %v1170_v41  ;;  %2199 = vst.msk [vmem:[#allocation2 + $0x70] sm:$0xff] %vm472_vm1, %v2167_v20 }
 0x291   : > { %2258 = vrot.lane.b32.xlu1 %v2120_v55, %s14150_s14  ;;  %v1168_v55 = vadd.f32 %v1136_v3, %v976_v46  ;;  %v982_v28 = vmul.f32 %v15176_v34, %v15368_v19  ;;  %v19536_v19 = vld [vmem:[#allocation41_spill] sm:$0xff]  ;;  %2205 = vst.msk [vmem:[#allocation2 + $0xa0] sm:$0xff] %vm472_vm1, %v2173_v56  ;;  %2209 = vst.msk [vmem:[#allocation2 + $0xc0] sm:$0xff] %vm472_vm1, %v2177_v39  ;;  %v19551_v39 = vld [vmem:[#allocation64_spill] sm:$0xff] }
 0x292   : > { %v1493_v16 = vadd.f32 %v19533_v0, %v1173_v14  ;;  %v2126_v61 = vadd.f32 %v19534_v49, %v1806_v47  ;;  %v1172_v8 = vadd.f32 %v1140_v33, %v980_v32  ;;  %v2169_v3 = vld [vmem:[%s15156_s24 + $0x68] sm:$0xff]  ;;  %v2175_v0 = vld [vmem:[%s15156_s24 + $0x98] sm:$0xff] }
 0x293   : > { %v1488_v62 = vadd.f32 %v15360_v1, %v1168_v55  ;;  %v1174_v43 = vadd.f32 %v1142_v53, %v982_v28  ;;  %2201 = vst.msk [vmem:[#allocation2 + $0x80] sm:$0xff] %vm472_vm1, %v2169_v3  ;;  %v1144_v55 = vmul.f32 %v14733_v4, %v15249_v36  ;;  %2207 = vst.msk [vmem:[#allocation2 + $0xb0] sm:$0xff] %vm472_vm1, %v2175_v0  ;;  %v19541_v36 = vld [vmem:[#allocation36_spill] sm:$0xff] }
 0x294   : > { %v1734_v31 = vpop.permute.xlu1 %1733  ;;  %v1492_v18 = vadd.f32 %v15448_v44, %v1172_v8  ;;  %v2176_v28 = vld [vmem:[%s15156_s24 + $0xa0] sm:$0xff] }
 0x295   : > { %2262 = vrot.lane.b32.xlu1 %v2122_v9, %s14150_s14  ;;  %v1808_v42 = vadd.f32 %v15382_v10, %v1488_v62  ;;  %v1813_v45 = vadd.f32 %v1734_v31, %v1493_v16  ;;  %v1810_v10 = vadd.f32 %v15429_v35, %v1490_v21  ;;  %v1494_v58 = vadd.f32 %v15501_v63, %v1174_v43  ;;  %v2174_v63 = vld [vmem:[%s15156_s24 + $0x90] sm:$0xff]  ;;  %v19540_v16 = vld [vmem:[#allocation49_spill] sm:$0xff]  ;;  %v2180_v0 = vld [vmem:[%s15156_s24 + $0xc0] sm:$0xff] }
 0x296   : > { %v1812_v35 = vadd.f32 %v15472_v30, %v1492_v18  ;;  %v984_v30 = vmul.f32 %v15176_v34, %v15413_v48  ;;  %2206 = vst.msk [vmem:[#allocation2 + $0xa8] sm:$0xff] %vm472_vm1, %v2174_v63  ;;  %v1145_v21 = vmul.f32 %v15442_v5, %v14748_v13  ;;  %2208 = vst.msk [vmem:[#allocation2 + $0xb8] sm:$0xff] %vm472_vm1, %v2176_v28 }
 0x297   : > { %v2128_v9 = vadd.f32 %v19535_v60, %v1808_v42  ;;  %v2130_v31 = vadd.f32 %v19536_v19, %v1810_v10  ;;  %v19542_v60 = vld [vmem:[#allocation31_spill] sm:$0xff]  ;;  %v1146_v10 = vmul.f32 %v19417_v27, %v15256_v29  ;;  %v988_v63 = vmul.f32 %v15176_v34, %v15513_v40  ;;  %2212 = vst.msk [vmem:[#allocation2 + $0xd8] sm:$0xff] %vm472_vm1, %v2180_v0 }
 0x298   : > { %v1736_v38 = vpop.permute.xlu1 %1735  ;;  %v2132_v6 = vadd.f32 %v19537_v54, %v1812_v35  ;;  %v1176_v48 = vadd.f32 %v1144_v55, %v984_v30  ;;  %v1147_v54 = vmul.f32 %v15493_v15, %v19490_v24  ;;  %v2179_v30 = vld [vmem:[%s15156_s24 + $0xb8] sm:$0xff]  ;;  %v19545_v24 = vld [vmem:[#allocation46_spill] sm:$0xff] }
 0x299   : > { %2266 = vrot.lane.b32.xlu1 %v2124_v25, %s14150_s14  ;;  %v2265_v26 = vpop.permute.xlu0 %2264  ;;  %v1814_v44 = vadd.f32 %v1736_v38, %v1494_v58  ;;  %v19538_v25 = vld [vmem:[#allocation18_spill] sm:$0xff]  ;;  %2211 = vst.msk [vmem:[#allocation2 + $0xd0] sm:$0xff] %vm472_vm1, %v2179_v30  ;;  %v19564_v0 = vld [vmem:[#allocation67_spill] sm:$0xff] }
 0x29a   : > { %2355 = vst.msk [vmem:[#allocation2 + $0x48] sm:$0xff] %vm2348_vm3, %v2265_v26  ;;  %v983_v47 = vmul.f32 %v15176_v34, %v19538_v25  ;;  %v19559_v30 = vld [vmem:[#allocation34_spill] sm:$0xff] }
 0x29b   : > { %v2134_v50 = vadd.f32 %v19539_v12, %v1814_v44  ;;  %v19544_v44 = vld [vmem:[#allocation20_spill] sm:$0xff]  ;;  %v19546_v12 = vld [vmem:[#allocation61_spill] sm:$0xff] }
 0x29c   : > { %v2054_v1 = vpop.permute.xlu1 %2053  ;;  %v1175_v38 = vadd.f32 %v1143_v2, %v983_v47  ;;  %v1148_v47 = vmul.f32 %v19487_v51, %v15264_v59 }
 0x29d   : > { %v2133_v46 = vadd.f32 %v2054_v1, %v1813_v45  ;;  %2270 = vrot.lane.b32.xlu1 %v2126_v61, %s14150_s14 }
 0x29e   : > { %v1495_v26 = vadd.f32 %v19540_v16, %v1175_v38 }
 0x29f   : > { %2284 = vrot.lane.b32.xlu0 %v2133_v46, %s14150_s14  ;;  %v986_v46 = vmul.f32 %v15176_v34, %v15454_v37 }
 0x2a0   : > { %v15564_v52 = vpop.permute.xlu1 %1094 }
 0x2a1   : > { %2274 = vrot.lane.b32.xlu1 %v2128_v9, %s14150_s14  ;;  %v985_v9 = vmul.f32 %v15176_v34, %v19542_v60  ;;  %v1178_v53 = vadd.f32 %v1146_v10, %v986_v46  ;;  %v19552_v46 = vld [vmem:[#allocation60_spill] sm:$0xff]  ;;  %v19553_v60 = vld [vmem:[#allocation51_spill] sm:$0xff] }
 0x2a2   : > { %v19554_v10 = vld [vmem:[#allocation55_spill] sm:$0xff] }
 0x2a3   : > { %v1177_v20 = vadd.f32 %v1145_v21, %v985_v9  ;;  %v991_v9 = vmul.f32 %v15176_v34, %v19553_v60  ;;  %v15750_v60 = vld [vmem:[%s18897_s2 + $0x10] sm:$0xff] }
 0x2a4   : > { %v1420_v57 = vpop.permute.xlu1 %1419 }
 0x2a5   : > { %2278 = vrot.lane.b32.xlu1 %v2130_v31, %s14150_s14  ;;  %v1496_v22 = vadd.f32 %v1420_v57, %v1176_v48  ;;  %v19543_v31 = vld [vmem:[#allocation27_spill] sm:$0xff]  ;;  %v19547_v48 = vld [vmem:[#allocation33_spill] sm:$0xff] }
 0x2a6   : > { %v1497_v13 = vadd.f32 %v19543_v31, %v1177_v20 }
 0x2a8   : > { %v15579_v14 = vpop.permute.xlu1 %932 }
 0x2a9   : > { %2282 = vrot.lane.b32.xlu1 %v2132_v6, %s14150_s14  ;;  %v2178_v6 = vld [vmem:[%s15156_s24 + $0xb0] sm:$0xff] }
 0x2aa   : > { %2210 = vst.msk [vmem:[#allocation2 + $0xc8] sm:$0xff] %vm472_vm1, %v2178_v6 }
 0x2ac   : > { %v1738_v17 = vpop.permute.xlu1 %1737 }
 0x2ad   : > { %2286 = vrot.lane.b32.xlu1 %v2134_v50, %s14150_s14  ;;  %v1815_v4 = vadd.f32 %v1738_v17, %v1495_v26  ;;  %v1149_v50 = vmul.f32 %v15564_v52, %v19546_v12  ;;  %v1180_v17 = vadd.f32 %v1148_v47, %v988_v63  ;;  %v990_v52 = vmul.f32 %v15176_v34, %v15579_v14  ;;  %v19561_v47 = vld [vmem:[#allocation26_spill] sm:$0xff] }
 0x2ae   : > { %v993_v63 = vmul.f32 %v15176_v34, %v19559_v30 }
 0x2b0   : > { %v1740_v62 = vpop.permute.xlu1 %1739 }
 0x2b1   : > { %v1816_v41 = vadd.f32 %v1740_v62, %v1496_v22  ;;  %v2269_v32 = vpop.permute.xlu0 %2268  ;;  %v989_v22 = vmul.f32 %v15176_v34, %v19547_v48 }
 0x2b2   : > { %2357 = vst.msk [vmem:[#allocation2 + $0x58] sm:$0xff] %vm2348_vm3, %v2269_v32  ;;  %v19548_v32 = vld [vmem:[#allocation40_spill] sm:$0xff] }
 0x2b3   : > { %v2136_v49 = vadd.f32 %v19541_v36, %v1816_v41  ;;  %v1181_v59 = vadd.f32 %v1149_v50, %v989_v22  ;;  %v2181_v41 = vld [vmem:[%s15156_s24 + $0xc8] sm:$0xff] }
 0x2b4   : > { %v2058_v61 = vpop.permute.xlu1 %2057  ;;  %2213 = vst.msk [vmem:[#allocation2 + $0xe0] sm:$0xff] %vm472_vm1, %v2181_v41  ;;  %v19562_v50 = vld [vmem:[#allocation65_spill] sm:$0xff] }
 0x2b5   : > { %v2135_v42 = vadd.f32 %v2058_v61, %v1815_v4  ;;  %2290 = vrot.lane.b32.xlu1 %v2136_v49, %s14150_s14  ;;  %v19549_v4 = vld [vmem:[#allocation59_spill] sm:$0xff]  ;;  %v19550_v49 = vld [vmem:[#allocation50_spill] sm:$0xff]  ;;  %v2185_v22 = vld [vmem:[%s15156_s24 + $0xe8] sm:$0xff] }
 0x2b6   : > { %v1150_v36 = vmul.f32 %v19549_v4, %v19548_v32  ;;  %v1501_v61 = vadd.f32 %v19550_v49, %v1181_v59  ;;  %2217 = vst.msk [vmem:[#allocation2 + $0x100] sm:$0xff] %vm472_vm1, %v2185_v22 }
 0x2b7   : > { %2288 = vrot.lane.b32.xlu0 %v2135_v42, %s14150_s14 }
 0x2b8   : > { %v15605_v45 = vpop.permute.xlu1 %1102  ;;  %v1821_v28 = vadd.f32 %v19552_v46, %v1501_v61  ;;  %v2184_v61 = vld [vmem:[%s15156_s24 + $0xe0] sm:$0xff] }
 0x2b9   : > { %v1151_v21 = vmul.f32 %v15605_v45, %v19551_v39  ;;  %v15671_v45 = vld [vmem:[%s18897_s2 + $0xf0] sm:$0xff]  ;;  %2216 = vst.msk [vmem:[#allocation2 + $0xf8] sm:$0xff] %vm472_vm1, %v2184_v61  ;;  %v15730_v39 = vld [vmem:[%s18897_s2 + $0x8] sm:$0xff] }
 0x2ba   : > { %v19570_v61 = vld [vmem:[#allocation62_spill] sm:$0xff] }
 0x2bc   : > { %v1424_v1 = vpop.permute.xlu1 %1423 }
 0x2bd   : > { %v1498_v18 = vadd.f32 %v1424_v1, %v1178_v53  ;;  %v1182_v1 = vadd.f32 %v1150_v36, %v990_v52  ;;  %v2182_v53 = vld [vmem:[%s15156_s24 + $0xd0] sm:$0xff]  ;;  %v19566_v52 = vld [vmem:[#allocation68_spill] sm:$0xff] }
 0x2be   : > { %2214 = vst.msk [vmem:[#allocation2 + $0xe8] sm:$0xff] %vm472_vm1, %v2182_v53  ;;  %v19567_v36 = vld [vmem:[#allocation74_spill] sm:$0xff] }
 0x2bf   : > { %v15762_v53 = vld [vmem:[%s18897_s2 + $0x30] sm:$0xff] }
 0x2c0   : > { %v15608_v33 = vpop.permute.xlu1 %942 }
 0x2c4   : > { %v1742_v8 = vpop.permute.xlu1 %1741 }
 0x2c5   : > { %v1817_v37 = vadd.f32 %v1742_v8, %v1497_v13  ;;  %v1502_v8 = vadd.f32 %v19554_v10, %v1182_v1  ;;  %v992_v13 = vmul.f32 %v15176_v34, %v15608_v33  ;;  %v19558_v33 = vld [vmem:[#allocation66_spill] sm:$0xff]  ;;  %v19568_v1 = vmov 0.0  }
 0x2c6   : > { %6347 = vst.msk [vmem:[#allocation3 + $0x8] sm:$0xff] %vm6345_vm4, %v19568_v1  ;;  %6348 = vst.msk [vmem:[#allocation3 + $0x10] sm:$0xff] %vm6345_vm4, %v19568_v1 }
 0x2c7   : > { %6346 = vst.msk [vmem:[#allocation3] sm:$0xff] %vm6345_vm4, %v19568_v1  ;;  %6349 = vst.msk [vmem:[#allocation3 + $0x118] sm:$0xff] %vm6345_vm4, %v19568_v1 }
 0x2c8   : > { %v1744_v19 = vpop.permute.xlu1 %1743  ;;  %6350 = vst.msk [vmem:[#allocation3 + $0x120] sm:$0xff] %vm6345_vm4, %v19568_v1  ;;  %6351 = vst.msk [vmem:[#allocation3 + $0x128] sm:$0xff] %vm6345_vm4, %v19568_v1 }
 0x2c9   : > { %v1818_v5 = vadd.f32 %v1744_v19, %v1498_v18  ;;  %v2273_v35 = vpop.permute.xlu0 %2272  ;;  %v1183_v18 = vadd.f32 %v1151_v21, %v991_v9  ;;  %v15736_v21 = vld [vmem:[%s18897_s2] sm:$0xff] }
 0x2ca   : > { %2359 = vst.msk [vmem:[#allocation2 + $0x68] sm:$0xff] %vm2348_vm3, %v2273_v35 }
 0x2cb   : > { %v2138_v43 = vadd.f32 %v15303_v23, %v1818_v5  ;;  %v987_v23 = vmul.f32 %v15176_v34, %v19544_v44 }
 0x2cc   : > { %v2062_v57 = vpop.permute.xlu1 %2061 }
 0x2cd   : > { %v2137_v3 = vadd.f32 %v2062_v57, %v1817_v37  ;;  %2294 = vrot.lane.b32.xlu1 %v2138_v43, %s14150_s14  ;;  %v1179_v2 = vadd.f32 %v1147_v54, %v987_v23  ;;  %v2183_v37 = vld [vmem:[%s15156_s24 + $0xd8] sm:$0xff]  ;;  %v19557_v54 = vld [vmem:[#allocation25_spill] sm:$0xff] }
 0x2ce   : > { %2215 = vst.msk [vmem:[#allocation2 + $0xf0] sm:$0xff] %vm472_vm1, %v2183_v37  ;;  %v19555_v57 = vld [vmem:[#allocation47_spill] sm:$0xff]  ;;  %v1503_v6 = vadd.f32 %v19557_v54, %v1183_v18  ;;  %v15783_v37 = vld [vmem:[%s18897_s2 + $0x28] sm:$0xff]  ;;  %v15792_v54 = vld [vmem:[%s18897_s2 + $0x50] sm:$0xff] }
 0x2cf   : > { %2292 = vrot.lane.b32.xlu0 %v2137_v3, %s14150_s14  ;;  %v1499_v15 = vadd.f32 %v19545_v24, %v1179_v2  ;;  %v19556_v3 = vld [vmem:[#allocation63_spill] sm:$0xff] }
 0x2d0   : > { %v15626_v27 = vpop.permute.xlu1 %1110  ;;  %v1823_v24 = vadd.f32 %v19561_v47, %v1503_v6  ;;  %v15768_v18 = vld [vmem:[%s18897_s2 + $0x18] sm:$0xff] }
 0x2d1   : > { %v15798_v6 = vld [vmem:[%s18897_s2 + $0x38] sm:$0xff]  ;;  %v2586_v47 = vld [vmem:[#allocation2 + $0x68] sm:$0xff] }
 0x2d4   : > { %v1428_v29 = vpop.permute.xlu1 %1427 }
 0x2d5   : > { %v1500_v40 = vadd.f32 %v1428_v29, %v1180_v17  ;;  %v1152_v29 = vmul.f32 %v19556_v3, %v19555_v57 }
 0x2d7   : > { %v1184_v23 = vadd.f32 %v1152_v29, %v992_v13  ;;  %v2580_v13 = vld [vmem:[#allocation2 + $0x38] sm:$0xff]  ;;  %v2582_v29 = vld [vmem:[#allocation2 + $0x48] sm:$0xff] }
 0x2d8   : > { %v15628_v58 = vpop.permute.xlu1 %952 }
 0x2d9   : > { %v994_v12 = vmul.f32 %v15176_v34, %v15628_v58  ;;  %v1504_v17 = vadd.f32 %v19562_v50, %v1184_v23 }
 0x2dc   : > { %v1746_v7 = vpop.permute.xlu1 %1745 }
 0x2dd   : > { %v1819_v56 = vadd.f32 %v1746_v7, %v1499_v15  ;;  %v1153_v7 = vmul.f32 %v15626_v27, %v19558_v33  ;;  %v2584_v33 = vld [vmem:[#allocation2 + $0x58] sm:$0xff] }
 0x2e0   : > { %v1748_v25 = vpop.permute.xlu1 %1747 }
 0x2e1   : > { %v2277_v55 = vpop.permute.xlu0 %2276  ;;  %v1820_v51 = vadd.f32 %v1748_v25, %v1500_v40  ;;  %v19560_v25 = vmov 4  }
 0x2e2   : > { %2361 = vst.msk [vmem:[#allocation2 + $0x78] sm:$0xff] %vm2348_vm3, %v2277_v55  ;;  %v1185_v55 = vadd.f32 %v1153_v7, %v993_v63  ;;  %v15807_v7 = vld [vmem:[%s18897_s2 + $0x60] sm:$0xff] }
 0x2e3   : > { %v15675_v35 = vpop.f32.mrb[30].mxu0 }
 0x2e4   : > { %v2066_v38 = vpop.permute.xlu1 %2065  ;;  %v15679_v43 = vpop.f32.mrb[31].mxu0  ;;  %v1505_v59 = vadd.f32 %v19564_v0, %v1185_v55  ;;  %v15859_v0 = vld [vmem:[%s18897_s2 + $0x78] sm:$0xff] }
 0x2e5   : > { %v2139_v62 = vadd.f32 %v2066_v38, %v1819_v56  ;;  %v19563_v56 = vld [vmem:[#allocation56_spill] sm:$0xff] }
 0x2e6   : > { %v1154_v38 = vmul.f32 %v14786_v11, %v19563_v56  ;;  %v15844_v56 = vld [vmem:[%s18897_s2 + $0x68] sm:$0xff] }
 0x2e7   : > { %2296 = vrot.lane.b32.xlu0 %v2139_v62, %s14150_s14  ;;  %v14151_v62 = vmov 0  }
 0x2e8   : > { %v2068_v16 = vpop.permute.xlu1 %2067  ;;  %v1186_v34 = vadd.f32 %v1154_v38, %v994_v12 }
 0x2e9   : > { %v2140_v26 = vadd.f32 %v2068_v16, %v1820_v51  ;;  %v19565_v16 = vld [vmem:[#allocation52_spill] sm:$0xff] }
 0x2ea   : > { %v1825_v11 = vadd.f32 %v19565_v16, %v1505_v59  ;;  %v15874_v16 = vld [vmem:[%s18897_s2 + $0x88] sm:$0xff] }
 0x2eb   : > { %2298 = vrot.lane.b32.xlu1 %v2140_v26, %s14150_s14  ;;  %v1506_v26 = vadd.f32 %v19566_v52, %v1186_v34 }
 0x2ec   : > { %v1752_v42 = vpop.permute.xlu1 %1751  ;;  %v2145_v49 = vadd.f32 %v19567_v36, %v1825_v11  ;;  %v15896_v36 = vld [vmem:[%s18897_s2 + $0xa8] sm:$0xff] }
 0x2ed   : > { %v1822_v19 = vadd.f32 %v1752_v42, %v1502_v8  ;;  %v2573_v8 = vld [vmem:[%s18900_s5] sm:$0xff] }
 0x2ee   : > { %12492 = vmatprep.subr.mxu1 %v2573_v8 }
 0x2ef   : > { %12493 = vmatpush3.msra.mxu1 %v2573_v8  ;;  %v15916_v8 = vld [vmem:[%s18897_s2 + $0xc8] sm:$0xff] }
 0x2f0   : > { %v2070_v14 = vpop.permute.xlu1 %2069 }
 0x2f1   : > { %v2141_v20 = vadd.f32 %v2070_v14, %v1821_v28  ;;  %v15744_v14 = vld [vmem:[%s18897_s2 + $0x20] sm:$0xff] }
 0x2f3   : > { %2300 = vrot.lane.b32.xlu0 %v2141_v20, %s14150_s14  ;;  %v2578_v20 = vld [vmem:[#allocation2 + $0x28] sm:$0xff] }
 0x2f4   : > { %v2072_v31 = vpop.permute.xlu1 %2071 }
 0x2f5   : > { %v2142_v5 = vadd.f32 %v2072_v31, %v1822_v19 }
 0x2f7   : > { %2302 = vrot.lane.b32.xlu1 %v2142_v5, %s14150_s14  ;;  %1310 = vperm.xlu0 %14078, %v15671_v45   ;;  %v15777_v5 = vld [vmem:[%s18897_s2 + $0x40] sm:$0xff] }
 0x2f8   : > { %v1756_v44 = vpop.permute.xlu1 %1755 }
 0x2f9   : > { %v2281_v2 = vpop.permute.xlu0 %2280  ;;  %v1824_v48 = vadd.f32 %v1756_v44, %v1504_v17  ;;  %v2588_v17 = vld [vmem:[#allocation2 + $0x78] sm:$0xff] }
 0x2fa   : > { %2363 = vst.msk [vmem:[#allocation2 + $0x88] sm:$0xff] %vm2348_vm3, %v2281_v2  ;;  %v15813_v2 = vld [vmem:[%s18897_s2 + $0x48] sm:$0xff] }
 0x2fb   : > { %14079 = vset.pattern.permute.xlu0 %v19560_v25 }
 0x2fc   : > { %v2074_v15 = vpop.permute.xlu1 %2073  ;;  %1630 = vperm.xlu0 %14079, %v15671_v45  }
 0x2fd   : > { %v2143_v27 = vadd.f32 %v2074_v15, %v1823_v24  ;;  %v15822_v24 = vld [vmem:[%s18897_s2 + $0x70] sm:$0xff]  ;;  %v15828_v15 = vld [vmem:[%s18897_s2 + $0x58] sm:$0xff] }
 0x2ff   : > { %2304 = vrot.lane.b32.xlu1 %v2143_v27, %s14150_s14  ;;  %v15838_v27 = vld [vmem:[%s18897_s2 + $0x80] sm:$0xff] }
 0x300   : > { %v2076_v40 = vpop.permute.xlu1 %2075  ;;  %14082 = vset.pattern.permute.xlu0 %v14151_v62 }
 0x301   : > { %v2144_v58 = vadd.f32 %v2076_v40, %v1824_v48  ;;  %v2590_v22 = vld [vmem:[#allocation2 + $0x88] sm:$0xff]  ;;  %v15853_v40 = vld [vmem:[%s18897_s2 + $0x90] sm:$0xff] }
 0x303   : > { %2306 = vrot.lane.b32.xlu1 %v2144_v58, %s14150_s14 }
 0x304   : > { %v1760_v51 = vpop.permute.xlu1 %1759 }
 0x305   : > { %v1826_v41 = vadd.f32 %v1760_v51, %v1506_v26  ;;  %v15868_v51 = vld [vmem:[%s18897_s2 + $0xa0] sm:$0xff]  ;;  %v15882_v26 = vld [vmem:[%s18897_s2 + $0xb0] sm:$0xff] }
 0x307   : > { %1950 = vperm.xlu1 %14080, %v15671_v45  }
 0x308   : > { %v2080_v32 = vpop.permute.xlu1 %2079 }
 0x309   : > { %v2146_v4 = vadd.f32 %v2080_v32, %v1826_v41  ;;  %v15888_v41 = vld [vmem:[%s18897_s2 + $0x98] sm:$0xff] }
 0x30b   : > { %2310 = vrot.lane.b32.xlu0 %v2146_v4, %s14150_s14  ;;  %2308 = vrot.lane.b32.xlu1 %v2145_v49, %s14150_s14  ;;  %v19569_v4 = vld [vmem:[#allocation21_spill] sm:$0xff] }
 0x30c   : > { %v2255_v42 = vpop.permute.xlu1 %2254  ;;  %14081 = vset.pattern.permute.xlu1 %v14151_v62 }
 0x30d   : > { %2350 = vst.msk [vmem:[#allocation2 + $0x20] sm:$0xff] %vm2348_vm3, %v2255_v42  ;;  %v15903_v42 = vld [vmem:[%s18897_s2 + $0xb8] sm:$0xff] }
 0x30f   : > { %2418 = vperm.xlu0 %14082, %v15730_v39   ;;  %2414 = vperm.xlu1 %14081, %v15736_v21  }
 0x310   : > { %v2259_v46 = vpop.permute.xlu1 %2258 }
 0x311   : > { %2352 = vst.msk [vmem:[#allocation2 + $0x30] sm:$0xff] %vm2348_vm3, %v2259_v46  ;;  %v2285_v28 = vpop.permute.xlu0 %2284 }
 0x312   : > { %2365 = vst.msk [vmem:[#allocation2 + $0x98] sm:$0xff] %vm2348_vm3, %v2285_v28  ;;  %v19571_v28 = vld [vmem:[#allocation28_spill] sm:$0xff] }
 0x313   : > { %2430 = vperm.xlu0 %14082, %v15744_v14   ;;  %2422 = vperm.xlu1 %14081, %v15750_v60  }
 0x314   : > { %v2263_v9 = vpop.permute.xlu1 %2262  ;;  %v2577_v10 = vld [vmem:[#allocation2 + $0x20] sm:$0xff] }
 0x315   : > { %2354 = vst.msk [vmem:[#allocation2 + $0x40] sm:$0xff] %vm2348_vm3, %v2263_v9  ;;  %12448 = vmatmul.mubr.msk.f32.gmra.mrb[2].mxu1 %vm2149_vm2, %v2577_v10  ;;  %v19572_v9 = vmov 6   ;;  %v19573_v10 = vmov 5  }
 0x316   : > { %12450 = vmatprep.mubr.msk.f32.mxu1 %vm2149_vm2, %v2578_v20 }
 0x317   : > { %2438 = vperm.xlu0 %14082, %v15762_v53   ;;  %2426 = vperm.xlu1 %14081, %v15768_v18  }
 0x318   : > { %v2267_v19 = vpop.permute.xlu1 %2266  ;;  %v2579_v31 = vld [vmem:[#allocation2 + $0x30] sm:$0xff] }
 0x319   : > { %2356 = vst.msk [vmem:[#allocation2 + $0x50] sm:$0xff] %vm2348_vm3, %v2267_v19  ;;  %12451 = vmatmul.mubr.msk.f32.gmra.mrb[4].mxu1 %vm2149_vm2, %v2579_v31  ;;  %v2592_v58 = vld [vmem:[#allocation2 + $0x98] sm:$0xff]  ;;  %v19574_v31 = vld [vmem:[#allocation22_spill] sm:$0xff] }
 0x31a   : > { %12453 = vmatprep.mubr.msk.f32.mxu1 %vm2149_vm2, %v2580_v13  ;;  %v15925_v13 = vld [vmem:[%s18897_s2 + $0xe0] sm:$0xff] }
 0x31b   : > { %2446 = vperm.xlu0 %14082, %v15777_v5   ;;  %2434 = vperm.xlu1 %14081, %v15783_v37  }
 0x31c   : > { %v2271_v57 = vpop.permute.xlu1 %2270  ;;  %v2581_v3 = vld [vmem:[#allocation2 + $0x40] sm:$0xff] }
 0x31d   : > { %2358 = vst.msk [vmem:[#allocation2 + $0x60] sm:$0xff] %vm2348_vm3, %v2271_v57  ;;  %12454 = vmatmul.mubr.msk.f32.gmra.mrb[6].mxu1 %vm2149_vm2, %v2581_v3  ;;  %v15931_v57 = vld [vmem:[%s18897_s2 + $0xf8] sm:$0xff]  ;;  %v19575_v3 = vmov 3  }
 0x31e   : > { %12456 = vmatprep.mubr.msk.f32.mxu1 %vm2149_vm2, %v2582_v29 }
 0x31f   : > { %2454 = vperm.xlu0 %14082, %v15792_v54   ;;  %2442 = vperm.xlu1 %14081, %v15798_v6  }
 0x320   : > { %v2275_v44 = vpop.permute.xlu1 %2274  ;;  %v2583_v23 = vld [vmem:[#allocation2 + $0x50] sm:$0xff] }
 0x321   : > { %2360 = vst.msk [vmem:[#allocation2 + $0x70] sm:$0xff] %vm2348_vm3, %v2275_v44  ;;  %12457 = vmatmul.mubr.msk.f32.gmra.mrb[8].mxu1 %vm2149_vm2, %v2583_v23 }
 0x322   : > { %12459 = vmatprep.mubr.msk.f32.mxu1 %vm2149_vm2, %v2584_v33 }
 0x323   : > { %2462 = vperm.xlu0 %14082, %v15807_v7   ;;  %2450 = vperm.xlu1 %14081, %v15813_v2  }
 0x324   : > { %v2279_v30 = vpop.permute.xlu1 %2278  ;;  %v2585_v63 = vld [vmem:[#allocation2 + $0x60] sm:$0xff] }
 0x325   : > { %2362 = vst.msk [vmem:[#allocation2 + $0x80] sm:$0xff] %vm2348_vm3, %v2279_v30  ;;  %12460 = vmatmul.mubr.msk.f32.gmra.mrb[10].mxu1 %vm2149_vm2, %v2585_v63 }
 0x326   : > { %12462 = vmatprep.mubr.msk.f32.mxu1 %vm2149_vm2, %v2586_v47 }
 0x327   : > { %2470 = vperm.xlu0 %14082, %v15822_v24   ;;  %2458 = vperm.xlu1 %14081, %v15828_v15  }
 0x328   : > { %v2283_v55 = vpop.permute.xlu1 %2282  ;;  %v2587_v12 = vld [vmem:[#allocation2 + $0x70] sm:$0xff] }
 0x329   : > { %2364 = vst.msk [vmem:[#allocation2 + $0x90] sm:$0xff] %vm2348_vm3, %v2283_v55  ;;  %v2289_v50 = vpop.permute.xlu0 %2288  ;;  %12463 = vmatmul.mubr.msk.f32.gmra.mrb[12].mxu1 %vm2149_vm2, %v2587_v12 }
 0x32a   : > { %2367 = vst.msk [vmem:[#allocation2 + $0xa8] sm:$0xff] %vm2348_vm3, %v2289_v50  ;;  %12465 = vmatprep.mubr.msk.f32.mxu1 %vm2149_vm2, %v2588_v17 }
 0x32b   : > { %2478 = vperm.xlu0 %14082, %v15838_v27   ;;  %2466 = vperm.xlu1 %14081, %v15844_v56  }
 0x32c   : > { %v2287_v38 = vpop.permute.xlu1 %2286  ;;  %v2589_v48 = vld [vmem:[#allocation2 + $0x80] sm:$0xff] }
 0x32d   : > { %2366 = vst.msk [vmem:[#allocation2 + $0xa0] sm:$0xff] %vm2348_vm3, %v2287_v38  ;;  %12466 = vmatmul.mubr.msk.f32.gmra.mrb[14].mxu1 %vm2149_vm2, %v2589_v48 }
 0x32e   : > { %12468 = vmatprep.mubr.msk.f32.mxu1 %vm2149_vm2, %v2590_v22 }
 0x32f   : > { %2486 = vperm.xlu0 %14082, %v15853_v40   ;;  %2474 = vperm.xlu1 %14081, %v15859_v0  }
 0x330   : > { %v2291_v59 = vpop.permute.xlu1 %2290  ;;  %v2591_v34 = vld [vmem:[#allocation2 + $0x90] sm:$0xff] }
 0x331   : > { %2368 = vst.msk [vmem:[#allocation2 + $0xb0] sm:$0xff] %vm2348_vm3, %v2291_v59  ;;  %12469 = vmatmul.mubr.msk.f32.gmra.mrb[16].mxu1 %vm2149_vm2, %v2591_v34  ;;  %v2594_v52 = vld [vmem:[#allocation2 + $0xa8] sm:$0xff] }
 0x332   : > { %12471 = vmatprep.mubr.msk.f32.mxu1 %vm2149_vm2, %v2592_v58  ;;  %v19576_v58 = vmov 2  }
 0x333   : > { %2494 = vperm.xlu0 %14082, %v15868_v51   ;;  %2482 = vperm.xlu1 %14081, %v15874_v16  }
 0x334   : > { %v2593_v11 = vld [vmem:[#allocation2 + $0xa0] sm:$0xff] }
 0x335   : > { %12472 = vmatmul.mubr.msk.f32.gmra.mrb[18].mxu1 %vm2149_vm2, %v2593_v11 }
 0x336   : > { %12474 = vmatprep.mubr.msk.f32.mxu1 %vm2149_vm2, %v2594_v52 }
 0x337   : > { %2502 = vperm.xlu0 %14082, %v15882_v26   ;;  %2490 = vperm.xlu1 %14081, %v15888_v41  }
 0x338   : > { %v2595_v32 = vld [vmem:[#allocation2 + $0xb0] sm:$0xff] }
 0x339   : > { %12475 = vmatmul.mubr.msk.f32.gmra.mrb[20].mxu1 %vm2149_vm2, %v2595_v32 }
 0x33b   : > { %2510 = vperm.xlu0 %14082, %v19569_v4   ;;  %2498 = vperm.xlu1 %14081, %v15896_v36  }
 0x33f   : > { %v2295_v49 = vpop.permute.xlu1 %2294  ;;  %2522 = vperm.xlu0 %14082, %v19570_v61   ;;  %2506 = vperm.xlu1 %14081, %v15903_v42   ;;  %v2382_v61 = vld [vmem:[#allocation2 + $0xf] sm:$0xff] }
 0x340   : > { %2370 = vst.msk [vmem:[#allocation2 + $0xc0] sm:$0xff] %vm2348_vm3, %v2295_v49 }
 0x341   : > { %v2293_v46 = vpop.permute.xlu0 %2292 }
 0x342   : > { %2369 = vst.msk [vmem:[#allocation2 + $0xb8] sm:$0xff] %vm2348_vm3, %v2293_v46 }
 0x343   : > { %2530 = vperm.xlu0 %14082, %v19571_v28   ;;  %14083 = vset.pattern.permute.xlu1 %v19572_v9 }
 0x344   : > { %957 = vperm.xlu1 %14083, %v15671_v45  }
 0x347   : > { %14088 = vset.pattern.permute.xlu0 %v19573_v10  ;;  %v2597_v19 = vld [vmem:[#allocation2 + $0xc0] sm:$0xff]  ;;  %v3441_v10 = vld [vmem:[%s18900_s5 + $0x10] sm:$0xff] }
 0x348   : > { %14084 = vset.pattern.permute.xlu1 %v14151_v62  ;;  %12542 = vmatprep.subr.mxu1 %v3441_v10 }
 0x349   : > { %2514 = vperm.xlu1 %14084, %v15916_v8   ;;  %v2596_v20 = vld [vmem:[#allocation2 + $0xb8] sm:$0xff] }
 0x34a   : > { %12477 = vmatprep.mubr.msk.f32.mxu1 %vm2149_vm2, %v2596_v20 }
 0x34b   : > { %12478 = vmatmul.mubr.msk.f32.gmra.mrb[22].mxu1 %vm2149_vm2, %v2597_v19  ;;  %v16000_v19 = vld [vmem:[#allocation2 + $0x17] sm:$0xff] }
 0x34d   : > { %2518 = vperm.xlu1 %14084, %v19574_v31  }
 0x351   : > { %2526 = vperm.xlu1 %14084, %v15925_v13  }
 0x355   : > { %14085 = vset.pattern.permute.xlu1 %v19575_v3  ;;  %v16005_v3 = vld [vmem:[#allocation2 + $0x1f] sm:$0xff] }
 0x356   : > { %1314 = vperm.xlu1 %14085, %v15931_v57  }
 0x359   : > { %v2297_v29 = vpop.permute.xlu0 %2296 }
 0x35a   : > { %2371 = vst.msk [vmem:[#allocation2 + $0xc8] sm:$0xff] %vm2348_vm3, %v2297_v29  ;;  %14086 = vset.pattern.permute.xlu1 %v19560_v25  ;;  %v14152_v25 = vmov 1  }
 0x35b   : > { %1634 = vperm.xlu1 %14086, %v15931_v57  }
 0x35d   : > { %v2299_v44 = vpop.permute.xlu1 %2298 }
 0x35e   : > { %2372 = vst.msk [vmem:[#allocation2 + $0xd0] sm:$0xff] %vm2348_vm3, %v2299_v44 }
 0x35f   : > { %14087 = vset.pattern.permute.xlu1 %v14151_v62 }
 0x360   : > { %2534 = vperm.xlu1 %14087, %v15671_v45  }
 0x361   : > { %v2598_v23 = vld [vmem:[#allocation2 + $0xc8] sm:$0xff] }
 0x362   : > { %12480 = vmatprep.mubr.msk.f32.mxu1 %vm2149_vm2, %v2598_v23 }
 0x364   : > { %2538 = vperm.xlu1 %14087, %v15931_v57  }
 0x365   : > { %v2301_v33 = vpop.permute.xlu0 %2300  ;;  %v2599_v30 = vld [vmem:[#allocation2 + $0xd0] sm:$0xff] }
 0x366   : > { %2373 = vst.msk [vmem:[#allocation2 + $0xd8] sm:$0xff] %vm2348_vm3, %v2301_v33  ;;  %12481 = vmatmul.mubr.msk.f32.gmra.mrb[24].mxu1 %vm2149_vm2, %v2599_v30  ;;  %v16021_v33 = vld [vmem:[#allocation2 + $0x2f] sm:$0xff] }
 0x368   : > { %14090 = vset.pattern.permute.xlu1 %v14152_v25 }
 0x369   : > { %v2303_v63 = vpop.permute.xlu1 %2302 }
 0x36a   : > { %2374 = vst.msk [vmem:[#allocation2 + $0xe0] sm:$0xff] %vm2348_vm3, %v2303_v63 }
 0x36d   : > { %v2600_v62 = vld [vmem:[#allocation2 + $0xd8] sm:$0xff] }
 0x36e   : > { %12483 = vmatprep.mubr.msk.f32.mxu1 %vm2149_vm2, %v2600_v62 }
 0x371   : > { %v2305_v47 = vpop.permute.xlu1 %2304  ;;  %v2601_v55 = vld [vmem:[#allocation2 + $0xe0] sm:$0xff] }
 0x372   : > { %2375 = vst.msk [vmem:[#allocation2 + $0xe8] sm:$0xff] %vm2348_vm3, %v2305_v47  ;;  %12484 = vmatmul.mubr.msk.f32.gmra.mrb[26].mxu1 %vm2149_vm2, %v2601_v55  ;;  %v16038_v47 = vld [vmem:[#allocation2 + $0x3f] sm:$0xff] }
 0x373   : > { %v16202_v1 = vld [vmem:[#allocation2 + $0xdf] sm:$0xff] }
 0x374   : > { %19605 = vst [vmem:[#allocation81_spill] sm:$0xff] %v16202_v1 }
 0x375   : > { %v2307_v12 = vpop.permute.xlu1 %2306 }
 0x376   : > { %2376 = vst.msk [vmem:[#allocation2 + $0xf0] sm:$0xff] %vm2348_vm3, %v2307_v12  ;;  %v1311_v50 = vpop.permute.xlu0 %1310 }
 0x377   : > { %v1347_v17 = vmul.f32 %v1311_v50, %v15679_v43 }
 0x379   : > { %1441 = vrot.lane.b32.xlu0 %v1347_v17, %s14145_s16  ;;  %v2602_v38 = vld [vmem:[#allocation2 + $0xe8] sm:$0xff] }
 0x37a   : > { %12486 = vmatprep.mubr.msk.f32.mxu1 %vm2149_vm2, %v2602_v38  ;;  %v16054_v17 = vld [vmem:[#allocation2 + $0x4f] sm:$0xff] }
 0x37b   : > { %v1631_v48 = vpop.permute.xlu0 %1630 }
 0x37c   : > { %v1667_v22 = vmul.f32 %v1631_v48, %v15679_v43 }
 0x37d   : > { %1954 = vperm.xlu0 %14088, %v15931_v57   ;;  %v2603_v59 = vld [vmem:[#allocation2 + $0xf0] sm:$0xff] }
 0x37e   : > { %1761 = vrot.lane.b32.xlu1 %v1667_v22, %s14148_s21  ;;  %12487 = vmatmul.mubr.msk.f32.gmra.mrb[28].mxu1 %vm2149_vm2, %v2603_v59  ;;  %v16070_v59 = vld [vmem:[#allocation2 + $0x5f] sm:$0xff] }
 0x37f   : > { %v2311_v34 = vpop.permute.xlu0 %2310 }
 0x380   : > { %2378 = vst.msk [vmem:[#allocation2 + $0x100] sm:$0xff] %vm2348_vm3, %v2311_v34 }
 0x381   : > { %14089 = vset.pattern.permute.xlu0 %v19576_v58 }
 0x382   : > { %3282 = vperm.xlu1 %14090, %v15736_v21   ;;  %1118 = vperm.xlu0 %14089, %v15671_v45   ;;  %v2381_v21 = vld [vmem:[#allocation2 + $0x7] sm:$0xff] }
 0x386   : > { %v1951_v11 = vpop.permute.xlu1 %1950  ;;  %3290 = vperm.xlu1 %14090, %v15750_v60  }
 0x387   : > { %v1987_v52 = vmul.f32 %v1951_v11, %v15679_v43 }
 0x389   : > { %2081 = vrot.lane.b32.xlu0 %v1987_v52, %s14146_s18  ;;  %v16086_v52 = vld [vmem:[#allocation2 + $0x6f] sm:$0xff] }
 0x38a   : > { %v2309_v32 = vpop.permute.xlu1 %2308  ;;  %3294 = vperm.xlu1 %14090, %v15768_v18  }
 0x38b   : > { %2377 = vst.msk [vmem:[#allocation2 + $0xf8] sm:$0xff] %vm2348_vm3, %v2309_v32 }
 0x38d   : > { %1122 = vperm.xlu0 %14089, %v15931_v57  }
 0x38e   : > { %v15968_v4 = vpop.permute.xlu0 %2418  ;;  %v15970_v49 = vpop.permute.xlu1 %2414  ;;  %3302 = vperm.xlu1 %14090, %v15783_v37   ;;  %v15985_v37 = vld [vmem:[#allocation2 + $0x100] sm:$0xff] }
 0x38f   : > { %19577 = vst [vmem:[#allocation57_spill] sm:$0xff] %v15970_v49  ;;  %v2541_v60 = vmul.f32 %v15970_v49, %v2381_v21  ;;  %19579 = vst [vmem:[#allocation30_spill] sm:$0xff] %v15985_v37  ;;  %v2542_v20 = vmul.f32 %v15968_v4, %v2382_v61 }
 0x391   : > { %14092 = vset.pattern.permute.xlu0 %v14152_v25 }
 0x392   : > { %v15975_v46 = vpop.permute.xlu0 %2430  ;;  %v15977_v28 = vpop.permute.xlu1 %2422  ;;  %3310 = vperm.xlu1 %14090, %v15798_v6   ;;  %3286 = vperm.xlu0 %14092, %v15730_v39   ;;  %v15981_v18 = vld [vmem:[#allocation2 + $0xf8] sm:$0xff] }
 0x393   : > { %19578 = vst [vmem:[#allocation58_spill] sm:$0xff] %v15981_v18  ;;  %12489 = vmatprep.mubr.msk.f32.mxu1 %vm2149_vm2, %v15981_v18  ;;  %v2543_v31 = vmul.f32 %v15977_v28, %v16000_v19 }
 0x394   : > { %12490 = vmatmul.mubr.msk.f32.gmra.mrb[30].mxu1 %vm2149_vm2, %v15985_v37 }
 0x395   : > { %12494 = vmatprep.mubr.msk.f32.mxu1 %vm2149_vm2, %v2541_v60  ;;  %v16102_v60 = vld [vmem:[#allocation2 + $0x7f] sm:$0xff] }
 0x396   : > { %v15994_v39 = vpop.permute.xlu0 %2438  ;;  %v15996_v6 = vpop.permute.xlu1 %2426  ;;  %3318 = vperm.xlu1 %14090, %v15813_v2   ;;  %3298 = vperm.xlu0 %14092, %v15744_v14   ;;  %v16016_v2 = vld [vmem:[#allocation2 + $0x27] sm:$0xff] }
 0x397   : > { %19580 = vst [vmem:[#allocation77_spill] sm:$0xff] %v15996_v6  ;;  %v2544_v14 = vmul.f32 %v16005_v3, %v15996_v6  ;;  %v2545_v23 = vmul.f32 %v15975_v46, %v16016_v2 }
 0x398   : > { %12495 = vmatmul.mubr.msk.f32.vlgmr.msra.gmra.mrb[0].mxu1 %vm2149_vm2, %v2542_v20 }
 0x399   : > { %12497 = vmatprep.mubr.msk.f32.mxu1 %vm2149_vm2, %v2543_v31  ;;  %12543 = vmatpush3.msra.mxu1 %v3441_v10 }
 0x39a   : > { %v16008_v29 = vpop.permute.xlu0 %2446  ;;  %v16010_v44 = vpop.permute.xlu1 %2434  ;;  %3326 = vperm.xlu1 %14090, %v15828_v15   ;;  %3306 = vperm.xlu0 %14092, %v15762_v53   ;;  %v16032_v15 = vld [vmem:[#allocation2 + $0x37] sm:$0xff] }
 0x39b   : > { %19581 = vst [vmem:[#allocation7_spill] sm:$0xff] %v16008_v29  ;;  %v2546_v53 = vmul.f32 %v16021_v33, %v16010_v44  ;;  %v2547_v62 = vmul.f32 %v15994_v39, %v16032_v15 }
 0x39c   : > { %12498 = vmatmul.mubr.msk.f32.gmra.mrb[2].mxu1 %vm2149_vm2, %v2544_v14  ;;  %v16118_v14 = vld [vmem:[#allocation2 + $0x8f] sm:$0xff] }
 0x39d   : > { %12500 = vmatprep.mubr.msk.f32.mxu1 %vm2149_vm2, %v2545_v23 }
 0x39e   : > { %v16024_v30 = vpop.permute.xlu0 %2454  ;;  %v16026_v63 = vpop.permute.xlu1 %2442  ;;  %3334 = vperm.xlu1 %14090, %v15844_v56   ;;  %3314 = vperm.xlu0 %14092, %v15777_v5   ;;  %v16048_v56 = vld [vmem:[#allocation2 + $0x47] sm:$0xff] }
 0x39f   : > { %19582 = vst [vmem:[#allocation69_spill] sm:$0xff] %v16024_v30  ;;  %v2548_v5 = vmul.f32 %v16026_v63, %v16038_v47  ;;  %v2549_v50 = vmul.f32 %v16008_v29, %v16048_v56 }
 0x3a0   : > { %12501 = vmatmul.mubr.msk.f32.gmra.mrb[4].mxu1 %vm2149_vm2, %v2546_v53 }
 0x3a1   : > { %12503 = vmatprep.mubr.msk.f32.mxu1 %vm2149_vm2, %v2547_v62  ;;  %v16133_v62 = vld [vmem:[#allocation2 + $0x9f] sm:$0xff] }
 0x3a2   : > { %v16040_v55 = vpop.permute.xlu0 %2462  ;;  %v16042_v12 = vpop.permute.xlu1 %2450  ;;  %3342 = vperm.xlu1 %14090, %v15859_v0   ;;  %3322 = vperm.xlu0 %14092, %v15792_v54   ;;  %v16064_v0 = vld [vmem:[#allocation2 + $0x57] sm:$0xff] }
 0x3a3   : > { %19583 = vst [vmem:[#allocation79_spill] sm:$0xff] %v16040_v55  ;;  %19584 = vst [vmem:[#allocation80_spill] sm:$0xff] %v16042_v12  ;;  %v2550_v54 = vmul.f32 %v16042_v12, %v16054_v17  ;;  %v2551_v22 = vmul.f32 %v16024_v30, %v16064_v0 }
 0x3a4   : > { %12504 = vmatmul.mubr.msk.f32.gmra.mrb[6].mxu1 %vm2149_vm2, %v2548_v5 }
 0x3a5   : > { %12506 = vmatprep.mubr.msk.f32.mxu1 %vm2149_vm2, %v2549_v50  ;;  %v16142_v50 = vld [vmem:[#allocation2 + $0xa7] sm:$0xff] }
 0x3a6   : > { %v16056_v38 = vpop.permute.xlu0 %2470  ;;  %v16058_v48 = vpop.permute.xlu1 %2458  ;;  %3350 = vperm.xlu1 %14090, %v15874_v16   ;;  %3330 = vperm.xlu0 %14092, %v15807_v7   ;;  %v16080_v16 = vld [vmem:[#allocation2 + $0x67] sm:$0xff] }
 0x3a7   : > { %19585 = vst [vmem:[#allocation70_spill] sm:$0xff] %v16056_v38  ;;  %19586 = vst [vmem:[#allocation4_spill] sm:$0xff] %v16058_v48  ;;  %v2552_v7 = vmul.f32 %v16058_v48, %v16070_v59  ;;  %v2553_v11 = vmul.f32 %v16040_v55, %v16080_v16 }
 0x3a8   : > { %12507 = vmatmul.mubr.msk.f32.gmra.mrb[8].mxu1 %vm2149_vm2, %v2550_v54 }
 0x3a9   : > { %12509 = vmatprep.mubr.msk.f32.mxu1 %vm2149_vm2, %v2551_v22  ;;  %v16150_v22 = vld [vmem:[#allocation2 + $0xaf] sm:$0xff] }
 0x3aa   : > { %v16072_v34 = vpop.permute.xlu0 %2478  ;;  %v16074_v58 = vpop.permute.xlu1 %2466  ;;  %3358 = vperm.xlu1 %14090, %v15888_v41   ;;  %3338 = vperm.xlu0 %14092, %v15822_v24   ;;  %v16096_v41 = vld [vmem:[#allocation2 + $0x77] sm:$0xff] }
 0x3ab   : > { %19587 = vst [vmem:[#allocation6_spill] sm:$0xff] %v16072_v34  ;;  %19588 = vst [vmem:[#allocation13_spill] sm:$0xff] %v16074_v58  ;;  %v2554_v24 = vmul.f32 %v16074_v58, %v16086_v52  ;;  %v2555_v61 = vmul.f32 %v16056_v38, %v16096_v41 }
 0x3ac   : > { %12510 = vmatmul.mubr.msk.f32.gmra.mrb[10].mxu1 %vm2149_vm2, %v2552_v7 }
 0x3ad   : > { %12512 = vmatprep.mubr.msk.f32.mxu1 %vm2149_vm2, %v2553_v11 }
 0x3ae   : > { %v16088_v32 = vpop.permute.xlu0 %2486  ;;  %v16090_v21 = vpop.permute.xlu1 %2474  ;;  %3366 = vperm.xlu1 %14090, %v15896_v36   ;;  %3346 = vperm.xlu0 %14092, %v15838_v27   ;;  %v16110_v36 = vld [vmem:[#allocation2 + $0x87] sm:$0xff] }
 0x3af   : > { %19589 = vst [vmem:[#allocation8_spill] sm:$0xff] %v16088_v32  ;;  %19590 = vst [vmem:[#allocation73_spill] sm:$0xff] %v16090_v21  ;;  %v2556_v27 = vmul.f32 %v16090_v21, %v16102_v60  ;;  %v2557_v20 = vmul.f32 %v16072_v34, %v16110_v36 }
 0x3b0   : > { %12513 = vmatmul.mubr.msk.f32.gmra.mrb[12].mxu1 %vm2149_vm2, %v2554_v24 }
 0x3b1   : > { %12515 = vmatprep.mubr.msk.f32.mxu1 %vm2149_vm2, %v2555_v61  ;;  %v14129_v61 = vld [vmem:[%s18897_s2 + $0xd0] sm:$0xff] }
 0x3b2   : > { %v16104_v10 = vpop.permute.xlu1 %2482  ;;  %3374 = vperm.xlu1 %14090, %v15903_v42   ;;  %3354 = vperm.xlu0 %14092, %v15853_v40   ;;  %v16114_v31 = vpop.permute.xlu0 %2494  ;;  %v16126_v42 = vld [vmem:[#allocation2 + $0x97] sm:$0xff] }
 0x3b3   : > { %19591 = vst [vmem:[#allocation14_spill] sm:$0xff] %v16104_v10  ;;  %19592 = vst [vmem:[#allocation32_spill] sm:$0xff] %v16114_v31  ;;  %v2558_v40 = vmul.f32 %v16104_v10, %v16118_v14  ;;  %v2559_v53 = vmul.f32 %v16088_v32, %v16126_v42  ;;  %v2561_v54 = vmul.f32 %v16114_v31, %v16142_v50 }
 0x3b4   : > { %12516 = vmatmul.mubr.msk.f32.gmra.mrb[14].mxu1 %vm2149_vm2, %v2556_v27  ;;  %v16170_v27 = vld [vmem:[#allocation2 + $0xbf] sm:$0xff] }
 0x3b5   : > { %12518 = vmatprep.mubr.msk.f32.mxu1 %vm2149_vm2, %v2557_v20  ;;  %19598 = vst [vmem:[#allocation78_spill] sm:$0xff] %v16170_v27  ;;  %v14130_v20 = vld [vmem:[%s18897_s2 + $0xd8] sm:$0xff] }
 0x3b6   : > { %v16120_v23 = vpop.permute.xlu1 %2490  ;;  %14091 = vset.pattern.permute.xlu1 %v19572_v9  ;;  %3362 = vperm.xlu0 %14092, %v15868_v51   ;;  %v16135_v5 = vpop.permute.xlu0 %2502 }
 0x3b7   : > { %19593 = vst [vmem:[#allocation71_spill] sm:$0xff] %v16120_v23  ;;  %962 = vperm.xlu1 %14091, %v15931_v57   ;;  %19594 = vst [vmem:[#allocation75_spill] sm:$0xff] %v16135_v5  ;;  %v2560_v51 = vmul.f32 %v16120_v23, %v16133_v62 }
 0x3b8   : > { %12519 = vmatmul.mubr.msk.f32.gmra.mrb[16].mxu1 %vm2149_vm2, %v2558_v40 }
 0x3b9   : > { %12521 = vmatprep.mubr.msk.f32.mxu1 %vm2149_vm2, %v2559_v53  ;;  %v16177_v53 = vld [vmem:[#allocation2 + $0xc7] sm:$0xff] }
 0x3ba   : > { %v16137_v9 = vpop.permute.xlu1 %2498  ;;  %3370 = vperm.xlu0 %14092, %v15882_v26   ;;  %v14128_v26 = vld [vmem:[%s18897_s2 + $0xc0] sm:$0xff]  ;;  %v16163_v24 = vpop.permute.xlu0 %2510  ;;  %19599 = vst [vmem:[#allocation76_spill] sm:$0xff] %v16177_v53 }
 0x3bb   : > { %19595 = vst [vmem:[#allocation12_spill] sm:$0xff] %v16137_v9  ;;  %14093 = vset.pattern.permute.xlu1 %v14152_v25  ;;  %v2562_v7 = vmul.f32 %v16137_v9, %v16150_v22  ;;  %v16157_v25 = vld [vmem:[#allocation2 + $0xb7] sm:$0xff]  ;;  %19597 = vst [vmem:[#allocation35_spill] sm:$0xff] %v16163_v24 }
 0x3bc   : > { %3382 = vperm.xlu1 %14093, %v15916_v8   ;;  %12522 = vmatmul.mubr.msk.f32.gmra.mrb[18].mxu1 %vm2149_vm2, %v2560_v51  ;;  %v2563_v8 = vmul.f32 %v16135_v5, %v16157_v25 }
 0x3bd   : > { %12524 = vmatprep.mubr.msk.f32.mxu1 %vm2149_vm2, %v2561_v54  ;;  %v2565_v54 = vmul.f32 %v16163_v24, %v16177_v53  ;;  %v16216_v24 = vld [vmem:[#allocation2 + $0xef] sm:$0xff] }
 0x3be   : > { %3378 = vperm.xlu0 %14092, %v14128_v26   ;;  %v16159_v11 = vpop.permute.xlu1 %2506  ;;  %19609 = vst [vmem:[#allocation11_spill] sm:$0xff] %v16216_v24 }
 0x3bf   : > { %19596 = vst [vmem:[#allocation24_spill] sm:$0xff] %v16159_v11  ;;  %v2564_v40 = vmul.f32 %v16159_v11, %v16170_v27 }
 0x3c0   : > { %3386 = vperm.xlu1 %14093, %v14129_v61   ;;  %12525 = vmatmul.mubr.msk.f32.gmra.mrb[20].mxu1 %vm2149_vm2, %v2562_v7  ;;  %v14131_v7 = vld [vmem:[%s18897_s2 + $0xe8] sm:$0xff]  ;;  %v16191_v61 = vpop.permute.xlu0 %2522 }
 0x3c1   : > { %12527 = vmatprep.mubr.msk.f32.mxu1 %vm2149_vm2, %v2563_v8  ;;  %v16189_v8 = vld [vmem:[#allocation2 + $0xcf] sm:$0xff]  ;;  %19602 = vst [vmem:[#allocation37_spill] sm:$0xff] %v16191_v61 }
 0x3c2   : > { %3390 = vperm.xlu0 %14092, %v14130_v20   ;;  %19601 = vst [vmem:[#allocation15_spill] sm:$0xff] %v16189_v8 }
 0x3c3   : > { %v958_v51 = vpop.permute.xlu1 %957 }
 0x3c4   : > { %3394 = vperm.xlu1 %14093, %v15925_v13   ;;  %12528 = vmatmul.mubr.msk.f32.gmra.mrb[22].mxu1 %vm2149_vm2, %v2564_v40  ;;  %v16198_v40 = vld [vmem:[#allocation2 + $0xd7] sm:$0xff]  ;;  %v16206_v37 = vpop.permute.xlu0 %2530 }
 0x3c5   : > { %12530 = vmatprep.mubr.msk.f32.mxu1 %vm2149_vm2, %v2565_v54  ;;  %19604 = vst [vmem:[#allocation29_spill] sm:$0xff] %v16198_v40  ;;  %19606 = vst [vmem:[#allocation53_spill] sm:$0xff] %v16206_v37 }
 0x3c8   : > { %v16184_v26 = vpop.permute.xlu1 %2514  ;;  %3398 = vperm.xlu1 %14093, %v14131_v7   ;;  %v2568_v7 = vmul.f32 %v16191_v61, %v16202_v1  ;;  %v16228_v1 = vld [vmem:[#allocation2 + $0xf7] sm:$0xff] }
 0x3c9   : > { %19600 = vst [vmem:[#allocation72_spill] sm:$0xff] %v16184_v26  ;;  %v2566_v20 = vmul.f32 %v16184_v26, %v16189_v8  ;;  %19611 = vst [vmem:[#allocation19_spill] sm:$0xff] %v16228_v1 }
 0x3cb   : > { %12531 = vmatmul.mubr.msk.f32.gmra.mrb[24].mxu1 %vm2149_vm2, %v2566_v20  ;;  %v16212_v20 = vld [vmem:[#allocation2 + $0xe7] sm:$0xff] }
 0x3cc   : > { %v16196_v13 = vpop.permute.xlu1 %2518  ;;  %19608 = vst [vmem:[#allocation23_spill] sm:$0xff] %v16212_v20 }
 0x3cd   : > { %19603 = vst [vmem:[#allocation16_spill] sm:$0xff] %v16196_v13  ;;  %v2567_v54 = vmul.f32 %v16196_v13, %v16198_v40  ;;  %v2570_v13 = vmul.f32 %v16206_v37, %v16216_v24  ;;  %v2186_v24 = vld [vmem:[%s15156_s24 + $0xf0] sm:$0xff] }
 0x3ce   : > { %v3249_v40 = vld [vmem:[#allocation2 + $0x9] sm:$0xff]  ;;  %2218 = vst.msk [vmem:[#allocation2 + $0x108] sm:$0xff] %vm472_vm1, %v2186_v24 }
 0x3cf   : > { %12533 = vmatprep.mubr.msk.f32.mxu1 %vm2149_vm2, %v2567_v54 }
 0x3d0   : > { %v16209_v18 = vpop.permute.xlu1 %2526  ;;  %12534 = vmatmul.mubr.msk.f32.gmra.mrb[26].mxu1 %vm2149_vm2, %v2568_v7 }
 0x3d1   : > { %19607 = vst [vmem:[#allocation39_spill] sm:$0xff] %v16209_v18  ;;  %v2569_v26 = vmul.f32 %v16209_v18, %v16212_v20 }
 0x3d3   : > { %12536 = vmatprep.mubr.msk.f32.mxu1 %vm2149_vm2, %v2569_v26 }
 0x3d4   : > { %12537 = vmatmul.mubr.msk.f32.gmra.mrb[28].mxu1 %vm2149_vm2, %v2570_v13  ;;  %v16236_v13 = vld [vmem:[#allocation2 + $0xff] sm:$0xff] }
 0x3d5   : > { %v1315_v61 = vpop.permute.xlu1 %1314  ;;  %19613 = vst [vmem:[#allocation38_spill] sm:$0xff] %v16236_v13 }
 0x3d6   : > { %v1348_v54 = vmul.f32 %v15675_v35, %v1315_v61 }
 0x3d8   : > { %1443 = vrot.lane.b32.xlu0 %v1348_v54, %s14145_s16 }
 0x3da   : > { %v1635_v7 = vpop.permute.xlu1 %1634 }
 0x3db   : > { %v1668_v18 = vmul.f32 %v15675_v35, %v1635_v7 }
 0x3dc   : > { %3402 = vperm.xlu0 %14092, %v15671_v45  }
 0x3df   : > { %v16226_v20 = vpop.permute.xlu1 %2534 }
 0x3e0   : > { %19610 = vst [vmem:[#allocation42_spill] sm:$0xff] %v16226_v20  ;;  %1763 = vrot.lane.b32.xlu0 %v1668_v18, %s14148_s21  ;;  %v2571_v26 = vmul.f32 %v16226_v20, %v16228_v1 }
 0x3e2   : > { %12539 = vmatprep.mubr.msk.f32.mxu1 %vm2149_vm2, %v2571_v26  ;;  %v16248_v26 = vld [vmem:[%s18899_s4] ss:$0 sm:$0xff] }
 0x3e3   : > { %v16234_v61 = vpop.permute.xlu1 %2538  ;;  %v995_v1 = vmul.f32 %v16248_v26, %v958_v51 }
 0x3e4   : > { %19612 = vst [vmem:[#allocation44_spill] sm:$0xff] %v16234_v61  ;;  %v2572_v45 = vmul.f32 %v16234_v61, %v16236_v13 }
 0x3e6   : > { %12540 = vmatmul.mubr.msk.f32.gmra.mrb[30].mxu1 %vm2149_vm2, %v2572_v45 }
 0x3eb   : > { %v1442_v54 = vpop.permute.xlu0 %1441 }
 0x3f0   : > { %v1762_v37 = vpop.permute.xlu1 %1761 }
 0x3fc   : > { %v1955_v7 = vpop.permute.xlu0 %1954 }
 0x401   : > { %v16243_v18 = vpop.permute.xlu1 %3282  ;;  %v1119_v20 = vpop.permute.xlu0 %1118 }
 0x402   : > { %19614 = vst [vmem:[#allocation45_spill] sm:$0xff] %v16243_v18  ;;  %v1155_v61 = vmul.f32 %v1119_v20, %v15679_v43  ;;  %v3409_v45 = vmul.f32 %v16243_v18, %v3249_v40  ;;  %v3250_v20 = vld [vmem:[#allocation2 + $0x11] sm:$0xff] }
 0x404   : > { %v1187_v13 = vadd.f32 %v1155_v61, %v995_v1  ;;  %12544 = vmatprep.mubr.msk.f32.mxu1 %vm2149_vm2, %v3409_v45  ;;  %v16294_v45 = vld [vmem:[#allocation2 + $0x31] sm:$0xff] }
 0x405   : > { %v16254_v11 = vpop.permute.xlu1 %3290  ;;  %v2082_v5 = vpop.permute.xlu0 %2081  ;;  %19622 = vst [vmem:[#allocation18_spill] sm:$0xff] %v16294_v45 }
 0x406   : > { %19615 = vst [vmem:[#allocation10_spill] sm:$0xff] %v16254_v11  ;;  %v1507_v24 = vadd.f32 %v1442_v54, %v1187_v13  ;;  %v16287_v13 = vld [vmem:[#allocation2 + $0x29] sm:$0xff] }
 0x408   : > { %v1827_v8 = vadd.f32 %v1762_v37, %v1507_v24  ;;  %v1988_v37 = vmul.f32 %v15675_v35, %v1955_v7 }
 0x409   : > { %v16256_v53 = vpop.permute.xlu1 %3294 }
 0x40a   : > { %19616 = vst [vmem:[#allocation48_spill] sm:$0xff] %v16256_v53  ;;  %v2147_v9 = vadd.f32 %v2082_v5, %v1827_v8  ;;  %v16271_v5 = vld [vmem:[#allocation2 + $0x19] sm:$0xff] }
 0x40c   : > { %2312 = vrot.lane.b32.xlu1 %v2147_v9, %s14150_s14  ;;  %v1123_v27 = vpop.permute.xlu0 %1122  ;;  %v3411_v9 = vmul.f32 %v16254_v11, %v16271_v5 }
 0x40d   : > { %v16260_v51 = vmul.f32 %v15675_v35, %v1123_v27  ;;  %v16262_v43 = vpop.permute.xlu1 %3302  ;;  %v16280_v27 = vld [vmem:[#allocation2 + $0x21] sm:$0xff] }
 0x40e   : > { %19617 = vst [vmem:[#allocation9_spill] sm:$0xff] %v16262_v43  ;;  %v3412_v54 = vmul.f32 %v16280_v27, %v16256_v53  ;;  %v16315_v53 = vld [vmem:[#allocation2 + $0x49] sm:$0xff] }
 0x40f   : > { %19629 = vst [vmem:[#allocation46_spill] sm:$0xff] %v16315_v53 }
 0x410   : > { %3406 = vperm.xlu1 %14093, %v15931_v57   ;;  %v3859_v57 = vld [vmem:[%s18900_s5 + $0x18] sm:$0xff] }
 0x411   : > { %v16265_v1 = vpop.permute.xlu1 %3310  ;;  %v16267_v40 = vpop.permute.xlu0 %3286  ;;  %12592 = vmatprep.subr.mxu1 %v3859_v57 }
 0x412   : > { %19618 = vst [vmem:[#allocation5_spill] sm:$0xff] %v16265_v1  ;;  %19619 = vst [vmem:[#allocation17_spill] sm:$0xff] %v16267_v40  ;;  %v3410_v61 = vmul.f32 %v16267_v40, %v3250_v20 }
 0x414   : > { %2083 = vrot.lane.b32.xlu1 %v1988_v37, %s14146_s18  ;;  %12545 = vmatmul.mubr.msk.f32.vlgmr.msra.gmra.mrb[0].mxu1 %vm2149_vm2, %v3410_v61  ;;  %v16301_v37 = vld [vmem:[#allocation2 + $0x39] sm:$0xff]  ;;  %v3414_v61 = vmul.f32 %v16294_v45, %v16262_v43 }
 0x415   : > { %v16282_v8 = vpop.permute.xlu1 %3318  ;;  %v16284_v35 = vpop.permute.xlu0 %3298  ;;  %12547 = vmatprep.mubr.msk.f32.mxu1 %vm2149_vm2, %v3411_v9  ;;  %12593 = vmatpush3.msra.mxu1 %v3859_v57  ;;  %19625 = vst [vmem:[#allocation36_spill] sm:$0xff] %v16301_v37 }
 0x416   : > { %19620 = vst [vmem:[#allocation41_spill] sm:$0xff] %v16282_v8  ;;  %19621 = vst [vmem:[#allocation54_spill] sm:$0xff] %v16284_v35  ;;  %v3413_v7 = vmul.f32 %v16284_v35, %v16287_v13  ;;  %v16313_v35 = vld [vmem:[#allocation2 + $0x41] sm:$0xff] }
 0x417   : > { %19628 = vst [vmem:[#allocation20_spill] sm:$0xff] %v16313_v35 }
 0x418   : > { %12548 = vmatmul.mubr.msk.f32.gmra.mrb[2].mxu1 %vm2149_vm2, %v3412_v54 }
 0x419   : > { %v16296_v24 = vpop.permute.xlu1 %3326  ;;  %v16298_v20 = vpop.permute.xlu0 %3306  ;;  %12550 = vmatprep.mubr.msk.f32.mxu1 %vm2149_vm2, %v3413_v7  ;;  %v3416_v7 = vmul.f32 %v16265_v1, %v16313_v35 }
 0x41a   : > { %19623 = vst [vmem:[#allocation43_spill] sm:$0xff] %v16296_v24  ;;  %19624 = vst [vmem:[#allocation49_spill] sm:$0xff] %v16298_v20  ;;  %v3415_v9 = vmul.f32 %v16298_v20, %v16301_v37  ;;  %v16327_v37 = vld [vmem:[#allocation2 + $0x51] sm:$0xff] }
 0x41b   : > { %19632 = vst [vmem:[#allocation40_spill] sm:$0xff] %v16327_v37  ;;  %v3418_v45 = vmul.f32 %v16282_v8, %v16327_v37 }
 0x41c   : > { %12551 = vmatmul.mubr.msk.f32.gmra.mrb[4].mxu1 %vm2149_vm2, %v3414_v61 }
 0x41d   : > { %v16308_v57 = vpop.permute.xlu1 %3334  ;;  %v16310_v54 = vpop.permute.xlu0 %3314  ;;  %12553 = vmatprep.mubr.msk.f32.mxu1 %vm2149_vm2, %v3415_v9  ;;  %v16329_v9 = vld [vmem:[#allocation2 + $0x59] sm:$0xff] }
 0x41e   : > { %19626 = vst [vmem:[#allocation31_spill] sm:$0xff] %v16308_v57  ;;  %19627 = vst [vmem:[#allocation27_spill] sm:$0xff] %v16310_v54  ;;  %v3417_v43 = vmul.f32 %v16310_v54, %v16315_v53  ;;  %v16341_v53 = vld [vmem:[#allocation2 + $0x61] sm:$0xff] }
 0x41f   : > { %19633 = vst [vmem:[#allocation59_spill] sm:$0xff] %v16329_v9  ;;  %19636 = vst [vmem:[#allocation60_spill] sm:$0xff] %v16341_v53  ;;  %v3420_v35 = vmul.f32 %v16296_v24, %v16341_v53 }
 0x420   : > { %12554 = vmatmul.mubr.msk.f32.gmra.mrb[6].mxu1 %vm2149_vm2, %v3416_v7 }
 0x421   : > { %v16322_v20 = vpop.permute.xlu1 %3342  ;;  %v16324_v61 = vpop.permute.xlu0 %3322  ;;  %12556 = vmatprep.mubr.msk.f32.mxu1 %vm2149_vm2, %v3417_v43  ;;  %v16343_v43 = vld [vmem:[#allocation2 + $0x69] sm:$0xff] }
 0x422   : > { %19630 = vst [vmem:[#allocation61_spill] sm:$0xff] %v16322_v20  ;;  %19631 = vst [vmem:[#allocation33_spill] sm:$0xff] %v16324_v61  ;;  %v3419_v1 = vmul.f32 %v16324_v61, %v16329_v9  ;;  %v16355_v9 = vld [vmem:[#allocation2 + $0x71] sm:$0xff] }
 0x423   : > { %19637 = vst [vmem:[#allocation51_spill] sm:$0xff] %v16343_v43  ;;  %19640 = vst [vmem:[#allocation63_spill] sm:$0xff] %v16355_v9  ;;  %v3422_v37 = vmul.f32 %v16308_v57, %v16355_v9 }
 0x424   : > { %12557 = vmatmul.mubr.msk.f32.gmra.mrb[8].mxu1 %vm2149_vm2, %v3418_v45 }
 0x425   : > { %v16336_v54 = vpop.permute.xlu1 %3350  ;;  %v16338_v7 = vpop.permute.xlu0 %3330  ;;  %12559 = vmatprep.mubr.msk.f32.mxu1 %vm2149_vm2, %v3419_v1  ;;  %v16357_v1 = vld [vmem:[#allocation2 + $0x79] sm:$0xff] }
 0x426   : > { %19634 = vst [vmem:[#allocation50_spill] sm:$0xff] %v16336_v54  ;;  %19635 = vst [vmem:[#allocation64_spill] sm:$0xff] %v16338_v7  ;;  %v3421_v8 = vmul.f32 %v16338_v7, %v16343_v43  ;;  %v16369_v43 = vld [vmem:[#allocation2 + $0x81] sm:$0xff] }
 0x427   : > { %19641 = vst [vmem:[#allocation25_spill] sm:$0xff] %v16357_v1  ;;  %19644 = vst [vmem:[#allocation26_spill] sm:$0xff] %v16369_v43  ;;  %v3424_v53 = vmul.f32 %v16322_v20, %v16369_v43 }
 0x428   : > { %12560 = vmatmul.mubr.msk.f32.gmra.mrb[10].mxu1 %vm2149_vm2, %v3420_v35 }
 0x429   : > { %v16350_v61 = vpop.permute.xlu1 %3358  ;;  %v16352_v45 = vpop.permute.xlu0 %3338  ;;  %12562 = vmatprep.mubr.msk.f32.mxu1 %vm2149_vm2, %v3421_v8  ;;  %v16371_v8 = vld [vmem:[#allocation2 + $0x89] sm:$0xff] }
 0x42a   : > { %19638 = vst [vmem:[#allocation55_spill] sm:$0xff] %v16350_v61  ;;  %19639 = vst [vmem:[#allocation47_spill] sm:$0xff] %v16352_v45  ;;  %v3423_v24 = vmul.f32 %v16352_v45, %v16357_v1  ;;  %v16383_v1 = vld [vmem:[#allocation2 + $0x91] sm:$0xff] }
 0x42b   : > { %19645 = vst [vmem:[#allocation65_spill] sm:$0xff] %v16371_v8  ;;  %19648 = vst [vmem:[#allocation52_spill] sm:$0xff] %v16383_v1  ;;  %v3426_v9 = vmul.f32 %v16336_v54, %v16383_v1 }
 0x42c   : > { %12563 = vmatmul.mubr.msk.f32.gmra.mrb[12].mxu1 %vm2149_vm2, %v3422_v37 }
 0x42d   : > { %v16364_v7 = vpop.permute.xlu1 %3366  ;;  %v16366_v35 = vpop.permute.xlu0 %3346  ;;  %12565 = vmatprep.mubr.msk.f32.mxu1 %vm2149_vm2, %v3423_v24  ;;  %v16385_v24 = vld [vmem:[#allocation2 + $0x99] sm:$0xff] }
 0x42e   : > { %19642 = vst [vmem:[#allocation66_spill] sm:$0xff] %v16364_v7  ;;  %19643 = vst [vmem:[#allocation34_spill] sm:$0xff] %v16366_v35  ;;  %v3425_v57 = vmul.f32 %v16366_v35, %v16371_v8  ;;  %v16397_v8 = vld [vmem:[#allocation2 + $0xa9] sm:$0xff] }
 0x42f   : > { %19649 = vst [vmem:[#allocation68_spill] sm:$0xff] %v16385_v24  ;;  %19651 = vst [vmem:[#allocation21_spill] sm:$0xff] %v16397_v8 }
 0x430   : > { %12566 = vmatmul.mubr.msk.f32.gmra.mrb[14].mxu1 %vm2149_vm2, %v3424_v53  ;;  %v16395_v53 = vld [vmem:[#allocation2 + $0xa1] sm:$0xff] }
 0x431   : > { %v16378_v45 = vpop.permute.xlu1 %3374  ;;  %v16380_v37 = vpop.permute.xlu0 %3354  ;;  %12568 = vmatprep.mubr.msk.f32.mxu1 %vm2149_vm2, %v3425_v57  ;;  %v3428_v43 = vmul.f32 %v16350_v61, %v16395_v53 }
 0x432   : > { %19646 = vst [vmem:[#allocation56_spill] sm:$0xff] %v16378_v45  ;;  %19647 = vst [vmem:[#allocation67_spill] sm:$0xff] %v16380_v37  ;;  %v3427_v20 = vmul.f32 %v16380_v37, %v16385_v24  ;;  %v16410_v37 = vld [vmem:[#allocation2 + $0xb9] sm:$0xff] }
 0x433   : > { %19653 = vst [vmem:[#allocation28_spill] sm:$0xff] %v16410_v37 }
 0x434   : > { %12569 = vmatmul.mubr.msk.f32.gmra.mrb[16].mxu1 %vm2149_vm2, %v3426_v9 }
 0x435   : > { %v16392_v35 = vpop.permute.xlu0 %3362  ;;  %12571 = vmatprep.mubr.msk.f32.mxu1 %vm2149_vm2, %v3427_v20  ;;  %v16408_v20 = vld [vmem:[#allocation2 + $0xb1] sm:$0xff] }
 0x436   : > { %19650 = vst [vmem:[#allocation74_spill] sm:$0xff] %v16392_v35  ;;  %v963_v57 = vpop.permute.xlu1 %962  ;;  %v3429_v54 = vmul.f32 %v16392_v35, %v16397_v8  ;;  %v3430_v61 = vmul.f32 %v16364_v7, %v16408_v20 }
 0x437   : > { %v996_v1 = vmul.f32 %v16248_v26, %v963_v57 }
 0x438   : > { %12572 = vmatmul.mubr.msk.f32.gmra.mrb[18].mxu1 %vm2149_vm2, %v3428_v43  ;;  %v16425_v43 = vld [vmem:[#allocation2 + $0xc9] sm:$0xff] }
 0x439   : > { %v16405_v9 = vpop.permute.xlu0 %3370  ;;  %12574 = vmatprep.mubr.msk.f32.mxu1 %vm2149_vm2, %v3429_v54  ;;  %v1188_v24 = vadd.f32 %v16260_v51, %v996_v1  ;;  %v16423_v54 = vld [vmem:[#allocation2 + $0xc1] sm:$0xff]  ;;  %19657 = vst [vmem:[#allocation84_spill] sm:$0xff] %v16425_v43 }
 0x43a   : > { %19652 = vst [vmem:[#allocation62_spill] sm:$0xff] %v16405_v9  ;;  %v3431_v35 = vmul.f32 %v16405_v9, %v16410_v37  ;;  %19656 = vst [vmem:[#allocation83_spill] sm:$0xff] %v16423_v54  ;;  %v3432_v51 = vmul.f32 %v16378_v45, %v16423_v54  ;;  %v16439_v9 = vld [vmem:[#allocation2 + $0xd9] sm:$0xff]  ;;  %v16453_v45 = vld [vmem:[#allocation2 + $0xe9] sm:$0xff]  ;;  %v3829_v54 = vmul.f32 %v15977_v28, %v16016_v2 }
 0x43b   : > { %v16417_v8 = vpop.permute.xlu1 %3382  ;;  %19660 = vst [vmem:[#allocation87_spill] sm:$0xff] %v16439_v9  ;;  %19664 = vst [vmem:[#allocation91_spill] sm:$0xff] %v16453_v45  ;;  %v3832_v2 = vmul.f32 %v16010_v44, %v16038_v47  ;;  %v3836_v47 = vmul.f32 %v16042_v12, %v16070_v59  ;;  %v3840_v59 = vmul.f32 %v16074_v58, %v16102_v60 }
 0x43c   : > { %19654 = vst [vmem:[#allocation22_spill] sm:$0xff] %v16417_v8  ;;  %12575 = vmatmul.mubr.msk.f32.gmra.mrb[20].mxu1 %vm2149_vm2, %v3430_v61  ;;  %v16435_v61 = vld [vmem:[#allocation2 + $0xd1] sm:$0xff]  ;;  %v3844_v60 = vmul.f32 %v16104_v10, %v16133_v62 }
 0x43d   : > { %v16420_v26 = vpop.permute.xlu0 %3378  ;;  %12577 = vmatprep.mubr.msk.f32.mxu1 %vm2149_vm2, %v3431_v35  ;;  %19659 = vst [vmem:[#allocation86_spill] sm:$0xff] %v16435_v61  ;;  %v3434_v35 = vmul.f32 %v16417_v8, %v16435_v61 }
 0x43e   : > { %19655 = vst [vmem:[#allocation82_spill] sm:$0xff] %v16420_v26  ;;  %v3433_v1 = vmul.f32 %v16420_v26, %v16425_v43 }
 0x43f   : > { %v16431_v57 = vpop.permute.xlu1 %3386 }
 0x440   : > { %19658 = vst [vmem:[#allocation85_spill] sm:$0xff] %v16431_v57  ;;  %12578 = vmatmul.mubr.msk.f32.gmra.mrb[22].mxu1 %vm2149_vm2, %v3432_v51  ;;  %v3435_v26 = vmul.f32 %v16431_v57, %v16439_v9  ;;  %v16449_v51 = vld [vmem:[#allocation2 + $0xe1] sm:$0xff] }
 0x441   : > { %12580 = vmatprep.mubr.msk.f32.mxu1 %vm2149_vm2, %v3433_v1  ;;  %v16441_v7 = vpop.permute.xlu0 %3390  ;;  %19663 = vst [vmem:[#allocation90_spill] sm:$0xff] %v16449_v51 }
 0x442   : > { %19661 = vst [vmem:[#allocation88_spill] sm:$0xff] %v16441_v7  ;;  %v3436_v1 = vmul.f32 %v16441_v7, %v16449_v51  ;;  %v4245_v7 = vld [vmem:[%s18900_s5 + $0x20] sm:$0xff] }
 0x443   : > { %v16443_v37 = vpop.permute.xlu1 %3394  ;;  %12642 = vmatprep.subr.mxu1 %v4245_v7 }
 0x444   : > { %19662 = vst [vmem:[#allocation89_spill] sm:$0xff] %v16443_v37  ;;  %12581 = vmatmul.mubr.msk.f32.gmra.mrb[24].mxu1 %vm2149_vm2, %v3434_v35  ;;  %v3437_v61 = vmul.f32 %v16443_v37, %v16453_v45  ;;  %v16461_v35 = vld [vmem:[#allocation2 + $0xf1] sm:$0xff]  ;;  %v16471_v37 = vld [vmem:[#allocation2 + $0xf9] sm:$0xff] }
 0x445   : > { %12583 = vmatprep.mubr.msk.f32.mxu1 %vm2149_vm2, %v3435_v26  ;;  %19666 = vst [vmem:[#allocation93_spill] sm:$0xff] %v16461_v35  ;;  %19668 = vst [vmem:[#allocation95_spill] sm:$0xff] %v16471_v37 }
 0x447   : > { %v16455_v8 = vpop.permute.xlu1 %3398 }
 0x448   : > { %19665 = vst [vmem:[#allocation92_spill] sm:$0xff] %v16455_v8  ;;  %12584 = vmatmul.mubr.msk.f32.gmra.mrb[26].mxu1 %vm2149_vm2, %v3436_v1  ;;  %v3438_v26 = vmul.f32 %v16455_v8, %v16461_v35  ;;  %v2187_v8 = vld [vmem:[%s15156_s24 + $0xf8] sm:$0xff] }
 0x449   : > { %12586 = vmatprep.mubr.msk.f32.mxu1 %vm2149_vm2, %v3437_v61  ;;  %2219 = vst.msk [vmem:[#allocation2 + $0x110] sm:$0xff] %vm472_vm1, %v2187_v8  ;;  %v3828_v8 = vmul.f32 %v16005_v3, %v15968_v4  ;;  %v3831_v3 = vmul.f32 %v15975_v46, %v16032_v15  ;;  %v3835_v15 = vmul.f32 %v16008_v29, %v16064_v0 }
 0x44a   : > { %v1444_v57 = vpop.permute.xlu0 %1443  ;;  %v3839_v0 = vmul.f32 %v16040_v55, %v16096_v41  ;;  %v3843_v41 = vmul.f32 %v16072_v34, %v16126_v42  ;;  %v3847_v42 = vmul.f32 %v16114_v31, %v16157_v25 }
 0x44b   : > { %v1508_v9 = vadd.f32 %v1444_v57, %v1188_v24  ;;  %v16496_v24 = vld [vmem:[%s18900_s5 + $0x28] sm:$0xff]  ;;  %v19673_v57 = vld [vmem:[#allocation75_spill] sm:$0xff] }
 0x44c   : > { %12587 = vmatmul.mubr.msk.f32.gmra.mrb[28].mxu1 %vm2149_vm2, %v3438_v26 }
 0x45b   : > { %v16469_v51 = vpop.permute.xlu0 %3402 }
 0x45c   : > { %19667 = vst [vmem:[#allocation94_spill] sm:$0xff] %v16469_v51  ;;  %v3439_v61 = vmul.f32 %v16469_v51, %v16471_v37  ;;  %v3827_v51 = vmul.f32 %v15970_v49, %v16000_v19  ;;  %v3830_v19 = vmul.f32 %v16021_v33, %v15996_v6 }
 0x45e   : > { %12589 = vmatprep.mubr.msk.f32.mxu1 %vm2149_vm2, %v3439_v61 }
 0x45f   : > { %v1764_v26 = vpop.permute.xlu0 %1763 }
 0x460   : > { %v1828_v37 = vadd.f32 %v1764_v26, %v1508_v9  ;;  %v19670_v9 = vld [vmem:[#allocation78_spill] sm:$0xff]  ;;  %v19675_v26 = vld [vmem:[#allocation24_spill] sm:$0xff] }
 0x47e   : > { %v2313_v1 = vpop.permute.xlu1 %2312 }
 0x47f   : > { %2379 = vst.msk [vmem:[#allocation2 + $0x108] sm:$0xff] %vm2348_vm3, %v2313_v1 }
 0x486   : > { %v16481_v45 = vld [vmem:[#allocation2 + $0x101] sm:$0xff] }
 0x48f   : > { %v16479_v35 = vpop.permute.xlu1 %3406 }
 0x490   : > { %19669 = vst [vmem:[#allocation96_spill] sm:$0xff] %v16479_v35  ;;  %v3440_v43 = vmul.f32 %v16479_v35, %v16481_v45 }
 0x492   : > { %12590 = vmatmul.mubr.msk.f32.gmra.mrb[30].mxu1 %vm2149_vm2, %v3440_v43  ;;  %v19672_v43 = vld [vmem:[#allocation76_spill] sm:$0xff] }
 0x493   : > { %v2084_v61 = vpop.permute.xlu1 %2083  ;;  %12594 = vmatprep.mubr.msk.f32.mxu1 %vm2149_vm2, %v3827_v51  ;;  %v19674_v51 = vld [vmem:[#allocation15_spill] sm:$0xff] }
 0x494   : > { %v2148_v1 = vadd.f32 %v2084_v61, %v1828_v37  ;;  %v3833_v37 = vmul.f32 %v15994_v39, %v16048_v56  ;;  %v3837_v56 = vmul.f32 %v16024_v30, %v16080_v16  ;;  %v3841_v16 = vmul.f32 %v16056_v38, %v16110_v36  ;;  %v19676_v61 = vld [vmem:[#allocation29_spill] sm:$0xff] }
 0x495   : > { %v3845_v36 = vmul.f32 %v16088_v32, %v16142_v50  ;;  %v3849_v50 = vmul.f32 %v19673_v57, %v19672_v43 }
 0x496   : > { %2314 = vrot.lane.b32.xlu0 %v2148_v1, %s14150_s14  ;;  %12595 = vmatmul.mubr.msk.f32.vlgmr.msra.gmra.mrb[0].mxu1 %vm2149_vm2, %v3828_v8  ;;  %v19677_v8 = vld [vmem:[#allocation35_spill] sm:$0xff]  ;;  %v19678_v1 = vld [vmem:[#allocation81_spill] sm:$0xff] }
 0x497   : > { %12597 = vmatprep.mubr.msk.f32.mxu1 %vm2149_vm2, %v3829_v54  ;;  %12643 = vmatpush3.msra.mxu1 %v4245_v7  ;;  %v3834_v7 = vmul.f32 %v16026_v63, %v16054_v17  ;;  %v3838_v17 = vmul.f32 %v16058_v48, %v16086_v52  ;;  %v3842_v52 = vmul.f32 %v16090_v21, %v16118_v14  ;;  %v19671_v54 = vld [vmem:[#allocation12_spill] sm:$0xff] }
 0x498   : > { %12692 = vmatprep.subr.mxu1 %v16496_v24  ;;  %v3846_v14 = vmul.f32 %v16120_v23, %v16150_v22  ;;  %v3848_v62 = vmul.f32 %v19671_v54, %v19670_v9  ;;  %v3850_v22 = vmul.f32 %v19675_v26, %v19674_v51  ;;  %v3851_v25 = vmul.f32 %v19677_v8, %v19676_v61  ;;  %v16598_v51 = vld [vmem:[#allocation2 + $0x20] sm:$0xff]  ;;  %v16607_v61 = vld [vmem:[#allocation2 + $0x28] sm:$0xff] }
 0x499   : > { %19691 = vst [vmem:[#allocation76_spill] sm:$0xff] %v16598_v51 }
 0x49a   : > { %12598 = vmatmul.mubr.msk.f32.gmra.mrb[2].mxu1 %vm2149_vm2, %v3830_v19  ;;  %v19679_v19 = vld [vmem:[#allocation72_spill] sm:$0xff] }
 0x49b   : > { %12600 = vmatprep.mubr.msk.f32.mxu1 %vm2149_vm2, %v3831_v3  ;;  %v3852_v3 = vmul.f32 %v19679_v19, %v19678_v1  ;;  %v16617_v1 = vld [vmem:[#allocation2 + $0x38] sm:$0xff] }
 0x49e   : > { %12601 = vmatmul.mubr.msk.f32.gmra.mrb[4].mxu1 %vm2149_vm2, %v3832_v2  ;;  %v19680_v2 = vld [vmem:[#allocation23_spill] sm:$0xff] }
 0x49f   : > { %12603 = vmatprep.mubr.msk.f32.mxu1 %vm2149_vm2, %v3833_v37  ;;  %v19681_v37 = vld [vmem:[#allocation16_spill] sm:$0xff] }
 0x4a2   : > { %12604 = vmatmul.mubr.msk.f32.gmra.mrb[6].mxu1 %vm2149_vm2, %v3834_v7  ;;  %v3853_v7 = vmul.f32 %v19681_v37, %v19680_v2  ;;  %v16629_v2 = vld [vmem:[#allocation2 + $0x50] sm:$0xff] }
 0x4a3   : > { %12606 = vmatprep.mubr.msk.f32.mxu1 %vm2149_vm2, %v3835_v15  ;;  %v19682_v15 = vld [vmem:[#allocation11_spill] sm:$0xff] }
 0x4a6   : > { %12607 = vmatmul.mubr.msk.f32.gmra.mrb[8].mxu1 %vm2149_vm2, %v3836_v47  ;;  %v19683_v47 = vld [vmem:[#allocation37_spill] sm:$0xff] }
 0x4a7   : > { %12609 = vmatprep.mubr.msk.f32.mxu1 %vm2149_vm2, %v3837_v56  ;;  %v3854_v56 = vmul.f32 %v19683_v47, %v19682_v15  ;;  %v16637_v15 = vld [vmem:[#allocation2 + $0x60] sm:$0xff] }
 0x4aa   : > { %12610 = vmatmul.mubr.msk.f32.gmra.mrb[10].mxu1 %vm2149_vm2, %v3838_v17  ;;  %v19684_v17 = vld [vmem:[#allocation19_spill] sm:$0xff] }
 0x4ab   : > { %12612 = vmatprep.mubr.msk.f32.mxu1 %vm2149_vm2, %v3839_v0  ;;  %v19685_v0 = vld [vmem:[#allocation39_spill] sm:$0xff] }
 0x4ae   : > { %12613 = vmatmul.mubr.msk.f32.gmra.mrb[12].mxu1 %vm2149_vm2, %v3840_v59  ;;  %v3855_v59 = vmul.f32 %v19685_v0, %v19684_v17  ;;  %v16645_v17 = vld [vmem:[#allocation2 + $0x70] sm:$0xff] }
 0x4af   : > { %12615 = vmatprep.mubr.msk.f32.mxu1 %vm2149_vm2, %v3841_v16  ;;  %v16579_v16 = vld [vmem:[#allocation2 + $0x107] sm:$0xff]  ;;  %19692 = vst [vmem:[#allocation15_spill] sm:$0xff] %v16645_v17 }
 0x4b2   : > { %12616 = vmatmul.mubr.msk.f32.gmra.mrb[14].mxu1 %vm2149_vm2, %v3842_v52  ;;  %v19686_v52 = vld [vmem:[#allocation38_spill] sm:$0xff] }
 0x4b3   : > { %12618 = vmatprep.mubr.msk.f32.mxu1 %vm2149_vm2, %v3843_v41  ;;  %v19687_v41 = vld [vmem:[#allocation53_spill] sm:$0xff] }
 0x4b6   : > { %12619 = vmatmul.mubr.msk.f32.gmra.mrb[16].mxu1 %vm2149_vm2, %v3844_v60  ;;  %v3856_v60 = vmul.f32 %v19687_v41, %v19686_v52  ;;  %v16653_v52 = vld [vmem:[#allocation2 + $0x80] sm:$0xff] }
 0x4b7   : > { %12621 = vmatprep.mubr.msk.f32.mxu1 %vm2149_vm2, %v3845_v36  ;;  %v19688_v36 = vld [vmem:[#allocation42_spill] sm:$0xff]  ;;  %19694 = vst [vmem:[#allocation81_spill] sm:$0xff] %v16653_v52 }
 0x4ba   : > { %12622 = vmatmul.mubr.msk.f32.gmra.mrb[18].mxu1 %vm2149_vm2, %v3846_v14  ;;  %v3857_v14 = vmul.f32 %v16579_v16, %v19688_v36 }
 0x4bb   : > { %12624 = vmatprep.mubr.msk.f32.mxu1 %vm2149_vm2, %v3847_v42 }
 0x4be   : > { %12625 = vmatmul.mubr.msk.f32.gmra.mrb[20].mxu1 %vm2149_vm2, %v3848_v62  ;;  %v19689_v62 = vld [vmem:[#allocation44_spill] sm:$0xff] }
 0x4bf   : > { %12627 = vmatprep.mubr.msk.f32.mxu1 %vm2149_vm2, %v3849_v50  ;;  %v16594_v50 = vld [vmem:[#allocation2 + $0x18] sm:$0xff] }
 0x4c0   : > { %19690 = vst [vmem:[#allocation78_spill] sm:$0xff] %v16594_v50 }
 0x4c2   : > { %12628 = vmatmul.mubr.msk.f32.gmra.mrb[22].mxu1 %vm2149_vm2, %v3850_v22  ;;  %v16603_v22 = vld [vmem:[%s18900_s5 + $0x30] sm:$0xff] }
 0x4c3   : > { %12630 = vmatprep.mubr.msk.f32.mxu1 %vm2149_vm2, %v3851_v25  ;;  %v16613_v25 = vld [vmem:[#allocation2 + $0x30] sm:$0xff] }
 0x4c6   : > { %12631 = vmatmul.mubr.msk.f32.gmra.mrb[24].mxu1 %vm2149_vm2, %v3852_v3  ;;  %v16621_v3 = vld [vmem:[#allocation2 + $0x40] sm:$0xff] }
 0x4c7   : > { %12633 = vmatprep.mubr.msk.f32.mxu1 %vm2149_vm2, %v3853_v7  ;;  %v16633_v7 = vld [vmem:[#allocation2 + $0x58] sm:$0xff] }
 0x4ca   : > { %12634 = vmatmul.mubr.msk.f32.gmra.mrb[26].mxu1 %vm2149_vm2, %v3854_v56  ;;  %v16641_v56 = vld [vmem:[#allocation2 + $0x68] sm:$0xff] }
 0x4cb   : > { %12636 = vmatprep.mubr.msk.f32.mxu1 %vm2149_vm2, %v3855_v59  ;;  %v16649_v59 = vld [vmem:[#allocation2 + $0x78] sm:$0xff] }
 0x4cc   : > { %19693 = vst [vmem:[#allocation29_spill] sm:$0xff] %v16649_v59 }
 0x4ce   : > { %12637 = vmatmul.mubr.msk.f32.gmra.mrb[28].mxu1 %vm2149_vm2, %v3856_v60  ;;  %v16657_v60 = vld [vmem:[#allocation2 + $0x88] sm:$0xff] }
 0x4cf   : > { %12639 = vmatprep.mubr.msk.f32.mxu1 %vm2149_vm2, %v3857_v14  ;;  %19695 = vst [vmem:[#allocation23_spill] sm:$0xff] %v16657_v60  ;;  %v16661_v14 = vld [vmem:[#allocation2 + $0x90] sm:$0xff] }
 0x4d0   : > { %19696 = vst [vmem:[#allocation11_spill] sm:$0xff] %v16661_v14 }
 0x508   : > { %v2315_v42 = vpop.permute.xlu0 %2314 }
 0x509   : > { %2380 = vst.msk [vmem:[#allocation2 + $0x110] sm:$0xff] %vm2348_vm3, %v2315_v42  ;;  %v16665_v42 = vld [vmem:[#allocation2 + $0x98] sm:$0xff] }
 0x50a   : > { %19697 = vst [vmem:[#allocation19_spill] sm:$0xff] %v16665_v42 }
 0x510   : > { %v16589_v9 = vld [vmem:[#allocation2 + $0x10f] sm:$0xff] }
 0x511   : > { %v3858_v43 = vmul.f32 %v16589_v9, %v19689_v62 }
 0x513   : > { %12640 = vmatmul.mubr.msk.f32.gmra.mrb[30].mxu1 %vm2149_vm2, %v3858_v43  ;;  %v16669_v43 = vld [vmem:[#allocation2 + $0xa0] sm:$0xff] }
 0x514   : > { %12644 = vmatprep.mubr.msk.f32.mxu1 %vm2149_vm2, %v16594_v50  ;;  %19698 = vst [vmem:[#allocation38_spill] sm:$0xff] %v16669_v43  ;;  %v16677_v50 = vld [vmem:[#allocation2 + $0xb0] sm:$0xff] }
 0x515   : > { %19700 = vst [vmem:[#allocation98_spill] sm:$0xff] %v16677_v50 }
 0x517   : > { %12645 = vmatmul.mubr.msk.f32.vlgmr.msra.gmra.mrb[0].mxu1 %vm2149_vm2, %v16598_v51  ;;  %v16673_v51 = vld [vmem:[#allocation2 + $0xa8] sm:$0xff] }
 0x518   : > { %12693 = vmatpush3.msra.mxu1 %v16496_v24  ;;  %12647 = vmatprep.mubr.msk.f32.mxu1 %vm2149_vm2, %v16607_v61  ;;  %v16625_v24 = vld [vmem:[#allocation2 + $0x48] sm:$0xff]  ;;  %19699 = vst [vmem:[#allocation97_spill] sm:$0xff] %v16673_v51 }
 0x519   : > { %12742 = vmatprep.subr.mxu1 %v16603_v22 }
 0x51b   : > { %12648 = vmatmul.mubr.msk.f32.gmra.mrb[2].mxu1 %vm2149_vm2, %v16613_v25 }
 0x51c   : > { %12650 = vmatprep.mubr.msk.f32.mxu1 %vm2149_vm2, %v16617_v1 }
 0x51f   : > { %12651 = vmatmul.mubr.msk.f32.gmra.mrb[4].mxu1 %vm2149_vm2, %v16621_v3 }
 0x520   : > { %12653 = vmatprep.mubr.msk.f32.mxu1 %vm2149_vm2, %v16625_v24 }
 0x523   : > { %12654 = vmatmul.mubr.msk.f32.gmra.mrb[6].mxu1 %vm2149_vm2, %v16629_v2 }
 0x524   : > { %12656 = vmatprep.mubr.msk.f32.mxu1 %vm2149_vm2, %v16633_v7 }
 0x527   : > { %12657 = vmatmul.mubr.msk.f32.gmra.mrb[8].mxu1 %vm2149_vm2, %v16637_v15 }
 0x528   : > { %12659 = vmatprep.mubr.msk.f32.mxu1 %vm2149_vm2, %v16641_v56 }
 0x52b   : > { %12660 = vmatmul.mubr.msk.f32.gmra.mrb[10].mxu1 %vm2149_vm2, %v16645_v17  ;;  %v19724_v17 = vld [vmem:[#allocation27_spill] sm:$0xff] }
 0x52c   : > { %12662 = vmatprep.mubr.msk.f32.mxu1 %vm2149_vm2, %v16649_v59  ;;  %v19723_v59 = vld [vmem:[#allocation59_spill] sm:$0xff] }
 0x52f   : > { %12663 = vmatmul.mubr.msk.f32.gmra.mrb[12].mxu1 %vm2149_vm2, %v16653_v52  ;;  %v19720_v52 = vld [vmem:[#allocation49_spill] sm:$0xff] }
 0x530   : > { %12665 = vmatprep.mubr.msk.f32.mxu1 %vm2149_vm2, %v16657_v60  ;;  %v19710_v60 = vld [vmem:[#allocation30_spill] sm:$0xff] }
 0x533   : > { %12666 = vmatmul.mubr.msk.f32.gmra.mrb[14].mxu1 %vm2149_vm2, %v16661_v14  ;;  %v16681_v14 = vld [vmem:[#allocation2 + $0xb8] sm:$0xff] }
 0x534   : > { %12668 = vmatprep.mubr.msk.f32.mxu1 %vm2149_vm2, %v16665_v42  ;;  %19701 = vst [vmem:[#allocation99_spill] sm:$0xff] %v16681_v14  ;;  %v16685_v42 = vld [vmem:[#allocation2 + $0xc0] sm:$0xff] }
 0x535   : > { %19702 = vst [vmem:[#allocation100_spill] sm:$0xff] %v16685_v42 }
 0x537   : > { %12669 = vmatmul.mubr.msk.f32.gmra.mrb[16].mxu1 %vm2149_vm2, %v16669_v43  ;;  %v16689_v43 = vld [vmem:[#allocation2 + $0xc8] sm:$0xff] }
 0x538   : > { %12671 = vmatprep.mubr.msk.f32.mxu1 %vm2149_vm2, %v16673_v51  ;;  %19703 = vst [vmem:[#allocation101_spill] sm:$0xff] %v16689_v43  ;;  %v16693_v51 = vld [vmem:[#allocation2 + $0xd0] sm:$0xff] }
 0x539   : > { %19704 = vst [vmem:[#allocation102_spill] sm:$0xff] %v16693_v51 }
 0x53b   : > { %12672 = vmatmul.mubr.msk.f32.gmra.mrb[18].mxu1 %vm2149_vm2, %v16677_v50  ;;  %v16697_v50 = vld [vmem:[#allocation2 + $0xd8] sm:$0xff] }
 0x53c   : > { %12674 = vmatprep.mubr.msk.f32.mxu1 %vm2149_vm2, %v16681_v14  ;;  %19705 = vst [vmem:[#allocation103_spill] sm:$0xff] %v16697_v50  ;;  %v16701_v14 = vld [vmem:[#allocation2 + $0xe0] sm:$0xff] }
 0x53d   : > { %19706 = vst [vmem:[#allocation104_spill] sm:$0xff] %v16701_v14 }
 0x53f   : > { %12675 = vmatmul.mubr.msk.f32.gmra.mrb[20].mxu1 %vm2149_vm2, %v16685_v42  ;;  %v16705_v42 = vld [vmem:[#allocation2 + $0xe8] sm:$0xff] }
 0x540   : > { %12677 = vmatprep.mubr.msk.f32.mxu1 %vm2149_vm2, %v16689_v43  ;;  %19707 = vst [vmem:[#allocation105_spill] sm:$0xff] %v16705_v42  ;;  %v16709_v43 = vld [vmem:[#allocation2 + $0xf0] sm:$0xff] }
 0x541   : > { %19708 = vst [vmem:[#allocation106_spill] sm:$0xff] %v16709_v43 }
 0x543   : > { %12678 = vmatmul.mubr.msk.f32.gmra.mrb[22].mxu1 %vm2149_vm2, %v16693_v51  ;;  %v19709_v51 = vld [vmem:[#allocation58_spill] sm:$0xff] }
 0x544   : > { %12680 = vmatprep.mubr.msk.f32.mxu1 %vm2149_vm2, %v16697_v50  ;;  %v16717_v50 = vld [vmem:[#allocation2 + $0x108] sm:$0xff] }
 0x545   : > { %19711 = vst [vmem:[#allocation58_spill] sm:$0xff] %v16717_v50 }
 0x547   : > { %12681 = vmatmul.mubr.msk.f32.gmra.mrb[24].mxu1 %vm2149_vm2, %v16701_v14  ;;  %v16721_v14 = vld [vmem:[#allocation2 + $0x110] sm:$0xff] }
 0x548   : > { %12683 = vmatprep.mubr.msk.f32.mxu1 %vm2149_vm2, %v16705_v42  ;;  %19712 = vst [vmem:[#allocation30_spill] sm:$0xff] %v16721_v14  ;;  %v4631_v42 = vmul.f32 %v16243_v18, %v16271_v5  ;;  %v19713_v5 = vld [vmem:[#allocation48_spill] sm:$0xff]  ;;  %v19714_v18 = vld [vmem:[#allocation18_spill] sm:$0xff] }
 0x54b   : > { %12684 = vmatmul.mubr.msk.f32.gmra.mrb[26].mxu1 %vm2149_vm2, %v16709_v43 }
 0x54c   : > { %12686 = vmatprep.mubr.msk.f32.mxu1 %vm2149_vm2, %v19709_v51  ;;  %v4632_v51 = vmul.f32 %v16280_v27, %v16267_v40  ;;  %v19715_v27 = vld [vmem:[#allocation36_spill] sm:$0xff]  ;;  %v19716_v40 = vld [vmem:[#allocation54_spill] sm:$0xff] }
 0x54f   : > { %12687 = vmatmul.mubr.msk.f32.gmra.mrb[28].mxu1 %vm2149_vm2, %v19710_v60  ;;  %v4633_v60 = vmul.f32 %v16254_v11, %v16287_v13  ;;  %v19717_v13 = vld [vmem:[#allocation20_spill] sm:$0xff]  ;;  %v19718_v11 = vld [vmem:[#allocation9_spill] sm:$0xff] }
 0x550   : > { %12689 = vmatprep.mubr.msk.f32.mxu1 %vm2149_vm2, %v16717_v50  ;;  %v16735_v50 = vld [vmem:[%s18900_s5 + $0x38] sm:$0xff]  ;;  %v4636_v43 = vmul.f32 %v19718_v11, %v19717_v13 }
 0x551   : > { %v19727_v11 = vld [vmem:[#allocation51_spill] sm:$0xff] }
 0x553   : > { %12690 = vmatmul.mubr.msk.f32.gmra.mrb[30].mxu1 %vm2149_vm2, %v16721_v14  ;;  %v4635_v14 = vmul.f32 %v19716_v40, %v19715_v27  ;;  %v4639_v27 = vmul.f32 %v19724_v17, %v19723_v59  ;;  %v19728_v40 = vld [vmem:[#allocation33_spill] sm:$0xff]  ;;  %v19736_v17 = vld [vmem:[#allocation47_spill] sm:$0xff] }
 0x554   : > { %12694 = vmatprep.mubr.msk.f32.mxu1 %vm2149_vm2, %v4631_v42  ;;  %v4634_v42 = vmul.f32 %v19714_v18, %v19713_v5  ;;  %v19722_v5 = vld [vmem:[#allocation5_spill] sm:$0xff] }
 0x557   : > { %12695 = vmatmul.mubr.msk.f32.vlgmr.msra.gmra.mrb[0].mxu1 %vm2149_vm2, %v4632_v51  ;;  %v19719_v51 = vld [vmem:[#allocation46_spill] sm:$0xff] }
 0x558   : > { %12743 = vmatpush3.msra.mxu1 %v16603_v22  ;;  %12697 = vmatprep.mubr.msk.f32.mxu1 %vm2149_vm2, %v4633_v60  ;;  %v4637_v22 = vmul.f32 %v19720_v52, %v19719_v51  ;;  %v19721_v60 = vld [vmem:[#allocation40_spill] sm:$0xff]  ;;  %v4641_v51 = vmul.f32 %v19728_v40, %v19727_v11  ;;  %v19740_v40 = vld [vmem:[#allocation34_spill] sm:$0xff] }
 0x559   : > { %12792 = vmatprep.subr.mxu1 %v16735_v50  ;;  %v4638_v18 = vmul.f32 %v19722_v5, %v19721_v60  ;;  %v19731_v5 = vld [vmem:[#allocation25_spill] sm:$0xff]  ;;  %v19732_v52 = vld [vmem:[#allocation64_spill] sm:$0xff] }
 0x55a   : > { %v4643_v59 = vmul.f32 %v19732_v52, %v19731_v5 }
 0x55b   : > { %12698 = vmatmul.mubr.msk.f32.gmra.mrb[2].mxu1 %vm2149_vm2, %v4634_v42  ;;  %v19726_v42 = vld [vmem:[#allocation41_spill] sm:$0xff] }
 0x55c   : > { %12700 = vmatprep.mubr.msk.f32.mxu1 %vm2149_vm2, %v4635_v14  ;;  %v19725_v14 = vld [vmem:[#allocation60_spill] sm:$0xff] }
 0x55d   : > { %v4640_v13 = vmul.f32 %v19726_v42, %v19725_v14  ;;  %v19735_v42 = vld [vmem:[#allocation65_spill] sm:$0xff] }
 0x55e   : > { %v4645_v11 = vmul.f32 %v19736_v17, %v19735_v42 }
 0x55f   : > { %12701 = vmatmul.mubr.msk.f32.gmra.mrb[4].mxu1 %vm2149_vm2, %v4636_v43  ;;  %v19729_v43 = vld [vmem:[#allocation63_spill] sm:$0xff] }
 0x560   : > { %12703 = vmatprep.mubr.msk.f32.mxu1 %vm2149_vm2, %v4637_v22  ;;  %v19730_v22 = vld [vmem:[#allocation43_spill] sm:$0xff] }
 0x561   : > { %v4642_v60 = vmul.f32 %v19730_v22, %v19729_v43  ;;  %v19739_v22 = vld [vmem:[#allocation68_spill] sm:$0xff] }
 0x562   : > { %v4647_v5 = vmul.f32 %v19740_v40, %v19739_v22  ;;  %v19750_v40 = vld [vmem:[#allocation62_spill] sm:$0xff] }
 0x563   : > { %12704 = vmatmul.mubr.msk.f32.gmra.mrb[6].mxu1 %vm2149_vm2, %v4638_v18  ;;  %v19733_v18 = vld [vmem:[#allocation26_spill] sm:$0xff] }
 0x564   : > { %12706 = vmatprep.mubr.msk.f32.mxu1 %vm2149_vm2, %v4639_v27  ;;  %v19734_v27 = vld [vmem:[#allocation31_spill] sm:$0xff] }
 0x565   : > { %v4644_v14 = vmul.f32 %v19734_v27, %v19733_v18  ;;  %v19742_v18 = vld [vmem:[#allocation21_spill] sm:$0xff]  ;;  %v19743_v27 = vld [vmem:[#allocation67_spill] sm:$0xff] }
 0x566   : > { %v4649_v42 = vmul.f32 %v19743_v27, %v19742_v18  ;;  %v19754_v27 = vld [vmem:[#allocation82_spill] sm:$0xff] }
 0x567   : > { %12707 = vmatmul.mubr.msk.f32.gmra.mrb[8].mxu1 %vm2149_vm2, %v4640_v13  ;;  %v19737_v13 = vld [vmem:[#allocation52_spill] sm:$0xff] }
 0x568   : > { %12709 = vmatprep.mubr.msk.f32.mxu1 %vm2149_vm2, %v4641_v51  ;;  %v19738_v51 = vld [vmem:[#allocation61_spill] sm:$0xff] }
 0x569   : > { %v4646_v43 = vmul.f32 %v19738_v51, %v19737_v13  ;;  %v19745_v13 = vld [vmem:[#allocation28_spill] sm:$0xff]  ;;  %v19746_v51 = vld [vmem:[#allocation74_spill] sm:$0xff] }
 0x56a   : > { %v4651_v22 = vmul.f32 %v19746_v51, %v19745_v13  ;;  %v19758_v51 = vld [vmem:[#allocation85_spill] sm:$0xff] }
 0x56b   : > { %12710 = vmatmul.mubr.msk.f32.gmra.mrb[10].mxu1 %vm2149_vm2, %v4642_v60  ;;  %v19741_v60 = vld [vmem:[#allocation50_spill] sm:$0xff] }
 0x56c   : > { %12712 = vmatprep.mubr.msk.f32.mxu1 %vm2149_vm2, %v4643_v59  ;;  %v4648_v59 = vmul.f32 %v19741_v60, %v16395_v53  ;;  %v19749_v60 = vld [vmem:[#allocation84_spill] sm:$0xff] }
 0x56d   : > { %v4653_v18 = vmul.f32 %v19750_v40, %v19749_v60  ;;  %v19762_v40 = vld [vmem:[#allocation89_spill] sm:$0xff] }
 0x56f   : > { %12713 = vmatmul.mubr.msk.f32.gmra.mrb[12].mxu1 %vm2149_vm2, %v4644_v14  ;;  %v19744_v14 = vld [vmem:[#allocation55_spill] sm:$0xff] }
 0x570   : > { %12715 = vmatprep.mubr.msk.f32.mxu1 %vm2149_vm2, %v4645_v11  ;;  %v4650_v11 = vmul.f32 %v19744_v14, %v16408_v20  ;;  %v19753_v14 = vld [vmem:[#allocation87_spill] sm:$0xff] }
 0x571   : > { %v4655_v13 = vmul.f32 %v19754_v27, %v19753_v14 }
 0x573   : > { %12716 = vmatmul.mubr.msk.f32.gmra.mrb[14].mxu1 %vm2149_vm2, %v4646_v43  ;;  %v19747_v43 = vld [vmem:[#allocation83_spill] sm:$0xff] }
 0x574   : > { %12718 = vmatprep.mubr.msk.f32.mxu1 %vm2149_vm2, %v4647_v5  ;;  %v19748_v5 = vld [vmem:[#allocation66_spill] sm:$0xff] }
 0x575   : > { %v4652_v53 = vmul.f32 %v19748_v5, %v19747_v43  ;;  %v19757_v5 = vld [vmem:[#allocation91_spill] sm:$0xff] }
 0x576   : > { %v4657_v60 = vmul.f32 %v19758_v51, %v19757_v5  ;;  %v19764_v5 = vld [vmem:[#allocation94_spill] sm:$0xff] }
 0x577   : > { %12719 = vmatmul.mubr.msk.f32.gmra.mrb[16].mxu1 %vm2149_vm2, %v4648_v59  ;;  %v19751_v59 = vld [vmem:[#allocation86_spill] sm:$0xff] }
 0x578   : > { %12721 = vmatprep.mubr.msk.f32.mxu1 %vm2149_vm2, %v4649_v42  ;;  %v19752_v42 = vld [vmem:[#allocation56_spill] sm:$0xff]  ;;  %v16825_v51 = vld [vmem:[#allocation2 + $0x111] sm:$0xff] }
 0x579   : > { %v4654_v20 = vmul.f32 %v19752_v42, %v19751_v59  ;;  %v19761_v42 = vld [vmem:[#allocation95_spill] sm:$0xff] }
 0x57a   : > { %v4659_v14 = vmul.f32 %v19762_v40, %v19761_v42  ;;  %v4662_v42 = vmul.f32 %v16825_v51, %v16479_v35 }
 0x57b   : > { %12722 = vmatmul.mubr.msk.f32.gmra.mrb[18].mxu1 %vm2149_vm2, %v4650_v11  ;;  %v19755_v11 = vld [vmem:[#allocation90_spill] sm:$0xff] }
 0x57c   : > { %12724 = vmatprep.mubr.msk.f32.mxu1 %vm2149_vm2, %v4651_v22  ;;  %v19756_v22 = vld [vmem:[#allocation22_spill] sm:$0xff] }
 0x57d   : > { %v4656_v43 = vmul.f32 %v19756_v22, %v19755_v11 }
 0x57f   : > { %12725 = vmatmul.mubr.msk.f32.gmra.mrb[20].mxu1 %vm2149_vm2, %v4652_v53  ;;  %v19759_v53 = vld [vmem:[#allocation93_spill] sm:$0xff] }
 0x580   : > { %12727 = vmatprep.mubr.msk.f32.mxu1 %vm2149_vm2, %v4653_v18  ;;  %v19760_v18 = vld [vmem:[#allocation88_spill] sm:$0xff] }
 0x581   : > { %v4658_v59 = vmul.f32 %v19760_v18, %v19759_v53 }
 0x583   : > { %12728 = vmatmul.mubr.msk.f32.gmra.mrb[22].mxu1 %vm2149_vm2, %v4654_v20  ;;  %v16818_v20 = vld [vmem:[#allocation2 + $0x109] sm:$0xff] }
 0x584   : > { %12730 = vmatprep.mubr.msk.f32.mxu1 %vm2149_vm2, %v4655_v13  ;;  %v19763_v13 = vld [vmem:[#allocation92_spill] sm:$0xff] }
 0x585   : > { %v4660_v11 = vmul.f32 %v19763_v13, %v16481_v45  ;;  %v5050_v45 = vmul.f32 %v16021_v33, %v15968_v4 }
 0x587   : > { %12731 = vmatmul.mubr.msk.f32.gmra.mrb[24].mxu1 %vm2149_vm2, %v4656_v43  ;;  %v4661_v43 = vmul.f32 %v16818_v20, %v19764_v5 }
 0x588   : > { %12733 = vmatprep.mubr.msk.f32.mxu1 %vm2149_vm2, %v4657_v60  ;;  %v5017_v60 = vld [vmem:[#allocation2 + $0x27] sm:$0xff] }
 0x589   : > { %v5049_v53 = vmul.f32 %v5017_v60, %v15970_v49  ;;  %v5021_v60 = vld [vmem:[#allocation2 + $0x47] sm:$0xff] }
 0x58a   : > { %v5053_v33 = vmul.f32 %v5021_v60, %v15975_v46 }
 0x58b   : > { %12734 = vmatmul.mubr.msk.f32.gmra.mrb[26].mxu1 %vm2149_vm2, %v4658_v59  ;;  %v5019_v59 = vld [vmem:[#allocation2 + $0x37] sm:$0xff] }
 0x58c   : > { %12736 = vmatprep.mubr.msk.f32.mxu1 %vm2149_vm2, %v4659_v14  ;;  %v5051_v14 = vmul.f32 %v5019_v59, %v15977_v28 }
 0x58f   : > { %12737 = vmatmul.mubr.msk.f32.gmra.mrb[28].mxu1 %vm2149_vm2, %v4660_v11  ;;  %v16840_v11 = vld [vmem:[%s18900_s5 + $0x40] sm:$0xff] }
 0x590   : > { %12739 = vmatprep.mubr.msk.f32.mxu1 %vm2149_vm2, %v4661_v43  ;;  %v5020_v43 = vld [vmem:[#allocation2 + $0x3f] sm:$0xff] }
 0x593   : > { %12740 = vmatmul.mubr.msk.f32.gmra.mrb[30].mxu1 %vm2149_vm2, %v4662_v42  ;;  %v5052_v42 = vmul.f32 %v5020_v43, %v15996_v6  ;;  %v5025_v6 = vld [vmem:[#allocation2 + $0x67] sm:$0xff] }
 0x594   : > { %12744 = vmatprep.mubr.msk.f32.mxu1 %vm2149_vm2, %v5049_v53  ;;  %v5022_v53 = vld [vmem:[#allocation2 + $0x4f] sm:$0xff]  ;;  %v5057_v60 = vmul.f32 %v5025_v6, %v16008_v29 }
 0x595   : > { %v5054_v59 = vmul.f32 %v5022_v53, %v16010_v44  ;;  %v5027_v53 = vld [vmem:[#allocation2 + $0x77] sm:$0xff] }
 0x596   : > { %v19789_v29 = vld [vmem:[#allocation54_spill] sm:$0xff] }
 0x597   : > { %12745 = vmatmul.mubr.msk.f32.vlgmr.msra.gmra.mrb[0].mxu1 %vm2149_vm2, %v5050_v45  ;;  %v5023_v45 = vld [vmem:[#allocation2 + $0x57] sm:$0xff] }
 0x598   : > { %12793 = vmatpush3.msra.mxu1 %v16735_v50  ;;  %12747 = vmatprep.mubr.msk.f32.mxu1 %vm2149_vm2, %v5051_v14  ;;  %v5055_v50 = vmul.f32 %v5023_v45, %v15994_v39  ;;  %v5024_v14 = vld [vmem:[#allocation2 + $0x5f] sm:$0xff]  ;;  %v5059_v45 = vmul.f32 %v5027_v53, %v16024_v30 }
 0x599   : > { %12842 = vmatprep.subr.mxu1 %v16840_v11  ;;  %v5056_v43 = vmul.f32 %v5024_v14, %v16026_v63  ;;  %v5029_v14 = vld [vmem:[#allocation2 + $0x87] sm:$0xff] }
 0x59a   : > { %v5061_v6 = vmul.f32 %v5029_v14, %v16040_v55  ;;  %v5823_v55 = vld [vmem:[#allocation2 + $0x39] sm:$0xff] }
 0x59b   : > { %12748 = vmatmul.mubr.msk.f32.gmra.mrb[2].mxu1 %vm2149_vm2, %v5052_v42  ;;  %v5026_v42 = vld [vmem:[#allocation2 + $0x6f] sm:$0xff] }
 0x59c   : > { %12750 = vmatprep.mubr.msk.f32.mxu1 %vm2149_vm2, %v5053_v33  ;;  %v5058_v33 = vmul.f32 %v5026_v42, %v16042_v12  ;;  %v5031_v42 = vld [vmem:[#allocation2 + $0x97] sm:$0xff]  ;;  %v5825_v12 = vld [vmem:[#allocation2 + $0x49] sm:$0xff] }
 0x59d   : > { %v5063_v53 = vmul.f32 %v5031_v42, %v16056_v38  ;;  %v19785_v38 = vld [vmem:[#allocation17_spill] sm:$0xff] }
 0x59f   : > { %12751 = vmatmul.mubr.msk.f32.gmra.mrb[4].mxu1 %vm2149_vm2, %v5054_v59  ;;  %v5028_v59 = vld [vmem:[#allocation2 + $0x7f] sm:$0xff] }
 0x5a0   : > { %12753 = vmatprep.mubr.msk.f32.mxu1 %vm2149_vm2, %v5055_v50  ;;  %v5060_v50 = vmul.f32 %v5028_v59, %v16058_v48  ;;  %v5033_v59 = vld [vmem:[#allocation2 + $0xa7] sm:$0xff]  ;;  %v19787_v48 = vld [vmem:[#allocation10_spill] sm:$0xff] }
 0x5a1   : > { %v5065_v14 = vmul.f32 %v5033_v59, %v16072_v34  ;;  %v6483_v34 = vld [vmem:[%s18902_s7 + $0x18] sm:$0xff]  ;;  %v5855_v30 = vmul.f32 %v5823_v55, %v19787_v48  ;;  %v19791_v48 = vld [vmem:[#allocation49_spill] sm:$0xff] }
 0x5a3   : > { %12754 = vmatmul.mubr.msk.f32.gmra.mrb[6].mxu1 %vm2149_vm2, %v5056_v43  ;;  %v5030_v43 = vld [vmem:[#allocation2 + $0x8f] sm:$0xff] }
 0x5a4   : > { %12756 = vmatprep.mubr.msk.f32.mxu1 %vm2149_vm2, %v5057_v60  ;;  %v5062_v60 = vmul.f32 %v5030_v43, %v16074_v58  ;;  %v5035_v43 = vld [vmem:[#allocation2 + $0xb7] sm:$0xff] }
 0x5a5   : > { %v5067_v42 = vmul.f32 %v5035_v43, %v16088_v32  ;;  %v19786_v58 = vld [vmem:[#allocation18_spill] sm:$0xff] }
 0x5a7   : > { %12757 = vmatmul.mubr.msk.f32.gmra.mrb[8].mxu1 %vm2149_vm2, %v5058_v33  ;;  %v5032_v33 = vld [vmem:[#allocation2 + $0x9f] sm:$0xff] }
 0x5a8   : > { %12759 = vmatprep.mubr.msk.f32.mxu1 %vm2149_vm2, %v5059_v45  ;;  %v5064_v45 = vmul.f32 %v5032_v33, %v16090_v21  ;;  %v5037_v33 = vld [vmem:[#allocation2 + $0xc7] sm:$0xff] }
 0x5a9   : > { %v5069_v59 = vmul.f32 %v5037_v33, %v16114_v31  ;;  %v5821_v31 = vld [vmem:[#allocation2 + $0x29] sm:$0xff] }
 0x5ab   : > { %12760 = vmatmul.mubr.msk.f32.gmra.mrb[10].mxu1 %vm2149_vm2, %v5060_v50  ;;  %v5034_v50 = vld [vmem:[#allocation2 + $0xaf] sm:$0xff] }
 0x5ac   : > { %12762 = vmatprep.mubr.msk.f32.mxu1 %vm2149_vm2, %v5061_v6  ;;  %v5066_v6 = vmul.f32 %v5034_v50, %v16104_v10  ;;  %v5039_v50 = vld [vmem:[#allocation2 + $0xd7] sm:$0xff] }
 0x5ad   : > { %v5071_v43 = vmul.f32 %v5039_v50, %v19673_v57  ;;  %v19783_v57 = vld [vmem:[#allocation30_spill] sm:$0xff] }
 0x5ae   : > { %v6482_v10 = vld [vmem:[%s18902_s7 + $0x10] sm:$0xff] }
 0x5af   : > { %12763 = vmatmul.mubr.msk.f32.gmra.mrb[12].mxu1 %vm2149_vm2, %v5062_v60  ;;  %v5036_v60 = vld [vmem:[#allocation2 + $0xbf] sm:$0xff]  ;;  %v13424_v21 = vpack.c.bf16 %v6483_v34, %v6482_v10  ;;  %v5826_v34 = vld [vmem:[#allocation2 + $0x51] sm:$0xff] }
 0x5b0   : > { %12765 = vmatprep.mubr.msk.f32.mxu1 %vm2149_vm2, %v5063_v53  ;;  %v5068_v53 = vmul.f32 %v5036_v60, %v16120_v23  ;;  %v5041_v60 = vld [vmem:[#allocation2 + $0xe7] sm:$0xff]  ;;  %v5827_v10 = vld [vmem:[#allocation2 + $0x59] sm:$0xff] }
 0x5b1   : > { %v5073_v33 = vmul.f32 %v5041_v60, %v19677_v8  ;;  %v5078_v60 = vmul.f32 %v16589_v9, %v19687_v41  ;;  %v19765_v9 = vld [vmem:[#allocation15_spill] sm:$0xff]  ;;  %v19779_v41 = vld [vmem:[#allocation104_spill] sm:$0xff]  ;;  %v19782_v8 = vld [vmem:[#allocation58_spill] sm:$0xff]  ;;  %13425 = vmatprep.subr.bf16.mxu0 %v13424_v21 }
 0x5b2   : > { %v19784_v23 = vld [vmem:[#allocation45_spill] sm:$0xff]  ;;  %13427 = vmatpush3.bf16.msra.mxu0 %v13424_v21 }
 0x5b3   : > { %12766 = vmatmul.mubr.msk.f32.gmra.mrb[14].mxu1 %vm2149_vm2, %v5064_v45  ;;  %v5038_v45 = vld [vmem:[#allocation2 + $0xcf] sm:$0xff]  ;;  %v5853_v32 = vmul.f32 %v5821_v31, %v19784_v23  ;;  %v5824_v31 = vld [vmem:[#allocation2 + $0x41] sm:$0xff] }
 0x5b4   : > { %12768 = vmatprep.mubr.msk.f32.mxu1 %vm2149_vm2, %v5065_v14  ;;  %v5070_v14 = vmul.f32 %v5038_v45, %v19671_v54  ;;  %v5043_v45 = vld [vmem:[#allocation2 + $0xf7] sm:$0xff]  ;;  %v5466_v54 = vld [vmem:[#allocation2 + $0x120] sm:$0xff]  ;;  %v19792_v21 = vld [vmem:[#allocation5_spill] sm:$0xff] }
 0x5b5   : > { %v5075_v50 = vmul.f32 %v5043_v45, %v19681_v37  ;;  %v19767_v45 = vld [vmem:[#allocation81_spill] sm:$0xff]  ;;  %v16962_v37 = vld [vmem:[#allocation2 + $0xf8] sm:$0xff] }
 0x5b7   : > { %12769 = vmatmul.mubr.msk.f32.gmra.mrb[16].mxu1 %vm2149_vm2, %v5066_v6  ;;  %v5040_v6 = vld [vmem:[#allocation2 + $0xdf] sm:$0xff] }
 0x5b8   : > { %12771 = vmatprep.mubr.msk.f32.mxu1 %vm2149_vm2, %v5067_v42  ;;  %v5072_v42 = vmul.f32 %v5040_v6, %v19675_v26  ;;  %v5077_v6 = vmul.f32 %v16579_v16, %v19685_v0  ;;  %v10101_v16 = vld [vmem:[%s18904_s9] sm:$0xff]  ;;  %v19780_v0 = vld [vmem:[#allocation105_spill] sm:$0xff]  ;;  %v5465_v26 = vld [vmem:[#allocation2 + $0x118] sm:$0xff] }
 0x5bb   : > { %12772 = vmatmul.mubr.msk.f32.gmra.mrb[18].mxu1 %vm2149_vm2, %v5068_v53  ;;  %v5042_v53 = vld [vmem:[#allocation2 + $0xef] sm:$0xff] }
 0x5bc   : > { %12774 = vmatprep.mubr.msk.f32.mxu1 %vm2149_vm2, %v5069_v59  ;;  %v5074_v59 = vmul.f32 %v5042_v53, %v19679_v19  ;;  %v5048_v53 = vld [vmem:[#allocation2 + $0x11f] sm:$0xff] }
 0x5bd   : > { %v16966_v19 = vld [vmem:[#allocation2 + $0x100] sm:$0xff] }
 0x5bf   : > { %12775 = vmatmul.mubr.msk.f32.gmra.mrb[20].mxu1 %vm2149_vm2, %v5070_v14  ;;  %v5044_v14 = vld [vmem:[#allocation2 + $0xff] sm:$0xff] }
 0x5c0   : > { %12777 = vmatprep.mubr.msk.f32.mxu1 %vm2149_vm2, %v5071_v43  ;;  %v5076_v43 = vmul.f32 %v5044_v14, %v19683_v47  ;;  %v19769_v14 = vld [vmem:[#allocation11_spill] sm:$0xff]  ;;  %v19781_v47 = vld [vmem:[#allocation106_spill] sm:$0xff] }
 0x5c3   : > { %12778 = vmatmul.mubr.msk.f32.gmra.mrb[22].mxu1 %vm2149_vm2, %v5072_v42  ;;  %v5047_v42 = vld [vmem:[#allocation2 + $0x117] sm:$0xff] }
 0x5c4   : > { %12780 = vmatprep.mubr.msk.f32.mxu1 %vm2149_vm2, %v5073_v33  ;;  %v5079_v33 = vmul.f32 %v5047_v42, %v19688_v36  ;;  %v19772_v42 = vld [vmem:[#allocation97_spill] sm:$0xff]  ;;  %v19778_v36 = vld [vmem:[#allocation103_spill] sm:$0xff] }
 0x5c7   : > { %12781 = vmatmul.mubr.msk.f32.gmra.mrb[24].mxu1 %vm2149_vm2, %v5074_v59  ;;  %v5080_v59 = vmul.f32 %v5048_v53, %v19689_v62  ;;  %v19775_v53 = vld [vmem:[#allocation100_spill] sm:$0xff]  ;;  %v19777_v62 = vld [vmem:[#allocation102_spill] sm:$0xff] }
 0x5c8   : > { %12783 = vmatprep.mubr.msk.f32.mxu1 %vm2149_vm2, %v5075_v50  ;;  %v19768_v50 = vld [vmem:[#allocation23_spill] sm:$0xff] }
 0x5cb   : > { %12784 = vmatmul.mubr.msk.f32.gmra.mrb[26].mxu1 %vm2149_vm2, %v5076_v43  ;;  %v19770_v43 = vld [vmem:[#allocation19_spill] sm:$0xff] }
 0x5cc   : > { %12786 = vmatprep.mubr.msk.f32.mxu1 %vm2149_vm2, %v5077_v6  ;;  %v19771_v6 = vld [vmem:[#allocation38_spill] sm:$0xff] }
 0x5cf   : > { %12787 = vmatmul.mubr.msk.f32.gmra.mrb[28].mxu1 %vm2149_vm2, %v5078_v60  ;;  %v19773_v60 = vld [vmem:[#allocation98_spill] sm:$0xff] }
 0x5d0   : > { %12789 = vmatprep.mubr.msk.f32.mxu1 %vm2149_vm2, %v5079_v33  ;;  %v19774_v33 = vld [vmem:[#allocation99_spill] sm:$0xff] }
 0x5d3   : > { %12790 = vmatmul.mubr.msk.f32.gmra.mrb[30].mxu1 %vm2149_vm2, %v5080_v59  ;;  %v19776_v59 = vld [vmem:[#allocation101_spill] sm:$0xff] }
 0x5d4   : > { %12794 = vmatprep.mubr.msk.f32.mxu1 %vm2149_vm2, %v16607_v61 }
 0x5d7   : > { %12795 = vmatmul.mubr.msk.f32.vlgmr.msra.gmra.mrb[0].mxu1 %vm2149_vm2, %v16613_v25 }
 0x5d8   : > { %12843 = vmatpush3.msra.mxu1 %v16840_v11  ;;  %12797 = vmatprep.mubr.msk.f32.mxu1 %vm2149_vm2, %v16617_v1  ;;  %v19766_v11 = vld [vmem:[#allocation29_spill] sm:$0xff] }
 0x5d9   : > { %13360 = vmatprep.subr.mxu1 %v10101_v16 }
 0x5db   : > { %12798 = vmatmul.mubr.msk.f32.gmra.mrb[2].mxu1 %vm2149_vm2, %v16621_v3 }
 0x5dc   : > { %12800 = vmatprep.mubr.msk.f32.mxu1 %vm2149_vm2, %v16625_v24 }
 0x5df   : > { %12801 = vmatmul.mubr.msk.f32.gmra.mrb[4].mxu1 %vm2149_vm2, %v16629_v2 }
 0x5e0   : > { %12803 = vmatprep.mubr.msk.f32.mxu1 %vm2149_vm2, %v16633_v7 }
 0x5e3   : > { %12804 = vmatmul.mubr.msk.f32.gmra.mrb[6].mxu1 %vm2149_vm2, %v16637_v15 }
 0x5e4   : > { %12806 = vmatprep.mubr.msk.f32.mxu1 %vm2149_vm2, %v16641_v56 }
 0x5e7   : > { %12807 = vmatmul.mubr.msk.f32.gmra.mrb[8].mxu1 %vm2149_vm2, %v19765_v9 }
 0x5e8   : > { %12809 = vmatprep.mubr.msk.f32.mxu1 %vm2149_vm2, %v19766_v11 }
 0x5eb   : > { %12810 = vmatmul.mubr.msk.f32.gmra.mrb[10].mxu1 %vm2149_vm2, %v19767_v45 }
 0x5ec   : > { %12812 = vmatprep.mubr.msk.f32.mxu1 %vm2149_vm2, %v19768_v50 }
 0x5ef   : > { %12813 = vmatmul.mubr.msk.f32.gmra.mrb[12].mxu1 %vm2149_vm2, %v19769_v14 }
 0x5f0   : > { %12815 = vmatprep.mubr.msk.f32.mxu1 %vm2149_vm2, %v19770_v43 }
 0x5f3   : > { %12816 = vmatmul.mubr.msk.f32.gmra.mrb[14].mxu1 %vm2149_vm2, %v19771_v6 }
 0x5f4   : > { %12818 = vmatprep.mubr.msk.f32.mxu1 %vm2149_vm2, %v19772_v42 }
 0x5f7   : > { %12819 = vmatmul.mubr.msk.f32.gmra.mrb[16].mxu1 %vm2149_vm2, %v19773_v60 }
 0x5f8   : > { %12821 = vmatprep.mubr.msk.f32.mxu1 %vm2149_vm2, %v19774_v33 }
 0x5fb   : > { %12822 = vmatmul.mubr.msk.f32.gmra.mrb[18].mxu1 %vm2149_vm2, %v19775_v53 }
 0x5fc   : > { %12824 = vmatprep.mubr.msk.f32.mxu1 %vm2149_vm2, %v19776_v59 }
 0x5ff   : > { %12825 = vmatmul.mubr.msk.f32.gmra.mrb[20].mxu1 %vm2149_vm2, %v19777_v62 }
 0x600   : > { %12827 = vmatprep.mubr.msk.f32.mxu1 %vm2149_vm2, %v19778_v36 }
 0x603   : > { %12828 = vmatmul.mubr.msk.f32.gmra.mrb[22].mxu1 %vm2149_vm2, %v19779_v41 }
 0x604   : > { %12830 = vmatprep.mubr.msk.f32.mxu1 %vm2149_vm2, %v19780_v0 }
 0x607   : > { %12831 = vmatmul.mubr.msk.f32.gmra.mrb[24].mxu1 %vm2149_vm2, %v19781_v47 }
 0x608   : > { %12833 = vmatprep.mubr.msk.f32.mxu1 %vm2149_vm2, %v16962_v37 }
 0x60b   : > { %12834 = vmatmul.mubr.msk.f32.gmra.mrb[26].mxu1 %vm2149_vm2, %v16966_v19 }
 0x60c   : > { %12836 = vmatprep.mubr.msk.f32.mxu1 %vm2149_vm2, %v19782_v8 }
 0x60f   : > { %12837 = vmatmul.mubr.msk.f32.gmra.mrb[28].mxu1 %vm2149_vm2, %v19783_v57 }
 0x610   : > { %12839 = vmatprep.mubr.msk.f32.mxu1 %vm2149_vm2, %v5465_v26  ;;  %v5854_v26 = vmul.f32 %v19786_v58, %v19785_v38  ;;  %v19790_v58 = vld [vmem:[#allocation9_spill] sm:$0xff] }
 0x611   : > { %v5858_v55 = vmul.f32 %v5826_v34, %v19790_v58  ;;  %v5831_v58 = vld [vmem:[#allocation2 + $0x79] sm:$0xff] }
 0x613   : > { %12840 = vmatmul.mubr.msk.f32.gmra.mrb[30].mxu1 %vm2149_vm2, %v5466_v54  ;;  %v19788_v54 = vld [vmem:[#allocation48_spill] sm:$0xff] }
 0x614   : > { %12844 = vmatprep.mubr.msk.f32.mxu1 %vm2149_vm2, %v5853_v32  ;;  %v5856_v23 = vmul.f32 %v5824_v31, %v19788_v54  ;;  %v5857_v32 = vmul.f32 %v5825_v12, %v19789_v29  ;;  %v5829_v31 = vld [vmem:[#allocation2 + $0x69] sm:$0xff]  ;;  %v19793_v54 = vld [vmem:[#allocation27_spill] sm:$0xff] }
 0x615   : > { %v5861_v12 = vmul.f32 %v5829_v31, %v19793_v54  ;;  %v19795_v29 = vld [vmem:[#allocation33_spill] sm:$0xff] }
 0x617   : > { %12845 = vmatmul.mubr.msk.f32.vlgmr.msra.gmra.mrb[0].mxu1 %vm2149_vm2, %v5854_v26  ;;  %v5859_v26 = vmul.f32 %v5827_v10, %v19791_v48  ;;  %v5863_v10 = vmul.f32 %v5831_v58, %v19795_v29  ;;  %v19799_v29 = vld [vmem:[#allocation34_spill] sm:$0xff] }
 0x618   : > { %12847 = vmatprep.mubr.msk.f32.mxu1 %vm2149_vm2, %v5855_v30  ;;  %13361 = vmatpush3.msra.mxu1 %v10101_v16  ;;  %v5828_v30 = vld [vmem:[#allocation2 + $0x61] sm:$0xff] }
 0x619   : > { %v5860_v16 = vmul.f32 %v5828_v30, %v19792_v21  ;;  %v5833_v21 = vld [vmem:[#allocation2 + $0x89] sm:$0xff] }
 0x61a   : > { %v5865_v31 = vmul.f32 %v5833_v21, %v19732_v52  ;;  %v19801_v52 = vld [vmem:[#allocation67_spill] sm:$0xff] }
 0x61b   : > { %12848 = vmatmul.mubr.msk.f32.gmra.mrb[2].mxu1 %vm2149_vm2, %v5856_v23  ;;  %v5830_v23 = vld [vmem:[#allocation2 + $0x71] sm:$0xff] }
 0x61c   : > { %12850 = vmatprep.mubr.msk.f32.mxu1 %vm2149_vm2, %v5857_v32  ;;  %v19794_v32 = vld [vmem:[#allocation41_spill] sm:$0xff] }
 0x61d   : > { %v5862_v34 = vmul.f32 %v5830_v23, %v19794_v32  ;;  %v5835_v32 = vld [vmem:[#allocation2 + $0x99] sm:$0xff] }
 0x61e   : > { %v5867_v58 = vmul.f32 %v5835_v32, %v19736_v17  ;;  %v19803_v17 = vld [vmem:[#allocation74_spill] sm:$0xff] }
 0x61f   : > { %12851 = vmatmul.mubr.msk.f32.gmra.mrb[4].mxu1 %vm2149_vm2, %v5858_v55  ;;  %v5832_v55 = vld [vmem:[#allocation2 + $0x81] sm:$0xff] }
 0x620   : > { %12853 = vmatprep.mubr.msk.f32.mxu1 %vm2149_vm2, %v5859_v26  ;;  %v19796_v26 = vld [vmem:[#allocation43_spill] sm:$0xff] }
 0x621   : > { %v5864_v30 = vmul.f32 %v5832_v55, %v19796_v26  ;;  %v5837_v26 = vld [vmem:[#allocation2 + $0xa9] sm:$0xff] }
 0x622   : > { %v5869_v21 = vmul.f32 %v5837_v26, %v19799_v29  ;;  %v19805_v29 = vld [vmem:[#allocation62_spill] sm:$0xff] }
 0x623   : > { %12854 = vmatmul.mubr.msk.f32.gmra.mrb[6].mxu1 %vm2149_vm2, %v5860_v16  ;;  %v5834_v16 = vld [vmem:[#allocation2 + $0x91] sm:$0xff] }
 0x624   : > { %12856 = vmatprep.mubr.msk.f32.mxu1 %vm2149_vm2, %v5861_v12  ;;  %v19797_v12 = vld [vmem:[#allocation31_spill] sm:$0xff] }
 0x625   : > { %v5866_v23 = vmul.f32 %v5834_v16, %v19797_v12  ;;  %v5839_v12 = vld [vmem:[#allocation2 + $0xb9] sm:$0xff] }
 0x626   : > { %v5871_v32 = vmul.f32 %v5839_v12, %v19801_v52 }
 0x627   : > { %12857 = vmatmul.mubr.msk.f32.gmra.mrb[8].mxu1 %vm2149_vm2, %v5862_v34  ;;  %v5836_v34 = vld [vmem:[#allocation2 + $0xa1] sm:$0xff] }
 0x628   : > { %12859 = vmatprep.mubr.msk.f32.mxu1 %vm2149_vm2, %v5863_v10  ;;  %v19798_v10 = vld [vmem:[#allocation61_spill] sm:$0xff] }
 0x629   : > { %v5868_v55 = vmul.f32 %v5836_v34, %v19798_v10  ;;  %v5841_v10 = vld [vmem:[#allocation2 + $0xc9] sm:$0xff] }
 0x62a   : > { %v5873_v26 = vmul.f32 %v5841_v10, %v19803_v17 }
 0x62b   : > { %12860 = vmatmul.mubr.msk.f32.gmra.mrb[10].mxu1 %vm2149_vm2, %v5864_v30  ;;  %v5838_v30 = vld [vmem:[#allocation2 + $0xb1] sm:$0xff] }
 0x62c   : > { %12862 = vmatprep.mubr.msk.f32.mxu1 %vm2149_vm2, %v5865_v31  ;;  %v19800_v31 = vld [vmem:[#allocation50_spill] sm:$0xff] }
 0x62d   : > { %v5870_v16 = vmul.f32 %v5838_v30, %v19800_v31  ;;  %v5843_v31 = vld [vmem:[#allocation2 + $0xd9] sm:$0xff] }
 0x62e   : > { %v5875_v12 = vmul.f32 %v5843_v31, %v19805_v29  ;;  %v5848_v29 = vld [vmem:[#allocation2 + $0x101] sm:$0xff] }
 0x62f   : > { %12863 = vmatmul.mubr.msk.f32.gmra.mrb[12].mxu1 %vm2149_vm2, %v5866_v23  ;;  %v5840_v23 = vld [vmem:[#allocation2 + $0xc1] sm:$0xff] }
 0x630   : > { %12865 = vmatprep.mubr.msk.f32.mxu1 %vm2149_vm2, %v5867_v58  ;;  %v19802_v58 = vld [vmem:[#allocation55_spill] sm:$0xff] }
 0x631   : > { %v5872_v34 = vmul.f32 %v5840_v23, %v19802_v58  ;;  %v5845_v58 = vld [vmem:[#allocation2 + $0xe9] sm:$0xff] }
 0x632   : > { %v5877_v10 = vmul.f32 %v5845_v58, %v19754_v27  ;;  %v5881_v58 = vmul.f32 %v16818_v20, %v19762_v40  ;;  %v19808_v20 = vld [vmem:[#allocation78_spill] sm:$0xff] }
 0x633   : > { %12866 = vmatmul.mubr.msk.f32.gmra.mrb[14].mxu1 %vm2149_vm2, %v5868_v55  ;;  %v5842_v55 = vld [vmem:[#allocation2 + $0xd1] sm:$0xff] }
 0x634   : > { %12868 = vmatprep.mubr.msk.f32.mxu1 %vm2149_vm2, %v5869_v21  ;;  %v19804_v21 = vld [vmem:[#allocation66_spill] sm:$0xff] }
 0x635   : > { %v5874_v30 = vmul.f32 %v5842_v55, %v19804_v21  ;;  %v5847_v55 = vld [vmem:[#allocation2 + $0xf9] sm:$0xff]  ;;  %v19807_v21 = vld [vmem:[#allocation85_spill] sm:$0xff] }
 0x636   : > { %v5879_v31 = vmul.f32 %v5847_v55, %v19807_v21 }
 0x637   : > { %12869 = vmatmul.mubr.msk.f32.gmra.mrb[16].mxu1 %vm2149_vm2, %v5870_v16  ;;  %v5844_v16 = vld [vmem:[#allocation2 + $0xe1] sm:$0xff] }
 0x638   : > { %12871 = vmatprep.mubr.msk.f32.mxu1 %vm2149_vm2, %v5871_v32  ;;  %v19806_v32 = vld [vmem:[#allocation56_spill] sm:$0xff] }
 0x639   : > { %v5876_v23 = vmul.f32 %v5844_v16, %v19806_v32  ;;  %v5882_v16 = vmul.f32 %v16825_v51, %v19763_v13 }
 0x63b   : > { %12872 = vmatmul.mubr.msk.f32.gmra.mrb[18].mxu1 %vm2149_vm2, %v5872_v34  ;;  %v5846_v34 = vld [vmem:[#allocation2 + $0xf1] sm:$0xff] }
 0x63c   : > { %12874 = vmatprep.mubr.msk.f32.mxu1 %vm2149_vm2, %v5873_v26  ;;  %v5878_v26 = vmul.f32 %v5846_v34, %v19756_v22  ;;  %v19809_v34 = vld [vmem:[#allocation76_spill] sm:$0xff] }
 0x63f   : > { %12875 = vmatmul.mubr.msk.f32.gmra.mrb[20].mxu1 %vm2149_vm2, %v5874_v30  ;;  %v5880_v30 = vmul.f32 %v5848_v29, %v19760_v18 }
 0x640   : > { %12877 = vmatprep.mubr.msk.f32.mxu1 %vm2149_vm2, %v5875_v12  ;;  %v5851_v12 = vld [vmem:[#allocation2 + $0x119] sm:$0xff] }
 0x643   : > { %12878 = vmatmul.mubr.msk.f32.gmra.mrb[22].mxu1 %vm2149_vm2, %v5876_v23  ;;  %v5883_v23 = vmul.f32 %v5851_v12, %v19764_v5 }
 0x644   : > { %12880 = vmatprep.mubr.msk.f32.mxu1 %vm2149_vm2, %v5877_v10  ;;  %v5852_v10 = vld [vmem:[#allocation2 + $0x121] sm:$0xff] }
 0x645   : > { %v5884_v29 = vmul.f32 %v5852_v10, %v16479_v35 }
 0x647   : > { %12881 = vmatmul.mubr.msk.f32.gmra.mrb[24].mxu1 %vm2149_vm2, %v5878_v26 }
 0x648   : > { %12883 = vmatprep.mubr.msk.f32.mxu1 %vm2149_vm2, %v5879_v31 }
 0x64b   : > { %12884 = vmatmul.mubr.msk.f32.gmra.mrb[26].mxu1 %vm2149_vm2, %v5880_v30 }
 0x64c   : > { %12886 = vmatprep.mubr.msk.f32.mxu1 %vm2149_vm2, %v5881_v58 }
 0x64f   : > { %12887 = vmatmul.mubr.msk.f32.gmra.mrb[28].mxu1 %vm2149_vm2, %v5882_v16 }
 0x650   : > { %12889 = vmatprep.mubr.msk.f32.mxu1 %vm2149_vm2, %v5883_v23 }
 0x653   : > { %12890 = vmatmul.mubr.msk.f32.gmra.mrb[30].mxu1 %vm2149_vm2, %v5884_v29 }
 0x654   : > { %13362 = vmatprep.mubr.msk.f32.mxu1 %vm2149_vm2, %v19808_v20 }
 0x657   : > { %13363 = vmatmul.mubr.msk.f32.vlgmr.msra.gmra.mrb[32].mxu1 %vm2149_vm2, %v19809_v34 }
 0x658   : > { %13365 = vmatprep.mubr.msk.f32.mxu1 %vm2149_vm2, %v16607_v61  ;;  %v6450_v61 = vld [vmem:[#allocation3 + $0x8] sm:$0xff] }
 0x659   : > { %12896 = vmatprep.mubr.msk.f32.mxu0 %vm6345_vm4, %v6450_v61 }
 0x65b   : > { %13366 = vmatmul.mubr.msk.f32.gmra.mrb[34].mxu1 %vm2149_vm2, %v16613_v25  ;;  %v6451_v25 = vld [vmem:[#allocation3 + $0x10] sm:$0xff] }
 0x65c   : > { %13368 = vmatprep.mubr.msk.f32.mxu1 %vm2149_vm2, %v16617_v1  ;;  %12897 = vmatmul.mubr.msk.f32.vlgmr.msra.gmra.mrb[32].mxu0 %vm6345_vm4, %v6451_v25  ;;  %v6448_v1 = vld [vmem:[%s18902_s7] sm:$0xff] }
 0x65f   : > { %13369 = vmatmul.mubr.msk.f32.gmra.mrb[36].mxu1 %vm2149_vm2, %v16621_v3  ;;  %v6449_v3 = vld [vmem:[%s18902_s7 + $0x8] sm:$0xff] }
 0x660   : > { %13371 = vmatprep.mubr.msk.f32.mxu1 %vm2149_vm2, %v16625_v24  ;;  %v13428_v24 = vpack.c.bf16 %v6449_v3, %v6448_v1 }
 0x662   : > { %13429 = vmatprep.subr.bf16.mxu0 %v13428_v24 }
 0x663   : > { %13372 = vmatmul.mubr.msk.f32.gmra.mrb[38].mxu1 %vm2149_vm2, %v16629_v2  ;;  %13431 = vmatpush3.bf16.msra.mxu0 %v13428_v24 }
 0x664   : > { %13374 = vmatprep.mubr.msk.f32.mxu1 %vm2149_vm2, %v16633_v7 }
 0x667   : > { %13375 = vmatmul.mubr.msk.f32.gmra.mrb[40].mxu1 %vm2149_vm2, %v16637_v15 }
 0x668   : > { %13377 = vmatprep.mubr.msk.f32.mxu1 %vm2149_vm2, %v16641_v56 }
 0x66b   : > { %13378 = vmatmul.mubr.msk.f32.gmra.mrb[42].mxu1 %vm2149_vm2, %v19765_v9 }
 0x66c   : > { %13380 = vmatprep.mubr.msk.f32.mxu1 %vm2149_vm2, %v19766_v11 }
 0x66f   : > { %13381 = vmatmul.mubr.msk.f32.gmra.mrb[44].mxu1 %vm2149_vm2, %v19767_v45 }
 0x670   : > { %13383 = vmatprep.mubr.msk.f32.mxu1 %vm2149_vm2, %v19768_v50 }
 0x673   : > { %13384 = vmatmul.mubr.msk.f32.gmra.mrb[46].mxu1 %vm2149_vm2, %v19769_v14 }
 0x674   : > { %13386 = vmatprep.mubr.msk.f32.mxu1 %vm2149_vm2, %v19770_v43 }
 0x677   : > { %13387 = vmatmul.mubr.msk.f32.gmra.mrb[48].mxu1 %vm2149_vm2, %v19771_v6 }
 0x678   : > { %13389 = vmatprep.mubr.msk.f32.mxu1 %vm2149_vm2, %v19772_v42 }
 0x67b   : > { %13390 = vmatmul.mubr.msk.f32.gmra.mrb[50].mxu1 %vm2149_vm2, %v19773_v60 }
 0x67c   : > { %13392 = vmatprep.mubr.msk.f32.mxu1 %vm2149_vm2, %v19774_v33 }
 0x67f   : > { %13393 = vmatmul.mubr.msk.f32.gmra.mrb[52].mxu1 %vm2149_vm2, %v19775_v53 }
 0x680   : > { %13395 = vmatprep.mubr.msk.f32.mxu1 %vm2149_vm2, %v19776_v59 }
 0x683   : > { %13396 = vmatmul.mubr.msk.f32.gmra.mrb[54].mxu1 %vm2149_vm2, %v19777_v62 }
 0x684   : > { %13398 = vmatprep.mubr.msk.f32.mxu1 %vm2149_vm2, %v19778_v36 }
 0x687   : > { %13399 = vmatmul.mubr.msk.f32.gmra.mrb[56].mxu1 %vm2149_vm2, %v19779_v41  ;;  %v7190_v41 = vld [vmem:[%s18902_s7 + $0x20] sm:$0xff] }
 0x688   : > { %13401 = vmatprep.mubr.msk.f32.mxu1 %vm2149_vm2, %v19780_v0 }
 0x68b   : > { %13402 = vmatmul.mubr.msk.f32.gmra.mrb[58].mxu1 %vm2149_vm2, %v19781_v47  ;;  %v7191_v47 = vld [vmem:[%s18902_s7 + $0x28] sm:$0xff] }
 0x68c   : > { %13404 = vmatprep.mubr.msk.f32.mxu1 %vm2149_vm2, %v16962_v37  ;;  %v17127_v0 = vpack.c.bf16 %v7191_v47, %v7190_v41 }
 0x68e   : > { %13433 = vmatprep.subr.bf16.mxu0 %v17127_v0 }
 0x68f   : > { %13405 = vmatmul.mubr.msk.f32.gmra.mrb[60].mxu1 %vm2149_vm2, %v16966_v19  ;;  %v17133_v19 = vld [vmem:[%s18901_s6] ss:$0 sm:$0xff] }
 0x690   : > { %13407 = vmatprep.mubr.msk.f32.mxu1 %vm2149_vm2, %v19782_v8 }
 0x693   : > { %13408 = vmatmul.mubr.msk.f32.gmra.mrb[62].mxu1 %vm2149_vm2, %v19783_v57  ;;  %v17138_v57 = vld [vmem:[%s18901_s6 + $0x1] ss:$0 sm:$0xff] }
 0x6ea   : > { %v12846_v8 = vpop.f32.mrb[0].mxu1 }
 0x6eb   : > { %v6245_v37 = vmul.f32 %v12846_v8, %v17133_v19  ;;  %v6048_v36 = vpop.f32.mrb[1].mxu1 }
 0x6ec   : > { %v6244_v62 = vmul.f32 %v17133_v19, %v6048_v36 }
 0x6ed   : > { %v6282_v2 = vadd.f32 %v17138_v57, %v6245_v37 }
 0x6ee   : > { %v6281_v7 = vadd.f32 %v17138_v57, %v6244_v62  ;;  %v12849_v15 = vpop.f32.mrb[2].mxu1 }
 0x6ef   : > { %v6314_v56 = vmax.f32 %v6282_v2, 0.0  ;;  %v6247_v51 = vmul.f32 %v12849_v15, %v17133_v19  ;;  %v6058_v9 = vpop.f32.mrb[3].mxu1 }
 0x6f0   : > { %v6313_v11 = vmax.f32 %v6281_v7, 0.0  ;;  %v6246_v45 = vmul.f32 %v17133_v19, %v6058_v9 }
 0x6f1   : > { %6353 = vst.msk [vmem:[#allocation3 + $0x20] sm:$0xff] %vm6345_vm4, %v6314_v56  ;;  %v6284_v50 = vadd.f32 %v17138_v57, %v6247_v51 }
 0x6f2   : > { %6352 = vst.msk [vmem:[#allocation3 + $0x18] sm:$0xff] %vm6345_vm4, %v6313_v11  ;;  %v6283_v14 = vadd.f32 %v17138_v57, %v6246_v45  ;;  %v12852_v43 = vpop.f32.mrb[4].mxu1 }
 0x6f3   : > { %v6316_v6 = vmax.f32 %v6284_v50, 0.0  ;;  %v6249_v42 = vmul.f32 %v12852_v43, %v17133_v19  ;;  %v6068_v60 = vpop.f32.mrb[5].mxu1 }
 0x6f4   : > { %v6315_v33 = vmax.f32 %v6283_v14, 0.0  ;;  %v6248_v53 = vmul.f32 %v17133_v19, %v6068_v60 }
 0x6f5   : > { %6355 = vst.msk [vmem:[#allocation3 + $0x30] sm:$0xff] %vm6345_vm4, %v6316_v6  ;;  %v6286_v59 = vadd.f32 %v17138_v57, %v6249_v42 }
 0x6f6   : > { %6354 = vst.msk [vmem:[#allocation3 + $0x28] sm:$0xff] %vm6345_vm4, %v6315_v33  ;;  %v6285_v26 = vadd.f32 %v17138_v57, %v6248_v53  ;;  %v12855_v55 = vpop.f32.mrb[6].mxu1 }
 0x6f7   : > { %v6318_v31 = vmax.f32 %v6286_v59, 0.0  ;;  %v6251_v30 = vmul.f32 %v12855_v55, %v17133_v19  ;;  %v6078_v58 = vpop.f32.mrb[7].mxu1 }
 0x6f8   : > { %v6317_v12 = vmax.f32 %v6285_v26, 0.0  ;;  %v6250_v16 = vmul.f32 %v17133_v19, %v6078_v58  ;;  %v6453_v34 = vld [vmem:[#allocation3 + $0x20] sm:$0xff] }
 0x6f9   : > { %6357 = vst.msk [vmem:[#allocation3 + $0x40] sm:$0xff] %vm6345_vm4, %v6318_v31  ;;  %v6288_v23 = vadd.f32 %v17138_v57, %v6251_v30  ;;  %v6452_v10 = vld [vmem:[#allocation3 + $0x18] sm:$0xff] }
 0x6fa   : > { %6356 = vst.msk [vmem:[#allocation3 + $0x38] sm:$0xff] %vm6345_vm4, %v6317_v12  ;;  %v6287_v29 = vadd.f32 %v17138_v57, %v6250_v16  ;;  %v12858_v20 = vpop.f32.mrb[8].mxu1  ;;  %12899 = vmatprep.mubr.msk.f32.mxu0 %vm6345_vm4, %v6452_v10 }
 0x6fb   : > { %v6320_v61 = vmax.f32 %v6288_v23, 0.0  ;;  %v6253_v25 = vmul.f32 %v12858_v20, %v17133_v19  ;;  %v6088_v1 = vpop.f32.mrb[9].mxu1  ;;  %12900 = vmatmul.mubr.msk.f32.gmra.mrb[34].mxu0 %vm6345_vm4, %v6453_v34 }
 0x6fc   : > { %v6319_v3 = vmax.f32 %v6287_v29, 0.0  ;;  %v6252_v24 = vmul.f32 %v17133_v19, %v6088_v1  ;;  %v6455_v36 = vld [vmem:[#allocation3 + $0x30] sm:$0xff] }
 0x6fd   : > { %6359 = vst.msk [vmem:[#allocation3 + $0x50] sm:$0xff] %vm6345_vm4, %v6320_v61  ;;  %v6290_v41 = vadd.f32 %v17138_v57, %v6253_v25  ;;  %v6454_v47 = vld [vmem:[#allocation3 + $0x28] sm:$0xff] }
 0x6fe   : > { %6358 = vst.msk [vmem:[#allocation3 + $0x48] sm:$0xff] %vm6345_vm4, %v6319_v3  ;;  %v6289_v8 = vadd.f32 %v17138_v57, %v6252_v24  ;;  %v12861_v37 = vpop.f32.mrb[10].mxu1  ;;  %12902 = vmatprep.mubr.msk.f32.mxu0 %vm6345_vm4, %v6454_v47 }
 0x6ff   : > { %v6322_v62 = vmax.f32 %v6290_v41, 0.0  ;;  %v6255_v2 = vmul.f32 %v12861_v37, %v17133_v19  ;;  %v6098_v7 = vpop.f32.mrb[11].mxu1  ;;  %12903 = vmatmul.mubr.msk.f32.gmra.mrb[36].mxu0 %vm6345_vm4, %v6455_v36 }
 0x700   : > { %v6321_v15 = vmax.f32 %v6289_v8, 0.0  ;;  %v6254_v56 = vmul.f32 %v17133_v19, %v6098_v7  ;;  %v6457_v50 = vld [vmem:[#allocation3 + $0x40] sm:$0xff] }
 0x701   : > { %6361 = vst.msk [vmem:[#allocation3 + $0x60] sm:$0xff] %vm6345_vm4, %v6322_v62  ;;  %v6292_v51 = vadd.f32 %v17138_v57, %v6255_v2  ;;  %v6456_v9 = vld [vmem:[#allocation3 + $0x38] sm:$0xff] }
 0x702   : > { %6360 = vst.msk [vmem:[#allocation3 + $0x58] sm:$0xff] %vm6345_vm4, %v6321_v15  ;;  %v6291_v11 = vadd.f32 %v17138_v57, %v6254_v56  ;;  %v12864_v45 = vpop.f32.mrb[12].mxu1  ;;  %12905 = vmatprep.mubr.msk.f32.mxu0 %vm6345_vm4, %v6456_v9 }
 0x703   : > { %v6324_v14 = vmax.f32 %v6292_v51, 0.0  ;;  %v6257_v43 = vmul.f32 %v12864_v45, %v17133_v19  ;;  %v6108_v6 = vpop.f32.mrb[13].mxu1  ;;  %12906 = vmatmul.mubr.msk.f32.gmra.mrb[38].mxu0 %vm6345_vm4, %v6457_v50 }
 0x704   : > { %v6323_v42 = vmax.f32 %v6291_v11, 0.0  ;;  %v6256_v60 = vmul.f32 %v17133_v19, %v6108_v6  ;;  %v6459_v55 = vld [vmem:[#allocation3 + $0x50] sm:$0xff] }
 0x705   : > { %6363 = vst.msk [vmem:[#allocation3 + $0x70] sm:$0xff] %vm6345_vm4, %v6324_v14  ;;  %v6294_v33 = vadd.f32 %v17138_v57, %v6257_v43  ;;  %v6458_v53 = vld [vmem:[#allocation3 + $0x48] sm:$0xff] }
 0x706   : > { %6362 = vst.msk [vmem:[#allocation3 + $0x68] sm:$0xff] %vm6345_vm4, %v6323_v42  ;;  %v6293_v59 = vadd.f32 %v17138_v57, %v6256_v60  ;;  %v12867_v26 = vpop.f32.mrb[14].mxu1  ;;  %12908 = vmatprep.mubr.msk.f32.mxu0 %vm6345_vm4, %v6458_v53 }
 0x707   : > { %v6326_v31 = vmax.f32 %v6294_v33, 0.0  ;;  %v6259_v30 = vmul.f32 %v12867_v26, %v17133_v19  ;;  %v6118_v58 = vpop.f32.mrb[15].mxu1  ;;  %12909 = vmatmul.mubr.msk.f32.gmra.mrb[40].mxu0 %vm6345_vm4, %v6459_v55 }
 0x708   : > { %v6325_v12 = vmax.f32 %v6293_v59, 0.0  ;;  %v6258_v16 = vmul.f32 %v17133_v19, %v6118_v58  ;;  %v6461_v34 = vld [vmem:[#allocation3 + $0x60] sm:$0xff] }
 0x709   : > { %6365 = vst.msk [vmem:[#allocation3 + $0x80] sm:$0xff] %vm6345_vm4, %v6326_v31  ;;  %v6296_v23 = vadd.f32 %v17138_v57, %v6259_v30  ;;  %v6460_v10 = vld [vmem:[#allocation3 + $0x58] sm:$0xff] }
 0x70a   : > { %6364 = vst.msk [vmem:[#allocation3 + $0x78] sm:$0xff] %vm6345_vm4, %v6325_v12  ;;  %v6295_v29 = vadd.f32 %v17138_v57, %v6258_v16  ;;  %v12870_v20 = vpop.f32.mrb[16].mxu1  ;;  %12911 = vmatprep.mubr.msk.f32.mxu0 %vm6345_vm4, %v6460_v10 }
 0x70b   : > { %v6328_v61 = vmax.f32 %v6296_v23, 0.0  ;;  %v6261_v25 = vmul.f32 %v12870_v20, %v17133_v19  ;;  %v6128_v1 = vpop.f32.mrb[17].mxu1  ;;  %12912 = vmatmul.mubr.msk.f32.gmra.mrb[42].mxu0 %vm6345_vm4, %v6461_v34 }
 0x70c   : > { %v6327_v3 = vmax.f32 %v6295_v29, 0.0  ;;  %v6260_v24 = vmul.f32 %v17133_v19, %v6128_v1  ;;  %v6463_v36 = vld [vmem:[#allocation3 + $0x70] sm:$0xff] }
 0x70d   : > { %6367 = vst.msk [vmem:[#allocation3 + $0x90] sm:$0xff] %vm6345_vm4, %v6328_v61  ;;  %v6298_v41 = vadd.f32 %v17138_v57, %v6261_v25  ;;  %v6462_v47 = vld [vmem:[#allocation3 + $0x68] sm:$0xff] }
 0x70e   : > { %6366 = vst.msk [vmem:[#allocation3 + $0x88] sm:$0xff] %vm6345_vm4, %v6327_v3  ;;  %v6297_v8 = vadd.f32 %v17138_v57, %v6260_v24  ;;  %v12873_v37 = vpop.f32.mrb[18].mxu1  ;;  %12914 = vmatprep.mubr.msk.f32.mxu0 %vm6345_vm4, %v6462_v47 }
 0x70f   : > { %v6330_v62 = vmax.f32 %v6298_v41, 0.0  ;;  %v6263_v2 = vmul.f32 %v12873_v37, %v17133_v19  ;;  %v6138_v7 = vpop.f32.mrb[19].mxu1  ;;  %12915 = vmatmul.mubr.msk.f32.gmra.mrb[44].mxu0 %vm6345_vm4, %v6463_v36 }
 0x710   : > { %v6329_v15 = vmax.f32 %v6297_v8, 0.0  ;;  %v6262_v56 = vmul.f32 %v17133_v19, %v6138_v7  ;;  %v6465_v50 = vld [vmem:[#allocation3 + $0x80] sm:$0xff] }
 0x711   : > { %6369 = vst.msk [vmem:[#allocation3 + $0xa0] sm:$0xff] %vm6345_vm4, %v6330_v62  ;;  %v6300_v51 = vadd.f32 %v17138_v57, %v6263_v2  ;;  %v6464_v9 = vld [vmem:[#allocation3 + $0x78] sm:$0xff] }
 0x712   : > { %6368 = vst.msk [vmem:[#allocation3 + $0x98] sm:$0xff] %vm6345_vm4, %v6329_v15  ;;  %v6299_v11 = vadd.f32 %v17138_v57, %v6262_v56  ;;  %v12876_v45 = vpop.f32.mrb[20].mxu1  ;;  %12917 = vmatprep.mubr.msk.f32.mxu0 %vm6345_vm4, %v6464_v9 }
 0x713   : > { %v6332_v14 = vmax.f32 %v6300_v51, 0.0  ;;  %v6265_v43 = vmul.f32 %v12876_v45, %v17133_v19  ;;  %v6148_v6 = vpop.f32.mrb[21].mxu1  ;;  %12918 = vmatmul.mubr.msk.f32.gmra.mrb[46].mxu0 %vm6345_vm4, %v6465_v50 }
 0x714   : > { %v6331_v42 = vmax.f32 %v6299_v11, 0.0  ;;  %v6264_v60 = vmul.f32 %v17133_v19, %v6148_v6  ;;  %v17222_v55 = vld [vmem:[#allocation3 + $0x90] sm:$0xff] }
 0x715   : > { %6371 = vst.msk [vmem:[#allocation3 + $0xb0] sm:$0xff] %vm6345_vm4, %v6332_v14  ;;  %v6302_v33 = vadd.f32 %v17138_v57, %v6265_v43  ;;  %v17216_v53 = vld [vmem:[#allocation3 + $0x88] sm:$0xff]  ;;  %19811 = vst [vmem:[#allocation20_spill] sm:$0xff] %v17222_v55 }
 0x716   : > { %19810 = vst [vmem:[#allocation36_spill] sm:$0xff] %v17216_v53  ;;  %6370 = vst.msk [vmem:[#allocation3 + $0xa8] sm:$0xff] %vm6345_vm4, %v6331_v42  ;;  %v6301_v59 = vadd.f32 %v17138_v57, %v6264_v60  ;;  %v12879_v26 = vpop.f32.mrb[22].mxu1  ;;  %12920 = vmatprep.mubr.msk.f32.mxu0 %vm6345_vm4, %v17216_v53 }
 0x717   : > { %v6334_v31 = vmax.f32 %v6302_v33, 0.0  ;;  %v6267_v30 = vmul.f32 %v12879_v26, %v17133_v19  ;;  %v6158_v58 = vpop.f32.mrb[23].mxu1  ;;  %12921 = vmatmul.mubr.msk.f32.gmra.mrb[48].mxu0 %vm6345_vm4, %v17222_v55 }
 0x718   : > { %v6333_v12 = vmax.f32 %v6301_v59, 0.0  ;;  %v6266_v16 = vmul.f32 %v17133_v19, %v6158_v58  ;;  %v17236_v34 = vld [vmem:[#allocation3 + $0xa0] sm:$0xff] }
 0x719   : > { %6373 = vst.msk [vmem:[#allocation3 + $0xc0] sm:$0xff] %vm6345_vm4, %v6334_v31  ;;  %v6304_v23 = vadd.f32 %v17138_v57, %v6267_v30  ;;  %v17230_v10 = vld [vmem:[#allocation3 + $0x98] sm:$0xff]  ;;  %19813 = vst [vmem:[#allocation40_spill] sm:$0xff] %v17236_v34 }
 0x71a   : > { %19812 = vst [vmem:[#allocation46_spill] sm:$0xff] %v17230_v10  ;;  %6372 = vst.msk [vmem:[#allocation3 + $0xb8] sm:$0xff] %vm6345_vm4, %v6333_v12  ;;  %v6303_v29 = vadd.f32 %v17138_v57, %v6266_v16  ;;  %v12882_v20 = vpop.f32.mrb[24].mxu1  ;;  %12923 = vmatprep.mubr.msk.f32.mxu0 %vm6345_vm4, %v17230_v10 }
 0x71b   : > { %v6336_v61 = vmax.f32 %v6304_v23, 0.0  ;;  %v6269_v25 = vmul.f32 %v12882_v20, %v17133_v19  ;;  %v6168_v1 = vpop.f32.mrb[25].mxu1  ;;  %12924 = vmatmul.mubr.msk.f32.gmra.mrb[50].mxu0 %vm6345_vm4, %v17236_v34 }
 0x71c   : > { %v6335_v3 = vmax.f32 %v6303_v29, 0.0  ;;  %v6268_v24 = vmul.f32 %v17133_v19, %v6168_v1  ;;  %v17250_v36 = vld [vmem:[#allocation3 + $0xb0] sm:$0xff] }
 0x71d   : > { %6375 = vst.msk [vmem:[#allocation3 + $0xd0] sm:$0xff] %vm6345_vm4, %v6336_v61  ;;  %v6306_v41 = vadd.f32 %v17138_v57, %v6269_v25  ;;  %v17244_v47 = vld [vmem:[#allocation3 + $0xa8] sm:$0xff]  ;;  %19815 = vst [vmem:[#allocation60_spill] sm:$0xff] %v17250_v36 }
 0x71e   : > { %19814 = vst [vmem:[#allocation59_spill] sm:$0xff] %v17244_v47  ;;  %6374 = vst.msk [vmem:[#allocation3 + $0xc8] sm:$0xff] %vm6345_vm4, %v6335_v3  ;;  %v6305_v8 = vadd.f32 %v17138_v57, %v6268_v24  ;;  %v12885_v37 = vpop.f32.mrb[26].mxu1  ;;  %12926 = vmatprep.mubr.msk.f32.mxu0 %vm6345_vm4, %v17244_v47 }
 0x71f   : > { %v6338_v62 = vmax.f32 %v6306_v41, 0.0  ;;  %v6271_v2 = vmul.f32 %v12885_v37, %v17133_v19  ;;  %v6178_v7 = vpop.f32.mrb[27].mxu1  ;;  %12927 = vmatmul.mubr.msk.f32.gmra.mrb[52].mxu0 %vm6345_vm4, %v17250_v36 }
 0x720   : > { %v6337_v15 = vmax.f32 %v6305_v8, 0.0  ;;  %v6270_v56 = vmul.f32 %v17133_v19, %v6178_v7  ;;  %v17264_v50 = vld [vmem:[#allocation3 + $0xc0] sm:$0xff] }
 0x721   : > { %6377 = vst.msk [vmem:[#allocation3 + $0xe0] sm:$0xff] %vm6345_vm4, %v6338_v62  ;;  %v6308_v51 = vadd.f32 %v17138_v57, %v6271_v2  ;;  %v17258_v9 = vld [vmem:[#allocation3 + $0xb8] sm:$0xff]  ;;  %19817 = vst [vmem:[#allocation63_spill] sm:$0xff] %v17264_v50 }
 0x722   : > { %19816 = vst [vmem:[#allocation51_spill] sm:$0xff] %v17258_v9  ;;  %6376 = vst.msk [vmem:[#allocation3 + $0xd8] sm:$0xff] %vm6345_vm4, %v6337_v15  ;;  %v6307_v11 = vadd.f32 %v17138_v57, %v6270_v56  ;;  %v12888_v45 = vpop.f32.mrb[28].mxu1  ;;  %12929 = vmatprep.mubr.msk.f32.mxu0 %vm6345_vm4, %v17258_v9  ;;  %v6384_v56 = vld [vmem:[#allocation3 + $0x7] sm:$0xff] }
 0x723   : > { %v6340_v14 = vmax.f32 %v6308_v51, 0.0  ;;  %v6273_v43 = vmul.f32 %v12888_v45, %v17133_v19  ;;  %v6188_v6 = vpop.f32.mrb[29].mxu1  ;;  %12930 = vmatmul.mubr.msk.f32.gmra.mrb[54].mxu0 %vm6345_vm4, %v17264_v50 }
 0x724   : > { %v6339_v42 = vmax.f32 %v6307_v11, 0.0  ;;  %v6272_v60 = vmul.f32 %v17133_v19, %v6188_v6  ;;  %v17278_v30 = vld [vmem:[#allocation3 + $0xd0] sm:$0xff] }
 0x725   : > { %6379 = vst.msk [vmem:[#allocation3 + $0xf0] sm:$0xff] %vm6345_vm4, %v6340_v14  ;;  %v6310_v33 = vadd.f32 %v17138_v57, %v6273_v43  ;;  %v17272_v59 = vld [vmem:[#allocation3 + $0xc8] sm:$0xff]  ;;  %19819 = vst [vmem:[#allocation26_spill] sm:$0xff] %v17278_v30 }
 0x726   : > { %19818 = vst [vmem:[#allocation25_spill] sm:$0xff] %v17272_v59  ;;  %6378 = vst.msk [vmem:[#allocation3 + $0xe8] sm:$0xff] %vm6345_vm4, %v6339_v42  ;;  %v6309_v26 = vadd.f32 %v17138_v57, %v6272_v60  ;;  %v12891_v31 = vpop.f32.mrb[30].mxu1  ;;  %12932 = vmatprep.mubr.msk.f32.mxu0 %vm6345_vm4, %v17272_v59  ;;  %v6385_v11 = vld [vmem:[#allocation3 + $0xf] sm:$0xff]  ;;  %v6416_v60 = vmul.f32 %v6384_v56, %v15970_v49  ;;  %v17360_v56 = vld [vmem:[#allocation3 + $0x27] sm:$0xff] }
 0x727   : > { %v6342_v58 = vmax.f32 %v6310_v33, 0.0  ;;  %v6275_v12 = vmul.f32 %v12891_v31, %v17133_v19  ;;  %v6198_v16 = vpop.f32.mrb[31].mxu1  ;;  %12933 = vmatmul.mubr.msk.f32.gmra.mrb[56].mxu0 %vm6345_vm4, %v17278_v30  ;;  %v7609_v33 = vld [vmem:[%s18902_s7 + $0x30] sm:$0xff] }
 0x728   : > { %v6341_v23 = vmax.f32 %v6309_v26, 0.0  ;;  %v6274_v29 = vmul.f32 %v17133_v19, %v6198_v16  ;;  %v17294_v3 = vld [vmem:[#allocation3 + $0xe0] sm:$0xff]  ;;  %v7610_v26 = vld [vmem:[%s18902_s7 + $0x38] sm:$0xff] }
 0x729   : > { %6381 = vst.msk [vmem:[#allocation3 + $0x100] sm:$0xff] %vm6345_vm4, %v6342_v58  ;;  %v6312_v20 = vadd.f32 %v17138_v57, %v6275_v12  ;;  %v17286_v61 = vld [vmem:[#allocation3 + $0xd8] sm:$0xff]  ;;  %19822 = vst [vmem:[#allocation68_spill] sm:$0xff] %v17294_v3 }
 0x72a   : > { %19820 = vst [vmem:[#allocation65_spill] sm:$0xff] %v17286_v61  ;;  %6380 = vst.msk [vmem:[#allocation3 + $0xf8] sm:$0xff] %vm6345_vm4, %v6341_v23  ;;  %v6311_v25 = vadd.f32 %v17138_v57, %v6274_v29  ;;  %12935 = vmatprep.mubr.msk.f32.mxu0 %vm6345_vm4, %v17286_v61  ;;  %v17292_v1 = vpop.f32.mrb[32].mxu1  ;;  %v17341_v12 = vld [vmem:[#allocation3 + $0x17] sm:$0xff]  ;;  %v6417_v23 = vmul.f32 %v6385_v11, %v15968_v4 }
 0x72b   : > { %19821 = vst [vmem:[#allocation52_spill] sm:$0xff] %v17292_v1  ;;  %v6344_v24 = vmax.f32 %v6312_v20, 0.0  ;;  %v10424_v19 = vsel %vm6345_vm4, %v17292_v1, 0.0  ;;  %12936 = vmatmul.mubr.msk.f32.gmra.mrb[58].mxu0 %vm6345_vm4, %v17294_v3  ;;  %v17300_v41 = vpop.f32.mrb[33].mxu1  ;;  %v17347_v20 = vpack.c.bf16 %v7610_v26, %v7609_v33  ;;  %v6420_v26 = vmul.f32 %v17360_v56, %v15975_v46 }
 0x72c   : > { %19823 = vst [vmem:[#allocation21_spill] sm:$0xff] %v17300_v41  ;;  %v6343_v8 = vmax.f32 %v6311_v25, 0.0  ;;  %v10423_v57 = vsel %vm6345_vm4, %v17300_v41, 0.0  ;;  %v17312_v7 = vld [vmem:[#allocation3 + $0xf0] sm:$0xff] }
 0x72d   : > { %6383 = vst.msk [vmem:[#allocation3 + $0x110] sm:$0xff] %vm6345_vm4, %v6344_v24  ;;  %v10425_v37 = vadd.f32 %v10424_v19, %v10423_v57  ;;  %v17305_v62 = vld [vmem:[#allocation3 + $0xe8] sm:$0xff]  ;;  %19826 = vst [vmem:[#allocation84_spill] sm:$0xff] %v17312_v7  ;;  %v6418_v19 = vmul.f32 %v17341_v12, %v15977_v28 }
 0x72e   : > { %19824 = vst [vmem:[#allocation28_spill] sm:$0xff] %v17305_v62  ;;  %6382 = vst.msk [vmem:[#allocation3 + $0x108] sm:$0xff] %vm6345_vm4, %v6343_v8  ;;  %12938 = vmatprep.mubr.msk.f32.mxu0 %vm6345_vm4, %v17305_v62  ;;  %v17310_v2 = vpop.f32.mrb[34].mxu1  ;;  %v17355_v8 = vld [vmem:[#allocation3 + $0x1f] sm:$0xff] }
 0x72f   : > { %19825 = vst [vmem:[#allocation83_spill] sm:$0xff] %v17310_v2  ;;  %12939 = vmatmul.mubr.msk.f32.gmra.mrb[60].mxu0 %vm6345_vm4, %v17312_v7  ;;  %v17316_v15 = vpop.f32.mrb[35].mxu1  ;;  %v10428_v43 = vsel %vm6345_vm4, %v17310_v2, 0.0 }
 0x730   : > { %19827 = vst [vmem:[#allocation86_spill] sm:$0xff] %v17316_v15  ;;  %v10426_v51 = vsel %vm6345_vm4, %v17316_v15, 0.0  ;;  %v17328_v42 = vld [vmem:[#allocation3 + $0x100] sm:$0xff] }
 0x731   : > { %v10427_v45 = vadd.f32 %v10426_v51, %v10425_v37  ;;  %v17320_v14 = vld [vmem:[#allocation3 + $0xf8] sm:$0xff]  ;;  %19830 = vst [vmem:[#allocation91_spill] sm:$0xff] %v17328_v42 }
 0x732   : > { %19828 = vst [vmem:[#allocation87_spill] sm:$0xff] %v17320_v14  ;;  %12941 = vmatprep.mubr.msk.f32.mxu0 %vm6345_vm4, %v17320_v14  ;;  %v17326_v6 = vpop.f32.mrb[36].mxu1 }
 0x733   : > { %19829 = vst [vmem:[#allocation90_spill] sm:$0xff] %v17326_v6  ;;  %12942 = vmatmul.mubr.msk.f32.gmra.mrb[62].mxu0 %vm6345_vm4, %v17328_v42  ;;  %v17339_v31 = vpop.f32.mrb[37].mxu1  ;;  %v10429_v58 = vadd.f32 %v10428_v43, %v10427_v45  ;;  %v10432_v25 = vsel %vm6345_vm4, %v17326_v6, 0.0  ;;  %v19834_v45 = vld [vmem:[#allocation77_spill] sm:$0xff] }
 0x734   : > { %19831 = vst [vmem:[#allocation93_spill] sm:$0xff] %v17339_v31  ;;  %v10430_v16 = vsel %vm6345_vm4, %v17339_v31, 0.0  ;;  %12948 = vmatprep.mubr.msk.f32.mxu0 %vm6345_vm4, %v6416_v60  ;;  %v6419_v43 = vmul.f32 %v17355_v8, %v19834_v45 }
 0x735   : > { %v10431_v29 = vadd.f32 %v10430_v16, %v10429_v58 }
 0x736   : > { %v17351_v24 = vpop.f32.mrb[38].mxu1 }
 0x737   : > { %19832 = vst [vmem:[#allocation88_spill] sm:$0xff] %v17351_v24  ;;  %12949 = vmatmul.mubr.msk.f32.vlgmr.msra.gmra.mrb[32].mxu0 %vm6345_vm4, %v6417_v23  ;;  %v17358_v57 = vpop.f32.mrb[39].mxu1  ;;  %v10433_v37 = vadd.f32 %v10432_v25, %v10431_v29  ;;  %v10436_v60 = vsel %vm6345_vm4, %v17351_v24, 0.0  ;;  %v17380_v23 = vld [vmem:[#allocation3 + $0x37] sm:$0xff] }
 0x738   : > { %19833 = vst [vmem:[#allocation95_spill] sm:$0xff] %v17358_v57  ;;  %13435 = vmatpush3.bf16.msra.mxu0 %v17127_v0  ;;  %v10434_v51 = vsel %vm6345_vm4, %v17358_v57, 0.0  ;;  %12951 = vmatprep.mubr.msk.f32.mxu0 %vm6345_vm4, %v6418_v19  ;;  %v17375_v0 = vld [vmem:[#allocation3 + $0x2f] sm:$0xff] }
 0x739   : > { %v10435_v11 = vadd.f32 %v10434_v51, %v10433_v37  ;;  %13437 = vmatprep.subr.bf16.mxu0 %v17347_v20  ;;  %v6421_v19 = vmul.f32 %v17375_v0, %v16010_v44 }
 0x73a   : > { %v17371_v33 = vpop.f32.mrb[40].mxu1 }
 0x73b   : > { %19835 = vst [vmem:[#allocation92_spill] sm:$0xff] %v17371_v33  ;;  %12952 = vmatmul.mubr.msk.f32.gmra.mrb[34].mxu0 %vm6345_vm4, %v6419_v43  ;;  %v17378_v58 = vpop.f32.mrb[41].mxu1  ;;  %v10437_v16 = vadd.f32 %v10436_v60, %v10435_v11  ;;  %v10440_v37 = vsel %vm6345_vm4, %v17371_v33, 0.0  ;;  %v6422_v43 = vmul.f32 %v17380_v23, %v15994_v39  ;;  %v17393_v11 = vld [vmem:[#allocation3 + $0x3f] sm:$0xff] }
 0x73c   : > { %19836 = vst [vmem:[#allocation15_spill] sm:$0xff] %v17378_v58  ;;  %v10438_v29 = vsel %vm6345_vm4, %v17378_v58, 0.0  ;;  %12954 = vmatprep.mubr.msk.f32.mxu0 %vm6345_vm4, %v6420_v26  ;;  %v17398_v26 = vld [vmem:[#allocation3 + $0x47] sm:$0xff]  ;;  %v6423_v33 = vmul.f32 %v17393_v11, %v16026_v63 }
 0x73d   : > { %v10439_v25 = vadd.f32 %v10438_v29, %v10437_v16 }
 0x73e   : > { %v17389_v51 = vpop.f32.mrb[42].mxu1 }
 0x73f   : > { %19837 = vst [vmem:[#allocation29_spill] sm:$0xff] %v17389_v51  ;;  %12955 = vmatmul.mubr.msk.f32.gmra.mrb[36].mxu0 %vm6345_vm4, %v6421_v19  ;;  %v17396_v60 = vpop.f32.mrb[43].mxu1  ;;  %v10441_v58 = vadd.f32 %v10440_v37, %v10439_v25  ;;  %v10444_v24 = vsel %vm6345_vm4, %v17389_v51, 0.0  ;;  %v19840_v19 = vld [vmem:[#allocation7_spill] sm:$0xff]  ;;  %v19842_v51 = vld [vmem:[#allocation80_spill] sm:$0xff] }
 0x740   : > { %19838 = vst [vmem:[#allocation81_spill] sm:$0xff] %v17396_v60  ;;  %v10442_v16 = vsel %vm6345_vm4, %v17396_v60, 0.0  ;;  %12957 = vmatprep.mubr.msk.f32.mxu0 %vm6345_vm4, %v6422_v43  ;;  %v6424_v6 = vmul.f32 %v17398_v26, %v19840_v19  ;;  %v17411_v25 = vld [vmem:[#allocation3 + $0x4f] sm:$0xff]  ;;  %v17416_v43 = vld [vmem:[#allocation3 + $0x57] sm:$0xff] }
 0x741   : > { %v10443_v29 = vadd.f32 %v10442_v16, %v10441_v58  ;;  %v6425_v31 = vmul.f32 %v17411_v25, %v19842_v51 }
 0x742   : > { %v17407_v57 = vpop.f32.mrb[44].mxu1 }
 0x743   : > { %19839 = vst [vmem:[#allocation23_spill] sm:$0xff] %v17407_v57  ;;  %12958 = vmatmul.mubr.msk.f32.gmra.mrb[38].mxu0 %vm6345_vm4, %v6423_v33  ;;  %v17414_v37 = vpop.f32.mrb[45].mxu1  ;;  %v10445_v60 = vadd.f32 %v10444_v24, %v10443_v29  ;;  %v10448_v2 = vsel %vm6345_vm4, %v17407_v57, 0.0  ;;  %v19844_v33 = vld [vmem:[#allocation69_spill] sm:$0xff]  ;;  %v19846_v57 = vld [vmem:[#allocation4_spill] sm:$0xff] }
 0x744   : > { %19841 = vst [vmem:[#allocation11_spill] sm:$0xff] %v17414_v37  ;;  %v10446_v58 = vsel %vm6345_vm4, %v17414_v37, 0.0  ;;  %12960 = vmatprep.mubr.msk.f32.mxu0 %vm6345_vm4, %v6424_v6  ;;  %v6426_v1 = vmul.f32 %v17416_v43, %v19844_v33  ;;  %v17429_v24 = vld [vmem:[#allocation3 + $0x5f] sm:$0xff]  ;;  %v17434_v6 = vld [vmem:[#allocation3 + $0x67] sm:$0xff] }
 0x745   : > { %v10447_v16 = vadd.f32 %v10446_v58, %v10445_v60  ;;  %v6427_v41 = vmul.f32 %v17429_v24, %v19846_v57 }
 0x746   : > { %v17425_v15 = vpop.f32.mrb[46].mxu1 }
 0x747   : > { %19843 = vst [vmem:[#allocation19_spill] sm:$0xff] %v17425_v15  ;;  %12961 = vmatmul.mubr.msk.f32.gmra.mrb[40].mxu0 %vm6345_vm4, %v6425_v31  ;;  %v17432_v29 = vpop.f32.mrb[47].mxu1  ;;  %v10449_v37 = vadd.f32 %v10448_v2, %v10447_v16  ;;  %v10452_v42 = vsel %vm6345_vm4, %v17425_v15, 0.0  ;;  %v19848_v31 = vld [vmem:[#allocation79_spill] sm:$0xff]  ;;  %v19850_v15 = vld [vmem:[#allocation13_spill] sm:$0xff] }
 0x748   : > { %19845 = vst [vmem:[#allocation38_spill] sm:$0xff] %v17432_v29  ;;  %v10450_v60 = vsel %vm6345_vm4, %v17432_v29, 0.0  ;;  %12963 = vmatprep.mubr.msk.f32.mxu0 %vm6345_vm4, %v6426_v1  ;;  %v6428_v7 = vmul.f32 %v17434_v6, %v19848_v31  ;;  %v17447_v2 = vld [vmem:[#allocation3 + $0x6f] sm:$0xff]  ;;  %v17452_v1 = vld [vmem:[#allocation3 + $0x77] sm:$0xff] }
 0x749   : > { %v10451_v58 = vadd.f32 %v10450_v60, %v10449_v37  ;;  %v6429_v62 = vmul.f32 %v17447_v2, %v19850_v15 }
 0x74a   : > { %v17443_v14 = vpop.f32.mrb[48].mxu1 }
 0x74b   : > { %19847 = vst [vmem:[#allocation97_spill] sm:$0xff] %v17443_v14  ;;  %12964 = vmatmul.mubr.msk.f32.gmra.mrb[42].mxu0 %vm6345_vm4, %v6427_v41  ;;  %v17450_v16 = vpop.f32.mrb[49].mxu1  ;;  %v10453_v29 = vadd.f32 %v10452_v42, %v10451_v58  ;;  %v10456_v3 = vsel %vm6345_vm4, %v17443_v14, 0.0  ;;  %v19852_v41 = vld [vmem:[#allocation70_spill] sm:$0xff]  ;;  %v19854_v14 = vld [vmem:[#allocation73_spill] sm:$0xff] }
 0x74c   : > { %19849 = vst [vmem:[#allocation98_spill] sm:$0xff] %v17450_v16  ;;  %v10454_v37 = vsel %vm6345_vm4, %v17450_v16, 0.0  ;;  %12966 = vmatprep.mubr.msk.f32.mxu0 %vm6345_vm4, %v6428_v7  ;;  %v6430_v30 = vmul.f32 %v17452_v1, %v19852_v41  ;;  %v17465_v42 = vld [vmem:[#allocation3 + $0x7f] sm:$0xff]  ;;  %v17470_v7 = vld [vmem:[#allocation3 + $0x87] sm:$0xff] }
 0x74d   : > { %v10455_v60 = vadd.f32 %v10454_v37, %v10453_v29  ;;  %v6431_v59 = vmul.f32 %v17465_v42, %v19854_v14 }
 0x74e   : > { %v17461_v61 = vpop.f32.mrb[50].mxu1 }
 0x74f   : > { %19851 = vst [vmem:[#allocation99_spill] sm:$0xff] %v17461_v61  ;;  %12967 = vmatmul.mubr.msk.f32.gmra.mrb[44].mxu0 %vm6345_vm4, %v6429_v62  ;;  %v17468_v58 = vpop.f32.mrb[51].mxu1  ;;  %v10457_v16 = vadd.f32 %v10456_v3, %v10455_v60  ;;  %v10460_v50 = vsel %vm6345_vm4, %v17461_v61, 0.0  ;;  %v19856_v62 = vld [vmem:[#allocation6_spill] sm:$0xff]  ;;  %v17483_v3 = vld [vmem:[#allocation3 + $0x8f] sm:$0xff] }
 0x750   : > { %19853 = vst [vmem:[#allocation100_spill] sm:$0xff] %v17468_v58  ;;  %v10458_v29 = vsel %vm6345_vm4, %v17468_v58, 0.0  ;;  %12969 = vmatprep.mubr.msk.f32.mxu0 %vm6345_vm4, %v6430_v30  ;;  %v6432_v36 = vmul.f32 %v17470_v7, %v19856_v62  ;;  %v17488_v30 = vld [vmem:[#allocation3 + $0x97] sm:$0xff]  ;;  %v19859_v61 = vld [vmem:[#allocation14_spill] sm:$0xff] }
 0x751   : > { %v10459_v37 = vadd.f32 %v10458_v29, %v10457_v16  ;;  %19858 = vst [vmem:[#allocation103_spill] sm:$0xff] %v17488_v30  ;;  %v6433_v47 = vmul.f32 %v17483_v3, %v19859_v61 }
 0x752   : > { %v17479_v9 = vpop.f32.mrb[52].mxu1 }
 0x753   : > { %19855 = vst [vmem:[#allocation101_spill] sm:$0xff] %v17479_v9  ;;  %12970 = vmatmul.mubr.msk.f32.gmra.mrb[46].mxu0 %vm6345_vm4, %v6431_v59  ;;  %v17486_v60 = vpop.f32.mrb[53].mxu1  ;;  %v10461_v58 = vadd.f32 %v10460_v50, %v10459_v37  ;;  %v10464_v34 = vsel %vm6345_vm4, %v17479_v9, 0.0  ;;  %v19861_v59 = vld [vmem:[#allocation8_spill] sm:$0xff]  ;;  %v17501_v50 = vld [vmem:[#allocation3 + $0x9f] sm:$0xff]  ;;  %v19865_v9 = vld [vmem:[#allocation71_spill] sm:$0xff] }
 0x754   : > { %19857 = vst [vmem:[#allocation102_spill] sm:$0xff] %v17486_v60  ;;  %v10462_v16 = vsel %vm6345_vm4, %v17486_v60, 0.0  ;;  %12972 = vmatprep.mubr.msk.f32.mxu0 %vm6345_vm4, %v6432_v36  ;;  %v6434_v55 = vmul.f32 %v17488_v30, %v19861_v59  ;;  %19862 = vst [vmem:[#allocation105_spill] sm:$0xff] %v17501_v50  ;;  %v17506_v36 = vld [vmem:[#allocation3 + $0xa7] sm:$0xff]  ;;  %v6435_v53 = vmul.f32 %v17501_v50, %v19865_v9 }
 0x755   : > { %v10463_v29 = vadd.f32 %v10462_v16, %v10461_v58  ;;  %19864 = vst [vmem:[#allocation58_spill] sm:$0xff] %v17506_v36 }
 0x756   : > { %v17497_v10 = vpop.f32.mrb[54].mxu1 }
 0x757   : > { %19860 = vst [vmem:[#allocation104_spill] sm:$0xff] %v17497_v10  ;;  %12973 = vmatmul.mubr.msk.f32.gmra.mrb[48].mxu0 %vm6345_vm4, %v6433_v47  ;;  %v17504_v37 = vpop.f32.mrb[55].mxu1  ;;  %v10465_v60 = vadd.f32 %v10464_v34, %v10463_v29  ;;  %v10468_v59 = vsel %vm6345_vm4, %v17497_v10, 0.0  ;;  %v19867_v47 = vld [vmem:[#allocation32_spill] sm:$0xff] }
 0x758   : > { %19863 = vst [vmem:[#allocation106_spill] sm:$0xff] %v17504_v37  ;;  %v10466_v58 = vsel %vm6345_vm4, %v17504_v37, 0.0  ;;  %12975 = vmatprep.mubr.msk.f32.mxu0 %vm6345_vm4, %v6434_v55  ;;  %v6436_v30 = vmul.f32 %v17506_v36, %v19867_v47  ;;  %v17519_v34 = vld [vmem:[#allocation3 + $0xaf] sm:$0xff]  ;;  %v17524_v55 = vld [vmem:[#allocation3 + $0xb7] sm:$0xff] }
 0x759   : > { %v10467_v16 = vadd.f32 %v10466_v58, %v10465_v60  ;;  %19868 = vst [vmem:[#allocation18_spill] sm:$0xff] %v17519_v34  ;;  %19870 = vst [vmem:[#allocation76_spill] sm:$0xff] %v17524_v55  ;;  %v19871_v10 = vld [vmem:[#allocation12_spill] sm:$0xff] }
 0x75a   : > { %v17515_v61 = vpop.f32.mrb[56].mxu1  ;;  %v6437_v9 = vmul.f32 %v17519_v34, %v19871_v10 }
 0x75b   : > { %19866 = vst [vmem:[#allocation30_spill] sm:$0xff] %v17515_v61  ;;  %12976 = vmatmul.mubr.msk.f32.gmra.mrb[50].mxu0 %vm6345_vm4, %v6435_v53  ;;  %v17522_v29 = vpop.f32.mrb[57].mxu1  ;;  %v10469_v37 = vadd.f32 %v10468_v59, %v10467_v16  ;;  %v10472_v47 = vsel %vm6345_vm4, %v17515_v61, 0.0  ;;  %v19873_v53 = vld [vmem:[#allocation75_spill] sm:$0xff]  ;;  %v17537_v59 = vld [vmem:[#allocation3 + $0xbf] sm:$0xff]  ;;  %v19877_v61 = vld [vmem:[#allocation24_spill] sm:$0xff] }
 0x75c   : > { %19869 = vst [vmem:[#allocation78_spill] sm:$0xff] %v17522_v29  ;;  %v10470_v60 = vsel %vm6345_vm4, %v17522_v29, 0.0  ;;  %12978 = vmatprep.mubr.msk.f32.mxu0 %vm6345_vm4, %v6436_v30  ;;  %v6438_v50 = vmul.f32 %v17524_v55, %v19873_v53  ;;  %19874 = vst [vmem:[#allocation7_spill] sm:$0xff] %v17537_v59  ;;  %v17542_v30 = vld [vmem:[#allocation3 + $0xc7] sm:$0xff]  ;;  %v6439_v10 = vmul.f32 %v17537_v59, %v19877_v61 }
 0x75d   : > { %v10471_v58 = vadd.f32 %v10470_v60, %v10469_v37  ;;  %19876 = vst [vmem:[#allocation69_spill] sm:$0xff] %v17542_v30 }
 0x75e   : > { %v17533_v36 = vpop.f32.mrb[58].mxu1 }
 0x75f   : > { %19872 = vst [vmem:[#allocation77_spill] sm:$0xff] %v17533_v36  ;;  %12979 = vmatmul.mubr.msk.f32.gmra.mrb[52].mxu0 %vm6345_vm4, %v6437_v9  ;;  %v17540_v16 = vpop.f32.mrb[59].mxu1  ;;  %v10473_v29 = vadd.f32 %v10472_v47, %v10471_v58  ;;  %v10476_v53 = vsel %vm6345_vm4, %v17533_v36, 0.0  ;;  %v19879_v9 = vld [vmem:[#allocation35_spill] sm:$0xff]  ;;  %v19883_v36 = vld [vmem:[#allocation72_spill] sm:$0xff] }
 0x760   : > { %19875 = vst [vmem:[#allocation80_spill] sm:$0xff] %v17540_v16  ;;  %v10474_v37 = vsel %vm6345_vm4, %v17540_v16, 0.0  ;;  %12981 = vmatprep.mubr.msk.f32.mxu0 %vm6345_vm4, %v6438_v50  ;;  %v6440_v34 = vmul.f32 %v17542_v30, %v19879_v9  ;;  %v17555_v47 = vld [vmem:[#allocation3 + $0xcf] sm:$0xff]  ;;  %v17560_v50 = vld [vmem:[#allocation3 + $0xd7] sm:$0xff] }
 0x761   : > { %v10475_v60 = vadd.f32 %v10474_v37, %v10473_v29  ;;  %19880 = vst [vmem:[#allocation79_spill] sm:$0xff] %v17555_v47  ;;  %19882 = vst [vmem:[#allocation70_spill] sm:$0xff] %v17560_v50  ;;  %v6441_v61 = vmul.f32 %v17555_v47, %v19883_v36  ;;  %v17589_v47 = vld [vmem:[#allocation3 + $0xef] sm:$0xff] }
 0x762   : > { %v17551_v55 = vpop.f32.mrb[60].mxu1 }
 0x763   : > { %19878 = vst [vmem:[#allocation4_spill] sm:$0xff] %v17551_v55  ;;  %12982 = vmatmul.mubr.msk.f32.gmra.mrb[54].mxu0 %vm6345_vm4, %v6439_v10  ;;  %v17558_v58 = vpop.f32.mrb[61].mxu1  ;;  %v10477_v16 = vadd.f32 %v10476_v53, %v10475_v60  ;;  %v10480_v9 = vsel %vm6345_vm4, %v17551_v55, 0.0  ;;  %v19885_v10 = vld [vmem:[#allocation16_spill] sm:$0xff]  ;;  %v17573_v53 = vld [vmem:[#allocation3 + $0xdf] sm:$0xff] }
 0x764   : > { %19881 = vst [vmem:[#allocation13_spill] sm:$0xff] %v17558_v58  ;;  %v10478_v29 = vsel %vm6345_vm4, %v17558_v58, 0.0  ;;  %12984 = vmatprep.mubr.msk.f32.mxu0 %vm6345_vm4, %v6440_v34  ;;  %v6442_v59 = vmul.f32 %v17560_v50, %v19885_v10  ;;  %19886 = vst [vmem:[#allocation6_spill] sm:$0xff] %v17573_v53  ;;  %v17578_v34 = vld [vmem:[#allocation3 + $0xe7] sm:$0xff]  ;;  %v19889_v55 = vld [vmem:[#allocation37_spill] sm:$0xff] }
 0x765   : > { %v10479_v37 = vadd.f32 %v10478_v29, %v10477_v16  ;;  %19888 = vst [vmem:[#allocation108_spill] sm:$0xff] %v17578_v34  ;;  %v6443_v36 = vmul.f32 %v17573_v53, %v19889_v55  ;;  %v19890_v50 = vld [vmem:[#allocation39_spill] sm:$0xff]  ;;  %v7127_v55 = vld [vmem:[#allocation3 + $0x11] sm:$0xff] }
 0x766   : > { %v17569_v30 = vpop.f32.mrb[62].mxu1 }
 0x767   : > { %19884 = vst [vmem:[#allocation73_spill] sm:$0xff] %v17569_v30  ;;  %12985 = vmatmul.mubr.msk.f32.gmra.mrb[56].mxu0 %vm6345_vm4, %v6441_v61  ;;  %v17576_v60 = vpop.f32.mrb[63].mxu1  ;;  %v10481_v58 = vadd.f32 %v10480_v9, %v10479_v37  ;;  %v10484_v10 = vsel %vm6345_vm4, %v17569_v30, 0.0  ;;  %v6444_v61 = vmul.f32 %v17578_v34, %v19890_v50  ;;  %v17594_v37 = vld [vmem:[#allocation3 + $0xf7] sm:$0xff]  ;;  %v17601_v30 = vld [vmem:[#allocation3 + $0xff] sm:$0xff]  ;;  %v7126_v50 = vld [vmem:[#allocation3 + $0x9] sm:$0xff] }
 0x768   : > { %19887 = vst [vmem:[#allocation107_spill] sm:$0xff] %v17576_v60  ;;  %v10482_v16 = vsel %vm6345_vm4, %v17576_v60, 0.0  ;;  %12987 = vmatprep.mubr.msk.f32.mxu0 %vm6345_vm4, %v6442_v59  ;;  %19892 = vst [vmem:[#allocation110_spill] sm:$0xff] %v17594_v37  ;;  %v19893_v59 = vld [vmem:[#allocation53_spill] sm:$0xff] }
 0x769   : > { %v10483_v29 = vadd.f32 %v10482_v16, %v10481_v58  ;;  %v6445_v58 = vmul.f32 %v17589_v47, %v19893_v59  ;;  %v19894_v16 = vld [vmem:[#allocation42_spill] sm:$0xff]  ;;  %19895 = vst [vmem:[#allocation111_spill] sm:$0xff] %v17601_v30  ;;  %v17626_v59 = vld [vmem:[#allocation3 + $0x29] sm:$0xff] }
 0x76a   : > { %v6446_v60 = vmul.f32 %v17594_v37, %v19894_v16  ;;  %v7997_v16 = vld [vmem:[%s18902_s7 + $0x48] sm:$0xff]  ;;  %19900 = vst [vmem:[#allocation113_spill] sm:$0xff] %v17626_v59 }
 0x76b   : > { %v17591_v9 = vadd.f32 %v10484_v10, %v10483_v29  ;;  %12988 = vmatmul.mubr.msk.f32.gmra.mrb[58].mxu0 %vm6345_vm4, %v6443_v36  ;;  %v19896_v10 = vld [vmem:[#allocation44_spill] sm:$0xff]  ;;  %v19897_v29 = vld [vmem:[#allocation45_spill] sm:$0xff] }
 0x76c   : > { %12990 = vmatprep.mubr.msk.f32.mxu0 %vm6345_vm4, %v6444_v61  ;;  %v6447_v36 = vmul.f32 %v17601_v30, %v19896_v10  ;;  %v7996_v61 = vld [vmem:[%s18902_s7 + $0x40] sm:$0xff]  ;;  %v17623_v30 = vld [vmem:[#allocation3 + $0x21] sm:$0xff] }
 0x76d   : > { %19891 = vst [vmem:[#allocation109_spill] sm:$0xff] %v17591_v9  ;;  %v7158_v9 = vmul.f32 %v7126_v50, %v19897_v29  ;;  %v17619_v10 = vpack.c.bf16 %v7997_v16, %v7996_v61  ;;  %v19898_v50 = vld [vmem:[#allocation10_spill] sm:$0xff]  ;;  %19899 = vst [vmem:[#allocation112_spill] sm:$0xff] %v17623_v30  ;;  %v17635_v61 = vld [vmem:[#allocation3 + $0x31] sm:$0xff] }
 0x76e   : > { %19903 = vst [vmem:[#allocation114_spill] sm:$0xff] %v17635_v61 }
 0x76f   : > { %12991 = vmatmul.mubr.msk.f32.gmra.mrb[60].mxu0 %vm6345_vm4, %v6445_v58  ;;  %v17615_v58 = vld [vmem:[#allocation3 + $0x19] sm:$0xff] }
 0x770   : > { %12993 = vmatprep.mubr.msk.f32.mxu0 %vm6345_vm4, %v6446_v60  ;;  %v7159_v60 = vmul.f32 %v7127_v55, %v19785_v38  ;;  %v7160_v29 = vmul.f32 %v17615_v58, %v19898_v50  ;;  %v19902_v55 = vld [vmem:[#allocation54_spill] sm:$0xff] }
 0x771   : > { %v7162_v16 = vmul.f32 %v17626_v59, %v19902_v55  ;;  %v17638_v50 = vld [vmem:[#allocation3 + $0x39] sm:$0xff]  ;;  %v17655_v59 = vld [vmem:[#allocation3 + $0x51] sm:$0xff] }
 0x772   : > { %19904 = vst [vmem:[#allocation115_spill] sm:$0xff] %v17638_v50  ;;  %v19908_v55 = vld [vmem:[#allocation5_spill] sm:$0xff]  ;;  %19909 = vst [vmem:[#allocation118_spill] sm:$0xff] %v17655_v59 }
 0x773   : > { %12994 = vmatmul.mubr.msk.f32.gmra.mrb[62].mxu0 %vm6345_vm4, %v6447_v36  ;;  %v19901_v36 = vld [vmem:[#allocation48_spill] sm:$0xff] }
 0x774   : > { %13000 = vmatprep.mubr.msk.f32.mxu0 %vm6345_vm4, %v7158_v9  ;;  %v7161_v9 = vmul.f32 %v17623_v30, %v19901_v36  ;;  %v17645_v36 = vld [vmem:[#allocation3 + $0x41] sm:$0xff]  ;;  %v17648_v30 = vld [vmem:[#allocation3 + $0x49] sm:$0xff] }
 0x775   : > { %19906 = vst [vmem:[#allocation116_spill] sm:$0xff] %v17645_v36  ;;  %19907 = vst [vmem:[#allocation117_spill] sm:$0xff] %v17648_v30 }
 0x777   : > { %13001 = vmatmul.mubr.msk.f32.vlgmr.msra.gmra.mrb[32].mxu0 %vm6345_vm4, %v7159_v60  ;;  %v19905_v60 = vld [vmem:[#allocation9_spill] sm:$0xff] }
 0x778   : > { %13439 = vmatpush3.bf16.msra.mxu0 %v17347_v20  ;;  %13003 = vmatprep.mubr.msk.f32.mxu0 %vm6345_vm4, %v7160_v29  ;;  %v7163_v20 = vmul.f32 %v17635_v61, %v19905_v60  ;;  %v7164_v29 = vmul.f32 %v17638_v50, %v19791_v48  ;;  %v17658_v60 = vld [vmem:[#allocation3 + $0x59] sm:$0xff]  ;;  %v17665_v61 = vld [vmem:[#allocation3 + $0x61] sm:$0xff] }
 0x779   : > { %13441 = vmatprep.subr.bf16.mxu0 %v17619_v10  ;;  %19910 = vst [vmem:[#allocation119_spill] sm:$0xff] %v17658_v60  ;;  %v19911_v48 = vld [vmem:[#allocation41_spill] sm:$0xff]  ;;  %19913 = vst [vmem:[#allocation120_spill] sm:$0xff] %v17665_v61 }
 0x77a   : > { %v19912_v50 = vld [vmem:[#allocation33_spill] sm:$0xff] }
 0x77b   : > { %13004 = vmatmul.mubr.msk.f32.gmra.mrb[34].mxu0 %vm6345_vm4, %v7161_v9  ;;  %v7165_v9 = vmul.f32 %v17645_v36, %v19908_v55  ;;  %v17668_v55 = vld [vmem:[#allocation3 + $0x69] sm:$0xff]  ;;  %v17675_v36 = vld [vmem:[#allocation3 + $0x71] sm:$0xff] }
 0x77c   : > { %13006 = vmatprep.mubr.msk.f32.mxu0 %vm6345_vm4, %v7162_v16  ;;  %v7166_v16 = vmul.f32 %v17648_v30, %v19793_v54  ;;  %19914 = vst [vmem:[#allocation121_spill] sm:$0xff] %v17668_v55  ;;  %v19915_v54 = vld [vmem:[#allocation43_spill] sm:$0xff]  ;;  %v19916_v30 = vld [vmem:[#allocation64_spill] sm:$0xff] }
 0x77f   : > { %13007 = vmatmul.mubr.msk.f32.gmra.mrb[36].mxu0 %vm6345_vm4, %v7163_v20  ;;  %v7167_v20 = vmul.f32 %v17655_v59, %v19911_v48  ;;  %v17678_v48 = vld [vmem:[#allocation3 + $0x79] sm:$0xff]  ;;  %v17685_v59 = vld [vmem:[#allocation3 + $0x81] sm:$0xff] }
 0x780   : > { %13009 = vmatprep.mubr.msk.f32.mxu0 %vm6345_vm4, %v7164_v29  ;;  %v7168_v29 = vmul.f32 %v17658_v60, %v19912_v50  ;;  %19917 = vst [vmem:[#allocation122_spill] sm:$0xff] %v17678_v48  ;;  %v19918_v50 = vld [vmem:[#allocation31_spill] sm:$0xff] }
 0x781   : > { %v19919_v60 = vld [vmem:[#allocation47_spill] sm:$0xff] }
 0x783   : > { %13010 = vmatmul.mubr.msk.f32.gmra.mrb[38].mxu0 %vm6345_vm4, %v7165_v9  ;;  %v7169_v9 = vmul.f32 %v17665_v61, %v19915_v54  ;;  %v17688_v54 = vld [vmem:[#allocation3 + $0x89] sm:$0xff]  ;;  %v17695_v61 = vld [vmem:[#allocation3 + $0x91] sm:$0xff] }
 0x784   : > { %13012 = vmatprep.mubr.msk.f32.mxu0 %vm6345_vm4, %v7166_v16  ;;  %v7170_v16 = vmul.f32 %v17668_v55, %v19916_v30  ;;  %19920 = vst [vmem:[#allocation123_spill] sm:$0xff] %v17688_v54  ;;  %v19921_v30 = vld [vmem:[#allocation61_spill] sm:$0xff]  ;;  %v19922_v55 = vld [vmem:[#allocation34_spill] sm:$0xff]  ;;  %19923 = vst [vmem:[#allocation124_spill] sm:$0xff] %v17695_v61 }
 0x787   : > { %13013 = vmatmul.mubr.msk.f32.gmra.mrb[40].mxu0 %vm6345_vm4, %v7167_v20  ;;  %v7171_v20 = vmul.f32 %v17675_v36, %v19918_v50  ;;  %v17698_v50 = vld [vmem:[#allocation3 + $0x99] sm:$0xff] }
 0x788   : > { %13015 = vmatprep.mubr.msk.f32.mxu0 %vm6345_vm4, %v7168_v29  ;;  %v7172_v29 = vmul.f32 %v17678_v48, %v19919_v60  ;;  %19924 = vst [vmem:[#allocation125_spill] sm:$0xff] %v17698_v50  ;;  %v19925_v60 = vld [vmem:[#allocation50_spill] sm:$0xff] }
 0x789   : > { %v17705_v48 = vld [vmem:[#allocation3 + $0xa1] sm:$0xff] }
 0x78b   : > { %13016 = vmatmul.mubr.msk.f32.gmra.mrb[42].mxu0 %vm6345_vm4, %v7169_v9  ;;  %v7173_v9 = vmul.f32 %v17685_v59, %v19921_v30  ;;  %v17708_v30 = vld [vmem:[#allocation3 + $0xa9] sm:$0xff] }
 0x78c   : > { %13018 = vmatprep.mubr.msk.f32.mxu0 %vm6345_vm4, %v7170_v16  ;;  %v7174_v16 = vmul.f32 %v17688_v54, %v19922_v55  ;;  %v19926_v55 = vld [vmem:[#allocation55_spill] sm:$0xff]  ;;  %v17715_v54 = vld [vmem:[#allocation3 + $0xb1] sm:$0xff] }
 0x78f   : > { %13019 = vmatmul.mubr.msk.f32.gmra.mrb[44].mxu0 %vm6345_vm4, %v7171_v20  ;;  %v7175_v20 = vmul.f32 %v17695_v61, %v19925_v60  ;;  %v17718_v60 = vld [vmem:[#allocation3 + $0xb9] sm:$0xff]  ;;  %v17725_v61 = vld [vmem:[#allocation3 + $0xc1] sm:$0xff] }
 0x790   : > { %13021 = vmatprep.mubr.msk.f32.mxu0 %vm6345_vm4, %v7172_v29  ;;  %v7176_v29 = vmul.f32 %v17698_v50, %v19801_v52  ;;  %v19927_v52 = vld [vmem:[#allocation66_spill] sm:$0xff] }
 0x791   : > { %v19928_v50 = vld [vmem:[#allocation62_spill] sm:$0xff] }
 0x793   : > { %13022 = vmatmul.mubr.msk.f32.gmra.mrb[46].mxu0 %vm6345_vm4, %v7173_v9  ;;  %v7177_v9 = vmul.f32 %v17705_v48, %v19926_v55  ;;  %v17728_v55 = vld [vmem:[#allocation3 + $0xc9] sm:$0xff] }
 0x794   : > { %13024 = vmatprep.mubr.msk.f32.mxu0 %vm6345_vm4, %v7174_v16  ;;  %v7178_v16 = vmul.f32 %v17708_v30, %v19803_v17  ;;  %v17735_v17 = vld [vmem:[#allocation3 + $0xd1] sm:$0xff] }
 0x797   : > { %13025 = vmatmul.mubr.msk.f32.gmra.mrb[48].mxu0 %vm6345_vm4, %v7175_v20  ;;  %v7179_v20 = vmul.f32 %v17715_v54, %v19927_v52  ;;  %v17738_v52 = vld [vmem:[#allocation3 + $0xd9] sm:$0xff] }
 0x798   : > { %13027 = vmatprep.mubr.msk.f32.mxu0 %vm6345_vm4, %v7176_v29  ;;  %v7180_v29 = vmul.f32 %v17718_v60, %v19928_v50  ;;  %v17745_v50 = vld [vmem:[#allocation3 + $0xe1] sm:$0xff] }
 0x79b   : > { %13028 = vmatmul.mubr.msk.f32.gmra.mrb[50].mxu0 %vm6345_vm4, %v7177_v9  ;;  %v7181_v9 = vmul.f32 %v17725_v61, %v19806_v32  ;;  %v17748_v32 = vld [vmem:[#allocation3 + $0xe9] sm:$0xff] }
 0x79c   : > { %13030 = vmatprep.mubr.msk.f32.mxu0 %vm6345_vm4, %v7178_v16  ;;  %v7182_v16 = vmul.f32 %v17728_v55, %v19754_v27  ;;  %v17755_v27 = vld [vmem:[#allocation3 + $0xf1] sm:$0xff] }
 0x79f   : > { %13031 = vmatmul.mubr.msk.f32.gmra.mrb[52].mxu0 %vm6345_vm4, %v7179_v20  ;;  %v7183_v20 = vmul.f32 %v17735_v17, %v19756_v22  ;;  %v17758_v22 = vld [vmem:[#allocation3 + $0xf9] sm:$0xff] }
 0x7a0   : > { %13033 = vmatprep.mubr.msk.f32.mxu0 %vm6345_vm4, %v7180_v29  ;;  %v7184_v29 = vmul.f32 %v17738_v52, %v19807_v21  ;;  %v17765_v21 = vld [vmem:[#allocation3 + $0x101] sm:$0xff] }
 0x7a3   : > { %13034 = vmatmul.mubr.msk.f32.gmra.mrb[54].mxu0 %vm6345_vm4, %v7181_v9  ;;  %v7185_v9 = vmul.f32 %v17745_v50, %v19760_v18 }
 0x7a4   : > { %13036 = vmatprep.mubr.msk.f32.mxu0 %vm6345_vm4, %v7182_v16  ;;  %v7186_v16 = vmul.f32 %v17748_v32, %v19762_v40  ;;  %v7189_v40 = vmul.f32 %v17765_v21, %v16479_v35 }
 0x7a7   : > { %13037 = vmatmul.mubr.msk.f32.gmra.mrb[56].mxu0 %vm6345_vm4, %v7183_v20  ;;  %v7187_v20 = vmul.f32 %v17755_v27, %v19763_v13 }
 0x7a8   : > { %13039 = vmatprep.mubr.msk.f32.mxu0 %vm6345_vm4, %v7184_v29  ;;  %v7188_v29 = vmul.f32 %v17758_v22, %v19764_v5  ;;  %v8416_v5 = vld [vmem:[%s18902_s7 + $0x58] sm:$0xff] }
 0x7ab   : > { %13040 = vmatmul.mubr.msk.f32.gmra.mrb[58].mxu0 %vm6345_vm4, %v7185_v9  ;;  %v7577_v9 = vmul.f32 %v17341_v12, %v15970_v49  ;;  %v7579_v12 = vmul.f32 %v17360_v56, %v15977_v28  ;;  %v7580_v49 = vmul.f32 %v17375_v0, %v19834_v45  ;;  %v7584_v56 = vmul.f32 %v17411_v25, %v16026_v63 }
 0x7ac   : > { %13042 = vmatprep.mubr.msk.f32.mxu0 %vm6345_vm4, %v7186_v16  ;;  %v8415_v16 = vld [vmem:[%s18902_s7 + $0x50] sm:$0xff]  ;;  %v7585_v0 = vmul.f32 %v17416_v43, %v19840_v19  ;;  %v7590_v25 = vmul.f32 %v17465_v42, %v19850_v15  ;;  %v7591_v43 = vmul.f32 %v17470_v7, %v19852_v41 }
 0x7af   : > { %13043 = vmatmul.mubr.msk.f32.gmra.mrb[60].mxu0 %vm6345_vm4, %v7187_v20  ;;  %v7578_v20 = vmul.f32 %v17355_v8, %v15968_v4  ;;  %v7583_v8 = vmul.f32 %v17398_v26, %v15994_v39  ;;  %v7589_v26 = vmul.f32 %v17452_v1, %v19848_v31 }
 0x7b0   : > { %13045 = vmatprep.mubr.msk.f32.mxu0 %vm6345_vm4, %v7188_v29  ;;  %v17783_v29 = vpack.c.bf16 %v8416_v5, %v8415_v16  ;;  %v7582_v5 = vmul.f32 %v17393_v11, %v16010_v44  ;;  %v7588_v11 = vmul.f32 %v17447_v2, %v19846_v57  ;;  %v19930_v16 = vld [vmem:[#allocation14_spill] sm:$0xff] }
 0x7b3   : > { %13046 = vmatmul.mubr.msk.f32.gmra.mrb[62].mxu0 %vm6345_vm4, %v7189_v40  ;;  %v7581_v40 = vmul.f32 %v17380_v23, %v15975_v46  ;;  %v7587_v23 = vmul.f32 %v17434_v6, %v19844_v33 }
 0x7b4   : > { %13052 = vmatprep.mubr.msk.f32.mxu0 %vm6345_vm4, %v7577_v9 }
 0x7b7   : > { %13053 = vmatmul.mubr.msk.f32.vlgmr.msra.gmra.mrb[32].mxu0 %vm6345_vm4, %v7578_v20  ;;  %v19931_v20 = vld [vmem:[#allocation105_spill] sm:$0xff] }
 0x7b8   : > { %13443 = vmatpush3.bf16.msra.mxu0 %v17619_v10  ;;  %13055 = vmatprep.mubr.msk.f32.mxu0 %vm6345_vm4, %v7579_v12  ;;  %v19929_v10 = vld [vmem:[#allocation103_spill] sm:$0xff]  ;;  %v7594_v12 = vmul.f32 %v19931_v20, %v19930_v16  ;;  %v19941_v16 = vld [vmem:[#allocation69_spill] sm:$0xff] }
 0x7b9   : > { %13445 = vmatprep.subr.bf16.mxu0 %v17783_v29  ;;  %v7593_v9 = vmul.f32 %v19929_v10, %v19856_v62 }
 0x7bb   : > { %13056 = vmatmul.mubr.msk.f32.gmra.mrb[34].mxu0 %vm6345_vm4, %v7580_v49  ;;  %v7586_v49 = vmul.f32 %v17429_v24, %v19842_v51  ;;  %v7592_v24 = vmul.f32 %v17483_v3, %v19854_v14 }
 0x7bc   : > { %13058 = vmatprep.mubr.msk.f32.mxu0 %vm6345_vm4, %v7581_v40  ;;  %v19932_v40 = vld [vmem:[#allocation8_spill] sm:$0xff] }
 0x7bf   : > { %13059 = vmatmul.mubr.msk.f32.gmra.mrb[36].mxu0 %vm6345_vm4, %v7582_v5  ;;  %v19933_v5 = vld [vmem:[#allocation58_spill] sm:$0xff] }
 0x7c0   : > { %13061 = vmatprep.mubr.msk.f32.mxu0 %vm6345_vm4, %v7583_v8  ;;  %v7595_v8 = vmul.f32 %v19933_v5, %v19932_v40  ;;  %v19945_v5 = vld [vmem:[#allocation70_spill] sm:$0xff] }
 0x7c3   : > { %13062 = vmatmul.mubr.msk.f32.gmra.mrb[38].mxu0 %vm6345_vm4, %v7584_v56  ;;  %v19934_v56 = vld [vmem:[#allocation71_spill] sm:$0xff] }
 0x7c4   : > { %13064 = vmatprep.mubr.msk.f32.mxu0 %vm6345_vm4, %v7585_v0  ;;  %v19935_v0 = vld [vmem:[#allocation18_spill] sm:$0xff] }
 0x7c7   : > { %13065 = vmatmul.mubr.msk.f32.gmra.mrb[40].mxu0 %vm6345_vm4, %v7586_v49  ;;  %v7596_v49 = vmul.f32 %v19935_v0, %v19934_v56  ;;  %v19944_v0 = vld [vmem:[#allocation35_spill] sm:$0xff] }
 0x7c8   : > { %13067 = vmatprep.mubr.msk.f32.mxu0 %vm6345_vm4, %v7587_v23  ;;  %v19936_v23 = vld [vmem:[#allocation32_spill] sm:$0xff] }
 0x7cb   : > { %13068 = vmatmul.mubr.msk.f32.gmra.mrb[42].mxu0 %vm6345_vm4, %v7588_v11  ;;  %v19937_v11 = vld [vmem:[#allocation76_spill] sm:$0xff] }
 0x7cc   : > { %13070 = vmatprep.mubr.msk.f32.mxu0 %vm6345_vm4, %v7589_v26  ;;  %v7597_v26 = vmul.f32 %v19937_v11, %v19936_v23  ;;  %v7601_v23 = vmul.f32 %v19945_v5, %v19944_v0 }
 0x7cf   : > { %13071 = vmatmul.mubr.msk.f32.gmra.mrb[44].mxu0 %vm6345_vm4, %v7590_v25  ;;  %v19938_v25 = vld [vmem:[#allocation12_spill] sm:$0xff] }
 0x7d0   : > { %13073 = vmatprep.mubr.msk.f32.mxu0 %vm6345_vm4, %v7591_v43  ;;  %v19939_v43 = vld [vmem:[#allocation7_spill] sm:$0xff] }
 0x7d3   : > { %13074 = vmatmul.mubr.msk.f32.gmra.mrb[46].mxu0 %vm6345_vm4, %v7592_v24  ;;  %v7598_v24 = vmul.f32 %v19939_v43, %v19938_v25  ;;  %v19947_v25 = vld [vmem:[#allocation16_spill] sm:$0xff] }
 0x7d4   : > { %13076 = vmatprep.mubr.msk.f32.mxu0 %vm6345_vm4, %v7593_v9  ;;  %v19940_v9 = vld [vmem:[#allocation75_spill] sm:$0xff] }
 0x7d5   : > { %v7599_v40 = vmul.f32 %v19941_v16, %v19940_v9  ;;  %v7603_v9 = vmul.f32 %v17578_v34, %v19947_v25  ;;  %v19953_v25 = vld [vmem:[#allocation42_spill] sm:$0xff]  ;;  %v17875_v34 = vld [vmem:[#allocation3 + $0x10f] sm:$0xff] }
 0x7d6   : > { %19954 = vst [vmem:[#allocation105_spill] sm:$0xff] %v17875_v34 }
 0x7d7   : > { %13077 = vmatmul.mubr.msk.f32.gmra.mrb[48].mxu0 %vm6345_vm4, %v7594_v12  ;;  %v19942_v12 = vld [vmem:[#allocation24_spill] sm:$0xff] }
 0x7d8   : > { %13079 = vmatprep.mubr.msk.f32.mxu0 %vm6345_vm4, %v7595_v8  ;;  %v19943_v8 = vld [vmem:[#allocation79_spill] sm:$0xff] }
 0x7d9   : > { %v7600_v56 = vmul.f32 %v19943_v8, %v19942_v12  ;;  %v19949_v12 = vld [vmem:[#allocation39_spill] sm:$0xff] }
 0x7da   : > { %v7605_v0 = vmul.f32 %v17594_v37, %v19949_v12 }
 0x7db   : > { %13080 = vmatmul.mubr.msk.f32.gmra.mrb[50].mxu0 %vm6345_vm4, %v7596_v49  ;;  %v19946_v49 = vld [vmem:[#allocation72_spill] sm:$0xff] }
 0x7dc   : > { %13082 = vmatprep.mubr.msk.f32.mxu0 %vm6345_vm4, %v7597_v26  ;;  %v7602_v26 = vmul.f32 %v17573_v53, %v19946_v49  ;;  %v19952_v49 = vld [vmem:[#allocation111_spill] sm:$0xff] }
 0x7df   : > { %13083 = vmatmul.mubr.msk.f32.gmra.mrb[52].mxu0 %vm6345_vm4, %v7598_v24 }
 0x7e0   : > { %13085 = vmatprep.mubr.msk.f32.mxu0 %vm6345_vm4, %v7599_v40  ;;  %v19948_v40 = vld [vmem:[#allocation37_spill] sm:$0xff] }
 0x7e1   : > { %v7604_v24 = vmul.f32 %v17589_v47, %v19948_v40 }
 0x7e3   : > { %13086 = vmatmul.mubr.msk.f32.gmra.mrb[54].mxu0 %vm6345_vm4, %v7600_v56  ;;  %v17868_v56 = vld [vmem:[#allocation3 + $0x107] sm:$0xff] }
 0x7e4   : > { %13088 = vmatprep.mubr.msk.f32.mxu0 %vm6345_vm4, %v7601_v23  ;;  %19950 = vst [vmem:[#allocation103_spill] sm:$0xff] %v17868_v56  ;;  %v19951_v23 = vld [vmem:[#allocation53_spill] sm:$0xff] }
 0x7e5   : > { %v7606_v53 = vmul.f32 %v19952_v49, %v19951_v23  ;;  %v19991_v49 = vld [vmem:[#allocation114_spill] sm:$0xff] }
 0x7e7   : > { %13089 = vmatmul.mubr.msk.f32.gmra.mrb[56].mxu0 %vm6345_vm4, %v7602_v26  ;;  %v7607_v26 = vmul.f32 %v17868_v56, %v19953_v25  ;;  %v7964_v25 = vld [vmem:[#allocation3 + $0x18] sm:$0xff]  ;;  %v19990_v56 = vld [vmem:[#allocation48_spill] sm:$0xff] }
 0x7e8   : > { %13091 = vmatprep.mubr.msk.f32.mxu0 %vm6345_vm4, %v7603_v9  ;;  %v19955_v9 = vld [vmem:[#allocation44_spill] sm:$0xff]  ;;  %v8386_v40 = vmul.f32 %v19991_v49, %v19990_v56  ;;  %v19998_v49 = vld [vmem:[#allocation5_spill] sm:$0xff] }
 0x7e9   : > { %v7608_v12 = vmul.f32 %v17875_v34, %v19955_v9  ;;  %v17895_v9 = vld [vmem:[#allocation3 + $0x30] sm:$0xff]  ;;  %v19988_v34 = vld [vmem:[#allocation10_spill] sm:$0xff] }
 0x7ea   : > { %19957 = vst [vmem:[#allocation7_spill] sm:$0xff] %v17895_v9 }
 0x7eb   : > { %13092 = vmatmul.mubr.msk.f32.gmra.mrb[58].mxu0 %vm6345_vm4, %v7604_v24  ;;  %v8834_v24 = vld [vmem:[%s18902_s7 + $0x60] sm:$0xff] }
 0x7ec   : > { %13094 = vmatprep.mubr.msk.f32.mxu0 %vm6345_vm4, %v7605_v0  ;;  %v8835_v0 = vld [vmem:[%s18902_s7 + $0x68] sm:$0xff] }
 0x7ed   : > { %v13448_v23 = vpack.c.bf16 %v8835_v0, %v8834_v24  ;;  %v17911_v24 = vld [vmem:[#allocation3 + $0x50] sm:$0xff]  ;;  %v17915_v0 = vld [vmem:[#allocation3 + $0x58] sm:$0xff] }
 0x7ee   : > { %19961 = vst [vmem:[#allocation126_spill] sm:$0xff] %v17911_v24  ;;  %19962 = vst [vmem:[#allocation127_spill] sm:$0xff] %v17915_v0 }
 0x7ef   : > { %13095 = vmatmul.mubr.msk.f32.gmra.mrb[60].mxu0 %vm6345_vm4, %v7606_v53  ;;  %v7965_v53 = vld [vmem:[#allocation3 + $0x20] sm:$0xff] }
 0x7f0   : > { %13097 = vmatprep.mubr.msk.f32.mxu0 %vm6345_vm4, %v7607_v26  ;;  %v17890_v26 = vld [vmem:[#allocation3 + $0x28] sm:$0xff] }
 0x7f1   : > { %19956 = vst [vmem:[#allocation76_spill] sm:$0xff] %v17890_v26 }
 0x7f3   : > { %13098 = vmatmul.mubr.msk.f32.gmra.mrb[62].mxu0 %vm6345_vm4, %v7608_v12  ;;  %v17899_v12 = vld [vmem:[#allocation3 + $0x38] sm:$0xff] }
 0x7f4   : > { %13104 = vmatprep.mubr.msk.f32.mxu0 %vm6345_vm4, %v7964_v25  ;;  %19958 = vst [vmem:[#allocation69_spill] sm:$0xff] %v17899_v12  ;;  %v17903_v25 = vld [vmem:[#allocation3 + $0x40] sm:$0xff] }
 0x7f5   : > { %19959 = vst [vmem:[#allocation79_spill] sm:$0xff] %v17903_v25 }
 0x7f7   : > { %13105 = vmatmul.mubr.msk.f32.vlgmr.msra.gmra.mrb[32].mxu0 %vm6345_vm4, %v7965_v53  ;;  %v17919_v53 = vld [vmem:[#allocation3 + $0x60] sm:$0xff] }
 0x7f8   : > { %13447 = vmatpush3.bf16.msra.mxu0 %v17783_v29  ;;  %13107 = vmatprep.mubr.msk.f32.mxu0 %vm6345_vm4, %v17890_v26  ;;  %v17907_v29 = vld [vmem:[#allocation3 + $0x48] sm:$0xff]  ;;  %19963 = vst [vmem:[#allocation128_spill] sm:$0xff] %v17919_v53 }
 0x7f9   : > { %13449 = vmatprep.subr.bf16.mxu0 %v13448_v23  ;;  %19960 = vst [vmem:[#allocation70_spill] sm:$0xff] %v17907_v29  ;;  %v19974_v26 = vld [vmem:[#allocation51_spill] sm:$0xff] }
 0x7fb   : > { %13108 = vmatmul.mubr.msk.f32.gmra.mrb[34].mxu0 %vm6345_vm4, %v17895_v9  ;;  %v19972_v9 = vld [vmem:[#allocation59_spill] sm:$0xff] }
 0x7fc   : > { %13110 = vmatprep.mubr.msk.f32.mxu0 %vm6345_vm4, %v17899_v12  ;;  %v19969_v12 = vld [vmem:[#allocation20_spill] sm:$0xff] }
 0x7ff   : > { %13111 = vmatmul.mubr.msk.f32.gmra.mrb[36].mxu0 %vm6345_vm4, %v17903_v25  ;;  %v17923_v25 = vld [vmem:[#allocation3 + $0x68] sm:$0xff] }
 0x800   : > { %13113 = vmatprep.mubr.msk.f32.mxu0 %vm6345_vm4, %v17907_v29  ;;  %19964 = vst [vmem:[#allocation129_spill] sm:$0xff] %v17923_v25  ;;  %v17927_v29 = vld [vmem:[#allocation3 + $0x70] sm:$0xff] }
 0x801   : > { %19965 = vst [vmem:[#allocation130_spill] sm:$0xff] %v17927_v29 }
 0x803   : > { %13114 = vmatmul.mubr.msk.f32.gmra.mrb[38].mxu0 %vm6345_vm4, %v17911_v24  ;;  %v17931_v24 = vld [vmem:[#allocation3 + $0x78] sm:$0xff] }
 0x804   : > { %13116 = vmatprep.mubr.msk.f32.mxu0 %vm6345_vm4, %v17915_v0  ;;  %19966 = vst [vmem:[#allocation131_spill] sm:$0xff] %v17931_v24  ;;  %v17935_v0 = vld [vmem:[#allocation3 + $0x80] sm:$0xff] }
 0x805   : > { %19967 = vst [vmem:[#allocation132_spill] sm:$0xff] %v17935_v0 }
 0x807   : > { %13117 = vmatmul.mubr.msk.f32.gmra.mrb[40].mxu0 %vm6345_vm4, %v17919_v53  ;;  %v19968_v53 = vld [vmem:[#allocation36_spill] sm:$0xff] }
 0x808   : > { %13119 = vmatprep.mubr.msk.f32.mxu0 %vm6345_vm4, %v17923_v25  ;;  %v19970_v25 = vld [vmem:[#allocation46_spill] sm:$0xff] }
 0x80b   : > { %13120 = vmatmul.mubr.msk.f32.gmra.mrb[42].mxu0 %vm6345_vm4, %v17927_v29  ;;  %v19971_v29 = vld [vmem:[#allocation40_spill] sm:$0xff] }
 0x80c   : > { %13122 = vmatprep.mubr.msk.f32.mxu0 %vm6345_vm4, %v17931_v24  ;;  %v19973_v24 = vld [vmem:[#allocation60_spill] sm:$0xff] }
 0x80f   : > { %13123 = vmatmul.mubr.msk.f32.gmra.mrb[44].mxu0 %vm6345_vm4, %v17935_v0  ;;  %v19975_v0 = vld [vmem:[#allocation63_spill] sm:$0xff] }
 0x810   : > { %13125 = vmatprep.mubr.msk.f32.mxu0 %vm6345_vm4, %v19968_v53  ;;  %v19976_v53 = vld [vmem:[#allocation25_spill] sm:$0xff] }
 0x813   : > { %13126 = vmatmul.mubr.msk.f32.gmra.mrb[46].mxu0 %vm6345_vm4, %v19969_v12  ;;  %v19977_v12 = vld [vmem:[#allocation26_spill] sm:$0xff] }
 0x814   : > { %13128 = vmatprep.mubr.msk.f32.mxu0 %vm6345_vm4, %v19970_v25  ;;  %v19978_v25 = vld [vmem:[#allocation65_spill] sm:$0xff] }
 0x817   : > { %13129 = vmatmul.mubr.msk.f32.gmra.mrb[48].mxu0 %vm6345_vm4, %v19971_v29  ;;  %v19979_v29 = vld [vmem:[#allocation68_spill] sm:$0xff] }
 0x818   : > { %13131 = vmatprep.mubr.msk.f32.mxu0 %vm6345_vm4, %v19972_v9  ;;  %v19980_v9 = vld [vmem:[#allocation28_spill] sm:$0xff] }
 0x81b   : > { %13132 = vmatmul.mubr.msk.f32.gmra.mrb[50].mxu0 %vm6345_vm4, %v19973_v24  ;;  %v19981_v24 = vld [vmem:[#allocation84_spill] sm:$0xff] }
 0x81c   : > { %13134 = vmatprep.mubr.msk.f32.mxu0 %vm6345_vm4, %v19974_v26  ;;  %v19982_v26 = vld [vmem:[#allocation87_spill] sm:$0xff] }
 0x81f   : > { %13135 = vmatmul.mubr.msk.f32.gmra.mrb[52].mxu0 %vm6345_vm4, %v19975_v0  ;;  %v19983_v0 = vld [vmem:[#allocation91_spill] sm:$0xff] }
 0x820   : > { %13137 = vmatprep.mubr.msk.f32.mxu0 %vm6345_vm4, %v19976_v53  ;;  %v17971_v53 = vld [vmem:[#allocation3 + $0x108] sm:$0xff] }
 0x821   : > { %19984 = vst [vmem:[#allocation36_spill] sm:$0xff] %v17971_v53 }
 0x823   : > { %13138 = vmatmul.mubr.msk.f32.gmra.mrb[54].mxu0 %vm6345_vm4, %v19977_v12  ;;  %v17975_v12 = vld [vmem:[#allocation3 + $0x110] sm:$0xff] }
 0x824   : > { %13140 = vmatprep.mubr.msk.f32.mxu0 %vm6345_vm4, %v19978_v25  ;;  %19985 = vst [vmem:[#allocation20_spill] sm:$0xff] %v17975_v12  ;;  %v19986_v25 = vld [vmem:[#allocation45_spill] sm:$0xff] }
 0x827   : > { %13141 = vmatmul.mubr.msk.f32.gmra.mrb[56].mxu0 %vm6345_vm4, %v19979_v29  ;;  %v8383_v29 = vmul.f32 %v17615_v58, %v19986_v25  ;;  %v19989_v58 = vld [vmem:[#allocation113_spill] sm:$0xff] }
 0x828   : > { %13143 = vmatprep.mubr.msk.f32.mxu0 %vm6345_vm4, %v19980_v9  ;;  %v9221_v9 = vld [vmem:[%s18902_s7 + $0x70] sm:$0xff]  ;;  %v8385_v25 = vmul.f32 %v19989_v58, %v19988_v34  ;;  %v19996_v58 = vld [vmem:[#allocation49_spill] sm:$0xff]  ;;  %v20000_v34 = vld [vmem:[#allocation27_spill] sm:$0xff] }
 0x82b   : > { %13144 = vmatmul.mubr.msk.f32.gmra.mrb[58].mxu0 %vm6345_vm4, %v19981_v24  ;;  %v9222_v24 = vld [vmem:[%s18902_s7 + $0x78] sm:$0xff] }
 0x82c   : > { %13146 = vmatprep.mubr.msk.f32.mxu0 %vm6345_vm4, %v19982_v26  ;;  %v19987_v26 = vld [vmem:[#allocation112_spill] sm:$0xff] }
 0x82f   : > { %13147 = vmatmul.mubr.msk.f32.gmra.mrb[60].mxu0 %vm6345_vm4, %v19983_v0  ;;  %v8384_v0 = vmul.f32 %v19987_v26, %v19785_v38  ;;  %v20001_v38 = vld [vmem:[#allocation119_spill] sm:$0xff] }
 0x830   : > { %13149 = vmatprep.mubr.msk.f32.mxu0 %vm6345_vm4, %v17971_v53  ;;  %v17990_v53 = vpack.c.bf16 %v9222_v24, %v9221_v9  ;;  %v19994_v9 = vld [vmem:[#allocation9_spill] sm:$0xff]  ;;  %v19995_v24 = vld [vmem:[#allocation116_spill] sm:$0xff] }
 0x831   : > { %v8388_v26 = vmul.f32 %v19995_v24, %v19994_v9  ;;  %v20004_v9 = vld [vmem:[#allocation33_spill] sm:$0xff] }
 0x833   : > { %13150 = vmatmul.mubr.msk.f32.gmra.mrb[62].mxu0 %vm6345_vm4, %v17975_v12  ;;  %v19992_v12 = vld [vmem:[#allocation54_spill] sm:$0xff] }
 0x834   : > { %13156 = vmatprep.mubr.msk.f32.mxu0 %vm6345_vm4, %v8383_v29  ;;  %v19993_v29 = vld [vmem:[#allocation115_spill] sm:$0xff] }
 0x835   : > { %v8387_v37 = vmul.f32 %v19993_v29, %v19992_v12  ;;  %v8391_v29 = vmul.f32 %v20001_v38, %v20000_v34  ;;  %v20005_v12 = vld [vmem:[#allocation121_spill] sm:$0xff] }
 0x837   : > { %13157 = vmatmul.mubr.msk.f32.vlgmr.msra.gmra.mrb[32].mxu0 %vm6345_vm4, %v8384_v0  ;;  %v19997_v0 = vld [vmem:[#allocation117_spill] sm:$0xff] }
 0x838   : > { %13451 = vmatpush3.bf16.msra.mxu0 %v13448_v23  ;;  %13159 = vmatprep.mubr.msk.f32.mxu0 %vm6345_vm4, %v8385_v25  ;;  %v8389_v23 = vmul.f32 %v19997_v0, %v19996_v58  ;;  %v19999_v25 = vld [vmem:[#allocation118_spill] sm:$0xff]  ;;  %v8393_v0 = vmul.f32 %v20005_v12, %v20004_v9  ;;  %v20015_v9 = vld [vmem:[#allocation125_spill] sm:$0xff] }
 0x839   : > { %13453 = vmatprep.subr.bf16.mxu0 %v17990_v53  ;;  %v8390_v56 = vmul.f32 %v19999_v25, %v19998_v49  ;;  %v20007_v25 = vld [vmem:[#allocation64_spill] sm:$0xff]  ;;  %v20008_v49 = vld [vmem:[#allocation122_spill] sm:$0xff] }
 0x83a   : > { %v8395_v38 = vmul.f32 %v20008_v49, %v20007_v25 }
 0x83b   : > { %13160 = vmatmul.mubr.msk.f32.gmra.mrb[34].mxu0 %vm6345_vm4, %v8386_v40  ;;  %v20003_v40 = vld [vmem:[#allocation120_spill] sm:$0xff] }
 0x83c   : > { %13162 = vmatprep.mubr.msk.f32.mxu0 %vm6345_vm4, %v8387_v37  ;;  %v20002_v37 = vld [vmem:[#allocation41_spill] sm:$0xff] }
 0x83d   : > { %v8392_v24 = vmul.f32 %v20003_v40, %v20002_v37  ;;  %v20010_v40 = vld [vmem:[#allocation47_spill] sm:$0xff] }
 0x83e   : > { %v20011_v37 = vld [vmem:[#allocation123_spill] sm:$0xff] }
 0x83f   : > { %13163 = vmatmul.mubr.msk.f32.gmra.mrb[36].mxu0 %vm6345_vm4, %v8388_v26  ;;  %v20006_v26 = vld [vmem:[#allocation43_spill] sm:$0xff]  ;;  %v8397_v12 = vmul.f32 %v20011_v37, %v20010_v40 }
 0x840   : > { %13165 = vmatprep.mubr.msk.f32.mxu0 %vm6345_vm4, %v8389_v23  ;;  %v8394_v23 = vmul.f32 %v17675_v36, %v20006_v26  ;;  %v20014_v26 = vld [vmem:[#allocation34_spill] sm:$0xff] }
 0x841   : > { %v8399_v49 = vmul.f32 %v20015_v9, %v20014_v26 }
 0x843   : > { %13166 = vmatmul.mubr.msk.f32.gmra.mrb[38].mxu0 %vm6345_vm4, %v8390_v56  ;;  %v20009_v56 = vld [vmem:[#allocation31_spill] sm:$0xff] }
 0x844   : > { %13168 = vmatprep.mubr.msk.f32.mxu0 %vm6345_vm4, %v8391_v29  ;;  %v8396_v29 = vmul.f32 %v17685_v59, %v20009_v56 }
 0x847   : > { %13169 = vmatmul.mubr.msk.f32.gmra.mrb[40].mxu0 %vm6345_vm4, %v8392_v24  ;;  %v20012_v24 = vld [vmem:[#allocation61_spill] sm:$0xff] }
 0x848   : > { %13171 = vmatprep.mubr.msk.f32.mxu0 %vm6345_vm4, %v8393_v0  ;;  %v20013_v0 = vld [vmem:[#allocation124_spill] sm:$0xff] }
 0x849   : > { %v8398_v36 = vmul.f32 %v20013_v0, %v20012_v24  ;;  %v20019_v0 = vld [vmem:[#allocation74_spill] sm:$0xff] }
 0x84a   : > { %v8403_v9 = vmul.f32 %v17718_v60, %v20019_v0 }
 0x84b   : > { %13172 = vmatmul.mubr.msk.f32.gmra.mrb[42].mxu0 %vm6345_vm4, %v8394_v23  ;;  %v20016_v23 = vld [vmem:[#allocation50_spill] sm:$0xff] }
 0x84c   : > { %13174 = vmatprep.mubr.msk.f32.mxu0 %vm6345_vm4, %v8395_v38  ;;  %v8400_v59 = vmul.f32 %v17705_v48, %v20016_v23  ;;  %v20017_v38 = vld [vmem:[#allocation67_spill] sm:$0xff] }
 0x84d   : > { %v8401_v37 = vmul.f32 %v17708_v30, %v20017_v38 }
 0x84f   : > { %13175 = vmatmul.mubr.msk.f32.gmra.mrb[44].mxu0 %vm6345_vm4, %v8396_v29  ;;  %v20018_v29 = vld [vmem:[#allocation55_spill] sm:$0xff] }
 0x850   : > { %13177 = vmatprep.mubr.msk.f32.mxu0 %vm6345_vm4, %v8397_v12  ;;  %v8402_v12 = vmul.f32 %v17715_v54, %v20018_v29 }
 0x853   : > { %13178 = vmatmul.mubr.msk.f32.gmra.mrb[46].mxu0 %vm6345_vm4, %v8398_v36  ;;  %v20020_v36 = vld [vmem:[#allocation66_spill] sm:$0xff] }
 0x854   : > { %13180 = vmatprep.mubr.msk.f32.mxu0 %vm6345_vm4, %v8399_v49  ;;  %v8404_v48 = vmul.f32 %v17725_v61, %v20020_v36  ;;  %v20021_v49 = vld [vmem:[#allocation62_spill] sm:$0xff] }
 0x855   : > { %v8405_v30 = vmul.f32 %v17728_v55, %v20021_v49 }
 0x857   : > { %13181 = vmatmul.mubr.msk.f32.gmra.mrb[48].mxu0 %vm6345_vm4, %v8400_v59  ;;  %v20022_v59 = vld [vmem:[#allocation56_spill] sm:$0xff] }
 0x858   : > { %13183 = vmatprep.mubr.msk.f32.mxu0 %vm6345_vm4, %v8401_v37  ;;  %v8406_v54 = vmul.f32 %v17735_v17, %v20022_v59  ;;  %v20023_v37 = vld [vmem:[#allocation82_spill] sm:$0xff]  ;;  %v8410_v17 = vmul.f32 %v17755_v27, %v19760_v18 }
 0x859   : > { %v8407_v60 = vmul.f32 %v17738_v52, %v20023_v37  ;;  %v8770_v27 = vld [vmem:[#allocation3 + $0x27] sm:$0xff] }
 0x85b   : > { %13184 = vmatmul.mubr.msk.f32.gmra.mrb[50].mxu0 %vm6345_vm4, %v8402_v12  ;;  %v20024_v12 = vld [vmem:[#allocation22_spill] sm:$0xff] }
 0x85c   : > { %13186 = vmatprep.mubr.msk.f32.mxu0 %vm6345_vm4, %v8403_v9  ;;  %v8408_v61 = vmul.f32 %v17745_v50, %v20024_v12  ;;  %v20025_v9 = vld [vmem:[#allocation85_spill] sm:$0xff]  ;;  %v8412_v50 = vmul.f32 %v17765_v21, %v19763_v13  ;;  %v9640_v21 = vld [vmem:[%s18902_s7 + $0x80] sm:$0xff] }
 0x85d   : > { %v8409_v55 = vmul.f32 %v17748_v32, %v20025_v9  ;;  %v20027_v32 = vld [vmem:[#allocation94_spill] sm:$0xff] }
 0x85f   : > { %13187 = vmatmul.mubr.msk.f32.gmra.mrb[52].mxu0 %vm6345_vm4, %v8404_v48  ;;  %v20026_v48 = vld [vmem:[#allocation89_spill] sm:$0xff] }
 0x860   : > { %13189 = vmatprep.mubr.msk.f32.mxu0 %vm6345_vm4, %v8405_v30  ;;  %v8411_v52 = vmul.f32 %v17758_v22, %v20026_v48  ;;  %v18074_v30 = vld [vmem:[#allocation3 + $0x109] sm:$0xff] }
 0x863   : > { %13190 = vmatmul.mubr.msk.f32.gmra.mrb[54].mxu0 %vm6345_vm4, %v8406_v54  ;;  %v8413_v54 = vmul.f32 %v18074_v30, %v20027_v32 }
 0x864   : > { %13192 = vmatprep.mubr.msk.f32.mxu0 %vm6345_vm4, %v8407_v60  ;;  %v18081_v60 = vld [vmem:[#allocation3 + $0x111] sm:$0xff] }
 0x865   : > { %20028 = vst [vmem:[#allocation46_spill] sm:$0xff] %v18081_v60  ;;  %v8414_v22 = vmul.f32 %v18081_v60, %v16479_v35  ;;  %v14153_v35 = vmov 0.0|0.0   ;;  %v8774_v60 = vld [vmem:[#allocation3 + $0x47] sm:$0xff] }
 0x866   : > { %13463 = vmatprep.subr.bf16.mxu1 %v14153_v35 }
 0x867   : > { %13193 = vmatmul.mubr.msk.f32.gmra.mrb[56].mxu0 %vm6345_vm4, %v8408_v61  ;;  %v20029_v61 = vld [vmem:[#allocation57_spill] sm:$0xff] }
 0x868   : > { %13195 = vmatprep.mubr.msk.f32.mxu0 %vm6345_vm4, %v8409_v55  ;;  %v8802_v55 = vmul.f32 %v8770_v27, %v20029_v61  ;;  %v8773_v61 = vld [vmem:[#allocation3 + $0x3f] sm:$0xff] }
 0x86b   : > { %13196 = vmatmul.mubr.msk.f32.gmra.mrb[58].mxu0 %vm6345_vm4, %v8410_v17  ;;  %v8771_v17 = vld [vmem:[#allocation3 + $0x2f] sm:$0xff] }
 0x86c   : > { %13198 = vmatprep.mubr.msk.f32.mxu0 %vm6345_vm4, %v8411_v52  ;;  %v9641_v52 = vld [vmem:[%s18902_s7 + $0x88] sm:$0xff] }
 0x86d   : > { %v18097_v32 = vpack.c.bf16 %v9641_v52, %v9640_v21  ;;  %v8775_v21 = vld [vmem:[#allocation3 + $0x4f] sm:$0xff]  ;;  %v8776_v52 = vld [vmem:[#allocation3 + $0x57] sm:$0xff] }
 0x86f   : > { %13199 = vmatmul.mubr.msk.f32.gmra.mrb[60].mxu0 %vm6345_vm4, %v8412_v50  ;;  %v8772_v50 = vld [vmem:[#allocation3 + $0x37] sm:$0xff] }
 0x870   : > { %13201 = vmatprep.mubr.msk.f32.mxu0 %vm6345_vm4, %v8413_v54  ;;  %v8803_v54 = vmul.f32 %v8771_v17, %v15968_v4  ;;  %v8804_v27 = vmul.f32 %v8772_v50, %v15977_v28  ;;  %v8805_v28 = vmul.f32 %v8773_v61, %v19834_v45  ;;  %v8806_v17 = vmul.f32 %v8774_v60, %v15975_v46  ;;  %v20039_v61 = vld [vmem:[#allocation6_spill] sm:$0xff] }
 0x871   : > { %v8808_v50 = vmul.f32 %v8776_v52, %v15994_v39  ;;  %v8810_v46 = vmul.f32 %v17434_v6, %v19840_v19  ;;  %v8811_v60 = vmul.f32 %v17447_v2, %v19842_v51  ;;  %v8812_v39 = vmul.f32 %v17452_v1, %v19844_v33  ;;  %v20030_v33 = vld [vmem:[#allocation58_spill] sm:$0xff]  ;;  %v20033_v1 = vld [vmem:[#allocation8_spill] sm:$0xff]  ;;  %v20045_v52 = vld [vmem:[#allocation37_spill] sm:$0xff] }
 0x872   : > { %v8815_v51 = vmul.f32 %v17483_v3, %v19850_v15  ;;  %v8816_v19 = vmul.f32 %v19929_v10, %v19852_v41  ;;  %v8818_v6 = vmul.f32 %v20030_v33, %v19856_v62  ;;  %v20032_v2 = vld [vmem:[#allocation18_spill] sm:$0xff]  ;;  %v8820_v41 = vmul.f32 %v19937_v11, %v20033_v1  ;;  %v20036_v3 = vld [vmem:[#allocation12_spill] sm:$0xff]  ;;  %v20057_v1 = vld [vmem:[#allocation79_spill] sm:$0xff] }
 0x873   : > { %13202 = vmatmul.mubr.msk.f32.gmra.mrb[62].mxu0 %vm6345_vm4, %v8414_v22  ;;  %v10492_v22 = vld [vmem:[%s18905_s10] sm:$0xff]  ;;  %v8823_v10 = vmul.f32 %v19943_v8, %v20036_v3 }
 0x874   : > { %13208 = vmatprep.mubr.msk.f32.mxu0 %vm6345_vm4, %v8802_v55  ;;  %v10493_v55 = vld [vmem:[%s18905_s10 + $0x8] sm:$0xff]  ;;  %v20065_v3 = vld [vmem:[#allocation132_spill] sm:$0xff] }
 0x875   : > { %v18110_v4 = vpack.c.bf16 %v10493_v55, %v10492_v22  ;;  %v20040_v22 = vld [vmem:[#allocation35_spill] sm:$0xff]  ;;  %v20041_v55 = vld [vmem:[#allocation108_spill] sm:$0xff] }
 0x877   : > { %13209 = vmatmul.mubr.msk.f32.vlgmr.msra.gmra.mrb[32].mxu0 %vm6345_vm4, %v8803_v54  ;;  %13465 = vmatpush3.bf16.msra.mxu1 %v18110_v4  ;;  %v8777_v54 = vld [vmem:[#allocation3 + $0x5f] sm:$0xff] }
 0x878   : > { %13455 = vmatpush3.bf16.msra.mxu0 %v17990_v53  ;;  %13211 = vmatprep.mubr.msk.f32.mxu0 %vm6345_vm4, %v8804_v27  ;;  %v8807_v53 = vmul.f32 %v8775_v21, %v16010_v44  ;;  %v8809_v45 = vmul.f32 %v8777_v54, %v16026_v63  ;;  %v8813_v44 = vmul.f32 %v17465_v42, %v19846_v57  ;;  %v20034_v42 = vld [vmem:[#allocation71_spill] sm:$0xff]  ;;  %v20038_v27 = vld [vmem:[#allocation24_spill] sm:$0xff]  ;;  %v20044_v21 = vld [vmem:[#allocation110_spill] sm:$0xff] }
 0x879   : > { %13457 = vmatprep.subr.bf16.mxu0 %v18097_v32  ;;  %v8814_v63 = vmul.f32 %v17470_v7, %v19848_v31  ;;  %v8817_v57 = vmul.f32 %v19931_v20, %v19854_v14  ;;  %v20031_v31 = vld [vmem:[#allocation14_spill] sm:$0xff]  ;;  %v8821_v14 = vmul.f32 %v19939_v43, %v20034_v42  ;;  %v20035_v7 = vld [vmem:[#allocation32_spill] sm:$0xff]  ;;  %v20037_v20 = vld [vmem:[#allocation75_spill] sm:$0xff]  ;;  %v8825_v43 = vmul.f32 %v20039_v61, %v20038_v27 }
 0x87a   : > { %v8819_v15 = vmul.f32 %v20032_v2, %v20031_v31  ;;  %v8822_v62 = vmul.f32 %v19941_v16, %v20035_v7  ;;  %v8824_v11 = vmul.f32 %v19945_v5, %v20037_v20  ;;  %v8826_v16 = vmul.f32 %v20041_v55, %v20040_v22  ;;  %v20047_v54 = vld [vmem:[#allocation39_spill] sm:$0xff]  ;;  %v20059_v42 = vld [vmem:[#allocation126_spill] sm:$0xff]  ;;  %v20061_v7 = vld [vmem:[#allocation128_spill] sm:$0xff] }
 0x87b   : > { %13212 = vmatmul.mubr.msk.f32.gmra.mrb[34].mxu0 %vm6345_vm4, %v8805_v28  ;;  %v20042_v28 = vld [vmem:[#allocation72_spill] sm:$0xff]  ;;  %v20054_v31 = vmov 0.0   ;;  %v20055_v2 = vld [vmem:[#allocation7_spill] sm:$0xff]  ;;  %v9204_v27 = vld [vmem:[#allocation3 + $0xa0] sm:$0xff] }
 0x87c   : > { %13214 = vmatprep.mubr.msk.f32.mxu0 %vm6345_vm4, %v8806_v17  ;;  %v8827_v8 = vmul.f32 %v17589_v47, %v20042_v28  ;;  %v20043_v17 = vld [vmem:[#allocation16_spill] sm:$0xff]  ;;  %v20050_v47 = vld [vmem:[#allocation105_spill] sm:$0xff]  ;;  %13421 = vmatprep.mubr.msk.f32.mxu1 %vm14154_vm5, %v20054_v31  ;;  %v9205_v61 = vld [vmem:[#allocation3 + $0xa8] sm:$0xff] }
 0x87d   : > { %v8828_v5 = vmul.f32 %v20044_v21, %v20043_v17  ;;  %v9202_v20 = vld [vmem:[#allocation3 + $0x90] sm:$0xff]  ;;  %v9207_v22 = vld [vmem:[#allocation3 + $0xb8] sm:$0xff]  ;;  %v9208_v55 = vld [vmem:[#allocation3 + $0xc0] sm:$0xff] }
 0x87e   : > { %v9210_v28 = vld [vmem:[#allocation3 + $0xd0] sm:$0xff]  ;;  %v9212_v17 = vld [vmem:[#allocation3 + $0xe0] sm:$0xff]  ;;  %v9213_v21 = vld [vmem:[#allocation3 + $0xe8] sm:$0xff] }
 0x87f   : > { %13215 = vmatmul.mubr.msk.f32.gmra.mrb[36].mxu0 %vm6345_vm4, %v8807_v53  ;;  %v20046_v53 = vld [vmem:[#allocation111_spill] sm:$0xff] }
 0x880   : > { %13217 = vmatprep.mubr.msk.f32.mxu0 %vm6345_vm4, %v8808_v50  ;;  %v8829_v50 = vmul.f32 %v20046_v53, %v20045_v52  ;;  %v9215_v52 = vld [vmem:[#allocation3 + $0xf8] sm:$0xff]  ;;  %v9216_v53 = vld [vmem:[#allocation3 + $0x100] sm:$0xff] }
 0x883   : > { %13218 = vmatmul.mubr.msk.f32.gmra.mrb[38].mxu0 %vm6345_vm4, %v8809_v45  ;;  %v20048_v45 = vld [vmem:[#allocation103_spill] sm:$0xff] }
 0x884   : > { %13220 = vmatprep.mubr.msk.f32.mxu0 %vm6345_vm4, %v8810_v46  ;;  %v8830_v46 = vmul.f32 %v20048_v45, %v20047_v54  ;;  %v9219_v54 = vld [vmem:[#allocation3 + $0x118] sm:$0xff]  ;;  %v20067_v45 = vld [vmem:[#allocation20_spill] sm:$0xff] }
 0x887   : > { %13221 = vmatmul.mubr.msk.f32.gmra.mrb[40].mxu0 %vm6345_vm4, %v8811_v60  ;;  %v8800_v60 = vld [vmem:[#allocation3 + $0x117] sm:$0xff] }
 0x888   : > { %13223 = vmatprep.mubr.msk.f32.mxu0 %vm6345_vm4, %v8812_v39  ;;  %v20049_v39 = vld [vmem:[#allocation53_spill] sm:$0xff] }
 0x88b   : > { %13224 = vmatmul.mubr.msk.f32.gmra.mrb[42].mxu0 %vm6345_vm4, %v8813_v44  ;;  %v8831_v44 = vmul.f32 %v20050_v47, %v20049_v39  ;;  %v20068_v39 = vld [vmem:[#allocation45_spill] sm:$0xff] }
 0x88c   : > { %13226 = vmatprep.mubr.msk.f32.mxu0 %vm6345_vm4, %v8814_v63  ;;  %v20051_v63 = vld [vmem:[#allocation42_spill] sm:$0xff] }
 0x88f   : > { %13227 = vmatmul.mubr.msk.f32.gmra.mrb[44].mxu0 %vm6345_vm4, %v8815_v51  ;;  %v8832_v51 = vmul.f32 %v8800_v60, %v20051_v63  ;;  %v9220_v60 = vld [vmem:[#allocation3 + $0x120] sm:$0xff] }
 0x890   : > { %13229 = vmatprep.mubr.msk.f32.mxu0 %vm6345_vm4, %v8816_v19  ;;  %v8801_v19 = vld [vmem:[#allocation3 + $0x11f] sm:$0xff] }
 0x891   : > { %v9578_v63 = vld [vmem:[#allocation3 + $0x39] sm:$0xff] }
 0x893   : > { %13230 = vmatmul.mubr.msk.f32.gmra.mrb[46].mxu0 %vm6345_vm4, %v8817_v57  ;;  %v20052_v57 = vld [vmem:[#allocation44_spill] sm:$0xff] }
 0x894   : > { %13232 = vmatprep.mubr.msk.f32.mxu0 %vm6345_vm4, %v8818_v6  ;;  %v8833_v33 = vmul.f32 %v8801_v19, %v20052_v57  ;;  %v20053_v6 = vld [vmem:[#allocation76_spill] sm:$0xff]  ;;  %v20070_v57 = vld [vmem:[#allocation10_spill] sm:$0xff] }
 0x897   : > { %13233 = vmatmul.mubr.msk.f32.gmra.mrb[48].mxu0 %vm6345_vm4, %v8819_v15  ;;  %v20056_v15 = vld [vmem:[#allocation69_spill] sm:$0xff] }
 0x898   : > { %13235 = vmatprep.mubr.msk.f32.mxu0 %vm6345_vm4, %v8820_v41  ;;  %v20058_v41 = vld [vmem:[#allocation70_spill] sm:$0xff] }
 0x89b   : > { %13236 = vmatmul.mubr.msk.f32.gmra.mrb[50].mxu0 %vm6345_vm4, %v8821_v14  ;;  %v20060_v14 = vld [vmem:[#allocation127_spill] sm:$0xff] }
 0x89c   : > { %13238 = vmatprep.mubr.msk.f32.mxu0 %vm6345_vm4, %v8822_v62  ;;  %v20063_v62 = vld [vmem:[#allocation130_spill] sm:$0xff] }
 0x89f   : > { %13239 = vmatmul.mubr.msk.f32.gmra.mrb[52].mxu0 %vm6345_vm4, %v8823_v10  ;;  %v9201_v10 = vld [vmem:[#allocation3 + $0x88] sm:$0xff] }
 0x8a0   : > { %13241 = vmatprep.mubr.msk.f32.mxu0 %vm6345_vm4, %v8824_v11  ;;  %v9203_v11 = vld [vmem:[#allocation3 + $0x98] sm:$0xff] }
 0x8a3   : > { %13242 = vmatmul.mubr.msk.f32.gmra.mrb[54].mxu0 %vm6345_vm4, %v8825_v43  ;;  %v9206_v43 = vld [vmem:[#allocation3 + $0xb0] sm:$0xff] }
 0x8a4   : > { %13244 = vmatprep.mubr.msk.f32.mxu0 %vm6345_vm4, %v8826_v16  ;;  %v9209_v16 = vld [vmem:[#allocation3 + $0xc8] sm:$0xff] }
 0x8a7   : > { %13245 = vmatmul.mubr.msk.f32.gmra.mrb[56].mxu0 %vm6345_vm4, %v8827_v8  ;;  %v9211_v8 = vld [vmem:[#allocation3 + $0xd8] sm:$0xff] }
 0x8a8   : > { %13247 = vmatprep.mubr.msk.f32.mxu0 %vm6345_vm4, %v8828_v5  ;;  %v9214_v5 = vld [vmem:[#allocation3 + $0xf0] sm:$0xff] }
 0x8ab   : > { %13248 = vmatmul.mubr.msk.f32.gmra.mrb[58].mxu0 %vm6345_vm4, %v8829_v50  ;;  %v20066_v50 = vld [vmem:[#allocation36_spill] sm:$0xff] }
 0x8ac   : > { %13250 = vmatprep.mubr.msk.f32.mxu0 %vm6345_vm4, %v8830_v46  ;;  %v9576_v46 = vld [vmem:[#allocation3 + $0x29] sm:$0xff] }
 0x8ad   : > { %v9608_v47 = vmul.f32 %v9576_v46, %v20068_v39  ;;  %v9593_v46 = vld [vmem:[#allocation3 + $0xb1] sm:$0xff]  ;;  %v9595_v39 = vld [vmem:[#allocation3 + $0xc1] sm:$0xff] }
 0x8af   : > { %13251 = vmatmul.mubr.msk.f32.gmra.mrb[60].mxu0 %vm6345_vm4, %v8831_v44  ;;  %v9577_v44 = vld [vmem:[#allocation3 + $0x31] sm:$0xff] }
 0x8b0   : > { %13253 = vmatprep.mubr.msk.f32.mxu0 %vm6345_vm4, %v8832_v51  ;;  %v20069_v51 = vld [vmem:[#allocation17_spill] sm:$0xff] }
 0x8b1   : > { %v9609_v19 = vmul.f32 %v9577_v44, %v20069_v51  ;;  %v9597_v44 = vld [vmem:[#allocation3 + $0xd1] sm:$0xff]  ;;  %v9599_v51 = vld [vmem:[#allocation3 + $0xe1] sm:$0xff] }
 0x8b3   : > { %13254 = vmatmul.mubr.msk.f32.gmra.mrb[62].mxu0 %vm6345_vm4, %v8833_v33  ;;  %v9610_v33 = vmul.f32 %v9578_v63, %v20070_v57  ;;  %v9598_v63 = vld [vmem:[#allocation3 + $0xd9] sm:$0xff] }
 0x8b4   : > { %13260 = vmatprep.mubr.msk.f32.mxu0 %vm6345_vm4, %v20053_v6  ;;  %v9579_v6 = vld [vmem:[#allocation3 + $0x41] sm:$0xff]  ;;  %v20078_v57 = vld [vmem:[#allocation109_spill] sm:$0xff] }
 0x8b7   : > { %13261 = vmatmul.mubr.msk.f32.vlgmr.msra.gmra.mrb[32].mxu0 %vm6345_vm4, %v20055_v2  ;;  %v9580_v2 = vld [vmem:[#allocation3 + $0x49] sm:$0xff] }
 0x8b8   : > { %13459 = vmatpush3.bf16.msra.mxu0 %v18097_v32  ;;  %13263 = vmatprep.mubr.msk.f32.mxu0 %vm6345_vm4, %v20056_v15  ;;  %v20062_v32 = vld [vmem:[#allocation129_spill] sm:$0xff]  ;;  %v20071_v15 = vld [vmem:[#allocation48_spill] sm:$0xff] }
 0x8b9   : > { %13460 = vmatprep.subr.bf16.mxu0 %v14153_v35  ;;  %v20064_v35 = vld [vmem:[#allocation131_spill] sm:$0xff] }
 0x8bb   : > { %13264 = vmatmul.mubr.msk.f32.gmra.mrb[34].mxu0 %vm6345_vm4, %v20057_v1  ;;  %v9611_v1 = vmul.f32 %v9579_v6, %v20071_v15  ;;  %v9601_v6 = vld [vmem:[#allocation3 + $0xf1] sm:$0xff] }
 0x8bc   : > { %13266 = vmatprep.mubr.msk.f32.mxu0 %vm6345_vm4, %v20058_v41  ;;  %v20072_v41 = vld [vmem:[#allocation54_spill] sm:$0xff] }
 0x8bf   : > { %13267 = vmatmul.mubr.msk.f32.gmra.mrb[36].mxu0 %vm6345_vm4, %v20059_v42  ;;  %v9612_v42 = vmul.f32 %v9580_v2, %v20072_v41  ;;  %v9602_v2 = vld [vmem:[#allocation3 + $0xf9] sm:$0xff]  ;;  %v9636_v41 = vmul.f32 %v18074_v30, %v20026_v48 }
 0x8c0   : > { %13269 = vmatprep.mubr.msk.f32.mxu0 %vm6345_vm4, %v20060_v14  ;;  %v9581_v14 = vld [vmem:[#allocation3 + $0x51] sm:$0xff]  ;;  %v9634_v15 = vmul.f32 %v9602_v2, %v20025_v9 }
 0x8c3   : > { %13270 = vmatmul.mubr.msk.f32.gmra.mrb[38].mxu0 %vm6345_vm4, %v20061_v7  ;;  %v9582_v7 = vld [vmem:[#allocation3 + $0x59] sm:$0xff] }
 0x8c4   : > { %13272 = vmatprep.mubr.msk.f32.mxu0 %vm6345_vm4, %v20062_v32  ;;  %v20073_v32 = vld [vmem:[#allocation9_spill] sm:$0xff] }
 0x8c7   : > { %13273 = vmatmul.mubr.msk.f32.gmra.mrb[40].mxu0 %vm6345_vm4, %v20063_v62  ;;  %v9613_v62 = vmul.f32 %v9581_v14, %v20073_v32 }
 0x8c8   : > { %13275 = vmatprep.mubr.msk.f32.mxu0 %vm6345_vm4, %v20064_v35  ;;  %v9614_v35 = vmul.f32 %v9582_v7, %v19996_v58  ;;  %v20080_v7 = vld [vmem:[#allocation94_spill] sm:$0xff] }
 0x8cb   : > { %13276 = vmatmul.mubr.msk.f32.gmra.mrb[42].mxu0 %vm6345_vm4, %v20065_v3  ;;  %v9583_v3 = vld [vmem:[#allocation3 + $0x61] sm:$0xff] }
 0x8cc   : > { %13278 = vmatprep.mubr.msk.f32.mxu0 %vm6345_vm4, %v9201_v10  ;;  %v20074_v10 = vld [vmem:[#allocation5_spill] sm:$0xff] }
 0x8cf   : > { %13279 = vmatmul.mubr.msk.f32.gmra.mrb[44].mxu0 %vm6345_vm4, %v9202_v20  ;;  %v9615_v20 = vmul.f32 %v9583_v3, %v20074_v10 }
 0x8d0   : > { %13281 = vmatprep.mubr.msk.f32.mxu0 %vm6345_vm4, %v9203_v11 }
 0x8d3   : > { %13282 = vmatmul.mubr.msk.f32.gmra.mrb[46].mxu0 %vm6345_vm4, %v9204_v27  ;;  %v9585_v27 = vld [vmem:[#allocation3 + $0x71] sm:$0xff] }
 0x8d4   : > { %13284 = vmatprep.mubr.msk.f32.mxu0 %vm6345_vm4, %v9205_v61  ;;  %v9586_v61 = vld [vmem:[#allocation3 + $0x79] sm:$0xff] }
 0x8d7   : > { %13285 = vmatmul.mubr.msk.f32.gmra.mrb[48].mxu0 %vm6345_vm4, %v9206_v43  ;;  %v20075_v43 = vld [vmem:[#allocation41_spill] sm:$0xff] }
 0x8d8   : > { %13287 = vmatprep.mubr.msk.f32.mxu0 %vm6345_vm4, %v9207_v22  ;;  %v9617_v22 = vmul.f32 %v9585_v27, %v20075_v43 }
 0x8db   : > { %13288 = vmatmul.mubr.msk.f32.gmra.mrb[50].mxu0 %vm6345_vm4, %v9208_v55  ;;  %v20076_v55 = vld [vmem:[#allocation33_spill] sm:$0xff] }
 0x8dc   : > { %13290 = vmatprep.mubr.msk.f32.mxu0 %vm6345_vm4, %v9209_v16  ;;  %v9618_v58 = vmul.f32 %v9586_v61, %v20076_v55  ;;  %v9587_v16 = vld [vmem:[#allocation3 + $0x81] sm:$0xff] }
 0x8df   : > { %13291 = vmatmul.mubr.msk.f32.gmra.mrb[52].mxu0 %vm6345_vm4, %v9210_v28  ;;  %v9588_v28 = vld [vmem:[#allocation3 + $0x89] sm:$0xff] }
 0x8e0   : > { %13293 = vmatprep.mubr.msk.f32.mxu0 %vm6345_vm4, %v9211_v8  ;;  %v20077_v8 = vld [vmem:[#allocation43_spill] sm:$0xff] }
 0x8e3   : > { %13294 = vmatmul.mubr.msk.f32.gmra.mrb[54].mxu0 %vm6345_vm4, %v9212_v17  ;;  %v9619_v17 = vmul.f32 %v9587_v16, %v20077_v8 }
 0x8e4   : > { %13296 = vmatprep.mubr.msk.f32.mxu0 %vm6345_vm4, %v9213_v21  ;;  %v9589_v21 = vld [vmem:[#allocation3 + $0x91] sm:$0xff] }
 0x8e7   : > { %13297 = vmatmul.mubr.msk.f32.gmra.mrb[56].mxu0 %vm6345_vm4, %v9214_v5  ;;  %v9590_v5 = vld [vmem:[#allocation3 + $0x99] sm:$0xff] }
 0x8e8   : > { %13299 = vmatprep.mubr.msk.f32.mxu0 %vm6345_vm4, %v9215_v52  ;;  %v9621_v52 = vmul.f32 %v9589_v21, %v20009_v56  ;;  %v9625_v56 = vmul.f32 %v9593_v46, %v20016_v23  ;;  %v9629_v23 = vmul.f32 %v9597_v44, %v20020_v36 }
 0x8eb   : > { %13300 = vmatmul.mubr.msk.f32.gmra.mrb[58].mxu0 %vm6345_vm4, %v9216_v53  ;;  %v9622_v53 = vmul.f32 %v9590_v5, %v20010_v40 }
 0x8ec   : > { %13302 = vmatprep.mubr.msk.f32.mxu0 %vm6345_vm4, %v20066_v50  ;;  %v9591_v50 = vld [vmem:[#allocation3 + $0xa1] sm:$0xff] }
 0x8ef   : > { %13303 = vmatmul.mubr.msk.f32.gmra.mrb[60].mxu0 %vm6345_vm4, %v20067_v45  ;;  %v9623_v45 = vmul.f32 %v9591_v50, %v20012_v24  ;;  %v9627_v24 = vmul.f32 %v9595_v39, %v20018_v29  ;;  %v10486_v29 = vrot.slane %v20078_v57, 4 }
 0x8f0   : > { %13305 = vmatprep.mubr.msk.f32.mxu0 %vm6345_vm4, %v9219_v54  ;;  %v9592_v54 = vld [vmem:[#allocation3 + $0xa9] sm:$0xff] }
 0x8f1   : > { %v10487_v36 = vadd.f32 %v10486_v29, %v20078_v57  ;;  %v20096_v57 = vld [vmem:[#allocation52_spill] sm:$0xff] }
 0x8f3   : > { %13306 = vmatmul.mubr.msk.f32.gmra.mrb[62].mxu0 %vm6345_vm4, %v9220_v60  ;;  %v9594_v60 = vld [vmem:[#allocation3 + $0xb9] sm:$0xff] }
 0x8f4   : > { %13312 = vmatprep.mubr.msk.f32.mxu0 %vm6345_vm4, %v9608_v47  ;;  %v9626_v40 = vmul.f32 %v9594_v60, %v20017_v38  ;;  %v9596_v47 = vld [vmem:[#allocation3 + $0xc9] sm:$0xff]  ;;  %v9630_v38 = vmul.f32 %v9598_v63, %v20021_v49  ;;  %v9633_v49 = vmul.f32 %v9601_v6, %v20024_v12  ;;  %v20079_v12 = vld [vmem:[#allocation46_spill] sm:$0xff] }
 0x8f5   : > { %v9637_v9 = vmul.f32 %v20079_v12, %v19763_v13  ;;  %v20100_v6 = vld [vmem:[#allocation83_spill] sm:$0xff] }
 0x8f7   : > { %13313 = vmatmul.mubr.msk.f32.vlgmr.msra.gmra.mrb[32].mxu0 %vm6345_vm4, %v9609_v19  ;;  %v9600_v19 = vld [vmem:[#allocation3 + $0xe9] sm:$0xff] }
 0x8f8   : > { %13462 = vmatpush3.bf16.msra.mxu0 %v18110_v4  ;;  %13315 = vmatprep.mubr.msk.f32.mxu0 %vm6345_vm4, %v9610_v33  ;;  %v9584_v4 = vld [vmem:[#allocation3 + $0x69] sm:$0xff]  ;;  %v9632_v33 = vmul.f32 %v9600_v19, %v20023_v37 }
 0x8f9   : > { %v9616_v11 = vmul.f32 %v9584_v4, %v20000_v34  ;;  %v9620_v34 = vmul.f32 %v9588_v28, %v20007_v25  ;;  %v9624_v25 = vmul.f32 %v9592_v54, %v20014_v26  ;;  %v9628_v26 = vmul.f32 %v9596_v47, %v20019_v0 }
 0x8fa   : > { %v9631_v0 = vmul.f32 %v9599_v51, %v20022_v59  ;;  %v10488_v59 = vrot.slane %v10487_v36, 2  ;;  %v20094_v51 = vld [vmem:[#allocation21_spill] sm:$0xff] }
 0x8fb   : > { %13316 = vmatmul.mubr.msk.f32.gmra.mrb[34].mxu0 %vm6345_vm4, %v9611_v1  ;;  %v9603_v1 = vld [vmem:[#allocation3 + $0x101] sm:$0xff] }
 0x8fc   : > { %13318 = vmatprep.mubr.msk.f32.mxu0 %vm6345_vm4, %v9612_v42  ;;  %v9635_v37 = vmul.f32 %v9603_v1, %v19760_v18  ;;  %v9606_v42 = vld [vmem:[#allocation3 + $0x119] sm:$0xff]  ;;  %v10489_v14 = vadd.f32 %v10488_v59, %v10487_v36  ;;  %v20104_v59 = vld [vmem:[#allocation95_spill] sm:$0xff] }
 0x8fd   : > { %v9638_v32 = vmul.f32 %v9606_v42, %v20080_v7  ;;  %v20102_v36 = vld [vmem:[#allocation93_spill] sm:$0xff] }
 0x8fe   : > { %v10490_v18 = vrot.slane %v10489_v14, 1 }
 0x8ff   : > { %13319 = vmatmul.mubr.msk.f32.gmra.mrb[36].mxu0 %vm6345_vm4, %v9613_v62  ;;  %v9607_v62 = vld [vmem:[#allocation3 + $0x121] sm:$0xff] }
 0x900   : > { %13321 = vmatprep.mubr.msk.f32.mxu0 %vm6345_vm4, %v9614_v35  ;;  %v20081_v35 = vld [vmem:[#allocation96_spill] sm:$0xff]  ;;  %v10491_v48 = vadd.f32 %v10490_v18, %v10489_v14  ;;  %v20106_v14 = vld [vmem:[#allocation15_spill] sm:$0xff]  ;;  %v20109_v18 = vld [vmem:[#allocation29_spill] sm:$0xff] }
 0x901   : > { %v9639_v3 = vmul.f32 %v9607_v62, %v20081_v35 }
 0x903   : > { %13322 = vmatmul.mubr.msk.f32.gmra.mrb[38].mxu0 %vm6345_vm4, %v9615_v20 }
 0x904   : > { %13324 = vmatprep.mubr.msk.f32.mxu0 %vm6345_vm4, %v9616_v11 }
 0x907   : > { %13325 = vmatmul.mubr.msk.f32.gmra.mrb[40].mxu0 %vm6345_vm4, %v9617_v22 }
 0x908   : > { %13327 = vmatprep.mubr.msk.f32.mxu0 %vm6345_vm4, %v9618_v58 }
 0x90b   : > { %13328 = vmatmul.mubr.msk.f32.gmra.mrb[42].mxu0 %vm6345_vm4, %v9619_v17 }
 0x90c   : > { %13330 = vmatprep.mubr.msk.f32.mxu0 %vm6345_vm4, %v9620_v34 }
 0x90f   : > { %13331 = vmatmul.mubr.msk.f32.gmra.mrb[44].mxu0 %vm6345_vm4, %v9621_v52 }
 0x910   : > { %13333 = vmatprep.mubr.msk.f32.mxu0 %vm6345_vm4, %v9622_v53 }
 0x913   : > { %13334 = vmatmul.mubr.msk.f32.gmra.mrb[46].mxu0 %vm6345_vm4, %v9623_v45 }
 0x914   : > { %13336 = vmatprep.mubr.msk.f32.mxu0 %vm6345_vm4, %v9624_v25 }
 0x917   : > { %13337 = vmatmul.mubr.msk.f32.gmra.mrb[48].mxu0 %vm6345_vm4, %v9625_v56  ;;  %v10567_v56 = vlaneseq }
 0x918   : > { %13339 = vmatprep.mubr.msk.f32.mxu0 %vm6345_vm4, %v9626_v40 }
 0x919   : > { %v18376_v47 = vshrl.u32 %v10567_v56, 7  ;;  %v20111_v56 = vld [vmem:[#allocation23_spill] sm:$0xff] }
 0x91b   : > { %13340 = vmatmul.mubr.msk.f32.gmra.mrb[50].mxu0 %vm6345_vm4, %v9627_v24  ;;  %20091 = vst [vmem:[#allocation28_spill] sm:$0xff] %v18376_v47  ;;  %v19294_v44 = vsub.s32 0, %v18376_v47 }
 0x91c   : > { %13342 = vmatprep.mubr.msk.f32.mxu0 %vm6345_vm4, %v9628_v26 }
 0x91f   : > { %13343 = vmatmul.mubr.msk.f32.gmra.mrb[52].mxu0 %vm6345_vm4, %v9629_v23 }
 0x920   : > { %13345 = vmatprep.mubr.msk.f32.mxu0 %vm6345_vm4, %v9630_v38 }
 0x923   : > { %13346 = vmatmul.mubr.msk.f32.gmra.mrb[54].mxu0 %vm6345_vm4, %v9631_v0  ;;  %v20098_v0 = vld [vmem:[#allocation86_spill] sm:$0xff] }
 0x924   : > { %13348 = vmatprep.mubr.msk.f32.mxu0 %vm6345_vm4, %v9632_v33 }
 0x927   : > { %13349 = vmatmul.mubr.msk.f32.gmra.mrb[56].mxu0 %vm6345_vm4, %v9633_v49 }
 0x928   : > { %13351 = vmatprep.mubr.msk.f32.mxu0 %vm6345_vm4, %v9634_v15  ;;  %v20103_v15 = vld [vmem:[#allocation90_spill] sm:$0xff] }
 0x92b   : > { %13352 = vmatmul.mubr.msk.f32.gmra.mrb[58].mxu0 %vm6345_vm4, %v9635_v37 }
 0x92c   : > { %13354 = vmatprep.mubr.msk.f32.mxu0 %vm6345_vm4, %v9636_v41  ;;  %v20105_v41 = vld [vmem:[#allocation88_spill] sm:$0xff] }
 0x92f   : > { %13355 = vmatmul.mubr.msk.f32.gmra.mrb[60].mxu0 %vm6345_vm4, %v9637_v9  ;;  %v20107_v9 = vld [vmem:[#allocation92_spill] sm:$0xff] }
 0x930   : > { %13357 = vmatprep.mubr.msk.f32.mxu0 %vm6345_vm4, %v9638_v32  ;;  %v20108_v32 = vld [vmem:[#allocation81_spill] sm:$0xff] }
 0x933   : > { %13358 = vmatmul.mubr.msk.f32.gmra.mrb[62].mxu0 %vm6345_vm4, %v9639_v3  ;;  %v20110_v3 = vld [vmem:[#allocation11_spill] sm:$0xff] }
 0x934   : > { %13414 = vmatprep.mubr.msk.f32.mxu0 %vm14154_vm5, %v20054_v31 }
 0x937   : > { %13415 = vmatmul.mubr.msk.f32.vlgmr.msra.gmra.mrb[64].mxu0 %vm6345_vm4, %v10491_v48 }
 0x9ca   : > { %v18316_v30 = vpop.f32.mrb[32].mxu0 }
 0x9cb   : > { %v18318_v13 = vpop.f32.mrb[33].mxu0 }
 0x9ce   : > { %v18320_v4 = vpop.f32.mrb[34].mxu0 }
 0x9cf   : > { %v18322_v10 = vpop.f32.mrb[35].mxu0 }
 0x9d2   : > { %v18324_v20 = vpop.f32.mrb[36].mxu0 }
 0x9d3   : > { %v18326_v11 = vpop.f32.mrb[37].mxu0 }
 0x9d6   : > { %v18328_v27 = vpop.f32.mrb[38].mxu0 }
 0x9d7   : > { %v18330_v61 = vpop.f32.mrb[39].mxu0 }
 0x9da   : > { %v18332_v31 = vpop.f32.mrb[40].mxu0 }
 0x9db   : > { %v18334_v43 = vpop.f32.mrb[41].mxu0 }
 0x9de   : > { %v18336_v22 = vpop.f32.mrb[42].mxu0 }
 0x9df   : > { %v18338_v55 = vpop.f32.mrb[43].mxu0 }
 0x9e2   : > { %v18340_v58 = vpop.f32.mrb[44].mxu0 }
 0x9e3   : > { %v18342_v16 = vpop.f32.mrb[45].mxu0 }
 0x9e6   : > { %v18344_v28 = vpop.f32.mrb[46].mxu0 }
 0x9e7   : > { %v18346_v8 = vpop.f32.mrb[47].mxu0 }
 0x9ea   : > { %v18348_v17 = vpop.f32.mrb[48].mxu0 }
 0x9eb   : > { %v18350_v34 = vpop.f32.mrb[49].mxu0 }
 0x9ee   : > { %v18352_v21 = vpop.f32.mrb[50].mxu0 }
 0x9ef   : > { %v18354_v5 = vpop.f32.mrb[51].mxu0 }
 0x9f2   : > { %v18356_v52 = vpop.f32.mrb[52].mxu0 }
 0x9f3   : > { %v18358_v53 = vpop.f32.mrb[53].mxu0 }
 0x9f4   : > { %20082 = vst [vmem:[#allocation40_spill] sm:$0xff] %v18358_v53 }
 0x9f6   : > { %v18360_v50 = vpop.f32.mrb[54].mxu0 }
 0x9f7   : > { %20083 = vst [vmem:[#allocation59_spill] sm:$0xff] %v18360_v50  ;;  %v18362_v54 = vpop.f32.mrb[55].mxu0 }
 0x9f8   : > { %20084 = vst [vmem:[#allocation60_spill] sm:$0xff] %v18362_v54 }
 0x9fa   : > { %v18364_v45 = vpop.f32.mrb[56].mxu0 }
 0x9fb   : > { %20085 = vst [vmem:[#allocation51_spill] sm:$0xff] %v18364_v45  ;;  %v18366_v25 = vpop.f32.mrb[57].mxu0 }
 0x9fc   : > { %20086 = vst [vmem:[#allocation63_spill] sm:$0xff] %v18366_v25 }
 0x9fe   : > { %v18368_v46 = vpop.f32.mrb[58].mxu0 }
 0x9ff   : > { %20087 = vst [vmem:[#allocation25_spill] sm:$0xff] %v18368_v46  ;;  %v18370_v60 = vpop.f32.mrb[59].mxu0 }
 0xa00   : > { %20088 = vst [vmem:[#allocation26_spill] sm:$0xff] %v18370_v60 }
 0xa02   : > { %v18372_v40 = vpop.f32.mrb[60].mxu0 }
 0xa03   : > { %20089 = vst [vmem:[#allocation65_spill] sm:$0xff] %v18372_v40  ;;  %v18374_v39 = vpop.f32.mrb[61].mxu0 }
 0xa04   : > { %20090 = vst [vmem:[#allocation68_spill] sm:$0xff] %v18374_v39 }
 0xa06   : > { %v18378_v24 = vpop.f32.mrb[62].mxu0 }
 0xa07   : > { %20092 = vst [vmem:[#allocation84_spill] sm:$0xff] %v18378_v24  ;;  %v18380_v26 = vpop.f32.mrb[63].mxu0 }
 0xa08   : > { %20093 = vst [vmem:[#allocation87_spill] sm:$0xff] %v18380_v26 }
 0xa0a   : > { %v10563_v63 = vpop.f32.mrb[64].mxu0 }
 0xa0b   : > { %v10570_v23 = vrot.slane %v10563_v63, %v19294_v44  ;;  %v13416_v38 = vpop.f32.mrb[65].mxu0 }
 0xa0c   : > { %v20112_v38 = vld [vmem:[#allocation38_spill] sm:$0xff] }
 0xa0d   : > { %v18386_v19 = vsub.f32 %v20094_v51, %v10570_v23  ;;  %v18389_v29 = vsub.f32 %v20096_v57, %v10570_v23  ;;  %v18392_v33 = vsub.f32 %v20098_v0, %v10570_v23  ;;  %v18395_v2 = vsub.f32 %v20100_v6, %v10570_v23  ;;  %v20113_v57 = vld [vmem:[#allocation19_spill] sm:$0xff]  ;;  %v20114_v6 = vld [vmem:[#allocation98_spill] sm:$0xff] }
 0xa0e   : > { %v18398_v49 = vsub.f32 %v20102_v36, %v10570_v23  ;;  %v18401_v1 = vsub.f32 %v20103_v15, %v10570_v23  ;;  %v18404_v37 = vsub.f32 %v20104_v59, %v10570_v23  ;;  %v18407_v42 = vsub.f32 %v20105_v41, %v10570_v23  ;;  %v20115_v15 = vld [vmem:[#allocation97_spill] sm:$0xff]  ;;  %v20116_v41 = vld [vmem:[#allocation100_spill] sm:$0xff] }
 0xa0f   : > { %20095 = vst [vmem:[#allocation91_spill] sm:$0xff] %v18386_v19  ;;  %20097 = vst [vmem:[#allocation112_spill] sm:$0xff] %v18389_v29  ;;  %v18410_v12 = vsub.f32 %v20106_v14, %v10570_v23  ;;  %v18413_v7 = vsub.f32 %v20107_v9, %v10570_v23  ;;  %v18416_v62 = vsub.f32 %v20108_v32, %v10570_v23  ;;  %v20117_v9 = vld [vmem:[#allocation99_spill] sm:$0xff] }
 0xa10   : > { %20099 = vst [vmem:[#allocation113_spill] sm:$0xff] %v18392_v33  ;;  %20101 = vst [vmem:[#allocation114_spill] sm:$0xff] %v18395_v2  ;;  %v18419_v35 = vsub.f32 %v20109_v18, %v10570_v23  ;;  %v18422_v48 = vsub.f32 %v20110_v3, %v10570_v23  ;;  %v18425_v63 = vsub.f32 %v20111_v56, %v10570_v23  ;;  %v20118_v18 = vld [vmem:[#allocation102_spill] sm:$0xff]  ;;  %v20119_v56 = vld [vmem:[#allocation101_spill] sm:$0xff] }
 0xa11   : > { %v18428_v51 = vsub.f32 %v20112_v38, %v10570_v23  ;;  %v18431_v0 = vsub.f32 %v20113_v57, %v10570_v23  ;;  %v18434_v36 = vsub.f32 %v20114_v6, %v10570_v23  ;;  %v18437_v59 = vsub.f32 %v20115_v15, %v10570_v23  ;;  %v20120_v57 = vld [vmem:[#allocation106_spill] sm:$0xff]  ;;  %v20121_v6 = vld [vmem:[#allocation104_spill] sm:$0xff] }
 0xa12   : > { %v18440_v14 = vsub.f32 %v20116_v41, %v10570_v23  ;;  %v18443_v32 = vsub.f32 %v20117_v9, %v10570_v23  ;;  %v18446_v3 = vsub.f32 %v20118_v18, %v10570_v23  ;;  %v18449_v38 = vsub.f32 %v20119_v56, %v10570_v23  ;;  %v20122_v15 = vld [vmem:[#allocation78_spill] sm:$0xff]  ;;  %v20124_v9 = vld [vmem:[#allocation80_spill] sm:$0xff]  ;;  %v20125_v18 = vld [vmem:[#allocation77_spill] sm:$0xff] }
 0xa13   : > { %v18452_v44 = vsub.f32 %v20120_v57, %v10570_v23  ;;  %v18455_v47 = vsub.f32 %v20121_v6, %v10570_v23  ;;  %v18458_v26 = vsub.f32 %v20122_v15, %v10570_v23  ;;  %v20123_v41 = vld [vmem:[#allocation30_spill] sm:$0xff]  ;;  %v18464_v39 = vsub.f32 %v20124_v9, %v10570_v23  ;;  %v20127_v56 = vld [vmem:[#allocation13_spill] sm:$0xff]  ;;  %v20129_v57 = vld [vmem:[#allocation4_spill] sm:$0xff] }
 0xa14   : > { %v18461_v24 = vsub.f32 %v20123_v41, %v10570_v23  ;;  %v18467_v40 = vsub.f32 %v20125_v18, %v10570_v23  ;;  %v18470_v60 = vsub.f32 %v20127_v56, %v10570_v23  ;;  %v18473_v46 = vsub.f32 %v20129_v57, %v10570_v23  ;;  %v20131_v6 = vld [vmem:[#allocation107_spill] sm:$0xff]  ;;  %v20133_v15 = vld [vmem:[#allocation73_spill] sm:$0xff] }
 0xa15   : > { %v18476_v25 = vsub.f32 %v20131_v6, %v10570_v23  ;;  %v18479_v45 = vsub.f32 %v20133_v15, %v10570_v23  ;;  %v10603_v41 = vmul.f32 %v18386_v19, %v18386_v19  ;;  %v10604_v9 = vmul.f32 %v18389_v29, %v18389_v29 }
 0xa16   : > { %20126 = vst [vmem:[#allocation115_spill] sm:$0xff] %v18467_v40  ;;  %20128 = vst [vmem:[#allocation116_spill] sm:$0xff] %v18470_v60  ;;  %v10605_v18 = vmul.f32 %v18392_v33, %v18392_v33  ;;  %v10606_v56 = vmul.f32 %v18395_v2, %v18395_v2  ;;  %v10607_v23 = vmul.f32 %v18398_v49, %v18398_v49 }
 0xa17   : > { %20130 = vst [vmem:[#allocation49_spill] sm:$0xff] %v18473_v46  ;;  %20132 = vst [vmem:[#allocation117_spill] sm:$0xff] %v18476_v25  ;;  %v10635_v57 = vsel %vm6345_vm4, %v10603_v41, 0.0  ;;  %v10636_v6 = vsel %vm6345_vm4, %v10604_v9, 0.0  ;;  %v10608_v29 = vmul.f32 %v18401_v1, %v18401_v1  ;;  %v10609_v2 = vmul.f32 %v18404_v37, %v18404_v37 }
 0xa18   : > { %v10637_v54 = vadd.f32 %v10636_v6, %v10635_v57  ;;  %v10638_v15 = vsel %vm6345_vm4, %v10605_v18, 0.0  ;;  %v10640_v50 = vsel %vm6345_vm4, %v10606_v56, 0.0  ;;  %v10642_v41 = vsel %vm6345_vm4, %v10607_v23, 0.0 }
 0xa19   : > { %v10610_v9 = vmul.f32 %v18407_v42, %v18407_v42  ;;  %v10644_v57 = vsel %vm6345_vm4, %v10608_v29, 0.0  ;;  %v10646_v18 = vsel %vm6345_vm4, %v10609_v2, 0.0  ;;  %v10615_v2 = vmul.f32 %v18422_v48, %v18422_v48 }
 0xa1a   : > { %v10639_v19 = vadd.f32 %v10638_v15, %v10637_v54  ;;  %v10611_v54 = vmul.f32 %v18410_v12, %v18410_v12 }
 0xa1c   : > { %v10641_v33 = vadd.f32 %v10640_v50, %v10639_v19  ;;  %v10612_v50 = vmul.f32 %v18413_v7, %v18413_v7  ;;  %v10648_v19 = vsel %vm6345_vm4, %v10610_v9, 0.0  ;;  %v10650_v23 = vsel %vm6345_vm4, %v10611_v54, 0.0 }
 0xa1d   : > { %v10616_v9 = vmul.f32 %v18425_v63, %v18425_v63  ;;  %v10617_v54 = vmul.f32 %v18428_v51, %v18428_v51 }
 0xa1e   : > { %v10643_v53 = vadd.f32 %v10642_v41, %v10641_v33  ;;  %v10613_v33 = vmul.f32 %v18416_v62, %v18416_v62  ;;  %v10652_v29 = vsel %vm6345_vm4, %v10612_v50, 0.0  ;;  %v10618_v50 = vmul.f32 %v18431_v0, %v18431_v0 }
 0xa20   : > { %v10645_v6 = vadd.f32 %v10644_v57, %v10643_v53  ;;  %v10614_v53 = vmul.f32 %v18419_v35, %v18419_v35 }
 0xa22   : > { %v10647_v15 = vadd.f32 %v10646_v18, %v10645_v6  ;;  %v10654_v6 = vsel %vm6345_vm4, %v10613_v33, 0.0  ;;  %v10619_v33 = vmul.f32 %v18434_v36, %v18434_v36 }
 0xa24   : > { %v10649_v56 = vadd.f32 %v10648_v19, %v10647_v15  ;;  %v10656_v15 = vsel %vm6345_vm4, %v10614_v53, 0.0  ;;  %v10620_v53 = vmul.f32 %v18437_v59, %v18437_v59 }
 0xa26   : > { %v10651_v41 = vadd.f32 %v10650_v23, %v10649_v56  ;;  %v10658_v56 = vsel %vm6345_vm4, %v10615_v2, 0.0  ;;  %v10621_v2 = vmul.f32 %v18440_v14, %v18440_v14 }
 0xa28   : > { %v10653_v57 = vadd.f32 %v10652_v29, %v10651_v41  ;;  %v10660_v41 = vsel %vm6345_vm4, %v10616_v9, 0.0  ;;  %v10622_v9 = vmul.f32 %v18443_v32, %v18443_v32 }
 0xa2a   : > { %v10655_v18 = vadd.f32 %v10654_v6, %v10653_v57  ;;  %v10662_v57 = vsel %vm6345_vm4, %v10617_v54, 0.0  ;;  %v10623_v54 = vmul.f32 %v18446_v3, %v18446_v3 }
 0xa2c   : > { %v10657_v19 = vadd.f32 %v10656_v15, %v10655_v18  ;;  %v10664_v18 = vsel %vm6345_vm4, %v10618_v50, 0.0  ;;  %v10624_v50 = vmul.f32 %v18449_v38, %v18449_v38 }
 0xa2e   : > { %v10659_v23 = vadd.f32 %v10658_v56, %v10657_v19  ;;  %v10666_v19 = vsel %vm6345_vm4, %v10619_v33, 0.0  ;;  %v10625_v33 = vmul.f32 %v18452_v44, %v18452_v44 }
 0xa30   : > { %v10661_v29 = vadd.f32 %v10660_v41, %v10659_v23  ;;  %v10668_v23 = vsel %vm6345_vm4, %v10620_v53, 0.0  ;;  %v10626_v53 = vmul.f32 %v18455_v47, %v18455_v47 }
 0xa32   : > { %v10663_v6 = vadd.f32 %v10662_v57, %v10661_v29  ;;  %v10670_v29 = vsel %vm6345_vm4, %v10621_v2, 0.0  ;;  %v10627_v2 = vmul.f32 %v18458_v26, %v18458_v26 }
 0xa34   : > { %v10665_v15 = vadd.f32 %v10664_v18, %v10663_v6  ;;  %v10672_v6 = vsel %vm6345_vm4, %v10622_v9, 0.0  ;;  %v10628_v9 = vmul.f32 %v18461_v24, %v18461_v24 }
 0xa36   : > { %v10667_v56 = vadd.f32 %v10666_v19, %v10665_v15  ;;  %v10674_v15 = vsel %vm6345_vm4, %v10623_v54, 0.0  ;;  %v10629_v54 = vmul.f32 %v18464_v39, %v18464_v39 }
 0xa38   : > { %v10669_v41 = vadd.f32 %v10668_v23, %v10667_v56  ;;  %v10676_v56 = vsel %vm6345_vm4, %v10624_v50, 0.0  ;;  %v10630_v50 = vmul.f32 %v18467_v40, %v18467_v40 }
 0xa3a   : > { %v10671_v57 = vadd.f32 %v10670_v29, %v10669_v41  ;;  %v10678_v41 = vsel %vm6345_vm4, %v10625_v33, 0.0  ;;  %v10631_v33 = vmul.f32 %v18470_v60, %v18470_v60 }
 0xa3c   : > { %v10673_v18 = vadd.f32 %v10672_v6, %v10671_v57  ;;  %v10680_v57 = vsel %vm6345_vm4, %v10626_v53, 0.0  ;;  %v10632_v53 = vmul.f32 %v18473_v46, %v18473_v46 }
 0xa3e   : > { %v10675_v19 = vadd.f32 %v10674_v15, %v10673_v18  ;;  %v10682_v18 = vsel %vm6345_vm4, %v10627_v2, 0.0  ;;  %v10633_v2 = vmul.f32 %v18476_v25, %v18476_v25 }
 0xa40   : > { %v10677_v23 = vadd.f32 %v10676_v56, %v10675_v19  ;;  %v10684_v19 = vsel %vm6345_vm4, %v10628_v9, 0.0  ;;  %v10634_v9 = vmul.f32 %v18479_v45, %v18479_v45 }
 0xa42   : > { %v10679_v29 = vadd.f32 %v10678_v41, %v10677_v23  ;;  %v10686_v23 = vsel %vm6345_vm4, %v10629_v54, 0.0  ;;  %v10694_v54 = vsel %vm6345_vm4, %v10633_v2, 0.0 }
 0xa44   : > { %v10681_v6 = vadd.f32 %v10680_v57, %v10679_v29  ;;  %v10688_v29 = vsel %vm6345_vm4, %v10630_v50, 0.0 }
 0xa46   : > { %v10683_v15 = vadd.f32 %v10682_v18, %v10681_v6  ;;  %v10690_v6 = vsel %vm6345_vm4, %v10631_v33, 0.0  ;;  %v11674_v33 = vld [vmem:[%s18903_s8] ss:$0 sm:$0xff] }
 0xa48   : > { %v10685_v56 = vadd.f32 %v10684_v19, %v10683_v15  ;;  %v10692_v15 = vsel %vm6345_vm4, %v10632_v53, 0.0  ;;  %v10001_v53 = vmul.f32 %v18316_v30, %v11674_v33  ;;  %v10007_v30 = vmul.f32 %v18328_v27, %v11674_v33 }
 0xa49   : > { %v10014_v27 = vmul.f32 %v11674_v33, %v18346_v8 }
 0xa4a   : > { %v10687_v41 = vadd.f32 %v10686_v23, %v10685_v56  ;;  %v10696_v23 = vsel %vm6345_vm4, %v10634_v9, 0.0  ;;  %v10006_v9 = vmul.f32 %v11674_v33, %v18330_v61 }
 0xa4c   : > { %v10689_v57 = vadd.f32 %v10688_v29, %v10687_v41 }
 0xa4e   : > { %v10691_v18 = vadd.f32 %v10690_v6, %v10689_v57  ;;  %v18585_v57 = vld [vmem:[%s18903_s8 + $0x1] ss:$0 sm:$0xff]  ;;  %v10004_v6 = vmul.f32 %v11674_v33, %v18326_v11  ;;  %v10015_v11 = vmul.f32 %v18344_v28, %v11674_v33 }
 0xa4f   : > { %v18588_v2 = vadd.f32 %v18585_v57, %v10001_v53 }
 0xa50   : > { %v10693_v19 = vadd.f32 %v10692_v15, %v10691_v18  ;;  %v10009_v15 = vmul.f32 %v18332_v31, %v11674_v33 }
 0xa52   : > { %v10695_v56 = vadd.f32 %v10694_v54, %v10693_v19  ;;  %v18627_v28 = vadd.f32 %v18585_v57, %v10009_v15 }
 0xa54   : > { %v10697_v46 = vadd.f32 %v10696_v23, %v10695_v56  ;;  %v10008_v56 = vmul.f32 %v11674_v33, %v18334_v43 }
 0xa56   : > { %v10698_v50 = vrot.slane %v10697_v46, 4  ;;  %v18630_v8 = vadd.f32 %v18585_v57, %v10008_v56  ;;  %v20143_v56 = vld [vmem:[#allocation51_spill] sm:$0xff] }
 0xa58   : > { %v10699_v41 = vadd.f32 %v10698_v50, %v10697_v46  ;;  %v10000_v46 = vmul.f32 %v11674_v33, %v18318_v13  ;;  %v10011_v13 = vmul.f32 %v18336_v22, %v11674_v33 }
 0xa5a   : > { %v10700_v29 = vrot.slane %v10699_v41, 2  ;;  %v18606_v61 = vadd.f32 %v18585_v57, %v10000_v46  ;;  %v18633_v23 = vadd.f32 %v18585_v57, %v10011_v13  ;;  %v18646_v46 = vadd.f32 %v18585_v57, %v10015_v11 }
 0xa5b   : > { %v10025_v13 = vmul.f32 %v20143_v56, %v11674_v33 }
 0xa5c   : > { %v10701_v60 = vadd.f32 %v10700_v29, %v10699_v41  ;;  %20134 = vst [vmem:[#allocation118_spill] sm:$0xff] %v18633_v23  ;;  %v10017_v41 = vmul.f32 %v18348_v17, %v11674_v33  ;;  %20138 = vst [vmem:[#allocation121_spill] sm:$0xff] %v18646_v46  ;;  %v10021_v17 = vmul.f32 %v18356_v52, %v11674_v33  ;;  %v20149_v52 = vld [vmem:[#allocation68_spill] sm:$0xff] }
 0xa5e   : > { %v10702_v25 = vrot.slane %v10701_v60, 1 }
 0xa60   : > { %v10703_v40 = vadd.f32 %v10702_v25, %v10701_v60  ;;  %v10003_v25 = vmul.f32 %v18320_v4, %v11674_v33  ;;  %v10002_v60 = vmul.f32 %v11674_v33, %v18322_v10  ;;  %v10010_v4 = vmul.f32 %v11674_v33, %v18338_v55 }
 0xa61   : > { %v10013_v10 = vmul.f32 %v18340_v58, %v11674_v33  ;;  %v18618_v55 = vadd.f32 %v18585_v57, %v10004_v6  ;;  %v18621_v58 = vadd.f32 %v18585_v57, %v10007_v30  ;;  %v10018_v6 = vmul.f32 %v11674_v33, %v18354_v5  ;;  %v20148_v5 = vld [vmem:[#allocation65_spill] sm:$0xff] }
 0xa62   : > { %13422 = vmatmul.mubr.msk.f32.vlgmr.msra.gmra.mrb[64].mxu1 %vm6345_vm4, %v10703_v40  ;;  %v10005_v40 = vmul.f32 %v18324_v20, %v11674_v33  ;;  %v10012_v20 = vmul.f32 %v11674_v33, %v18342_v16  ;;  %v18609_v31 = vadd.f32 %v18585_v57, %v10003_v25  ;;  %v18612_v43 = vadd.f32 %v18585_v57, %v10002_v60 }
 0xa63   : > { %v18624_v16 = vadd.f32 %v18585_v57, %v10006_v9  ;;  %v18636_v50 = vadd.f32 %v18585_v57, %v10010_v4  ;;  %v18640_v29 = vadd.f32 %v18585_v57, %v10013_v10  ;;  %v18649_v25 = vadd.f32 %v18585_v57, %v10014_v27  ;;  %v20141_v9 = vld [vmem:[#allocation59_spill] sm:$0xff] }
 0xa64   : > { %v18615_v22 = vadd.f32 %v18585_v57, %v10005_v40  ;;  %v18643_v53 = vadd.f32 %v18585_v57, %v10012_v20  ;;  %v10016_v60 = vmul.f32 %v11674_v33, %v18350_v34  ;;  %v10019_v40 = vmul.f32 %v18352_v21, %v11674_v33  ;;  %v20145_v10 = vld [vmem:[#allocation63_spill] sm:$0xff]  ;;  %v20146_v34 = vld [vmem:[#allocation25_spill] sm:$0xff]  ;;  %v20147_v21 = vld [vmem:[#allocation26_spill] sm:$0xff] }
 0xa65   : > { %20135 = vst [vmem:[#allocation27_spill] sm:$0xff] %v18636_v50  ;;  %20136 = vst [vmem:[#allocation119_spill] sm:$0xff] %v18640_v29  ;;  %v10023_v15 = vmul.f32 %v20141_v9, %v11674_v33  ;;  %v18660_v4 = vadd.f32 %v18585_v57, %v10017_v41  ;;  %v10024_v20 = vmul.f32 %v11674_v33, %v20145_v10  ;;  %v20151_v9 = vld [vmem:[#allocation87_spill] sm:$0xff] }
 0xa66   : > { %20137 = vst [vmem:[#allocation120_spill] sm:$0xff] %v18643_v53  ;;  %20139 = vst [vmem:[#allocation64_spill] sm:$0xff] %v18649_v25  ;;  %v10027_v11 = vmul.f32 %v20146_v34, %v11674_v33  ;;  %v10026_v27 = vmul.f32 %v11674_v33, %v20147_v21  ;;  %v10029_v46 = vmul.f32 %v20148_v5, %v11674_v33 }
 0xa67   : > { %20144 = vst [vmem:[#allocation122_spill] sm:$0xff] %v18660_v4  ;;  %v10028_v25 = vmul.f32 %v11674_v33, %v20149_v52  ;;  %v10030_v53 = vmul.f32 %v11674_v33, %v20151_v9  ;;  %v18673_v41 = vadd.f32 %v18585_v57, %v10019_v40  ;;  %v18676_v56 = vadd.f32 %v18585_v57, %v10018_v6 }
 0xa68   : > { %v18679_v10 = vadd.f32 %v18585_v57, %v10021_v17  ;;  %v18685_v5 = vadd.f32 %v18585_v57, %v10023_v15  ;;  %v18694_v40 = vadd.f32 %v18585_v57, %v10024_v20  ;;  %v18697_v6 = vadd.f32 %v18585_v57, %v10027_v11  ;;  %v20169_v11 = vld [vmem:[#allocation91_spill] sm:$0xff] }
 0xa69   : > { %20153 = vst [vmem:[#allocation47_spill] sm:$0xff] %v18673_v41  ;;  %20154 = vst [vmem:[#allocation123_spill] sm:$0xff] %v18676_v56  ;;  %v18700_v17 = vadd.f32 %v18585_v57, %v10026_v27  ;;  %v18705_v15 = vadd.f32 %v18585_v57, %v10029_v46  ;;  %v18714_v20 = vadd.f32 %v18585_v57, %v10030_v53 }
 0xa6a   : > { %20155 = vst [vmem:[#allocation61_spill] sm:$0xff] %v18679_v10  ;;  %20157 = vst [vmem:[#allocation34_spill] sm:$0xff] %v18685_v5 }
 0xa6b   : > { %20160 = vst [vmem:[#allocation67_spill] sm:$0xff] %v18694_v40  ;;  %20161 = vst [vmem:[#allocation55_spill] sm:$0xff] %v18697_v6  ;;  %v20170_v6 = vld [vmem:[#allocation112_spill] sm:$0xff] }
 0xa6c   : > { %20162 = vst [vmem:[#allocation74_spill] sm:$0xff] %v18700_v17  ;;  %20165 = vst [vmem:[#allocation66_spill] sm:$0xff] %v18705_v15  ;;  %v20171_v17 = vld [vmem:[#allocation113_spill] sm:$0xff] }
 0xa6d   : > { %20168 = vst [vmem:[#allocation82_spill] sm:$0xff] %v18714_v20  ;;  %v20175_v20 = vld [vmem:[#allocation49_spill] sm:$0xff] }
 0xa6e   : > { %v20176_v15 = vld [vmem:[#allocation117_spill] sm:$0xff] }
 0xb35   : > { %v10773_v18 = vpop.f32.mrb[64].mxu1 }
 0xb36   : > { %v10774_v19 = vadd.f32 1e-05, %v10773_v18  ;;  %v13423_v54 = vpop.f32.mrb[65].mxu1  ;;  %v20140_v18 = vld [vmem:[#allocation40_spill] sm:$0xff] }
 0xb37   : > { %v10020_v30 = vmul.f32 %v11674_v33, %v20140_v18  ;;  %v20150_v18 = vld [vmem:[#allocation84_spill] sm:$0xff] }
 0xb38   : > { %14094 = vrsqrt.f32 %v10774_v19  ;;  %v20142_v19 = vld [vmem:[#allocation60_spill] sm:$0xff]  ;;  %v10031_v29 = vmul.f32 %v20150_v18, %v11674_v33 }
 0xb39   : > { %v10022_v54 = vmul.f32 %v11674_v33, %v20142_v19  ;;  %v18670_v19 = vadd.f32 %v18585_v57, %v10016_v60  ;;  %v18682_v21 = vadd.f32 %v18585_v57, %v10020_v30  ;;  %v18691_v60 = vadd.f32 %v18585_v57, %v10025_v13  ;;  %v20163_v30 = vld [vmem:[#allocation28_spill] sm:$0xff] }
 0xb3a   : > { %v20164_v52 = vsub.s32 0, %v20163_v30  ;;  %v18711_v13 = vadd.f32 %v18585_v57, %v10031_v29  ;;  %v20172_v30 = vld [vmem:[#allocation114_spill] sm:$0xff] }
 0xb3b   : > { %20152 = vst [vmem:[#allocation31_spill] sm:$0xff] %v18670_v19  ;;  %20156 = vst [vmem:[#allocation124_spill] sm:$0xff] %v18682_v21  ;;  %v18688_v33 = vadd.f32 %v18585_v57, %v10022_v54  ;;  %v18708_v54 = vadd.f32 %v18585_v57, %v10028_v25 }
 0xb3c   : > { %20159 = vst [vmem:[#allocation50_spill] sm:$0xff] %v18691_v60  ;;  %20167 = vst [vmem:[#allocation56_spill] sm:$0xff] %v18711_v13 }
 0xb3d   : > { %20158 = vst [vmem:[#allocation125_spill] sm:$0xff] %v18688_v33  ;;  %20166 = vst [vmem:[#allocation62_spill] sm:$0xff] %v18708_v54 }
 0xb42   : > { %v14095_v34 = vpop.eup %14094 }
 0xb43   : > { %v10781_v18 = vrot.slane %v14095_v34, %v20164_v52 }
 0xb45   : > { %v10782_v9 = vmul.f32 %v10781_v18, %v20169_v11  ;;  %v10783_v27 = vmul.f32 %v10781_v18, %v20170_v6  ;;  %v10784_v60 = vmul.f32 %v10781_v18, %v20171_v17  ;;  %v10785_v34 = vmul.f32 %v10781_v18, %v20172_v30  ;;  %v20174_v30 = vld [vmem:[#allocation116_spill] sm:$0xff] }
 0xb46   : > { %v10786_v46 = vmul.f32 %v10781_v18, %v18398_v49  ;;  %v10787_v52 = vmul.f32 %v10781_v18, %v18401_v1  ;;  %v10788_v25 = vmul.f32 %v10781_v18, %v18404_v37  ;;  %v10789_v29 = vmul.f32 %v10781_v18, %v18407_v42 }
 0xb47   : > { %v10790_v13 = vmul.f32 %v10781_v18, %v18410_v12  ;;  %v10791_v57 = vmul.f32 %v10781_v18, %v18413_v7  ;;  %v10792_v53 = vmul.f32 %v10781_v18, %v18416_v62  ;;  %v10793_v6 = vmul.f32 %v10781_v18, %v18419_v35 }
 0xb48   : > { %v10794_v17 = vmul.f32 %v10781_v18, %v18422_v48  ;;  %v10795_v11 = vmul.f32 %v10781_v18, %v18425_v63  ;;  %v10796_v49 = vmul.f32 %v10781_v18, %v18428_v51  ;;  %v10797_v1 = vmul.f32 %v10781_v18, %v18431_v0  ;;  %v11710_v51 = vld [vmem:[%s18903_s8 + $0x2] ss:$0 sm:$0xff] }
 0xb49   : > { %v10798_v37 = vmul.f32 %v10781_v18, %v18434_v36  ;;  %v10799_v42 = vmul.f32 %v10781_v18, %v18437_v59  ;;  %v10800_v12 = vmul.f32 %v10781_v18, %v18440_v14  ;;  %v10801_v7 = vmul.f32 %v10781_v18, %v18443_v32  ;;  %v20173_v14 = vld [vmem:[#allocation115_spill] sm:$0xff] }
 0xb4a   : > { %v10802_v62 = vmul.f32 %v10781_v18, %v18446_v3  ;;  %v10803_v35 = vmul.f32 %v10781_v18, %v18449_v38  ;;  %v10804_v48 = vmul.f32 %v10781_v18, %v18452_v44  ;;  %v10805_v63 = vmul.f32 %v10781_v18, %v18455_v47 }
 0xb4b   : > { %v10806_v0 = vmul.f32 %v10781_v18, %v18458_v26  ;;  %v10807_v36 = vmul.f32 %v10781_v18, %v18461_v24  ;;  %v10808_v59 = vmul.f32 %v10781_v18, %v18464_v39  ;;  %v10809_v32 = vmul.f32 %v10781_v18, %v20173_v14 }
 0xb4c   : > { %v10810_v3 = vmul.f32 %v10781_v18, %v20174_v30  ;;  %v10811_v38 = vmul.f32 %v10781_v18, %v20175_v20  ;;  %v10812_v44 = vmul.f32 %v10781_v18, %v20176_v15  ;;  %v10813_v47 = vmul.f32 %v10781_v18, %v18479_v45 }
 0xb4d   : > { %v10819_v54 = vmul.f32 %v11710_v51, %v10782_v9  ;;  %v10820_v40 = vmul.f32 %v11710_v51, %v10783_v27  ;;  %v10821_v5 = vmul.f32 %v11710_v51, %v10784_v60  ;;  %v10822_v33 = vmul.f32 %v11710_v51, %v10785_v34  ;;  %v11711_v34 = vld [vmem:[%s18903_s8 + $0x3] ss:$0 sm:$0xff] }
 0xb4e   : > { %v10823_v10 = vmul.f32 %v11710_v51, %v10786_v46  ;;  %v10824_v26 = vmul.f32 %v11710_v51, %v10787_v52  ;;  %v10825_v21 = vmul.f32 %v11710_v51, %v10788_v25  ;;  %v10826_v24 = vmul.f32 %v11710_v51, %v10789_v29 }
 0xb4f   : > { %v10827_v41 = vmul.f32 %v11710_v51, %v10790_v13  ;;  %v10828_v39 = vmul.f32 %v11710_v51, %v10791_v57  ;;  %v10829_v56 = vmul.f32 %v11710_v51, %v10792_v53  ;;  %v10830_v14 = vmul.f32 %v11710_v51, %v10793_v6 }
 0xb50   : > { %v10831_v4 = vmul.f32 %v11710_v51, %v10794_v17  ;;  %v10832_v30 = vmul.f32 %v11710_v51, %v10795_v11  ;;  %v10833_v19 = vmul.f32 %v11710_v51, %v10796_v49  ;;  %v10834_v20 = vmul.f32 %v11710_v51, %v10797_v1 }
 0xb51   : > { %v10835_v23 = vmul.f32 %v11710_v51, %v10798_v37  ;;  %v10836_v15 = vmul.f32 %v11710_v51, %v10799_v42  ;;  %v10837_v50 = vmul.f32 %v11710_v51, %v10800_v12  ;;  %v10838_v45 = vmul.f32 %v11710_v51, %v10801_v7 }
 0xb52   : > { %v10839_v18 = vmul.f32 %v11710_v51, %v10802_v62  ;;  %v10840_v9 = vmul.f32 %v11710_v51, %v10803_v35  ;;  %v10841_v60 = vmul.f32 %v11710_v51, %v10804_v48  ;;  %v10842_v27 = vmul.f32 %v11710_v51, %v10805_v63 }
 0xb53   : > { %v10843_v13 = vmul.f32 %v11710_v51, %v10806_v0  ;;  %v10844_v46 = vmul.f32 %v11710_v51, %v10807_v36  ;;  %v10845_v52 = vmul.f32 %v11710_v51, %v10808_v59  ;;  %v10846_v25 = vmul.f32 %v11710_v51, %v10809_v32 }
 0xb54   : > { %v10847_v29 = vmul.f32 %v11710_v51, %v10810_v3  ;;  %v10848_v57 = vmul.f32 %v11710_v51, %v10811_v38  ;;  %v10849_v53 = vmul.f32 %v11710_v51, %v10812_v44  ;;  %v10850_v6 = vmul.f32 %v11710_v51, %v10813_v47 }
 0xb55   : > { %v10856_v17 = vadd.f32 %v11711_v34, %v10819_v54  ;;  %v10857_v11 = vadd.f32 %v11711_v34, %v10820_v40  ;;  %v10858_v49 = vadd.f32 %v11711_v34, %v10821_v5  ;;  %v10859_v1 = vadd.f32 %v11711_v34, %v10822_v33 }
 0xb56   : > { %v10860_v37 = vadd.f32 %v11711_v34, %v10823_v10  ;;  %v10861_v42 = vadd.f32 %v11711_v34, %v10824_v26  ;;  %v10862_v12 = vadd.f32 %v11711_v34, %v10825_v21  ;;  %v10863_v7 = vadd.f32 %v11711_v34, %v10826_v24 }
 0xb57   : > { %v10864_v62 = vadd.f32 %v11711_v34, %v10827_v41  ;;  %v10865_v35 = vadd.f32 %v11711_v34, %v10828_v39  ;;  %v10866_v48 = vadd.f32 %v11711_v34, %v10829_v56  ;;  %v10867_v63 = vadd.f32 %v11711_v34, %v10830_v14 }
 0xb58   : > { %v10868_v0 = vadd.f32 %v11711_v34, %v10831_v4  ;;  %v10869_v36 = vadd.f32 %v11711_v34, %v10832_v30  ;;  %v10870_v59 = vadd.f32 %v11711_v34, %v10833_v19  ;;  %v10871_v32 = vadd.f32 %v11711_v34, %v10834_v20 }
 0xb59   : > { %v10872_v3 = vadd.f32 %v11711_v34, %v10835_v23  ;;  %v10873_v38 = vadd.f32 %v11711_v34, %v10836_v15  ;;  %v10874_v44 = vadd.f32 %v11711_v34, %v10837_v50  ;;  %v10875_v51 = vadd.f32 %v11711_v34, %v10838_v45 }
 0xb5a   : > { %v10876_v54 = vadd.f32 %v11711_v34, %v10839_v18  ;;  %v10877_v40 = vadd.f32 %v11711_v34, %v10840_v9  ;;  %v10878_v5 = vadd.f32 %v11711_v34, %v10841_v60  ;;  %v10879_v33 = vadd.f32 %v11711_v34, %v10842_v27  ;;  %v20177_v9 = vld [vmem:[#allocation27_spill] sm:$0xff]  ;;  %v20178_v60 = vld [vmem:[#allocation118_spill] sm:$0xff]  ;;  %v20179_v27 = vld [vmem:[#allocation120_spill] sm:$0xff] }
 0xb5b   : > { %v10880_v10 = vadd.f32 %v11711_v34, %v10843_v13  ;;  %v10881_v47 = vadd.f32 %v11711_v34, %v10844_v46  ;;  %v10882_v21 = vadd.f32 %v11711_v34, %v10845_v52  ;;  %v10883_v26 = vadd.f32 %v11711_v34, %v10846_v25 }
 0xb5c   : > { %v10884_v41 = vadd.f32 %v11711_v34, %v10847_v29  ;;  %v10885_v24 = vadd.f32 %v11711_v34, %v10848_v57  ;;  %v10886_v56 = vadd.f32 %v11711_v34, %v10849_v53  ;;  %v10887_v39 = vadd.f32 %v11711_v34, %v10850_v6  ;;  %v20180_v34 = vld [vmem:[#allocation119_spill] sm:$0xff]  ;;  %v20187_v53 = vld [vmem:[#allocation124_spill] sm:$0xff] }
 0xb5d   : > { %v10888_v4 = vadd.f32 %v10856_v17, %v18606_v61  ;;  %v10889_v19 = vadd.f32 %v10857_v11, %v18588_v2  ;;  %v10890_v23 = vadd.f32 %v10858_v49, %v18612_v43  ;;  %v10891_v50 = vadd.f32 %v10859_v1, %v18609_v31  ;;  %v20188_v17 = vld [vmem:[#allocation61_spill] sm:$0xff] }
 0xb5e   : > { %v10892_v14 = vadd.f32 %v10860_v37, %v18618_v55  ;;  %v10893_v30 = vadd.f32 %v10861_v42, %v18615_v22  ;;  %v10894_v20 = vadd.f32 %v10862_v12, %v18624_v16  ;;  %v10895_v15 = vadd.f32 %v10863_v7, %v18621_v58  ;;  %v20181_v55 = vld [vmem:[#allocation64_spill] sm:$0xff]  ;;  %v20182_v22 = vld [vmem:[#allocation121_spill] sm:$0xff]  ;;  %v20183_v16 = vld [vmem:[#allocation31_spill] sm:$0xff] }
 0xb5f   : > { %v10896_v45 = vadd.f32 %v10864_v62, %v18630_v8  ;;  %v10897_v18 = vadd.f32 %v10865_v35, %v18627_v28  ;;  %v10898_v61 = vadd.f32 %v10866_v48, %v20177_v9  ;;  %v10899_v2 = vadd.f32 %v10867_v63, %v20178_v60  ;;  %v20184_v58 = vld [vmem:[#allocation122_spill] sm:$0xff]  ;;  %v20185_v8 = vld [vmem:[#allocation123_spill] sm:$0xff]  ;;  %v20189_v49 = vld [vmem:[#allocation125_spill] sm:$0xff] }
 0xb60   : > { %v10900_v43 = vadd.f32 %v10868_v0, %v20179_v27  ;;  %v10901_v31 = vadd.f32 %v10869_v36, %v20180_v34  ;;  %v10902_v13 = vadd.f32 %v10870_v59, %v20181_v55  ;;  %v10903_v46 = vadd.f32 %v10871_v32, %v20182_v22  ;;  %v20186_v28 = vld [vmem:[#allocation47_spill] sm:$0xff]  ;;  %v20190_v37 = vld [vmem:[#allocation34_spill] sm:$0xff] }
 0xb61   : > { %v10904_v52 = vadd.f32 %v10872_v3, %v20183_v16  ;;  %v10905_v25 = vadd.f32 %v10873_v38, %v20184_v58  ;;  %v10906_v29 = vadd.f32 %v10874_v44, %v20185_v8  ;;  %v10907_v57 = vadd.f32 %v10875_v51, %v20186_v28  ;;  %v20191_v12 = vld [vmem:[#allocation67_spill] sm:$0xff]  ;;  %v20192_v62 = vld [vmem:[#allocation50_spill] sm:$0xff] }
 0xb62   : > { %v18775_v6 = vadd.f32 %v10876_v54, %v20187_v53  ;;  %v18778_v11 = vadd.f32 %v10877_v40, %v20188_v17  ;;  %v18781_v1 = vadd.f32 %v10878_v5, %v20189_v49  ;;  %v18784_v42 = vadd.f32 %v10879_v33, %v20190_v37  ;;  %v20193_v48 = vld [vmem:[#allocation74_spill] sm:$0xff]  ;;  %v20194_v0 = vld [vmem:[#allocation55_spill] sm:$0xff]  ;;  %v20198_v54 = vld [vmem:[#allocation56_spill] sm:$0xff] }
 0xb63   : > { %v18787_v7 = vadd.f32 %v10880_v10, %v20191_v12  ;;  %v18790_v35 = vadd.f32 %v10881_v47, %v20192_v62  ;;  %v18793_v63 = vadd.f32 %v10882_v21, %v20193_v48  ;;  %v18796_v36 = vadd.f32 %v10883_v26, %v20194_v0  ;;  %v20195_v59 = vld [vmem:[#allocation62_spill] sm:$0xff] }
 0xb64   : > { %v18805_v32 = vadd.f32 %v10884_v41, %v20195_v59  ;;  %v20196_v3 = vld [vmem:[#allocation66_spill] sm:$0xff]  ;;  %v18814_v40 = vadd.f32 %v10887_v39, %v20198_v54  ;;  %v10920_v5 = vmax.f32 %v10888_v4, 0.0  ;;  %v10921_v33 = vmax.f32 %v10889_v19, 0.0 }
 0xb65   : > { %v18808_v38 = vadd.f32 %v10885_v24, %v20196_v3  ;;  %v20197_v44 = vld [vmem:[#allocation82_spill] sm:$0xff]  ;;  %v10922_v10 = vmax.f32 %v10890_v23, 0.0  ;;  %v10923_v47 = vmax.f32 %v10891_v50, 0.0  ;;  %v10924_v21 = vmax.f32 %v10892_v14, 0.0 }
 0xb66   : > { %v18811_v51 = vadd.f32 %v10886_v56, %v20197_v44  ;;  %v10925_v26 = vmax.f32 %v10893_v30, 0.0  ;;  %v10926_v41 = vmax.f32 %v10894_v20, 0.0  ;;  %v10927_v24 = vmax.f32 %v10895_v15, 0.0  ;;  %10952 = vst.msk [vmem:[%s18802_s26] sm:$0xff] %vm6345_vm4, %v10920_v5  ;;  %10953 = vst.msk [vmem:[%s18802_s26 + $0x8] sm:$0xff] %vm6345_vm4, %v10921_v33 }
 0xb67   : > { %v10928_v9 = vmax.f32 %v10896_v45, 0.0  ;;  %v10929_v56 = vmax.f32 %v10897_v18, 0.0  ;;  %v10930_v60 = vmax.f32 %v10898_v61, 0.0  ;;  %v10931_v27 = vmax.f32 %v10899_v2, 0.0  ;;  %10954 = vst.msk [vmem:[%s18802_s26 + $0x10] sm:$0xff] %vm6345_vm4, %v10922_v10  ;;  %10955 = vst.msk [vmem:[%s18802_s26 + $0x18] sm:$0xff] %vm6345_vm4, %v10923_v47 }
 0xb68   : > { %v10932_v39 = vmax.f32 %v10900_v43, 0.0  ;;  %v10933_v4 = vmax.f32 %v10901_v31, 0.0  ;;  %v10934_v19 = vmax.f32 %v10902_v13, 0.0  ;;  %v10935_v23 = vmax.f32 %v10903_v46, 0.0  ;;  %10956 = vst.msk [vmem:[%s18802_s26 + $0x20] sm:$0xff] %vm6345_vm4, %v10924_v21  ;;  %10957 = vst.msk [vmem:[%s18802_s26 + $0x28] sm:$0xff] %vm6345_vm4, %v10925_v26 }
 0xb69   : > { %10958 = vst.msk [vmem:[%s18802_s26 + $0x30] sm:$0xff] %vm6345_vm4, %v10926_v41  ;;  %10959 = vst.msk [vmem:[%s18802_s26 + $0x38] sm:$0xff] %vm6345_vm4, %v10927_v24  ;;  %v10936_v50 = vmax.f32 %v10904_v52, 0.0  ;;  %v10937_v14 = vmax.f32 %v10905_v25, 0.0  ;;  %v10938_v30 = vmax.f32 %v10906_v29, 0.0  ;;  %v10939_v20 = vmax.f32 %v10907_v57, 0.0 }
 0xb6a   : > { %10960 = vst.msk [vmem:[%s18802_s26 + $0x40] sm:$0xff] %vm6345_vm4, %v10928_v9  ;;  %10961 = vst.msk [vmem:[%s18802_s26 + $0x48] sm:$0xff] %vm6345_vm4, %v10929_v56  ;;  %v10940_v15 = vmax.f32 %v18775_v6, 0.0  ;;  %v10941_v45 = vmax.f32 %v18778_v11, 0.0  ;;  %v10942_v18 = vmax.f32 %v18781_v1, 0.0  ;;  %v10943_v61 = vmax.f32 %v18784_v42, 0.0 }
 0xb6b   : > { %10962 = vst.msk [vmem:[%s18802_s26 + $0x50] sm:$0xff] %vm6345_vm4, %v10930_v60  ;;  %10963 = vst.msk [vmem:[%s18802_s26 + $0x58] sm:$0xff] %vm6345_vm4, %v10931_v27  ;;  %v10944_v2 = vmax.f32 %v18787_v7, 0.0  ;;  %v10945_v43 = vmax.f32 %v18790_v35, 0.0  ;;  %v10946_v34 = vmax.f32 %v18793_v63, 0.0  ;;  %v10947_v31 = vmax.f32 %v18796_v36, 0.0 }
 0xb6c   : > { %10964 = vst.msk [vmem:[%s18802_s26 + $0x60] sm:$0xff] %vm6345_vm4, %v10932_v39  ;;  %10965 = vst.msk [vmem:[%s18802_s26 + $0x68] sm:$0xff] %vm6345_vm4, %v10933_v4  ;;  %v10948_v55 = vmax.f32 %v18805_v32, 0.0  ;;  %v10949_v13 = vmax.f32 %v18808_v38, 0.0  ;;  %v10950_v22 = vmax.f32 %v18811_v51, 0.0  ;;  %v10951_v46 = vmax.f32 %v18814_v40, 0.0 }
 0xb6d   : > { %10966 = vst.msk [vmem:[%s18802_s26 + $0x70] sm:$0xff] %vm6345_vm4, %v10934_v19  ;;  %10967 = vst.msk [vmem:[%s18802_s26 + $0x78] sm:$0xff] %vm6345_vm4, %v10935_v23 }
 0xb6e   : > { %10968 = vst.msk [vmem:[%s18802_s26 + $0x80] sm:$0xff] %vm6345_vm4, %v10936_v50  ;;  %10969 = vst.msk [vmem:[%s18802_s26 + $0x88] sm:$0xff] %vm6345_vm4, %v10937_v14 }
 0xb6f   : > { %10970 = vst.msk [vmem:[%s18802_s26 + $0x90] sm:$0xff] %vm6345_vm4, %v10938_v30  ;;  %10971 = vst.msk [vmem:[%s18802_s26 + $0x98] sm:$0xff] %vm6345_vm4, %v10939_v20 }
 0xb70   : > { %10972 = vst.msk [vmem:[%s18802_s26 + $0xa0] sm:$0xff] %vm6345_vm4, %v10940_v15  ;;  %10973 = vst.msk [vmem:[%s18802_s26 + $0xa8] sm:$0xff] %vm6345_vm4, %v10941_v45 }
 0xb71   : > { %10974 = vst.msk [vmem:[%s18802_s26 + $0xb0] sm:$0xff] %vm6345_vm4, %v10942_v18  ;;  %10975 = vst.msk [vmem:[%s18802_s26 + $0xb8] sm:$0xff] %vm6345_vm4, %v10943_v61 }
 0xb72   : > { %10976 = vst.msk [vmem:[%s18802_s26 + $0xc0] sm:$0xff] %vm6345_vm4, %v10944_v2  ;;  %10977 = vst.msk [vmem:[%s18802_s26 + $0xc8] sm:$0xff] %vm6345_vm4, %v10945_v43 }
 0xb73   : > { %10978 = vst.msk [vmem:[%s18802_s26 + $0xd0] sm:$0xff] %vm6345_vm4, %v10946_v34  ;;  %10979 = vst.msk [vmem:[%s18802_s26 + $0xd8] sm:$0xff] %vm6345_vm4, %v10947_v31 }
 0xb74   : > { %10980 = vst.msk [vmem:[%s18802_s26 + $0xe0] sm:$0xff] %vm6345_vm4, %v10948_v55  ;;  %10981 = vst.msk [vmem:[%s18802_s26 + $0xe8] sm:$0xff] %vm6345_vm4, %v10949_v13 }
 0xb75   : > { %10982 = vst.msk [vmem:[%s18802_s26 + $0xf0] sm:$0xff] %vm6345_vm4, %v10950_v22  ;;  %10983 = vst.msk [vmem:[%s18802_s26 + $0xf8] sm:$0xff] %vm6345_vm4, %v10951_v46 }
 0xb76 PF: > { %s21_s17 = sadd.s32 1, %s14139_s17  }
 0xb77   : > { %p18_p4 = scmp.ge.s32.totalorder %s21_s17, 4  }
 0xb79   :  { %20 = sbr.rel (!%p18_p4) target bundleno = 1 (0x1), region = 97 }

</bundles_post_ra>
